<compile_context>
chip_gen: v5e
topology: v5e:2x2
jax: 0.10.0
libtpu: 0.0.40
codegen_flags: <defaults>
</compile_context>

<pallas_src>
import numpy as np
import jax
import jax.numpy as jnp
from jax import lax
from jax.experimental import pallas as pl
from jax.experimental.pallas import tpu as pltpu

SEQ_LEN = 8
INPUT_DIM = 32
HIDDEN_DIM = 2 * INPUT_DIM
N_FEATURES = 1
LANE = 128            # vreg lane width: each LSTM gate is padded to one full vreg
GATES = 4 * LANE      # 512 lanes of packed (i,f,g,o)
PACK = 8              # samples per grid step, packed into the sublane dimension


def decoder_kernel(x_ref, w_ref, b_ref, wout_ref, bout_ref, out_ref, ys2_ref):
    # ---- weight slab: [wih1 | whh1 | wih2 | whh2], each (128, 512); read once ----
    wih1 = w_ref[:, 0 * GATES:1 * GATES]            # (128, 512)
    whh1_wih2 = w_ref[:, 1 * GATES:3 * GATES]       # (128, 1024): rnn1 recur + rnn2 input
    whh2 = w_ref[:, 3 * GATES:4 * GATES]            # (128, 512)
    b1 = b_ref[:, :GATES]                           # (1, 512)
    b2 = b_ref[:, GATES:]                           # (1, 512)

    def cell(pre, c):
        # pre: (PACK, 512); gate k occupies lanes [k*128, (k+1)*128) -> whole-vreg slices
        i = jax.nn.sigmoid(pre[:, 0 * LANE:1 * LANE])
        f = jax.nn.sigmoid(pre[:, 1 * LANE:2 * LANE])
        g = jnp.tanh(pre[:, 2 * LANE:3 * LANE])
        o = jax.nn.sigmoid(pre[:, 3 * LANE:4 * LANE])
        c = f * c + i * g
        return o * jnp.tanh(c), c

    # x.repeat(seq_len, 1): every timestep sees the same input, so rnn1's input
    # projection is loop-invariant -> computed once for the whole PACK batch.
    xg1 = jnp.dot(x_ref[...], wih1, preferred_element_type=jnp.float32) + b1  # (PACK, 512)

    zeros = jnp.zeros((PACK, LANE), jnp.float32)

    # rnn1 step 0 (h = c = 0 -> recurrent term is exactly zero)
    h1, c1 = cell(xg1, zeros)
    h2, c2 = zeros, zeros

    # Skewed interleave: iteration t runs rnn1 step t and rnn2 step t-1.
    # The two chains are independent, so MXU/EUP latency of one hides under the other.
    for t in range(1, SEQ_LEN):
        r = jnp.dot(h1, whh1_wih2, preferred_element_type=jnp.float32)   # (PACK, 1024)
        pre1 = xg1 + r[:, :GATES]                                        # rnn1 step t
        pre2 = r[:, GATES:] + b2 + jnp.dot(h2, whh2,                     # rnn2 step t-1
                                           preferred_element_type=jnp.float32)
        h2, c2 = cell(pre2, c2)
        ys2_ref[:, (t - 1) * LANE:t * LANE] = h2       # full (8,128) unmasked slab store
        h1, c1 = cell(pre1, c1)

    # final rnn2 step (SEQ_LEN - 1) consumes ys1[SEQ_LEN - 1] = h1
    r = jnp.dot(h1, whh1_wih2, preferred_element_type=jnp.float32)
    pre2 = r[:, GATES:] + b2 + jnp.dot(h2, whh2, preferred_element_type=jnp.float32)
    h2, c2 = cell(pre2, c2)
    ys2_ref[:, (SEQ_LEN - 1) * LANE:SEQ_LEN * LANE] = h2

    # ---- output_layer: block-diagonal projection -> dense (PACK, SEQ_LEN) block ----
    out_ref[...] = (jnp.dot(ys2_ref[...], wout_ref[...],
                            preferred_element_type=jnp.float32) + bout_ref[...])


@jax.jit
def decoder_forward(x, params):
    """x: (B, INPUT_DIM) latents -> (B, SEQ_LEN, N_FEATURES); each row b is one
    independent Decoder.forward(x[b])."""
    w_slab, b_slab, wout_bd, bout_p = params
    B = x.shape[0]
    Bp = ((B + PACK - 1) // PACK) * PACK                      # pad batch to PACK multiple
    xp = jnp.zeros((Bp, LANE), jnp.float32).at[:B, :INPUT_DIM].set(x)

    out = pl.pallas_call(
        decoder_kernel,
        out_shape=jax.ShapeDtypeStruct((Bp, SEQ_LEN), jnp.float32),
        grid=(Bp // PACK,),
        in_specs=[
            pl.BlockSpec((PACK, LANE), lambda b: (b, 0)),               # packed latents
            pl.BlockSpec((LANE, 4 * GATES), lambda b: (0, 0)),          # LSTM weight slab
            pl.BlockSpec((1, 2 * GATES), lambda b: (0, 0)),             # bias slab
            pl.BlockSpec((SEQ_LEN * LANE, SEQ_LEN), lambda b: (0, 0)),  # block-diag out weight
            pl.BlockSpec((1, SEQ_LEN), lambda b: (0, 0)),               # out bias
        ],
        out_specs=pl.BlockSpec((PACK, SEQ_LEN), lambda b: (b, 0)),
        scratch_shapes=[pltpu.VMEM((PACK, SEQ_LEN * LANE), jnp.float32)],  # rnn2 hidden states
        compiler_params=pltpu.CompilerParams(
            dimension_semantics=("parallel",)),
    )(xp, w_slab, b_slab, wout_bd, bout_p)

    # drop batch padding and restore the (SEQ_LEN, N_FEATURES=1) trailing shape
    return out[:B, :, None]


# ----------------------------- parameter handling -----------------------------

def init_params(key):
    """Raw PyTorch-layout weights, U(-1/sqrt(h), 1/sqrt(h)) init."""
    ks = jax.random.split(key, 10)

    def u(k, shape, bound):
        return jax.random.uniform(k, shape, jnp.float32, -bound, bound)

    b1 = 1.0 / np.sqrt(INPUT_DIM)
    wih1 = u(ks[0], (4 * INPUT_DIM, INPUT_DIM), b1)
    whh1 = u(ks[1], (4 * INPUT_DIM, INPUT_DIM), b1)
    bih1 = u(ks[2], (4 * INPUT_DIM,), b1)
    bhh1 = u(ks[3], (4 * INPUT_DIM,), b1)

    b2 = 1.0 / np.sqrt(HIDDEN_DIM)
    wih2 = u(ks[4], (4 * HIDDEN_DIM, INPUT_DIM), b2)
    whh2 = u(ks[5], (4 * HIDDEN_DIM, HIDDEN_DIM), b2)
    bih2 = u(ks[6], (4 * HIDDEN_DIM,), b2)
    bhh2 = u(ks[7], (4 * HIDDEN_DIM,), b2)

    bo = 1.0 / np.sqrt(HIDDEN_DIM)
    wout = u(ks[8], (N_FEATURES, HIDDEN_DIM), bo)
    bout = u(ks[9], (N_FEATURES,), bo)
    return (wih1, whh1, bih1, bhh1, wih2, whh2, bih2, bhh2, wout, bout)


def _pad_lstm(wih, whh, bih, bhh, in_dim, hdim):
    """Transpose to (in, 4h), fold biases, pad every gate to a 128-lane block
    (rows padded to 128 so h stays a full-width vreg). Padded lanes stay zero
    through the recurrence (pre=0 -> i=f=o=0.5, g=0 -> c=h=0)."""
    wih_t = np.asarray(wih).T
    whh_t = np.asarray(whh).T
    b = np.asarray(bih) + np.asarray(bhh)
    wih_p = np.zeros((LANE, GATES), np.float32)
    whh_p = np.zeros((LANE, GATES), np.float32)
    b_p = np.zeros((1, GATES), np.float32)
    for k in range(4):
        wih_p[:in_dim, k * LANE:k * LANE + hdim] = wih_t[:, k * hdim:(k + 1) * hdim]
        whh_p[:hdim, k * LANE:k * LANE + hdim] = whh_t[:, k * hdim:(k + 1) * hdim]
        b_p[0, k * LANE:k * LANE + hdim] = b[k * hdim:(k + 1) * hdim]
    return wih_p, whh_p, b_p


def pack_params(raw):
    (wih1, whh1, bih1, bhh1, wih2, whh2, bih2, bhh2, wout, bout) = raw
    wih1_p, whh1_p, b1_p = _pad_lstm(wih1, whh1, bih1, bhh1, INPUT_DIM, INPUT_DIM)
    wih2_p, whh2_p, b2_p = _pad_lstm(wih2, whh2, bih2, bhh2, INPUT_DIM, HIDDEN_DIM)

    # one weight slab [wih1 | whh1 | wih2 | whh2] and one bias slab [b1 | b2]
    w_slab = np.concatenate([wih1_p, whh1_p, wih2_p, whh2_p], axis=1)   # (128, 2048)
    b_slab = np.concatenate([b1_p, b2_p], axis=1)                       # (1, 1024)

    # block-diagonal output projection: out[p, t] = ys2[p, t*128 : t*128+64] @ wout + bout
    wout_bd = np.zeros((SEQ_LEN * LANE, SEQ_LEN), np.float32)
    wcol = np.asarray(wout).reshape(N_FEATURES, HIDDEN_DIM)[0]
    for t in range(SEQ_LEN):
        wout_bd[t * LANE:t * LANE + HIDDEN_DIM, t] = wcol
    bout_p = np.full((1, SEQ_LEN), float(np.asarray(bout).reshape(-1)[0]), np.float32)

    return (jnp.asarray(w_slab), jnp.asarray(b_slab),
            jnp.asarray(wout_bd), jnp.asarray(bout_p))


# --------------------------------- reference ----------------------------------

def reference_forward(x, raw):
    """Pure-JAX mirror of the PyTorch forward for one latent x of shape (INPUT_DIM,)."""
    (wih1, whh1, bih1, bhh1, wih2, whh2, bih2, bhh2, wout, bout) = raw

    xs = jnp.tile(x.reshape(1, INPUT_DIM), (SEQ_LEN, N_FEATURES))
    xs = xs.reshape(N_FEATURES, SEQ_LEN, INPUT_DIM)[0]          # (T, D), batch == 1

    def lstm(seq, wih, whh, bih, bhh, hdim):
        wih_t, whh_t = wih.T, whh.T
        b = (bih + bhh)[None, :]

        def step(carry, xt):
            h, c = carry
            pre = xt[None, :] @ wih_t + h @ whh_t + b
            i = jax.nn.sigmoid(pre[:, :hdim])
            f = jax.nn.sigmoid(pre[:, hdim:2 * hdim])
            g = jnp.tanh(pre[:, 2 * hdim:3 * hdim])
            o = jax.nn.sigmoid(pre[:, 3 * hdim:])
            c = f * c + i * g
            h = o * jnp.tanh(c)
            return (h, c), h[0]

        init = (jnp.zeros((1, hdim), jnp.float32), jnp.zeros((1, hdim), jnp.float32))
        _, ys = lax.scan(step, init, seq)
        return ys

    y1 = lstm(xs, wih1, whh1, bih1, bhh1, INPUT_DIM)
    y2 = lstm(y1, wih2, whh2, bih2, bhh2, HIDDEN_DIM)
    return y2 @ wout.T + bout[None, :]


if __name__ == "__main__":
    B = 16  # batch of independent latents; 16 = 2 grid steps of PACK=8 (feeds both v7x TCs)
    x = jax.random.normal(jax.random.PRNGKey(0), (B, INPUT_DIM), jnp.float32)
    raw = init_params(jax.random.PRNGKey(1))
    params = pack_params(raw)

    out = jax.block_until_ready(decoder_forward(x, params))
    assert out.shape == (B, SEQ_LEN, N_FEATURES), out.shape

    ref = jnp.stack([reference_forward(x[b], raw) for b in range(B)])
    np.testing.assert_allclose(np.asarray(out), np.asarray(ref), rtol=1e-5, atol=1e-5)

    print("KERNEL_OK")
</pallas_src>

<mosaic_0001>
module attributes {stable_mosaic.version = 11 : i64} {
  func.func @decoder_kernel(%arg0: i32, %arg1: memref<8x128xf32, #tpu.memory_space<vmem>>, %arg2: memref<128x2048xf32, #tpu.memory_space<vmem>>, %arg3: memref<1x1024xf32, #tpu.memory_space<vmem>>, %arg4: memref<1024x8xf32, #tpu.memory_space<vmem>>, %arg5: memref<1x8xf32, #tpu.memory_space<vmem>>, %arg6: memref<8x8xf32, #tpu.memory_space<vmem>>, %arg7: memref<8x1024xf32, #tpu.memory_space<vmem>>) attributes {dimension_semantics = [#tpu.dimension_semantics<parallel>], iteration_bounds = array<i64: 2>, scalar_prefetch = 0 : i64, scratch_operands = 1 : i64, tpu.core_type = #tpu.core_type<tc>, window_params = [{transform_indices = @transform_0, window_bounds = array<i64: 8, 128>}, {pipeline_mode = #tpu.pipeline_mode<synchronous>, transform_indices = @transform_1, window_bounds = array<i64: 128, 2048>}, {pipeline_mode = #tpu.pipeline_mode<synchronous>, transform_indices = @transform_2, window_bounds = array<i64: 1, 1024>}, {pipeline_mode = #tpu.pipeline_mode<synchronous>, transform_indices = @transform_3, window_bounds = array<i64: 1024, 8>}, {pipeline_mode = #tpu.pipeline_mode<synchronous>, transform_indices = @transform_4, window_bounds = array<i64: 1, 8>}, {transform_indices = @transform_5, window_bounds = array<i64: 8, 8>}]} {
    %c0 = arith.constant 0 : index
    %c0_0 = arith.constant 0 : index
    %0 = vector.load %arg2[%c0, %c0_0] : memref<128x2048xf32, #tpu.memory_space<vmem>>, vector<128x512xf32>
    %c0_1 = arith.constant 0 : index
    %c512 = arith.constant 512 : index
    %1 = vector.load %arg2[%c0_1, %c512] : memref<128x2048xf32, #tpu.memory_space<vmem>>, vector<128x1024xf32>
    %c0_2 = arith.constant 0 : index
    %c1536 = arith.constant 1536 : index
    %2 = vector.load %arg2[%c0_2, %c1536] : memref<128x2048xf32, #tpu.memory_space<vmem>>, vector<128x512xf32>
    %c0_3 = arith.constant 0 : index
    %c0_4 = arith.constant 0 : index
    %3 = vector.load %arg3[%c0_3, %c0_4] : memref<1x1024xf32, #tpu.memory_space<vmem>>, vector<1x512xf32>
    %c0_5 = arith.constant 0 : index
    %c512_6 = arith.constant 512 : index
    %4 = vector.load %arg3[%c0_5, %c512_6] : memref<1x1024xf32, #tpu.memory_space<vmem>>, vector<1x512xf32>
    %c0_7 = arith.constant 0 : index
    %c0_8 = arith.constant 0 : index
    %5 = vector.load %arg1[%c0_7, %c0_8] : memref<8x128xf32, #tpu.memory_space<vmem>>, vector<8x128xf32>
    %cst = arith.constant dense<0.000000e+00> : vector<8x512xf32>
    %6 = tpu.matmul %5, %0, %cst {dimension_numbers = #tpu.dot_dimension_numbers<[1], [0], [0], [1], [0, 0, 1, 1], [], []>} : vector<8x128xf32>, vector<128x512xf32>, vector<8x512xf32> -> vector<8x512xf32>
    %7 = vector.broadcast %3 : vector<1x512xf32> to vector<8x512xf32>
    %8 = arith.addf %6, %7 : vector<8x512xf32>
    %cst_9 = arith.constant 0.000000e+00 : f32
    %9 = vector.broadcast %cst_9 : f32 to vector<8x128xf32>
    %10 = vector.extract_strided_slice %8 {offsets = [0, 0], sizes = [8, 128], strides = [1, 1]} : vector<8x512xf32> to vector<8x128xf32>
    %11 = arith.negf %10 : vector<8x128xf32>
    %12 = math.exp %11 : vector<8x128xf32>
    %cst_10 = arith.constant 1.000000e+00 : f32
    %13 = vector.broadcast %cst_10 : f32 to vector<8x128xf32>
    %14 = arith.addf %13, %12 : vector<8x128xf32>
    %15 = arith.divf %13, %14 : vector<8x128xf32>
    %16 = vector.extract_strided_slice %8 {offsets = [0, 128], sizes = [8, 128], strides = [1, 1]} : vector<8x512xf32> to vector<8x128xf32>
    %17 = arith.negf %16 : vector<8x128xf32>
    %18 = math.exp %17 : vector<8x128xf32>
    %cst_11 = arith.constant 1.000000e+00 : f32
    %19 = vector.broadcast %cst_11 : f32 to vector<8x128xf32>
    %20 = arith.addf %19, %18 : vector<8x128xf32>
    %21 = arith.divf %19, %20 : vector<8x128xf32>
    %22 = vector.extract_strided_slice %8 {offsets = [0, 256], sizes = [8, 128], strides = [1, 1]} : vector<8x512xf32> to vector<8x128xf32>
    %23 = math.tanh %22 : vector<8x128xf32>
    %24 = vector.extract_strided_slice %8 {offsets = [0, 384], sizes = [8, 128], strides = [1, 1]} : vector<8x512xf32> to vector<8x128xf32>
    %25 = arith.negf %24 : vector<8x128xf32>
    %26 = math.exp %25 : vector<8x128xf32>
    %cst_12 = arith.constant 1.000000e+00 : f32
    %27 = vector.broadcast %cst_12 : f32 to vector<8x128xf32>
    %28 = arith.addf %27, %26 : vector<8x128xf32>
    %29 = arith.divf %27, %28 : vector<8x128xf32>
    %30 = arith.mulf %21, %9 : vector<8x128xf32>
    %31 = arith.mulf %15, %23 : vector<8x128xf32>
    %32 = arith.addf %30, %31 : vector<8x128xf32>
    %33 = math.tanh %32 : vector<8x128xf32>
    %34 = arith.mulf %29, %33 : vector<8x128xf32>
    %cst_13 = arith.constant dense<0.000000e+00> : vector<8x1024xf32>
    %35 = tpu.matmul %34, %1, %cst_13 {dimension_numbers = #tpu.dot_dimension_numbers<[1], [0], [0], [1], [0, 0, 1, 1], [], []>} : vector<8x128xf32>, vector<128x1024xf32>, vector<8x1024xf32> -> vector<8x1024xf32>
    %36 = vector.extract_strided_slice %35 {offsets = [0, 0], sizes = [8, 512], strides = [1, 1]} : vector<8x1024xf32> to vector<8x512xf32>
    %37 = arith.addf %8, %36 : vector<8x512xf32>
    %38 = vector.extract_strided_slice %35 {offsets = [0, 512], sizes = [8, 512], strides = [1, 1]} : vector<8x1024xf32> to vector<8x512xf32>
    %39 = vector.broadcast %4 : vector<1x512xf32> to vector<8x512xf32>
    %40 = arith.addf %38, %39 : vector<8x512xf32>
    %cst_14 = arith.constant dense<0.000000e+00> : vector<8x512xf32>
    %41 = tpu.matmul %9, %2, %cst_14 {dimension_numbers = #tpu.dot_dimension_numbers<[1], [0], [0], [1], [0, 0, 1, 1], [], []>} : vector<8x128xf32>, vector<128x512xf32>, vector<8x512xf32> -> vector<8x512xf32>
    %42 = arith.addf %40, %41 : vector<8x512xf32>
    %43 = vector.extract_strided_slice %42 {offsets = [0, 0], sizes = [8, 128], strides = [1, 1]} : vector<8x512xf32> to vector<8x128xf32>
    %44 = arith.negf %43 : vector<8x128xf32>
    %45 = math.exp %44 : vector<8x128xf32>
    %cst_15 = arith.constant 1.000000e+00 : f32
    %46 = vector.broadcast %cst_15 : f32 to vector<8x128xf32>
    %47 = arith.addf %46, %45 : vector<8x128xf32>
    %48 = arith.divf %46, %47 : vector<8x128xf32>
    %49 = vector.extract_strided_slice %42 {offsets = [0, 128], sizes = [8, 128], strides = [1, 1]} : vector<8x512xf32> to vector<8x128xf32>
    %50 = arith.negf %49 : vector<8x128xf32>
    %51 = math.exp %50 : vector<8x128xf32>
    %cst_16 = arith.constant 1.000000e+00 : f32
    %52 = vector.broadcast %cst_16 : f32 to vector<8x128xf32>
    %53 = arith.addf %52, %51 : vector<8x128xf32>
    %54 = arith.divf %52, %53 : vector<8x128xf32>
    %55 = vector.extract_strided_slice %42 {offsets = [0, 256], sizes = [8, 128], strides = [1, 1]} : vector<8x512xf32> to vector<8x128xf32>
    %56 = math.tanh %55 : vector<8x128xf32>
    %57 = vector.extract_strided_slice %42 {offsets = [0, 384], sizes = [8, 128], strides = [1, 1]} : vector<8x512xf32> to vector<8x128xf32>
    %58 = arith.negf %57 : vector<8x128xf32>
    %59 = math.exp %58 : vector<8x128xf32>
    %cst_17 = arith.constant 1.000000e+00 : f32
    %60 = vector.broadcast %cst_17 : f32 to vector<8x128xf32>
    %61 = arith.addf %60, %59 : vector<8x128xf32>
    %62 = arith.divf %60, %61 : vector<8x128xf32>
    %63 = arith.mulf %54, %9 : vector<8x128xf32>
    %64 = arith.mulf %48, %56 : vector<8x128xf32>
    %65 = arith.addf %63, %64 : vector<8x128xf32>
    %66 = math.tanh %65 : vector<8x128xf32>
    %67 = arith.mulf %62, %66 : vector<8x128xf32>
    %c0_18 = arith.constant 0 : index
    %c0_19 = arith.constant 0 : index
    %68 = vector.load %arg7[%c0_18, %c0_19] : memref<8x1024xf32, #tpu.memory_space<vmem>>, vector<8x128xf32>
    tpu.vector_store %arg7[%c0_18, %c0_19], %67 {strides = array<i32>} : memref<8x1024xf32, #tpu.memory_space<vmem>>, vector<8x128xf32>,
    %69 = vector.extract_strided_slice %37 {offsets = [0, 0], sizes = [8, 128], strides = [1, 1]} : vector<8x512xf32> to vector<8x128xf32>
    %70 = arith.negf %69 : vector<8x128xf32>
    %71 = math.exp %70 : vector<8x128xf32>
    %cst_20 = arith.constant 1.000000e+00 : f32
    %72 = vector.broadcast %cst_20 : f32 to vector<8x128xf32>
    %73 = arith.addf %72, %71 : vector<8x128xf32>
    %74 = arith.divf %72, %73 : vector<8x128xf32>
    %75 = vector.extract_strided_slice %37 {offsets = [0, 128], sizes = [8, 128], strides = [1, 1]} : vector<8x512xf32> to vector<8x128xf32>
    %76 = arith.negf %75 : vector<8x128xf32>
    %77 = math.exp %76 : vector<8x128xf32>
    %cst_21 = arith.constant 1.000000e+00 : f32
    %78 = vector.broadcast %cst_21 : f32 to vector<8x128xf32>
    %79 = arith.addf %78, %77 : vector<8x128xf32>
    %80 = arith.divf %78, %79 : vector<8x128xf32>
    %81 = vector.extract_strided_slice %37 {offsets = [0, 256], sizes = [8, 128], strides = [1, 1]} : vector<8x512xf32> to vector<8x128xf32>
    %82 = math.tanh %81 : vector<8x128xf32>
    %83 = vector.extract_strided_slice %37 {offsets = [0, 384], sizes = [8, 128], strides = [1, 1]} : vector<8x512xf32> to vector<8x128xf32>
    %84 = arith.negf %83 : vector<8x128xf32>
    %85 = math.exp %84 : vector<8x128xf32>
    %cst_22 = arith.constant 1.000000e+00 : f32
    %86 = vector.broadcast %cst_22 : f32 to vector<8x128xf32>
    %87 = arith.addf %86, %85 : vector<8x128xf32>
    %88 = arith.divf %86, %87 : vector<8x128xf32>
    %89 = arith.mulf %80, %32 : vector<8x128xf32>
    %90 = arith.mulf %74, %82 : vector<8x128xf32>
    %91 = arith.addf %89, %90 : vector<8x128xf32>
    %92 = math.tanh %91 : vector<8x128xf32>
    %93 = arith.mulf %88, %92 : vector<8x128xf32>
    %cst_23 = arith.constant dense<0.000000e+00> : vector<8x1024xf32>
    %94 = tpu.matmul %93, %1, %cst_23 {dimension_numbers = #tpu.dot_dimension_numbers<[1], [0], [0], [1], [0, 0, 1, 1], [], []>} : vector<8x128xf32>, vector<128x1024xf32>, vector<8x1024xf32> -> vector<8x1024xf32>
    %95 = vector.extract_strided_slice %94 {offsets = [0, 0], sizes = [8, 512], strides = [1, 1]} : vector<8x1024xf32> to vector<8x512xf32>
    %96 = arith.addf %8, %95 : vector<8x512xf32>
    %97 = vector.extract_strided_slice %94 {offsets = [0, 512], sizes = [8, 512], strides = [1, 1]} : vector<8x1024xf32> to vector<8x512xf32>
    %98 = vector.broadcast %4 : vector<1x512xf32> to vector<8x512xf32>
    %99 = arith.addf %97, %98 : vector<8x512xf32>
    %cst_24 = arith.constant dense<0.000000e+00> : vector<8x512xf32>
    %100 = tpu.matmul %67, %2, %cst_24 {dimension_numbers = #tpu.dot_dimension_numbers<[1], [0], [0], [1], [0, 0, 1, 1], [], []>} : vector<8x128xf32>, vector<128x512xf32>, vector<8x512xf32> -> vector<8x512xf32>
    %101 = arith.addf %99, %100 : vector<8x512xf32>
    %102 = vector.extract_strided_slice %101 {offsets = [0, 0], sizes = [8, 128], strides = [1, 1]} : vector<8x512xf32> to vector<8x128xf32>
    %103 = arith.negf %102 : vector<8x128xf32>
    %104 = math.exp %103 : vector<8x128xf32>
    %cst_25 = arith.constant 1.000000e+00 : f32
    %105 = vector.broadcast %cst_25 : f32 to vector<8x128xf32>
    %106 = arith.addf %105, %104 : vector<8x128xf32>
    %107 = arith.divf %105, %106 : vector<8x128xf32>
    %108 = vector.extract_strided_slice %101 {offsets = [0, 128], sizes = [8, 128], strides = [1, 1]} : vector<8x512xf32> to vector<8x128xf32>
    %109 = arith.negf %108 : vector<8x128xf32>
    %110 = math.exp %109 : vector<8x128xf32>
    %cst_26 = arith.constant 1.000000e+00 : f32
    %111 = vector.broadcast %cst_26 : f32 to vector<8x128xf32>
    %112 = arith.addf %111, %110 : vector<8x128xf32>
    %113 = arith.divf %111, %112 : vector<8x128xf32>
    %114 = vector.extract_strided_slice %101 {offsets = [0, 256], sizes = [8, 128], strides = [1, 1]} : vector<8x512xf32> to vector<8x128xf32>
    %115 = math.tanh %114 : vector<8x128xf32>
    %116 = vector.extract_strided_slice %101 {offsets = [0, 384], sizes = [8, 128], strides = [1, 1]} : vector<8x512xf32> to vector<8x128xf32>
    %117 = arith.negf %116 : vector<8x128xf32>
    %118 = math.exp %117 : vector<8x128xf32>
    %cst_27 = arith.constant 1.000000e+00 : f32
    %119 = vector.broadcast %cst_27 : f32 to vector<8x128xf32>
    %120 = arith.addf %119, %118 : vector<8x128xf32>
    %121 = arith.divf %119, %120 : vector<8x128xf32>
    %122 = arith.mulf %113, %65 : vector<8x128xf32>
    %123 = arith.mulf %107, %115 : vector<8x128xf32>
    %124 = arith.addf %122, %123 : vector<8x128xf32>
    %125 = math.tanh %124 : vector<8x128xf32>
    %126 = arith.mulf %121, %125 : vector<8x128xf32>
    %c0_28 = arith.constant 0 : index
    %c128 = arith.constant 128 : index
    %127 = vector.load %arg7[%c0_28, %c128] : memref<8x1024xf32, #tpu.memory_space<vmem>>, vector<8x128xf32>
    tpu.vector_store %arg7[%c0_28, %c128], %126 {strides = array<i32>} : memref<8x1024xf32, #tpu.memory_space<vmem>>, vector<8x128xf32>,
    %128 = vector.extract_strided_slice %96 {offsets = [0, 0], sizes = [8, 128], strides = [1, 1]} : vector<8x512xf32> to vector<8x128xf32>
    %129 = arith.negf %128 : vector<8x128xf32>
    %130 = math.exp %129 : vector<8x128xf32>
    %cst_29 = arith.constant 1.000000e+00 : f32
    %131 = vector.broadcast %cst_29 : f32 to vector<8x128xf32>
    %132 = arith.addf %131, %130 : vector<8x128xf32>
    %133 = arith.divf %131, %132 : vector<8x128xf32>
    %134 = vector.extract_strided_slice %96 {offsets = [0, 128], sizes = [8, 128], strides = [1, 1]} : vector<8x512xf32> to vector<8x128xf32>
    %135 = arith.negf %134 : vector<8x128xf32>
    %136 = math.exp %135 : vector<8x128xf32>
    %cst_30 = arith.constant 1.000000e+00 : f32
    %137 = vector.broadcast %cst_30 : f32 to vector<8x128xf32>
    %138 = arith.addf %137, %136 : vector<8x128xf32>
    %139 = arith.divf %137, %138 : vector<8x128xf32>
    %140 = vector.extract_strided_slice %96 {offsets = [0, 256], sizes = [8, 128], strides = [1, 1]} : vector<8x512xf32> to vector<8x128xf32>
    %141 = math.tanh %140 : vector<8x128xf32>
    %142 = vector.extract_strided_slice %96 {offsets = [0, 384], sizes = [8, 128], strides = [1, 1]} : vector<8x512xf32> to vector<8x128xf32>
    %143 = arith.negf %142 : vector<8x128xf32>
    %144 = math.exp %143 : vector<8x128xf32>
    %cst_31 = arith.constant 1.000000e+00 : f32
    %145 = vector.broadcast %cst_31 : f32 to vector<8x128xf32>
    %146 = arith.addf %145, %144 : vector<8x128xf32>
    %147 = arith.divf %145, %146 : vector<8x128xf32>
    %148 = arith.mulf %139, %91 : vector<8x128xf32>
    %149 = arith.mulf %133, %141 : vector<8x128xf32>
    %150 = arith.addf %148, %149 : vector<8x128xf32>
    %151 = math.tanh %150 : vector<8x128xf32>
    %152 = arith.mulf %147, %151 : vector<8x128xf32>
    %cst_32 = arith.constant dense<0.000000e+00> : vector<8x1024xf32>
    %153 = tpu.matmul %152, %1, %cst_32 {dimension_numbers = #tpu.dot_dimension_numbers<[1], [0], [0], [1], [0, 0, 1, 1], [], []>} : vector<8x128xf32>, vector<128x1024xf32>, vector<8x1024xf32> -> vector<8x1024xf32>
    %154 = vector.extract_strided_slice %153 {offsets = [0, 0], sizes = [8, 512], strides = [1, 1]} : vector<8x1024xf32> to vector<8x512xf32>
    %155 = arith.addf %8, %154 : vector<8x512xf32>
    %156 = vector.extract_strided_slice %153 {offsets = [0, 512], sizes = [8, 512], strides = [1, 1]} : vector<8x1024xf32> to vector<8x512xf32>
    %157 = vector.broadcast %4 : vector<1x512xf32> to vector<8x512xf32>
    %158 = arith.addf %156, %157 : vector<8x512xf32>
    %cst_33 = arith.constant dense<0.000000e+00> : vector<8x512xf32>
    %159 = tpu.matmul %126, %2, %cst_33 {dimension_numbers = #tpu.dot_dimension_numbers<[1], [0], [0], [1], [0, 0, 1, 1], [], []>} : vector<8x128xf32>, vector<128x512xf32>, vector<8x512xf32> -> vector<8x512xf32>
    %160 = arith.addf %158, %159 : vector<8x512xf32>
    %161 = vector.extract_strided_slice %160 {offsets = [0, 0], sizes = [8, 128], strides = [1, 1]} : vector<8x512xf32> to vector<8x128xf32>
    %162 = arith.negf %161 : vector<8x128xf32>
    %163 = math.exp %162 : vector<8x128xf32>
    %cst_34 = arith.constant 1.000000e+00 : f32
    %164 = vector.broadcast %cst_34 : f32 to vector<8x128xf32>
    %165 = arith.addf %164, %163 : vector<8x128xf32>
    %166 = arith.divf %164, %165 : vector<8x128xf32>
    %167 = vector.extract_strided_slice %160 {offsets = [0, 128], sizes = [8, 128], strides = [1, 1]} : vector<8x512xf32> to vector<8x128xf32>
    %168 = arith.negf %167 : vector<8x128xf32>
    %169 = math.exp %168 : vector<8x128xf32>
    %cst_35 = arith.constant 1.000000e+00 : f32
    %170 = vector.broadcast %cst_35 : f32 to vector<8x128xf32>
    %171 = arith.addf %170, %169 : vector<8x128xf32>
    %172 = arith.divf %170, %171 : vector<8x128xf32>
    %173 = vector.extract_strided_slice %160 {offsets = [0, 256], sizes = [8, 128], strides = [1, 1]} : vector<8x512xf32> to vector<8x128xf32>
    %174 = math.tanh %173 : vector<8x128xf32>
    %175 = vector.extract_strided_slice %160 {offsets = [0, 384], sizes = [8, 128], strides = [1, 1]} : vector<8x512xf32> to vector<8x128xf32>
    %176 = arith.negf %175 : vector<8x128xf32>
    %177 = math.exp %176 : vector<8x128xf32>
    %cst_36 = arith.constant 1.000000e+00 : f32
    %178 = vector.broadcast %cst_36 : f32 to vector<8x128xf32>
    %179 = arith.addf %178, %177 : vector<8x128xf32>
    %180 = arith.divf %178, %179 : vector<8x128xf32>
    %181 = arith.mulf %172, %124 : vector<8x128xf32>
    %182 = arith.mulf %166, %174 : vector<8x128xf32>
    %183 = arith.addf %181, %182 : vector<8x128xf32>
    %184 = math.tanh %183 : vector<8x128xf32>
    %185 = arith.mulf %180, %184 : vector<8x128xf32>
    %c0_37 = arith.constant 0 : index
    %c256 = arith.constant 256 : index
    %186 = vector.load %arg7[%c0_37, %c256] : memref<8x1024xf32, #tpu.memory_space<vmem>>, vector<8x128xf32>
    tpu.vector_store %arg7[%c0_37, %c256], %185 {strides = array<i32>} : memref<8x1024xf32, #tpu.memory_space<vmem>>, vector<8x128xf32>,
    %187 = vector.extract_strided_slice %155 {offsets = [0, 0], sizes = [8, 128], strides = [1, 1]} : vector<8x512xf32> to vector<8x128xf32>
    %188 = arith.negf %187 : vector<8x128xf32>
    %189 = math.exp %188 : vector<8x128xf32>
    %cst_38 = arith.constant 1.000000e+00 : f32
    %190 = vector.broadcast %cst_38 : f32 to vector<8x128xf32>
    %191 = arith.addf %190, %189 : vector<8x128xf32>
    %192 = arith.divf %190, %191 : vector<8x128xf32>
    %193 = vector.extract_strided_slice %155 {offsets = [0, 128], sizes = [8, 128], strides = [1, 1]} : vector<8x512xf32> to vector<8x128xf32>
    %194 = arith.negf %193 : vector<8x128xf32>
    %195 = math.exp %194 : vector<8x128xf32>
    %cst_39 = arith.constant 1.000000e+00 : f32
    %196 = vector.broadcast %cst_39 : f32 to vector<8x128xf32>
    %197 = arith.addf %196, %195 : vector<8x128xf32>
    %198 = arith.divf %196, %197 : vector<8x128xf32>
    %199 = vector.extract_strided_slice %155 {offsets = [0, 256], sizes = [8, 128], strides = [1, 1]} : vector<8x512xf32> to vector<8x128xf32>
    %200 = math.tanh %199 : vector<8x128xf32>
    %201 = vector.extract_strided_slice %155 {offsets = [0, 384], sizes = [8, 128], strides = [1, 1]} : vector<8x512xf32> to vector<8x128xf32>
    %202 = arith.negf %201 : vector<8x128xf32>
    %203 = math.exp %202 : vector<8x128xf32>
    %cst_40 = arith.constant 1.000000e+00 : f32
    %204 = vector.broadcast %cst_40 : f32 to vector<8x128xf32>
    %205 = arith.addf %204, %203 : vector<8x128xf32>
    %206 = arith.divf %204, %205 : vector<8x128xf32>
    %207 = arith.mulf %198, %150 : vector<8x128xf32>
    %208 = arith.mulf %192, %200 : vector<8x128xf32>
    %209 = arith.addf %207, %208 : vector<8x128xf32>
    %210 = math.tanh %209 : vector<8x128xf32>
    %211 = arith.mulf %206, %210 : vector<8x128xf32>
    %cst_41 = arith.constant dense<0.000000e+00> : vector<8x1024xf32>
    %212 = tpu.matmul %211, %1, %cst_41 {dimension_numbers = #tpu.dot_dimension_numbers<[1], [0], [0], [1], [0, 0, 1, 1], [], []>} : vector<8x128xf32>, vector<128x1024xf32>, vector<8x1024xf32> -> vector<8x1024xf32>
    %213 = vector.extract_strided_slice %212 {offsets = [0, 0], sizes = [8, 512], strides = [1, 1]} : vector<8x1024xf32> to vector<8x512xf32>
    %214 = arith.addf %8, %213 : vector<8x512xf32>
    %215 = vector.extract_strided_slice %212 {offsets = [0, 512], sizes = [8, 512], strides = [1, 1]} : vector<8x1024xf32> to vector<8x512xf32>
    %216 = vector.broadcast %4 : vector<1x512xf32> to vector<8x512xf32>
    %217 = arith.addf %215, %216 : vector<8x512xf32>
    %cst_42 = arith.constant dense<0.000000e+00> : vector<8x512xf32>
    %218 = tpu.matmul %185, %2, %cst_42 {dimension_numbers = #tpu.dot_dimension_numbers<[1], [0], [0], [1], [0, 0, 1, 1], [], []>} : vector<8x128xf32>, vector<128x512xf32>, vector<8x512xf32> -> vector<8x512xf32>
    %219 = arith.addf %217, %218 : vector<8x512xf32>
    %220 = vector.extract_strided_slice %219 {offsets = [0, 0], sizes = [8, 128], strides = [1, 1]} : vector<8x512xf32> to vector<8x128xf32>
    %221 = arith.negf %220 : vector<8x128xf32>
    %222 = math.exp %221 : vector<8x128xf32>
    %cst_43 = arith.constant 1.000000e+00 : f32
    %223 = vector.broadcast %cst_43 : f32 to vector<8x128xf32>
    %224 = arith.addf %223, %222 : vector<8x128xf32>
    %225 = arith.divf %223, %224 : vector<8x128xf32>
    %226 = vector.extract_strided_slice %219 {offsets = [0, 128], sizes = [8, 128], strides = [1, 1]} : vector<8x512xf32> to vector<8x128xf32>
    %227 = arith.negf %226 : vector<8x128xf32>
    %228 = math.exp %227 : vector<8x128xf32>
    %cst_44 = arith.constant 1.000000e+00 : f32
    %229 = vector.broadcast %cst_44 : f32 to vector<8x128xf32>
    %230 = arith.addf %229, %228 : vector<8x128xf32>
    %231 = arith.divf %229, %230 : vector<8x128xf32>
    %232 = vector.extract_strided_slice %219 {offsets = [0, 256], sizes = [8, 128], strides = [1, 1]} : vector<8x512xf32> to vector<8x128xf32>
    %233 = math.tanh %232 : vector<8x128xf32>
    %234 = vector.extract_strided_slice %219 {offsets = [0, 384], sizes = [8, 128], strides = [1, 1]} : vector<8x512xf32> to vector<8x128xf32>
    %235 = arith.negf %234 : vector<8x128xf32>
    %236 = math.exp %235 : vector<8x128xf32>
    %cst_45 = arith.constant 1.000000e+00 : f32
    %237 = vector.broadcast %cst_45 : f32 to vector<8x128xf32>
    %238 = arith.addf %237, %236 : vector<8x128xf32>
    %239 = arith.divf %237, %238 : vector<8x128xf32>
    %240 = arith.mulf %231, %183 : vector<8x128xf32>
    %241 = arith.mulf %225, %233 : vector<8x128xf32>
    %242 = arith.addf %240, %241 : vector<8x128xf32>
    %243 = math.tanh %242 : vector<8x128xf32>
    %244 = arith.mulf %239, %243 : vector<8x128xf32>
    %c0_46 = arith.constant 0 : index
    %c384 = arith.constant 384 : index
    %245 = vector.load %arg7[%c0_46, %c384] : memref<8x1024xf32, #tpu.memory_space<vmem>>, vector<8x128xf32>
    tpu.vector_store %arg7[%c0_46, %c384], %244 {strides = array<i32>} : memref<8x1024xf32, #tpu.memory_space<vmem>>, vector<8x128xf32>,
    %246 = vector.extract_strided_slice %214 {offsets = [0, 0], sizes = [8, 128], strides = [1, 1]} : vector<8x512xf32> to vector<8x128xf32>
    %247 = arith.negf %246 : vector<8x128xf32>
    %248 = math.exp %247 : vector<8x128xf32>
    %cst_47 = arith.constant 1.000000e+00 : f32
    %249 = vector.broadcast %cst_47 : f32 to vector<8x128xf32>
    %250 = arith.addf %249, %248 : vector<8x128xf32>
    %251 = arith.divf %249, %250 : vector<8x128xf32>
    %252 = vector.extract_strided_slice %214 {offsets = [0, 128], sizes = [8, 128], strides = [1, 1]} : vector<8x512xf32> to vector<8x128xf32>
    %253 = arith.negf %252 : vector<8x128xf32>
    %254 = math.exp %253 : vector<8x128xf32>
    %cst_48 = arith.constant 1.000000e+00 : f32
    %255 = vector.broadcast %cst_48 : f32 to vector<8x128xf32>
    %256 = arith.addf %255, %254 : vector<8x128xf32>
    %257 = arith.divf %255, %256 : vector<8x128xf32>
    %258 = vector.extract_strided_slice %214 {offsets = [0, 256], sizes = [8, 128], strides = [1, 1]} : vector<8x512xf32> to vector<8x128xf32>
    %259 = math.tanh %258 : vector<8x128xf32>
    %260 = vector.extract_strided_slice %214 {offsets = [0, 384], sizes = [8, 128], strides = [1, 1]} : vector<8x512xf32> to vector<8x128xf32>
    %261 = arith.negf %260 : vector<8x128xf32>
    %262 = math.exp %261 : vector<8x128xf32>
    %cst_49 = arith.constant 1.000000e+00 : f32
    %263 = vector.broadcast %cst_49 : f32 to vector<8x128xf32>
    %264 = arith.addf %263, %262 : vector<8x128xf32>
    %265 = arith.divf %263, %264 : vector<8x128xf32>
    %266 = arith.mulf %257, %209 : vector<8x128xf32>
    %267 = arith.mulf %251, %259 : vector<8x128xf32>
    %268 = arith.addf %266, %267 : vector<8x128xf32>
    %269 = math.tanh %268 : vector<8x128xf32>
    %270 = arith.mulf %265, %269 : vector<8x128xf32>
    %cst_50 = arith.constant dense<0.000000e+00> : vector<8x1024xf32>
    %271 = tpu.matmul %270, %1, %cst_50 {dimension_numbers = #tpu.dot_dimension_numbers<[1], [0], [0], [1], [0, 0, 1, 1], [], []>} : vector<8x128xf32>, vector<128x1024xf32>, vector<8x1024xf32> -> vector<8x1024xf32>
    %272 = vector.extract_strided_slice %271 {offsets = [0, 0], sizes = [8, 512], strides = [1, 1]} : vector<8x1024xf32> to vector<8x512xf32>
    %273 = arith.addf %8, %272 : vector<8x512xf32>
    %274 = vector.extract_strided_slice %271 {offsets = [0, 512], sizes = [8, 512], strides = [1, 1]} : vector<8x1024xf32> to vector<8x512xf32>
    %275 = vector.broadcast %4 : vector<1x512xf32> to vector<8x512xf32>
    %276 = arith.addf %274, %275 : vector<8x512xf32>
    %cst_51 = arith.constant dense<0.000000e+00> : vector<8x512xf32>
    %277 = tpu.matmul %244, %2, %cst_51 {dimension_numbers = #tpu.dot_dimension_numbers<[1], [0], [0], [1], [0, 0, 1, 1], [], []>} : vector<8x128xf32>, vector<128x512xf32>, vector<8x512xf32> -> vector<8x512xf32>
    %278 = arith.addf %276, %277 : vector<8x512xf32>
    %279 = vector.extract_strided_slice %278 {offsets = [0, 0], sizes = [8, 128], strides = [1, 1]} : vector<8x512xf32> to vector<8x128xf32>
    %280 = arith.negf %279 : vector<8x128xf32>
    %281 = math.exp %280 : vector<8x128xf32>
    %cst_52 = arith.constant 1.000000e+00 : f32
    %282 = vector.broadcast %cst_52 : f32 to vector<8x128xf32>
    %283 = arith.addf %282, %281 : vector<8x128xf32>
    %284 = arith.divf %282, %283 : vector<8x128xf32>
    %285 = vector.extract_strided_slice %278 {offsets = [0, 128], sizes = [8, 128], strides = [1, 1]} : vector<8x512xf32> to vector<8x128xf32>
    %286 = arith.negf %285 : vector<8x128xf32>
    %287 = math.exp %286 : vector<8x128xf32>
    %cst_53 = arith.constant 1.000000e+00 : f32
    %288 = vector.broadcast %cst_53 : f32 to vector<8x128xf32>
    %289 = arith.addf %288, %287 : vector<8x128xf32>
    %290 = arith.divf %288, %289 : vector<8x128xf32>
    %291 = vector.extract_strided_slice %278 {offsets = [0, 256], sizes = [8, 128], strides = [1, 1]} : vector<8x512xf32> to vector<8x128xf32>
    %292 = math.tanh %291 : vector<8x128xf32>
    %293 = vector.extract_strided_slice %278 {offsets = [0, 384], sizes = [8, 128], strides = [1, 1]} : vector<8x512xf32> to vector<8x128xf32>
    %294 = arith.negf %293 : vector<8x128xf32>
    %295 = math.exp %294 : vector<8x128xf32>
    %cst_54 = arith.constant 1.000000e+00 : f32
    %296 = vector.broadcast %cst_54 : f32 to vector<8x128xf32>
    %297 = arith.addf %296, %295 : vector<8x128xf32>
    %298 = arith.divf %296, %297 : vector<8x128xf32>
    %299 = arith.mulf %290, %242 : vector<8x128xf32>
    %300 = arith.mulf %284, %292 : vector<8x128xf32>
    %301 = arith.addf %299, %300 : vector<8x128xf32>
    %302 = math.tanh %301 : vector<8x128xf32>
    %303 = arith.mulf %298, %302 : vector<8x128xf32>
    %c0_55 = arith.constant 0 : index
    %c512_56 = arith.constant 512 : index
    %304 = vector.load %arg7[%c0_55, %c512_56] : memref<8x1024xf32, #tpu.memory_space<vmem>>, vector<8x128xf32>
    tpu.vector_store %arg7[%c0_55, %c512_56], %303 {strides = array<i32>} : memref<8x1024xf32, #tpu.memory_space<vmem>>, vector<8x128xf32>,
    %305 = vector.extract_strided_slice %273 {offsets = [0, 0], sizes = [8, 128], strides = [1, 1]} : vector<8x512xf32> to vector<8x128xf32>
    %306 = arith.negf %305 : vector<8x128xf32>
    %307 = math.exp %306 : vector<8x128xf32>
    %cst_57 = arith.constant 1.000000e+00 : f32
    %308 = vector.broadcast %cst_57 : f32 to vector<8x128xf32>
    %309 = arith.addf %308, %307 : vector<8x128xf32>
    %310 = arith.divf %308, %309 : vector<8x128xf32>
    %311 = vector.extract_strided_slice %273 {offsets = [0, 128], sizes = [8, 128], strides = [1, 1]} : vector<8x512xf32> to vector<8x128xf32>
    %312 = arith.negf %311 : vector<8x128xf32>
    %313 = math.exp %312 : vector<8x128xf32>
    %cst_58 = arith.constant 1.000000e+00 : f32
    %314 = vector.broadcast %cst_58 : f32 to vector<8x128xf32>
    %315 = arith.addf %314, %313 : vector<8x128xf32>
    %316 = arith.divf %314, %315 : vector<8x128xf32>
    %317 = vector.extract_strided_slice %273 {offsets = [0, 256], sizes = [8, 128], strides = [1, 1]} : vector<8x512xf32> to vector<8x128xf32>
    %318 = math.tanh %317 : vector<8x128xf32>
    %319 = vector.extract_strided_slice %273 {offsets = [0, 384], sizes = [8, 128], strides = [1, 1]} : vector<8x512xf32> to vector<8x128xf32>
    %320 = arith.negf %319 : vector<8x128xf32>
    %321 = math.exp %320 : vector<8x128xf32>
    %cst_59 = arith.constant 1.000000e+00 : f32
    %322 = vector.broadcast %cst_59 : f32 to vector<8x128xf32>
    %323 = arith.addf %322, %321 : vector<8x128xf32>
    %324 = arith.divf %322, %323 : vector<8x128xf32>
    %325 = arith.mulf %316, %268 : vector<8x128xf32>
    %326 = arith.mulf %310, %318 : vector<8x128xf32>
    %327 = arith.addf %325, %326 : vector<8x128xf32>
    %328 = math.tanh %327 : vector<8x128xf32>
    %329 = arith.mulf %324, %328 : vector<8x128xf32>
    %cst_60 = arith.constant dense<0.000000e+00> : vector<8x1024xf32>
    %330 = tpu.matmul %329, %1, %cst_60 {dimension_numbers = #tpu.dot_dimension_numbers<[1], [0], [0], [1], [0, 0, 1, 1], [], []>} : vector<8x128xf32>, vector<128x1024xf32>, vector<8x1024xf32> -> vector<8x1024xf32>
    %331 = vector.extract_strided_slice %330 {offsets = [0, 0], sizes = [8, 512], strides = [1, 1]} : vector<8x1024xf32> to vector<8x512xf32>
    %332 = arith.addf %8, %331 : vector<8x512xf32>
    %333 = vector.extract_strided_slice %330 {offsets = [0, 512], sizes = [8, 512], strides = [1, 1]} : vector<8x1024xf32> to vector<8x512xf32>
    %334 = vector.broadcast %4 : vector<1x512xf32> to vector<8x512xf32>
    %335 = arith.addf %333, %334 : vector<8x512xf32>
    %cst_61 = arith.constant dense<0.000000e+00> : vector<8x512xf32>
    %336 = tpu.matmul %303, %2, %cst_61 {dimension_numbers = #tpu.dot_dimension_numbers<[1], [0], [0], [1], [0, 0, 1, 1], [], []>} : vector<8x128xf32>, vector<128x512xf32>, vector<8x512xf32> -> vector<8x512xf32>
    %337 = arith.addf %335, %336 : vector<8x512xf32>
    %338 = vector.extract_strided_slice %337 {offsets = [0, 0], sizes = [8, 128], strides = [1, 1]} : vector<8x512xf32> to vector<8x128xf32>
    %339 = arith.negf %338 : vector<8x128xf32>
    %340 = math.exp %339 : vector<8x128xf32>
    %cst_62 = arith.constant 1.000000e+00 : f32
    %341 = vector.broadcast %cst_62 : f32 to vector<8x128xf32>
    %342 = arith.addf %341, %340 : vector<8x128xf32>
    %343 = arith.divf %341, %342 : vector<8x128xf32>
    %344 = vector.extract_strided_slice %337 {offsets = [0, 128], sizes = [8, 128], strides = [1, 1]} : vector<8x512xf32> to vector<8x128xf32>
    %345 = arith.negf %344 : vector<8x128xf32>
    %346 = math.exp %345 : vector<8x128xf32>
    %cst_63 = arith.constant 1.000000e+00 : f32
    %347 = vector.broadcast %cst_63 : f32 to vector<8x128xf32>
    %348 = arith.addf %347, %346 : vector<8x128xf32>
    %349 = arith.divf %347, %348 : vector<8x128xf32>
    %350 = vector.extract_strided_slice %337 {offsets = [0, 256], sizes = [8, 128], strides = [1, 1]} : vector<8x512xf32> to vector<8x128xf32>
    %351 = math.tanh %350 : vector<8x128xf32>
    %352 = vector.extract_strided_slice %337 {offsets = [0, 384], sizes = [8, 128], strides = [1, 1]} : vector<8x512xf32> to vector<8x128xf32>
    %353 = arith.negf %352 : vector<8x128xf32>
    %354 = math.exp %353 : vector<8x128xf32>
    %cst_64 = arith.constant 1.000000e+00 : f32
    %355 = vector.broadcast %cst_64 : f32 to vector<8x128xf32>
    %356 = arith.addf %355, %354 : vector<8x128xf32>
    %357 = arith.divf %355, %356 : vector<8x128xf32>
    %358 = arith.mulf %349, %301 : vector<8x128xf32>
    %359 = arith.mulf %343, %351 : vector<8x128xf32>
    %360 = arith.addf %358, %359 : vector<8x128xf32>
    %361 = math.tanh %360 : vector<8x128xf32>
    %362 = arith.mulf %357, %361 : vector<8x128xf32>
    %c0_65 = arith.constant 0 : index
    %c640 = arith.constant 640 : index
    %363 = vector.load %arg7[%c0_65, %c640] : memref<8x1024xf32, #tpu.memory_space<vmem>>, vector<8x128xf32>
    tpu.vector_store %arg7[%c0_65, %c640], %362 {strides = array<i32>} : memref<8x1024xf32, #tpu.memory_space<vmem>>, vector<8x128xf32>,
    %364 = vector.extract_strided_slice %332 {offsets = [0, 0], sizes = [8, 128], strides = [1, 1]} : vector<8x512xf32> to vector<8x128xf32>
    %365 = arith.negf %364 : vector<8x128xf32>
    %366 = math.exp %365 : vector<8x128xf32>
    %cst_66 = arith.constant 1.000000e+00 : f32
    %367 = vector.broadcast %cst_66 : f32 to vector<8x128xf32>
    %368 = arith.addf %367, %366 : vector<8x128xf32>
    %369 = arith.divf %367, %368 : vector<8x128xf32>
    %370 = vector.extract_strided_slice %332 {offsets = [0, 128], sizes = [8, 128], strides = [1, 1]} : vector<8x512xf32> to vector<8x128xf32>
    %371 = arith.negf %370 : vector<8x128xf32>
    %372 = math.exp %371 : vector<8x128xf32>
    %cst_67 = arith.constant 1.000000e+00 : f32
    %373 = vector.broadcast %cst_67 : f32 to vector<8x128xf32>
    %374 = arith.addf %373, %372 : vector<8x128xf32>
    %375 = arith.divf %373, %374 : vector<8x128xf32>
    %376 = vector.extract_strided_slice %332 {offsets = [0, 256], sizes = [8, 128], strides = [1, 1]} : vector<8x512xf32> to vector<8x128xf32>
    %377 = math.tanh %376 : vector<8x128xf32>
    %378 = vector.extract_strided_slice %332 {offsets = [0, 384], sizes = [8, 128], strides = [1, 1]} : vector<8x512xf32> to vector<8x128xf32>
    %379 = arith.negf %378 : vector<8x128xf32>
    %380 = math.exp %379 : vector<8x128xf32>
    %cst_68 = arith.constant 1.000000e+00 : f32
    %381 = vector.broadcast %cst_68 : f32 to vector<8x128xf32>
    %382 = arith.addf %381, %380 : vector<8x128xf32>
    %383 = arith.divf %381, %382 : vector<8x128xf32>
    %384 = arith.mulf %375, %327 : vector<8x128xf32>
    %385 = arith.mulf %369, %377 : vector<8x128xf32>
    %386 = arith.addf %384, %385 : vector<8x128xf32>
    %387 = math.tanh %386 : vector<8x128xf32>
    %388 = arith.mulf %383, %387 : vector<8x128xf32>
    %cst_69 = arith.constant dense<0.000000e+00> : vector<8x1024xf32>
    %389 = tpu.matmul %388, %1, %cst_69 {dimension_numbers = #tpu.dot_dimension_numbers<[1], [0], [0], [1], [0, 0, 1, 1], [], []>} : vector<8x128xf32>, vector<128x1024xf32>, vector<8x1024xf32> -> vector<8x1024xf32>
    %390 = vector.extract_strided_slice %389 {offsets = [0, 0], sizes = [8, 512], strides = [1, 1]} : vector<8x1024xf32> to vector<8x512xf32>
    %391 = arith.addf %8, %390 : vector<8x512xf32>
    %392 = vector.extract_strided_slice %389 {offsets = [0, 512], sizes = [8, 512], strides = [1, 1]} : vector<8x1024xf32> to vector<8x512xf32>
    %393 = vector.broadcast %4 : vector<1x512xf32> to vector<8x512xf32>
    %394 = arith.addf %392, %393 : vector<8x512xf32>
    %cst_70 = arith.constant dense<0.000000e+00> : vector<8x512xf32>
    %395 = tpu.matmul %362, %2, %cst_70 {dimension_numbers = #tpu.dot_dimension_numbers<[1], [0], [0], [1], [0, 0, 1, 1], [], []>} : vector<8x128xf32>, vector<128x512xf32>, vector<8x512xf32> -> vector<8x512xf32>
    %396 = arith.addf %394, %395 : vector<8x512xf32>
    %397 = vector.extract_strided_slice %396 {offsets = [0, 0], sizes = [8, 128], strides = [1, 1]} : vector<8x512xf32> to vector<8x128xf32>
    %398 = arith.negf %397 : vector<8x128xf32>
    %399 = math.exp %398 : vector<8x128xf32>
    %cst_71 = arith.constant 1.000000e+00 : f32
    %400 = vector.broadcast %cst_71 : f32 to vector<8x128xf32>
    %401 = arith.addf %400, %399 : vector<8x128xf32>
    %402 = arith.divf %400, %401 : vector<8x128xf32>
    %403 = vector.extract_strided_slice %396 {offsets = [0, 128], sizes = [8, 128], strides = [1, 1]} : vector<8x512xf32> to vector<8x128xf32>
    %404 = arith.negf %403 : vector<8x128xf32>
    %405 = math.exp %404 : vector<8x128xf32>
    %cst_72 = arith.constant 1.000000e+00 : f32
    %406 = vector.broadcast %cst_72 : f32 to vector<8x128xf32>
    %407 = arith.addf %406, %405 : vector<8x128xf32>
    %408 = arith.divf %406, %407 : vector<8x128xf32>
    %409 = vector.extract_strided_slice %396 {offsets = [0, 256], sizes = [8, 128], strides = [1, 1]} : vector<8x512xf32> to vector<8x128xf32>
    %410 = math.tanh %409 : vector<8x128xf32>
    %411 = vector.extract_strided_slice %396 {offsets = [0, 384], sizes = [8, 128], strides = [1, 1]} : vector<8x512xf32> to vector<8x128xf32>
    %412 = arith.negf %411 : vector<8x128xf32>
    %413 = math.exp %412 : vector<8x128xf32>
    %cst_73 = arith.constant 1.000000e+00 : f32
    %414 = vector.broadcast %cst_73 : f32 to vector<8x128xf32>
    %415 = arith.addf %414, %413 : vector<8x128xf32>
    %416 = arith.divf %414, %415 : vector<8x128xf32>
    %417 = arith.mulf %408, %360 : vector<8x128xf32>
    %418 = arith.mulf %402, %410 : vector<8x128xf32>
    %419 = arith.addf %417, %418 : vector<8x128xf32>
    %420 = math.tanh %419 : vector<8x128xf32>
    %421 = arith.mulf %416, %420 : vector<8x128xf32>
    %c0_74 = arith.constant 0 : index
    %c768 = arith.constant 768 : index
    %422 = vector.load %arg7[%c0_74, %c768] : memref<8x1024xf32, #tpu.memory_space<vmem>>, vector<8x128xf32>
    tpu.vector_store %arg7[%c0_74, %c768], %421 {strides = array<i32>} : memref<8x1024xf32, #tpu.memory_space<vmem>>, vector<8x128xf32>,
    %423 = vector.extract_strided_slice %391 {offsets = [0, 0], sizes = [8, 128], strides = [1, 1]} : vector<8x512xf32> to vector<8x128xf32>
    %424 = arith.negf %423 : vector<8x128xf32>
    %425 = math.exp %424 : vector<8x128xf32>
    %cst_75 = arith.constant 1.000000e+00 : f32
    %426 = vector.broadcast %cst_75 : f32 to vector<8x128xf32>
    %427 = arith.addf %426, %425 : vector<8x128xf32>
    %428 = arith.divf %426, %427 : vector<8x128xf32>
    %429 = vector.extract_strided_slice %391 {offsets = [0, 128], sizes = [8, 128], strides = [1, 1]} : vector<8x512xf32> to vector<8x128xf32>
    %430 = arith.negf %429 : vector<8x128xf32>
    %431 = math.exp %430 : vector<8x128xf32>
    %cst_76 = arith.constant 1.000000e+00 : f32
    %432 = vector.broadcast %cst_76 : f32 to vector<8x128xf32>
    %433 = arith.addf %432, %431 : vector<8x128xf32>
    %434 = arith.divf %432, %433 : vector<8x128xf32>
    %435 = vector.extract_strided_slice %391 {offsets = [0, 256], sizes = [8, 128], strides = [1, 1]} : vector<8x512xf32> to vector<8x128xf32>
    %436 = math.tanh %435 : vector<8x128xf32>
    %437 = vector.extract_strided_slice %391 {offsets = [0, 384], sizes = [8, 128], strides = [1, 1]} : vector<8x512xf32> to vector<8x128xf32>
    %438 = arith.negf %437 : vector<8x128xf32>
    %439 = math.exp %438 : vector<8x128xf32>
    %cst_77 = arith.constant 1.000000e+00 : f32
    %440 = vector.broadcast %cst_77 : f32 to vector<8x128xf32>
    %441 = arith.addf %440, %439 : vector<8x128xf32>
    %442 = arith.divf %440, %441 : vector<8x128xf32>
    %443 = arith.mulf %434, %386 : vector<8x128xf32>
    %444 = arith.mulf %428, %436 : vector<8x128xf32>
    %445 = arith.addf %443, %444 : vector<8x128xf32>
    %446 = math.tanh %445 : vector<8x128xf32>
    %447 = arith.mulf %442, %446 : vector<8x128xf32>
    %cst_78 = arith.constant dense<0.000000e+00> : vector<8x1024xf32>
    %448 = tpu.matmul %447, %1, %cst_78 {dimension_numbers = #tpu.dot_dimension_numbers<[1], [0], [0], [1], [0, 0, 1, 1], [], []>} : vector<8x128xf32>, vector<128x1024xf32>, vector<8x1024xf32> -> vector<8x1024xf32>
    %449 = vector.extract_strided_slice %448 {offsets = [0, 512], sizes = [8, 512], strides = [1, 1]} : vector<8x1024xf32> to vector<8x512xf32>
    %450 = vector.broadcast %4 : vector<1x512xf32> to vector<8x512xf32>
    %451 = arith.addf %449, %450 : vector<8x512xf32>
    %cst_79 = arith.constant dense<0.000000e+00> : vector<8x512xf32>
    %452 = tpu.matmul %421, %2, %cst_79 {dimension_numbers = #tpu.dot_dimension_numbers<[1], [0], [0], [1], [0, 0, 1, 1], [], []>} : vector<8x128xf32>, vector<128x512xf32>, vector<8x512xf32> -> vector<8x512xf32>
    %453 = arith.addf %451, %452 : vector<8x512xf32>
    %454 = vector.extract_strided_slice %453 {offsets = [0, 0], sizes = [8, 128], strides = [1, 1]} : vector<8x512xf32> to vector<8x128xf32>
    %455 = arith.negf %454 : vector<8x128xf32>
    %456 = math.exp %455 : vector<8x128xf32>
    %cst_80 = arith.constant 1.000000e+00 : f32
    %457 = vector.broadcast %cst_80 : f32 to vector<8x128xf32>
    %458 = arith.addf %457, %456 : vector<8x128xf32>
    %459 = arith.divf %457, %458 : vector<8x128xf32>
    %460 = vector.extract_strided_slice %453 {offsets = [0, 128], sizes = [8, 128], strides = [1, 1]} : vector<8x512xf32> to vector<8x128xf32>
    %461 = arith.negf %460 : vector<8x128xf32>
    %462 = math.exp %461 : vector<8x128xf32>
    %cst_81 = arith.constant 1.000000e+00 : f32
    %463 = vector.broadcast %cst_81 : f32 to vector<8x128xf32>
    %464 = arith.addf %463, %462 : vector<8x128xf32>
    %465 = arith.divf %463, %464 : vector<8x128xf32>
    %466 = vector.extract_strided_slice %453 {offsets = [0, 256], sizes = [8, 128], strides = [1, 1]} : vector<8x512xf32> to vector<8x128xf32>
    %467 = math.tanh %466 : vector<8x128xf32>
    %468 = vector.extract_strided_slice %453 {offsets = [0, 384], sizes = [8, 128], strides = [1, 1]} : vector<8x512xf32> to vector<8x128xf32>
    %469 = arith.negf %468 : vector<8x128xf32>
    %470 = math.exp %469 : vector<8x128xf32>
    %cst_82 = arith.constant 1.000000e+00 : f32
    %471 = vector.broadcast %cst_82 : f32 to vector<8x128xf32>
    %472 = arith.addf %471, %470 : vector<8x128xf32>
    %473 = arith.divf %471, %472 : vector<8x128xf32>
    %474 = arith.mulf %465, %419 : vector<8x128xf32>
    %475 = arith.mulf %459, %467 : vector<8x128xf32>
    %476 = arith.addf %474, %475 : vector<8x128xf32>
    %477 = math.tanh %476 : vector<8x128xf32>
    %478 = arith.mulf %473, %477 : vector<8x128xf32>
    %c0_83 = arith.constant 0 : index
    %c896 = arith.constant 896 : index
    %479 = vector.load %arg7[%c0_83, %c896] : memref<8x1024xf32, #tpu.memory_space<vmem>>, vector<8x128xf32>
    tpu.vector_store %arg7[%c0_83, %c896], %478 {strides = array<i32>} : memref<8x1024xf32, #tpu.memory_space<vmem>>, vector<8x128xf32>,
    %c0_84 = arith.constant 0 : index
    %c0_85 = arith.constant 0 : index
    %480 = vector.load %arg7[%c0_84, %c0_85] : memref<8x1024xf32, #tpu.memory_space<vmem>>, vector<8x1024xf32>
    %c0_86 = arith.constant 0 : index
    %c0_87 = arith.constant 0 : index
    %481 = vector.load %arg4[%c0_86, %c0_87] : memref<1024x8xf32, #tpu.memory_space<vmem>>, vector<1024x8xf32>
    %cst_88 = arith.constant dense<0.000000e+00> : vector<8x8xf32>
    %482 = tpu.matmul %480, %481, %cst_88 {dimension_numbers = #tpu.dot_dimension_numbers<[1], [0], [0], [1], [0, 0, 1, 1], [], []>} : vector<8x1024xf32>, vector<1024x8xf32>, vector<8x8xf32> -> vector<8x8xf32>
    %c0_89 = arith.constant 0 : index
    %c0_90 = arith.constant 0 : index
    %483 = vector.load %arg5[%c0_89, %c0_90] : memref<1x8xf32, #tpu.memory_space<vmem>>, vector<1x8xf32>
    %484 = vector.broadcast %483 : vector<1x8xf32> to vector<8x8xf32>
    %485 = arith.addf %482, %484 : vector<8x8xf32>
    %c0_91 = arith.constant 0 : index
    %c0_92 = arith.constant 0 : index
    %486 = vector.load %arg6[%c0_91, %c0_92] : memref<8x8xf32, #tpu.memory_space<vmem>>, vector<8x8xf32>
    tpu.vector_store %arg6[%c0_91, %c0_92], %485 {strides = array<i32>} : memref<8x8xf32, #tpu.memory_space<vmem>>, vector<8x8xf32>,
    return
  }
  func.func @transform_0(%arg0: i32) -> (i32, i32) {
    %c0_i32 = arith.constant 0 : i32
    %c0_i32_0 = arith.constant 0 : i32
    return %arg0, %c0_i32 : i32, i32
  }
  func.func @transform_1(%arg0: i32) -> (i32, i32) {
    %c0_i32 = arith.constant 0 : i32
    %c0_i32_0 = arith.constant 0 : i32
    %c0_i32_1 = arith.constant 0 : i32
    return %c0_i32, %c0_i32_0 : i32, i32
  }
  func.func @transform_2(%arg0: i32) -> (i32, i32) {
    %c0_i32 = arith.constant 0 : i32
    %c0_i32_0 = arith.constant 0 : i32
    %c0_i32_1 = arith.constant 0 : i32
    return %c0_i32, %c0_i32_0 : i32, i32
  }
  func.func @transform_3(%arg0: i32) -> (i32, i32) {
    %c0_i32 = arith.constant 0 : i32
    %c0_i32_0 = arith.constant 0 : i32
    %c0_i32_1 = arith.constant 0 : i32
    return %c0_i32, %c0_i32_0 : i32, i32
  }
  func.func @transform_4(%arg0: i32) -> (i32, i32) {
    %c0_i32 = arith.constant 0 : i32
    %c0_i32_0 = arith.constant 0 : i32
    %c0_i32_1 = arith.constant 0 : i32
    return %c0_i32, %c0_i32_0 : i32, i32
  }
  func.func @transform_5(%arg0: i32) -> (i32, i32) {
    %c0_i32 = arith.constant 0 : i32
    %c0_i32_0 = arith.constant 0 : i32
    return %arg0, %c0_i32 : i32, i32
  }
}

</mosaic_0001>

<bundles_post_ra>
// kernel: decoder_forward.1
= control target key start
LH: loop header
LB: loop body
LE: loop exit
PB: predicated region body
PF: predicated region fallthrough
CT: control target
= control target key end

     0   :  { %10 = vsyncpa [#allocation4], 0  ;;  %s4899_s18 = smov 0   ;;  %s8718_s0 = inlined_call_operand.vmem [shape: f32[16,128], index: 0, kind: input, shape index: {}]   ;;  %s8719_s1 = inlined_call_operand.hbm [shape: f32[128,2048], index: 1, kind: input, shape index: {}]   ;;  %s8720_s2 = inlined_call_operand.vmem [shape: f32[1,1024], index: 2, kind: input, shape index: {}]   ;;  %s8721_s3 = inlined_call_operand.vmem [shape: f32[1024,8], index: 3, kind: input, shape index: {}]   ;;  %s8722_s4 = inlined_call_operand.vmem [shape: f32[1,8], index: 4, kind: input, shape index: {}]   ;;  %s8723_s5 = inlined_call_operand.vmem [shape: f32[16,8], index: 5, kind: output, shape index: {}]  }
   0x1 LB: > { %s168_s21 = sshll.u32 %s8719_s1, 4  ;;  %s4908_s22 = sadd.s32 4294967295, %s4863_s18   ;;  %s4863_s18 = sphi %s4899_s18, %s16_s18   ;;  %s169_s21 = int_to_ptr.hbm [resolvable:$true] %s168_s21 }
   0x2   : > { %p3911_p0 = scmp.ge.s32.totalorder %s4863_s18, 1  ;;  %p157_p1 = scmp.lt.s32.totalorder %s4863_s18, 3 }
   0x3   : > { %p3976_p2 = scmp.eq.s32.totalorder %s4908_s22, 0  ;;  %s4865_s23 = smov [#allocation3]  }
   0x4   : > { %p158_p3 = pnand %p3911_p0, %p157_p1  ;;  %s170_s24 = sshll.u32 %s4865_s23, 4  ;;  %s171_s24 = int_to_ptr.vmem [resolvable:$true] %s170_s24 }
   0x5   : > { %s4866_s25 = smov 2048   ;;  %s4867_s26 = smov 128  }
   0x6   : > { %p3972_p4 = pneg %p158_p3  ;;  %202 = sbr.rel (%p158_p3) target bundleno = 1761 (0x6e1), region = 40 }
   0x8   : > { %p3973_p5 = pnand %p3976_p2, %p3972_p4 }
   0xa   : > { %3975 = dma.hbm_to_vmem [thread:$0]  (!%p3973_p5), %s169_s21, 32768, %s171_s24, [#allocation4], %s4866_s25, %s4866_s25, %s4867_s26  }
   0xb   : > { %4858 = dma.done.wait (%p3976_p2), [#allocation4], 32768  }
   0xc   : > { %4860 = vsyncadd (%p3976_p2), [#allocation4], 4294934528  ;;  %v297_v0 = vld [vmem:[#allocation3 + $0x780] sm:$0xff]  ;;  %v298_v1 = vld [vmem:[#allocation3 + $0x788] sm:$0xff]  ;;  %p229_p6 = scmp.lt.s32.totalorder %s4908_s22, 1 }
   0xd   : > { %v300_v2 = vld [vmem:[#allocation3 + $0x798] sm:$0xff]  ;;  %505 = vmatpush.msra.mxu0 %v297_v0  ;;  %525 = vmatpush.msra.mxu1 %v298_v1  ;;  %v293_v3 = vld [vmem:[#allocation3 + $0x700] sm:$0xff]  ;;  %v294_v4 = vld [vmem:[#allocation3 + $0x708] sm:$0xff] }
   0xe   : > { %v296_v5 = vld [vmem:[#allocation3 + $0x718] sm:$0xff]  ;;  %565 = vmatpush.msra.mxu3 %v300_v2  ;;  %v289_v6 = vld [vmem:[#allocation3 + $0x680] sm:$0xff]  ;;  %v290_v7 = vld [vmem:[#allocation3 + $0x688] sm:$0xff]  ;;  %s10261_s22 = smov (!%p229_p6, %s4908_s22), 1 }
   0xf   : > { %506 = vmatpush.msra.mxu0 %v293_v3  ;;  %526 = vmatpush.msra.mxu1 %v294_v4  ;;  %v292_v8 = vld [vmem:[#allocation3 + $0x698] sm:$0xff]  ;;  %v285_v9 = vld [vmem:[#allocation3 + $0x600] sm:$0xff]  ;;  %v286_v10 = vld [vmem:[#allocation3 + $0x608] sm:$0xff]  ;;  %s3916_s27 = sshll.u32 %s10261_s22, 3 }
  0x10   : > { %566 = vmatpush.msra.mxu3 %v296_v5  ;;  %v288_v11 = vld [vmem:[#allocation3 + $0x618] sm:$0xff]  ;;  %v281_v12 = vld [vmem:[#allocation3 + $0x580] sm:$0xff]  ;;  %v282_v13 = vld [vmem:[#allocation3 + $0x588] sm:$0xff]  ;;  %s232_s30 = scalar_lea.vmem %s8718_s0, %s3916_s27  ;;  %s236_s6 = scalar_lea.vmem %s8723_s5, %s3916_s27 }
  0x11   : > { %507 = vmatpush.msra.mxu0 %v289_v6  ;;  %527 = vmatpush.msra.mxu1 %v290_v7  ;;  %v284_v14 = vld [vmem:[#allocation3 + $0x598] sm:$0xff]  ;;  %v277_v15 = vld [vmem:[#allocation3 + $0x500] sm:$0xff]  ;;  %v278_v16 = vld [vmem:[#allocation3 + $0x508] sm:$0xff] }
  0x12   : > { %567 = vmatpush.msra.mxu3 %v292_v8  ;;  %v299_v17 = vld [vmem:[#allocation3 + $0x790] sm:$0xff]  ;;  %v280_v18 = vld [vmem:[#allocation3 + $0x518] sm:$0xff]  ;;  %v273_v20 = vld [vmem:[#allocation3 + $0x480] sm:$0xff] }
  0x13   : > { %508 = vmatpush.msra.mxu0 %v285_v9  ;;  %528 = vmatpush.msra.mxu1 %v286_v10  ;;  %v295_v19 = vld [vmem:[#allocation3 + $0x710] sm:$0xff]  ;;  %v274_v21 = vld [vmem:[#allocation3 + $0x488] sm:$0xff]  ;;  %v276_v22 = vld [vmem:[#allocation3 + $0x498] sm:$0xff] }
  0x14   : > { %568 = vmatpush.msra.mxu3 %v288_v11  ;;  %545 = vmatpush.msra.mxu2 %v299_v17  ;;  %v291_v23 = vld [vmem:[#allocation3 + $0x690] sm:$0xff]  ;;  %v269_v24 = vld [vmem:[#allocation3 + $0x400] sm:$0xff]  ;;  %v270_v25 = vld [vmem:[#allocation3 + $0x408] sm:$0xff] }
  0x15   : > { %509 = vmatpush.msra.mxu0 %v281_v12  ;;  %529 = vmatpush.msra.mxu1 %v282_v13  ;;  %v272_v26 = vld [vmem:[#allocation3 + $0x418] sm:$0xff]  ;;  %v287_v27 = vld [vmem:[#allocation3 + $0x610] sm:$0xff]  ;;  %v265_v28 = vld [vmem:[#allocation3 + $0x380] sm:$0xff] }
  0x16   : > { %569 = vmatpush.msra.mxu3 %v284_v14  ;;  %546 = vmatpush.msra.mxu2 %v295_v19  ;;  %v266_v29 = vld [vmem:[#allocation3 + $0x388] sm:$0xff]  ;;  %v268_v30 = vld [vmem:[#allocation3 + $0x398] sm:$0xff]  ;;  %v283_v31 = vld [vmem:[#allocation3 + $0x590] sm:$0xff] }
  0x17   : > { %510 = vmatpush.msra.mxu0 %v277_v15  ;;  %530 = vmatpush.msra.mxu1 %v278_v16  ;;  %v261_v32 = vld [vmem:[#allocation3 + $0x300] sm:$0xff]  ;;  %v262_v33 = vld [vmem:[#allocation3 + $0x308] sm:$0xff]  ;;  %v264_v34 = vld [vmem:[#allocation3 + $0x318] sm:$0xff] }
  0x18   : > { %570 = vmatpush.msra.mxu3 %v280_v18  ;;  %547 = vmatpush.msra.mxu2 %v291_v23  ;;  %v279_v35 = vld [vmem:[#allocation3 + $0x510] sm:$0xff]  ;;  %v257_v36 = vld [vmem:[#allocation3 + $0x280] sm:$0xff]  ;;  %v258_v37 = vld [vmem:[#allocation3 + $0x288] sm:$0xff] }
  0x19   : > { %511 = vmatpush.msra.mxu0 %v273_v20  ;;  %531 = vmatpush.msra.mxu1 %v274_v21  ;;  %v260_v38 = vld [vmem:[#allocation3 + $0x298] sm:$0xff]  ;;  %v275_v39 = vld [vmem:[#allocation3 + $0x490] sm:$0xff]  ;;  %v253_v40 = vld [vmem:[#allocation3 + $0x200] sm:$0xff] }
  0x1a   : > { %571 = vmatpush.msra.mxu3 %v276_v22  ;;  %548 = vmatpush.msra.mxu2 %v287_v27  ;;  %v254_v41 = vld [vmem:[#allocation3 + $0x208] sm:$0xff]  ;;  %v256_v42 = vld [vmem:[#allocation3 + $0x218] sm:$0xff]  ;;  %v271_v43 = vld [vmem:[#allocation3 + $0x410] sm:$0xff] }
  0x1b   : > { %512 = vmatpush.msra.mxu0 %v269_v24  ;;  %532 = vmatpush.msra.mxu1 %v270_v25  ;;  %v249_v44 = vld [vmem:[#allocation3 + $0x180] sm:$0xff]  ;;  %v250_v45 = vld [vmem:[#allocation3 + $0x188] sm:$0xff]  ;;  %v252_v46 = vld [vmem:[#allocation3 + $0x198] sm:$0xff] }
  0x1c   : > { %572 = vmatpush.msra.mxu3 %v272_v26  ;;  %549 = vmatpush.msra.mxu2 %v283_v31  ;;  %v267_v47 = vld [vmem:[#allocation3 + $0x390] sm:$0xff]  ;;  %v245_v48 = vld [vmem:[#allocation3 + $0x100] sm:$0xff]  ;;  %v246_v49 = vld [vmem:[#allocation3 + $0x108] sm:$0xff] }
  0x1d   : > { %513 = vmatpush.msra.mxu0 %v265_v28  ;;  %533 = vmatpush.msra.mxu1 %v266_v29  ;;  %v248_v50 = vld [vmem:[#allocation3 + $0x118] sm:$0xff]  ;;  %v263_v51 = vld [vmem:[#allocation3 + $0x310] sm:$0xff]  ;;  %v241_v52 = vld [vmem:[#allocation3 + $0x80] sm:$0xff] }
  0x1e   : > { %573 = vmatpush.msra.mxu3 %v268_v30  ;;  %550 = vmatpush.msra.mxu2 %v279_v35  ;;  %v242_v53 = vld [vmem:[#allocation3 + $0x88] sm:$0xff]  ;;  %v244_v54 = vld [vmem:[#allocation3 + $0x98] sm:$0xff]  ;;  %v259_v55 = vld [vmem:[#allocation3 + $0x290] sm:$0xff] }
  0x1f   : > { %514 = vmatpush.msra.mxu0 %v261_v32  ;;  %534 = vmatpush.msra.mxu1 %v262_v33  ;;  %v237_v56 = vld [vmem:[#allocation3] sm:$0xff]  ;;  %v238_v57 = vld [vmem:[#allocation3 + $0x8] sm:$0xff]  ;;  %v240_v58 = vld [vmem:[#allocation3 + $0x18] sm:$0xff] }
  0x20   : > { %574 = vmatpush.msra.mxu3 %v264_v34  ;;  %551 = vmatpush.msra.mxu2 %v275_v39  ;;  %v495_v59 = vld [vmem:[%s232_s30] sm:$0xff]  ;;  %v255_v60 = vld [vmem:[#allocation3 + $0x210] sm:$0xff]  ;;  %v4927_v62 = vld [vmem:[#allocation3 + $0x7a8] sm:$0xff] }
  0x21   : > { %515 = vmatpush.msra.mxu0 %v257_v36  ;;  %535 = vmatpush.msra.mxu1 %v258_v37  ;;  %v4925_v61 = vld [vmem:[#allocation3 + $0x7a0] sm:$0xff]  ;;  %v4929_v63 = vld [vmem:[#allocation3 + $0x7b8] sm:$0xff]  ;;  %v251_v0 = vld [vmem:[#allocation3 + $0x190] sm:$0xff] }
  0x22   : > { %575 = vmatpush.msra.mxu3 %v260_v38  ;;  %552 = vmatpush.msra.mxu2 %v271_v43  ;;  %v4931_v1 = vld [vmem:[#allocation3 + $0x720] sm:$0xff]  ;;  %v4934_v2 = vld [vmem:[#allocation3 + $0x728] sm:$0xff]  ;;  %v4936_v3 = vld [vmem:[#allocation3 + $0x738] sm:$0xff] }
  0x23   : > { %516 = vmatpush.msra.mxu0 %v253_v40  ;;  %536 = vmatpush.msra.mxu1 %v254_v41  ;;  %v247_v4 = vld [vmem:[#allocation3 + $0x110] sm:$0xff]  ;;  %v4940_v5 = vld [vmem:[#allocation3 + $0x6a0] sm:$0xff]  ;;  %v4943_v6 = vld [vmem:[#allocation3 + $0x6a8] sm:$0xff] }
  0x24   : > { %576 = vmatpush.msra.mxu3 %v256_v42  ;;  %553 = vmatpush.msra.mxu2 %v267_v47  ;;  %v4945_v7 = vld [vmem:[#allocation3 + $0x6b8] sm:$0xff]  ;;  %v243_v8 = vld [vmem:[#allocation3 + $0x90] sm:$0xff]  ;;  %v4949_v9 = vld [vmem:[#allocation3 + $0x620] sm:$0xff] }
  0x25   : > { %517 = vmatpush.msra.mxu0 %v249_v44  ;;  %537 = vmatpush.msra.mxu1 %v250_v45  ;;  %v4952_v10 = vld [vmem:[#allocation3 + $0x628] sm:$0xff]  ;;  %v4954_v11 = vld [vmem:[#allocation3 + $0x638] sm:$0xff]  ;;  %v239_v12 = vld [vmem:[#allocation3 + $0x10] sm:$0xff] }
  0x26   : > { %577 = vmatpush.msra.mxu3 %v252_v46  ;;  %554 = vmatpush.msra.mxu2 %v263_v51  ;;  %v4958_v13 = vld [vmem:[#allocation3 + $0x5a0] sm:$0xff]  ;;  %v4961_v14 = vld [vmem:[#allocation3 + $0x5a8] sm:$0xff]  ;;  %v4963_v15 = vld [vmem:[#allocation3 + $0x7b0] sm:$0xff] }
  0x27   : > { %518 = vmatpush.msra.mxu0 %v245_v48  ;;  %538 = vmatpush.msra.mxu1 %v246_v49  ;;  %v4967_v16 = vld [vmem:[#allocation3 + $0x5b8] sm:$0xff]  ;;  %v4970_v17 = vld [vmem:[#allocation3 + $0x520] sm:$0xff]  ;;  %v4972_v18 = vld [vmem:[#allocation3 + $0x528] sm:$0xff] }
  0x28   : > { %578 = vmatpush.msra.mxu3 %v248_v50  ;;  %555 = vmatpush.msra.mxu2 %v259_v55  ;;  %v4974_v19 = vld [vmem:[#allocation3 + $0x730] sm:$0xff]  ;;  %v4977_v20 = vld [vmem:[#allocation3 + $0x538] sm:$0xff]  ;;  %v4981_v21 = vld [vmem:[#allocation3 + $0x4a0] sm:$0xff] }
  0x29   : > { %519 = vmatpush.msra.mxu0 %v241_v52  ;;  %539 = vmatpush.msra.mxu1 %v242_v53  ;;  %v4983_v22 = vld [vmem:[#allocation3 + $0x4a8] sm:$0xff]  ;;  %v4985_v23 = vld [vmem:[#allocation3 + $0x6b0] sm:$0xff]  ;;  %v4989_v24 = vld [vmem:[#allocation3 + $0x4b8] sm:$0xff] }
  0x2a   : > { %579 = vmatpush.msra.mxu3 %v244_v54  ;;  %556 = vmatpush.msra.mxu2 %v255_v60  ;;  %v4993_v25 = vld [vmem:[#allocation3 + $0x420] sm:$0xff]  ;;  %v4995_v26 = vld [vmem:[#allocation3 + $0x428] sm:$0xff]  ;;  %v4997_v27 = vld [vmem:[#allocation3 + $0x630] sm:$0xff] }
  0x2b   : > { %520 = vmatpush.msra.mxu0 %v237_v56  ;;  %540 = vmatpush.msra.mxu1 %v238_v57  ;;  %v5001_v28 = vld [vmem:[#allocation3 + $0x438] sm:$0xff]  ;;  %v5005_v29 = vld [vmem:[#allocation3 + $0x3a0] sm:$0xff]  ;;  %v5007_v30 = vld [vmem:[#allocation3 + $0x3a8] sm:$0xff] }
  0x2c   : > { %580 = vmatpush.msra.mxu3 %v240_v58  ;;  %521 = vmatmul.f32.vlgmr.msra.gmra.mxu0 %v495_v59  ;;  %v5009_v31 = vld [vmem:[#allocation3 + $0x5b0] sm:$0xff]  ;;  %v5013_v32 = vld [vmem:[#allocation3 + $0x3b8] sm:$0xff]  ;;  %v5033_v37 = vld [vmem:[#allocation3 + $0x320] sm:$0xff] }
  0x2d   : > { %541 = vmatmul.f32.vlgmr.msra.gmra.mxu1 %v495_v59  ;;  %581 = vmatmul.f32.vlgmr.msra.gmra.mxu3 %v495_v59  ;;  %v5017_v33 = vld [vmem:[#allocation3 + $0x530] sm:$0xff]  ;;  %v5035_v38 = vld [vmem:[#allocation3 + $0x328] sm:$0xff]  ;;  %v5041_v40 = vld [vmem:[#allocation3 + $0x338] sm:$0xff] }
  0x2e   : > { %648 = vmatpush.msrb.mxu0 %v4925_v61  ;;  %668 = vmatpush.msrb.mxu1 %v4927_v62  ;;  %v5023_v34 = vld [vmem:[#allocation3 + $0x4b0] sm:$0xff]  ;;  %9237 = vst [vmem:[#allocation7_spill] sm:$0xff] %v5041_v40  ;;  %v5045_v41 = vld [vmem:[#allocation3 + $0x2a0] sm:$0xff]  ;;  %v5047_v42 = vld [vmem:[#allocation3 + $0x2a8] sm:$0xff] }
  0x2f   : > { %708 = vmatpush.msrb.mxu3 %v4929_v63  ;;  %557 = vmatpush.msra.mxu2 %v251_v0  ;;  %v5026_v35 = vld [vmem:[#allocation3 + $0x430] sm:$0xff]  ;;  %9238 = vst [vmem:[#allocation8_spill] sm:$0xff] %v5045_v41  ;;  %v5053_v44 = vld [vmem:[#allocation3 + $0x2b8] sm:$0xff]  ;;  %v5057_v45 = vld [vmem:[#allocation3 + $0x220] sm:$0xff] }
  0x30   : > { %649 = vmatpush.msrb.mxu0 %v4931_v1  ;;  %669 = vmatpush.msrb.mxu1 %v4934_v2  ;;  %v5029_v36 = vld [vmem:[#allocation3 + $0x3b0] sm:$0xff]  ;;  %9239 = vst [vmem:[#allocation9_spill] sm:$0xff] %v5047_v42  ;;  %v5059_v46 = vld [vmem:[#allocation3 + $0x228] sm:$0xff]  ;;  %v5065_v48 = vld [vmem:[#allocation3 + $0x238] sm:$0xff] }
  0x31   : > { %709 = vmatpush.msrb.mxu3 %v4936_v3  ;;  %558 = vmatpush.msra.mxu2 %v247_v4  ;;  %v5037_v39 = vld [vmem:[#allocation3 + $0x330] sm:$0xff]  ;;  %9241 = vst [vmem:[#allocation11_spill] sm:$0xff] %v5053_v44  ;;  %v5069_v49 = vld [vmem:[#allocation3 + $0x1a0] sm:$0xff]  ;;  %v5071_v50 = vld [vmem:[#allocation3 + $0x1a8] sm:$0xff] }
  0x32   : > { %650 = vmatpush.msrb.mxu0 %v4940_v5  ;;  %670 = vmatpush.msrb.mxu1 %v4943_v6  ;;  %9236 = vst [vmem:[#allocation6_spill] sm:$0xff] %v5037_v39  ;;  %v5049_v43 = vld [vmem:[#allocation3 + $0x2b0] sm:$0xff]  ;;  %v5077_v52 = vld [vmem:[#allocation3 + $0x1b8] sm:$0xff]  ;;  %v5081_v53 = vld [vmem:[#allocation3 + $0x120] sm:$0xff] }
  0x33   : > { %710 = vmatpush.msrb.mxu3 %v4945_v7  ;;  %559 = vmatpush.msra.mxu2 %v243_v8  ;;  %9240 = vst [vmem:[#allocation10_spill] sm:$0xff] %v5049_v43  ;;  %v5061_v47 = vld [vmem:[#allocation3 + $0x230] sm:$0xff]  ;;  %v5083_v54 = vld [vmem:[#allocation3 + $0x128] sm:$0xff]  ;;  %v5089_v56 = vld [vmem:[#allocation3 + $0x138] sm:$0xff] }
  0x34   : > { %651 = vmatpush.msrb.mxu0 %v4949_v9  ;;  %671 = vmatpush.msrb.mxu1 %v4952_v10  ;;  %9242 = vst [vmem:[#allocation12_spill] sm:$0xff] %v5057_v45  ;;  %v5073_v51 = vld [vmem:[#allocation3 + $0x1b0] sm:$0xff]  ;;  %v5093_v57 = vld [vmem:[#allocation3 + $0xa0] sm:$0xff]  ;;  %v5095_v58 = vld [vmem:[#allocation3 + $0xa8] sm:$0xff] }
  0x35   : > { %711 = vmatpush.msrb.mxu3 %v4954_v11  ;;  %560 = vmatpush.msra.mxu2 %v239_v12  ;;  %9243 = vst [vmem:[#allocation13_spill] sm:$0xff] %v5059_v46  ;;  %v5085_v55 = vld [vmem:[#allocation3 + $0x130] sm:$0xff]  ;;  %v5101_v60 = vld [vmem:[#allocation3 + $0xb8] sm:$0xff]  ;;  %v5105_v0 = vld [vmem:[#allocation3 + $0x20] sm:$0xff] }
  0x36   : > { %652 = vmatpush.msrb.mxu0 %v4958_v13  ;;  %561 = vmatmul.f32.vlgmr.msra.gmra.mxu2 %v495_v59  ;;  %9244 = vst [vmem:[#allocation14_spill] sm:$0xff] %v5061_v47  ;;  %v5097_v59 = vld [vmem:[#allocation3 + $0xb0] sm:$0xff]  ;;  %v5107_v4 = vld [vmem:[#allocation3 + $0x28] sm:$0xff]  ;;  %v5113_v12 = vld [vmem:[#allocation3 + $0x38] sm:$0xff] }
  0x37   : > { %672 = vmatpush.msrb.mxu1 %v4961_v14  ;;  %688 = vmatpush.msrb.mxu2 %v4963_v15  ;;  %9245 = vst [vmem:[#allocation15_spill] sm:$0xff] %v5065_v48  ;;  %v5109_v8 = vld [vmem:[#allocation3 + $0x30] sm:$0xff] }
  0x38   : > { %712 = vmatpush.msrb.mxu3 %v4967_v16  ;;  %653 = vmatpush.msrb.mxu0 %v4970_v17  ;;  %9246 = vst [vmem:[#allocation16_spill] sm:$0xff] %v5069_v49 }
  0x39   : > { %673 = vmatpush.msrb.mxu1 %v4972_v18  ;;  %689 = vmatpush.msrb.mxu2 %v4974_v19  ;;  %9247 = vst [vmem:[#allocation17_spill] sm:$0xff] %v5071_v50 }
  0x3a   : > { %713 = vmatpush.msrb.mxu3 %v4977_v20  ;;  %654 = vmatpush.msrb.mxu0 %v4981_v21  ;;  %9248 = vst [vmem:[#allocation18_spill] sm:$0xff] %v5073_v51 }
  0x3b   : > { %674 = vmatpush.msrb.mxu1 %v4983_v22  ;;  %690 = vmatpush.msrb.mxu2 %v4985_v23  ;;  %9249 = vst [vmem:[#allocation19_spill] sm:$0xff] %v5077_v52 }
  0x3c   : > { %714 = vmatpush.msrb.mxu3 %v4989_v24  ;;  %655 = vmatpush.msrb.mxu0 %v4993_v25  ;;  %9250 = vst [vmem:[#allocation20_spill] sm:$0xff] %v5081_v53 }
  0x3d   : > { %675 = vmatpush.msrb.mxu1 %v4995_v26  ;;  %691 = vmatpush.msrb.mxu2 %v4997_v27  ;;  %9251 = vst [vmem:[#allocation21_spill] sm:$0xff] %v5083_v54 }
  0x3e   : > { %715 = vmatpush.msrb.mxu3 %v5001_v28  ;;  %656 = vmatpush.msrb.mxu0 %v5005_v29  ;;  %9252 = vst [vmem:[#allocation22_spill] sm:$0xff] %v5085_v55 }
  0x3f   : > { %676 = vmatpush.msrb.mxu1 %v5007_v30  ;;  %692 = vmatpush.msrb.mxu2 %v5009_v31  ;;  %9253 = vst [vmem:[#allocation23_spill] sm:$0xff] %v5089_v56 }
  0x40   : > { %716 = vmatpush.msrb.mxu3 %v5013_v32  ;;  %657 = vmatpush.msrb.mxu0 %v5033_v37  ;;  %9254 = vst [vmem:[#allocation24_spill] sm:$0xff] %v5093_v57 }
  0x41   : > { %693 = vmatpush.msrb.mxu2 %v5017_v33  ;;  %677 = vmatpush.msrb.mxu1 %v5035_v38  ;;  %9255 = vst [vmem:[#allocation25_spill] sm:$0xff] %v5095_v58 }
  0x42   : > { %717 = vmatpush.msrb.mxu3 %v5041_v40  ;;  %658 = vmatpush.msrb.mxu0 %v5045_v41  ;;  %9256 = vst [vmem:[#allocation26_spill] sm:$0xff] %v5097_v59 }
  0x43   : > { %694 = vmatpush.msrb.mxu2 %v5023_v34  ;;  %678 = vmatpush.msrb.mxu1 %v5047_v42  ;;  %9257 = vst [vmem:[#allocation27_spill] sm:$0xff] %v5101_v60 }
  0x44   : > { %718 = vmatpush.msrb.mxu3 %v5053_v44  ;;  %659 = vmatpush.msrb.mxu0 %v5057_v45  ;;  %9258 = vst [vmem:[#allocation28_spill] sm:$0xff] %v5105_v0 }
  0x45   : > { %695 = vmatpush.msrb.mxu2 %v5026_v35  ;;  %679 = vmatpush.msrb.mxu1 %v5059_v46  ;;  %9259 = vst [vmem:[#allocation29_spill] sm:$0xff] %v5107_v4 }
  0x46   : > { %719 = vmatpush.msrb.mxu3 %v5065_v48  ;;  %660 = vmatpush.msrb.mxu0 %v5069_v49  ;;  %9260 = vst [vmem:[#allocation30_spill] sm:$0xff] %v5109_v8  ;;  %v5250_v49 = vld [vmem:[#allocation3 + $0x2d8] sm:$0xff]  ;;  %v5258_v48 = vld [vmem:[#allocation3 + $0x248] sm:$0xff] }
  0x47   : > { %696 = vmatpush.msrb.mxu2 %v5029_v36  ;;  %680 = vmatpush.msrb.mxu1 %v5071_v50  ;;  %9261 = vst [vmem:[#allocation31_spill] sm:$0xff] %v5113_v12  ;;  %v5248_v50 = vld [vmem:[#allocation3 + $0x2d0] sm:$0xff] }
  0x48   : > { %720 = vmatpush.msrb.mxu3 %v5077_v52  ;;  %661 = vmatpush.msrb.mxu0 %v5081_v53  ;;  %9305 = vst [vmem:[#allocation75_spill] sm:$0xff] %v5248_v50 }
  0x49   : > { %697 = vmatpush.msrb.mxu2 %v5037_v39  ;;  %681 = vmatpush.msrb.mxu1 %v5083_v54  ;;  %v5212_v54 = vld [vmem:[#allocation3 + $0x458] sm:$0xff]  ;;  %9306 = vst [vmem:[#allocation76_spill] sm:$0xff] %v5250_v49 }
  0x4a   : > { %721 = vmatpush.msrb.mxu3 %v5089_v56  ;;  %662 = vmatpush.msrb.mxu0 %v5093_v57  ;;  %v5115_v57 = vld [vmem:[#allocation3 + $0x7c0] sm:$0xff]  ;;  %v5131_v56 = vld [vmem:[#allocation3 + $0x750] sm:$0xff]  ;;  %9293 = vst [vmem:[#allocation63_spill] sm:$0xff] %v5212_v54 }
  0x4b   : > { %698 = vmatpush.msrb.mxu2 %v5049_v43  ;;  %682 = vmatpush.msrb.mxu1 %v5095_v58  ;;  %9262 = vst [vmem:[#allocation32_spill] sm:$0xff] %v5115_v57  ;;  %v5117_v58 = vld [vmem:[#allocation3 + $0x7c8] sm:$0xff] }
  0x4c   : > { %722 = vmatpush.msrb.mxu3 %v5101_v60  ;;  %663 = vmatpush.msrb.mxu0 %v5105_v0  ;;  %9263 = vst [vmem:[#allocation33_spill] sm:$0xff] %v5117_v58  ;;  %v5121_v60 = vld [vmem:[#allocation3 + $0x7d0] sm:$0xff]  ;;  %v5127_v0 = vld [vmem:[#allocation3 + $0x740] sm:$0xff] }
  0x4d   : > { %699 = vmatpush.msrb.mxu2 %v5061_v47  ;;  %683 = vmatpush.msrb.mxu1 %v5107_v4  ;;  %9264 = vst [vmem:[#allocation34_spill] sm:$0xff] %v5121_v60  ;;  %v5129_v4 = vld [vmem:[#allocation3 + $0x748] sm:$0xff] }
  0x4e   : > { %723 = vmatpush.msrb.mxu3 %v5113_v12  ;;  %728 = vmatpush.msra.mxu0 %v5115_v57  ;;  %9266 = vst [vmem:[#allocation36_spill] sm:$0xff] %v5127_v0  ;;  %v5139_v12 = vld [vmem:[#allocation3 + $0x6c0] sm:$0xff]  ;;  %v5141_v57 = vld [vmem:[#allocation3 + $0x6c8] sm:$0xff] }
  0x4f   : > { %700 = vmatpush.msrb.mxu2 %v5073_v51  ;;  %748 = vmatpush.msra.mxu1 %v5117_v58  ;;  %9267 = vst [vmem:[#allocation37_spill] sm:$0xff] %v5129_v4  ;;  %v5143_v58 = vld [vmem:[#allocation3 + $0x6d0] sm:$0xff]  ;;  %v5242_v51 = vld [vmem:[#allocation3 + $0x2c8] sm:$0xff] }
  0x50   : > { %9268 = vst [vmem:[#allocation38_spill] sm:$0xff] %v5131_v56  ;;  %729 = vmatpush.msra.mxu0 %v5127_v0  ;;  %v5153_v0 = vld [vmem:[#allocation3 + $0x648] sm:$0xff] }
  0x51   : > { %701 = vmatpush.msrb.mxu2 %v5085_v55  ;;  %749 = vmatpush.msra.mxu1 %v5129_v4  ;;  %9270 = vst [vmem:[#allocation40_spill] sm:$0xff] %v5139_v12  ;;  %v5147_v55 = vld [vmem:[#allocation3 + $0x6d8] sm:$0xff]  ;;  %v5155_v4 = vld [vmem:[#allocation3 + $0x650] sm:$0xff] }
  0x52   : > { %9271 = vst [vmem:[#allocation41_spill] sm:$0xff] %v5141_v57  ;;  %730 = vmatpush.msra.mxu0 %v5139_v12  ;;  %v5165_v12 = vld [vmem:[#allocation3 + $0x5c8] sm:$0xff] }
  0x53   : > { %702 = vmatpush.msrb.mxu2 %v5097_v59  ;;  %v5123_v59 = vld [vmem:[#allocation3 + $0x7d8] sm:$0xff]  ;;  %9272 = vst [vmem:[#allocation42_spill] sm:$0xff] %v5143_v58  ;;  %750 = vmatpush.msra.mxu1 %v5141_v57  ;;  %v5167_v57 = vld [vmem:[#allocation3 + $0x5d0] sm:$0xff] }
  0x54   : > { %9265 = vst [vmem:[#allocation35_spill] sm:$0xff] %v5123_v59  ;;  %788 = vmatpush.msra.mxu3 %v5123_v59  ;;  %v5151_v59 = vld [vmem:[#allocation3 + $0x640] sm:$0xff] }
  0x55   : > { %703 = vmatpush.msrb.mxu2 %v5109_v8  ;;  %v5135_v8 = vld [vmem:[#allocation3 + $0x758] sm:$0xff]  ;;  %9273 = vst [vmem:[#allocation43_spill] sm:$0xff] %v5147_v55  ;;  %731 = vmatpush.msra.mxu0 %v5151_v59 }
  0x56   : > { %9269 = vst [vmem:[#allocation39_spill] sm:$0xff] %v5135_v8  ;;  %789 = vmatpush.msra.mxu3 %v5135_v8  ;;  %751 = vmatpush.msra.mxu1 %v5153_v0  ;;  %v5163_v8 = vld [vmem:[#allocation3 + $0x5c0] sm:$0xff] }
  0x57   : > { %768 = vmatpush.msra.mxu2 %v5121_v60  ;;  %9274 = vst [vmem:[#allocation44_spill] sm:$0xff] %v5151_v59  ;;  %v5159_v60 = vld [vmem:[#allocation3 + $0x658] sm:$0xff]  ;;  %732 = vmatpush.msra.mxu0 %v5163_v8  ;;  %v5177_v59 = vld [vmem:[#allocation3 + $0x548] sm:$0xff] }
  0x58   : > { %9275 = vst [vmem:[#allocation45_spill] sm:$0xff] %v5153_v0  ;;  %790 = vmatpush.msra.mxu3 %v5147_v55  ;;  %752 = vmatpush.msra.mxu1 %v5165_v12  ;;  %v5175_v55 = vld [vmem:[#allocation3 + $0x540] sm:$0xff]  ;;  %v5179_v0 = vld [vmem:[#allocation3 + $0x550] sm:$0xff] }
  0x59   : > { %769 = vmatpush.msra.mxu2 %v5131_v56  ;;  %9276 = vst [vmem:[#allocation46_spill] sm:$0xff] %v5155_v4  ;;  %v5171_v56 = vld [vmem:[#allocation3 + $0x5d8] sm:$0xff]  ;;  %733 = vmatpush.msra.mxu0 %v5175_v55 }
  0x5a   : > { %9277 = vst [vmem:[#allocation47_spill] sm:$0xff] %v5159_v60  ;;  %791 = vmatpush.msra.mxu3 %v5159_v60  ;;  %753 = vmatpush.msra.mxu1 %v5177_v59  ;;  %v5187_v60 = vld [vmem:[#allocation3 + $0x4c0] sm:$0xff] }
  0x5b   : > { %770 = vmatpush.msra.mxu2 %v5143_v58  ;;  %9278 = vst [vmem:[#allocation48_spill] sm:$0xff] %v5163_v8  ;;  %v5183_v58 = vld [vmem:[#allocation3 + $0x558] sm:$0xff]  ;;  %v5189_v8 = vld [vmem:[#allocation3 + $0x4c8] sm:$0xff]  ;;  %734 = vmatpush.msra.mxu0 %v5187_v60 }
  0x5c   : > { %9279 = vst [vmem:[#allocation49_spill] sm:$0xff] %v5165_v12  ;;  %792 = vmatpush.msra.mxu3 %v5171_v56  ;;  %v5191_v12 = vld [vmem:[#allocation3 + $0x4d0] sm:$0xff]  ;;  %754 = vmatpush.msra.mxu1 %v5189_v8 }
  0x5d   : > { %9280 = vst [vmem:[#allocation50_spill] sm:$0xff] %v5167_v57  ;;  %771 = vmatpush.msra.mxu2 %v5155_v4  ;;  %v5196_v4 = vld [vmem:[%s8720_s2] sm:$0xf] }
  0x5e   : > { %9281 = vst [vmem:[#allocation51_spill] sm:$0xff] %v5171_v56  ;;  %793 = vmatpush.msra.mxu3 %v5183_v58  ;;  %v5200_v56 = vld [vmem:[#allocation3 + $0x4d8] sm:$0xff]  ;;  %v498_v53 = vperm.slane %v5196_v4, 1 }
  0x5f   : > { %9282 = vst [vmem:[#allocation52_spill] sm:$0xff] %v5175_v55  ;;  %772 = vmatpush.msra.mxu2 %v5167_v57  ;;  %v5206_v55 = vld [vmem:[#allocation3 + $0x448] sm:$0xff]  ;;  %v5208_v57 = vld [vmem:[#allocation3 + $0x450] sm:$0xff] }
  0x60   : > { %9283 = vst [vmem:[#allocation53_spill] sm:$0xff] %v5177_v59  ;;  %v5204_v59 = vld [vmem:[#allocation3 + $0x440] sm:$0xff]  ;;  %794 = vmatpush.msra.mxu3 %v5200_v56  ;;  %755 = vmatpush.msra.mxu1 %v5206_v55 }
  0x61   : > { %9284 = vst [vmem:[#allocation54_spill] sm:$0xff] %v5179_v0  ;;  %773 = vmatpush.msra.mxu2 %v5179_v0  ;;  %735 = vmatpush.msra.mxu0 %v5204_v59  ;;  %v5221_v0 = vld [vmem:[#allocation3 + $0x3d0] sm:$0xff] }
  0x62   : > { %9285 = vst [vmem:[#allocation55_spill] sm:$0xff] %v5183_v58  ;;  %v497_v58 = vperm.slane %v5196_v4, 0  ;;  %795 = vmatpush.msra.mxu3 %v5212_v54  ;;  %v5240_v54 = vld [vmem:[#allocation3 + $0x2c0] sm:$0xff] }
  0x63   : > { %9286 = vst [vmem:[#allocation56_spill] sm:$0xff] %v5187_v60  ;;  %774 = vmatpush.msra.mxu2 %v5191_v12  ;;  %v5217_v60 = vld [vmem:[#allocation3 + $0x3c0] sm:$0xff] }
  0x64   : > { %9287 = vst [vmem:[#allocation57_spill] sm:$0xff] %v5189_v8  ;;  %v5219_v8 = vld [vmem:[#allocation3 + $0x3c8] sm:$0xff]  ;;  %736 = vmatpush.msra.mxu0 %v5217_v60 }
  0x65   : > { %9288 = vst [vmem:[#allocation58_spill] sm:$0xff] %v5191_v12  ;;  %775 = vmatpush.msra.mxu2 %v5208_v57  ;;  %756 = vmatpush.msra.mxu1 %v5219_v8  ;;  %v5234_v12 = vld [vmem:[#allocation3 + $0x350] sm:$0xff] }
  0x66   : > { %9289 = vst [vmem:[#allocation59_spill] sm:$0xff] %v5200_v56  ;;  %v5226_v56 = vld [vmem:[#allocation3 + $0x3d8] sm:$0xff] }
  0x67   : > { %9290 = vst [vmem:[#allocation60_spill] sm:$0xff] %v5204_v59  ;;  %v5230_v59 = vld [vmem:[#allocation3 + $0x340] sm:$0xff]  ;;  %776 = vmatpush.msra.mxu2 %v5221_v0  ;;  %796 = vmatpush.msra.mxu3 %v5226_v56 }
  0x68   : > { %9291 = vst [vmem:[#allocation61_spill] sm:$0xff] %v5206_v55  ;;  %v5232_v55 = vld [vmem:[#allocation3 + $0x348] sm:$0xff]  ;;  %737 = vmatpush.msra.mxu0 %v5230_v59 }
  0x69   : > { %9292 = vst [vmem:[#allocation62_spill] sm:$0xff] %v5208_v57  ;;  %v5238_v57 = vld [vmem:[#allocation3 + $0x358] sm:$0xff]  ;;  %757 = vmatpush.msra.mxu1 %v5232_v55  ;;  %777 = vmatpush.msra.mxu2 %v5234_v12 }
  0x6a   : > { %9294 = vst [vmem:[#allocation64_spill] sm:$0xff] %v5217_v60  ;;  %797 = vmatpush.msra.mxu3 %v5238_v57  ;;  %738 = vmatpush.msra.mxu0 %v5240_v54 }
  0x6b   : > { %9295 = vst [vmem:[#allocation65_spill] sm:$0xff] %v5219_v8  ;;  %758 = vmatpush.msra.mxu1 %v5242_v51  ;;  %778 = vmatpush.msra.mxu2 %v5248_v50 }
  0x6c   : > { %9296 = vst [vmem:[#allocation66_spill] sm:$0xff] %v5221_v0  ;;  %798 = vmatpush.msra.mxu3 %v5250_v49  ;;  %v5285_v49 = vld [vmem:[#allocation3 + $0x148] sm:$0xff] }
  0x6d   : > { %9297 = vst [vmem:[#allocation67_spill] sm:$0xff] %v5226_v56  ;;  %v5256_v56 = vld [vmem:[#allocation3 + $0x240] sm:$0xff]  ;;  %759 = vmatpush.msra.mxu1 %v5258_v48 }
  0x6e   : > { %9298 = vst [vmem:[#allocation68_spill] sm:$0xff] %v5230_v59  ;;  %739 = vmatpush.msra.mxu0 %v5256_v56 }
  0x6f   : > { %9299 = vst [vmem:[#allocation69_spill] sm:$0xff] %v5232_v55  ;;  %v5265_v55 = vld [vmem:[#allocation3 + $0x258] sm:$0xff] }
  0x70   : > { %9300 = vst [vmem:[#allocation70_spill] sm:$0xff] %v5234_v12  ;;  %v5273_v12 = vld [vmem:[#allocation3 + $0x1c8] sm:$0xff]  ;;  %799 = vmatpush.msra.mxu3 %v5265_v55 }
  0x71   : > { %9301 = vst [vmem:[#allocation71_spill] sm:$0xff] %v5238_v57  ;;  %v5271_v57 = vld [vmem:[#allocation3 + $0x1c0] sm:$0xff]  ;;  %760 = vmatpush.msra.mxu1 %v5273_v12 }
  0x72   : > { %9302 = vst [vmem:[#allocation72_spill] sm:$0xff] %v5240_v54  ;;  %740 = vmatpush.msra.mxu0 %v5271_v57 }
  0x73   : > { %9303 = vst [vmem:[#allocation73_spill] sm:$0xff] %v5242_v51  ;;  %v5279_v51 = vld [vmem:[#allocation3 + $0x1d8] sm:$0xff]  ;;  %761 = vmatpush.msra.mxu1 %v5285_v49 }
  0x74   : > { %9308 = vst [vmem:[#allocation78_spill] sm:$0xff] %v5256_v56  ;;  %800 = vmatpush.msra.mxu3 %v5279_v51 }
  0x75   : > { %9309 = vst [vmem:[#allocation79_spill] sm:$0xff] %v5258_v48  ;;  %v5291_v48 = vld [vmem:[#allocation3 + $0x158] sm:$0xff] }
  0x76   : > { %9311 = vst [vmem:[#allocation81_spill] sm:$0xff] %v5265_v55  ;;  %v5299_v55 = vld [vmem:[#allocation3 + $0xc8] sm:$0xff]  ;;  %801 = vmatpush.msra.mxu3 %v5291_v48 }
  0x77   : > { %9312 = vst [vmem:[#allocation82_spill] sm:$0xff] %v5271_v57  ;;  %v5303_v57 = vld [vmem:[#allocation3 + $0xd0] sm:$0xff]  ;;  %762 = vmatpush.msra.mxu1 %v5299_v55 }
  0x78   : > { %9313 = vst [vmem:[#allocation83_spill] sm:$0xff] %v5273_v12  ;;  %v5305_v12 = vld [vmem:[#allocation3 + $0xd8] sm:$0xff] }
  0x79   : > { %9315 = vst [vmem:[#allocation85_spill] sm:$0xff] %v5279_v51  ;;  %802 = vmatpush.msra.mxu3 %v5305_v12 }
  0x7a   : > { %9317 = vst [vmem:[#allocation87_spill] sm:$0xff] %v5285_v49  ;;  %v5316_v49 = vld [vmem:[#allocation3 + $0x50] sm:$0xff] }
  0x7b   : > { %9319 = vst [vmem:[#allocation89_spill] sm:$0xff] %v5291_v48 }
  0x7c   : > { %9322 = vst [vmem:[#allocation92_spill] sm:$0xff] %v5299_v55 }
  0x7d   : > { %9323 = vst [vmem:[#allocation93_spill] sm:$0xff] %v5303_v57 }
  0x7e   : > { %9324 = vst [vmem:[#allocation94_spill] sm:$0xff] %v5305_v12 }
  0x7f   : > { %9327 = vst [vmem:[#allocation97_spill] sm:$0xff] %v5316_v49 }
  0xa9   : > { %v522_v52 = vpop.f32.mrf.mxu0 }
  0xaa   : > { %v5244_v60 = vadd.f32 %v522_v52, %v497_v58  ;;  %v542_v8 = vpop.f32.mrf.mxu1  ;;  %v5263_v58 = vld [vmem:[#allocation3 + $0x250] sm:$0xff] }
  0xab   : > { %v5252_v0 = vadd.f32 %v542_v8, %v498_v53  ;;  %9310 = vst [vmem:[#allocation80_spill] sm:$0xff] %v5263_v58  ;;  %v500_v8 = vperm.slane %v5196_v4, 3  ;;  %779 = vmatpush.msra.mxu2 %v5263_v58 }
  0xac   : > { %9304 = vst [vmem:[#allocation74_spill] sm:$0xff] %v5244_v60  ;;  %v3918_v52 = vmul.f32 -1.442695, %v5244_v60  ;;  %v5277_v60 = vld [vmem:[#allocation3 + $0x1d0] sm:$0xff] }
  0xad   : > { %9307 = vst [vmem:[#allocation77_spill] sm:$0xff] %v5252_v0  ;;  %v3919_v53 = vmul.f32 -1.442695, %v5252_v0  ;;  %v5283_v0 = vld [vmem:[#allocation3 + $0x140] sm:$0xff]  ;;  %780 = vmatpush.msra.mxu2 %v5277_v60 }
  0xae   : > { %3991 = vpow2.f32 %v3918_v52  ;;  %9314 = vst [vmem:[#allocation84_spill] sm:$0xff] %v5277_v60  ;;  %v5289_v52 = vld [vmem:[#allocation3 + $0x150] sm:$0xff]  ;;  %741 = vmatpush.msra.mxu0 %v5283_v0 }
  0xaf   : > { %3993 = vpow2.f32 %v3919_v53  ;;  %9316 = vst [vmem:[#allocation86_spill] sm:$0xff] %v5283_v0  ;;  %v5297_v53 = vld [vmem:[#allocation3 + $0xc0] sm:$0xff]  ;;  %781 = vmatpush.msra.mxu2 %v5289_v52  ;;  %v5318_v0 = vld [vmem:[#allocation3 + $0x58] sm:$0xff] }
  0xb0   : > { %v582_v50 = vpop.f32.mrf.mxu3  ;;  %9318 = vst [vmem:[#allocation88_spill] sm:$0xff] %v5289_v52  ;;  %742 = vmatpush.msra.mxu0 %v5297_v53  ;;  %803 = vmatpush.msra.mxu3 %v5318_v0 }
  0xb1   : > { %v5293_v56 = vadd.f32 %v582_v50, %v500_v8  ;;  %9321 = vst [vmem:[#allocation91_spill] sm:$0xff] %v5297_v53  ;;  %v5310_v50 = vld [vmem:[#allocation3 + $0x40] sm:$0xff]  ;;  %v5312_v8 = vld [vmem:[#allocation3 + $0x48] sm:$0xff]  ;;  %782 = vmatpush.msra.mxu2 %v5303_v57  ;;  %v499_v53 = vperm.slane %v5196_v4, 2 }
  0xb2   : > { %9325 = vst [vmem:[#allocation95_spill] sm:$0xff] %v5310_v50  ;;  %743 = vmatpush.msra.mxu0 %v5310_v50  ;;  %763 = vmatpush.msra.mxu1 %v5312_v8 }
  0xb3   : > { %9320 = vst [vmem:[#allocation90_spill] sm:$0xff] %v5293_v56  ;;  %v3920_v58 = vmul.f32 -1.442695, %v5293_v56  ;;  %783 = vmatpush.msra.mxu2 %v5316_v49 }
  0xb4   : > { %9326 = vst [vmem:[#allocation96_spill] sm:$0xff] %v5312_v8  ;;  %v3992_v51 = vpop.eup %3991 }
  0xb5   : > { %9328 = vst [vmem:[#allocation98_spill] sm:$0xff] %v5318_v0  ;;  %v3994_v60 = vpop.eup %3993  ;;  %v588_v54 = vadd.f32 1.0, %v3992_v51  ;;  %3995 = vpow2.f32 %v3920_v58 }
  0xb6   : > { %v607_v56 = vadd.f32 1.0, %v3994_v60 }
  0xb7   : > { %3997 = vrcp.f32 %v588_v54  ;;  %v600_v4 = vand.u32 2147483648, %v588_v54  ;;  %v598_v49 = vand.u32 2147483647, %v588_v54  ;;  %vm594_vm2 = vweird.f32 %v588_v54 }
  0xb8   : > { %3999 = vrcp.f32 %v607_v56  ;;  %v619_v0 = vand.u32 2147483648, %v607_v56  ;;  %v617_v46 = vand.u32 2147483647, %v607_v56  ;;  %vm613_vm4 = vweird.f32 %v607_v56 }
  0xb9   : > { %v562_v55 = vpop.f32.mrf.mxu2  ;;  %v601_v45 = vor.u32 1.1754944e-38, %v600_v4  ;;  %vm599_vm5 = vcmp.eq.f32.partialorder %v598_v49, 8.507059e+37 }
  0xba   : > { %v5327_v58 = vadd.f32 %v562_v55, %v499_v53  ;;  %vm618_vm7 = vcmp.eq.f32.partialorder %v617_v46, 8.507059e+37  ;;  %v5333_v46 = vld [vmem:[#allocation3 + $0x7e0] sm:$0xff] }
  0xbb   : > { %v3996_v51 = vpop.eup %3995 }
  0xbc   : > { %9329 = vst [vmem:[#allocation99_spill] sm:$0xff] %v5327_v58  ;;  %v627_v57 = vadd.f32 1.0, %v3996_v51 }
  0xbd   : > { %v3998_v48 = vpop.eup %3997 }
  0xbe   : > { %v4000_v12 = vpop.eup %3999  ;;  %v590_v60 = vmul.f32 %v3998_v48, %v588_v54  ;;  %4001 = vrcp.f32 %v627_v57  ;;  %vm595_vm0 = vweird.f32 %v3998_v48  ;;  %v639_v4 = vand.u32 2147483648, %v627_v57 }
  0xbf   : > { %v609_v50 = vmul.f32 %v4000_v12, %v607_v56  ;;  %4003 = vtanh.f32 %v5327_v58  ;;  %vm614_vm1 = vweird.f32 %v4000_v12  ;;  %vm596_vm3 = vmor %vm594_vm2, %vm595_vm0  ;;  %vm633_vm9 = vweird.f32 %v627_v57  ;;  %v5343_v56 = vld [vmem:[#allocation3 + $0x768] sm:$0xff] }
  0xc0   : > { %v591_v8 = vsub.f32 1.0, %v590_v60  ;;  %vm615_vm6 = vmor %vm613_vm4, %vm614_vm1  ;;  %v640_v49 = vor.u32 1.1754944e-38, %v639_v4  ;;  %v5385_v4 = vld [vmem:[#allocation3 + $0x5f0] sm:$0xff] }
  0xc1   : > { %v610_v52 = vsub.f32 1.0, %v609_v50  ;;  %v620_v50 = vor.u32 1.1754944e-38, %v619_v0  ;;  %v5349_v0 = vld [vmem:[#allocation3 + $0x778] sm:$0xff]  ;;  %9334 = vst [vmem:[#allocation104_spill] sm:$0xff] %v5385_v4 }
  0xc2   : > { %v592_v59 = vmul.f32 %v3998_v48, %v591_v8 }
  0xc3   : > { %v611_v47 = vmul.f32 %v4000_v12, %v610_v52 }
  0xc4   : > { %v4002_v55 = vpop.eup %4001  ;;  %v593_v53 = vadd.f32 %v3998_v48, %v592_v59 }
  0xc5   : > { %v4004_v51 = vpop.eup %4003  ;;  %v612_v44 = vadd.f32 %v4000_v12, %v611_v47  ;;  %v629_v43 = vmul.f32 %v4002_v55, %v627_v57  ;;  %vm634_vm8 = vweird.f32 %v4002_v55  ;;  %v637_v47 = vand.u32 2147483647, %v627_v57  ;;  %v5347_v57 = vld [vmem:[#allocation3 + $0x770] sm:$0xff] }
  0xc6   : > { %v597_v58 = vsel %vm596_vm3, %v3998_v48, %v593_v53  ;;  %vm635_vm10 = vmor %vm633_vm9, %vm634_vm8  ;;  %v5361_v53 = vld [vmem:[#allocation3 + $0x6f8] sm:$0xff] }
  0xc7   : > { %v602_v8 = vsel %vm599_vm5, %v601_v45, %v597_v58  ;;  %v616_v60 = vsel %vm615_vm6, %v4000_v12, %v612_v44  ;;  %v630_v42 = vsub.f32 1.0, %v629_v43  ;;  %vm638_vm11 = vcmp.eq.f32.partialorder %v637_v47, 8.507059e+37  ;;  %v5353_v12 = vld [vmem:[#allocation3 + $0x6e0] sm:$0xff]  ;;  %v5355_v58 = vld [vmem:[#allocation3 + $0x6e8] sm:$0xff]  ;;  %v5387_v47 = vld [vmem:[#allocation3 + $0x5f8] sm:$0xff] }
  0xc8   : > { %v644_v52 = vmul.f32 %v4004_v51, %v602_v8  ;;  %v621_v41 = vsel %vm618_vm7, %v620_v50, %v616_v60  ;;  %v5365_v51 = vld [vmem:[#allocation3 + $0x660] sm:$0xff]  ;;  %v5367_v50 = vld [vmem:[#allocation3 + $0x668] sm:$0xff]  ;;  %v5371_v8 = vld [vmem:[#allocation3 + $0x670] sm:$0xff]  ;;  %9335 = vst [vmem:[#allocation105_spill] sm:$0xff] %v5387_v47 }
  0xc9   : > { %v631_v40 = vmul.f32 %v4002_v55, %v630_v42  ;;  %v643_v39 = vmul.f32 0.0, %v621_v41  ;;  %v5335_v42 = vld [vmem:[#allocation3 + $0x7e8] sm:$0xff]  ;;  %v5341_v41 = vld [vmem:[#allocation3 + $0x760] sm:$0xff]  ;;  %9330 = vst [vmem:[#allocation100_spill] sm:$0xff] %v5371_v8  ;;  %v5373_v60 = vld [vmem:[#allocation3 + $0x678] sm:$0xff] }
  0xca   : > { %9331 = vst [vmem:[#allocation101_spill] sm:$0xff] %v5373_v60 }
  0xcb   : > { %v5330_v59 = vadd.f32 %v644_v52, %v643_v39  ;;  %v632_v54 = vadd.f32 %v4002_v55, %v631_v40  ;;  %v5337_v39 = vld [vmem:[#allocation3 + $0x7f0] sm:$0xff]  ;;  %v5339_v40 = vld [vmem:[#allocation3 + $0x7f8] sm:$0xff]  ;;  %v5381_v52 = vld [vmem:[#allocation3 + $0x5e0] sm:$0xff] }
  0xcc   : > { %9332 = vst [vmem:[#allocation102_spill] sm:$0xff] %v5381_v52 }
  0xcd   : > { %4005 = vtanh.f32 %v5330_v59  ;;  %v636_v48 = vsel %vm635_vm10, %v4002_v55, %v632_v54  ;;  %v5359_v55 = vld [vmem:[#allocation3 + $0x6f0] sm:$0xff]  ;;  %v5383_v54 = vld [vmem:[#allocation3 + $0x5e8] sm:$0xff] }
  0xce   : > { %v641_v45 = vsel %vm638_vm11, %v640_v49, %v636_v48  ;;  %9333 = vst [vmem:[#allocation103_spill] sm:$0xff] %v5383_v54  ;;  %v5389_v48 = vld [vmem:[#allocation3 + $0x560] sm:$0xff]  ;;  %v5391_v49 = vld [vmem:[#allocation3 + $0x568] sm:$0xff] }
  0xcf   : > { %9336 = vst [vmem:[#allocation106_spill] sm:$0xff] %v5389_v48 }
  0xd0   : > { %9337 = vst [vmem:[#allocation107_spill] sm:$0xff] %v5391_v49 }
  0xd3   : > { %v4006_v44 = vpop.eup %4005 }
  0xd4   : > { %v647_v43 = vmul.f32 %v4006_v44, %v641_v45  ;;  %v5395_v44 = vld [vmem:[#allocation3 + $0x570] sm:$0xff]  ;;  %v5397_v45 = vld [vmem:[#allocation3 + $0x578] sm:$0xff] }
  0xd5   : > { %9338 = vst [vmem:[#allocation108_spill] sm:$0xff] %v5395_v44 }
  0xd6   : > { %664 = vmatmul.f32.vlgmr.msrb.gmra.mxu0 %v647_v43  ;;  %684 = vmatmul.f32.vlgmr.msrb.gmra.mxu1 %v647_v43  ;;  %9339 = vst [vmem:[#allocation109_spill] sm:$0xff] %v5397_v45 }
  0xd7   : > { %704 = vmatmul.f32.vlgmr.msrb.gmra.mxu2 %v647_v43  ;;  %724 = vmatmul.f32.vlgmr.msrb.gmra.mxu3 %v647_v43 }
  0xd8   : > { %825 = vmatpush.msrb.mxu0 %v5333_v46  ;;  %845 = vmatpush.msrb.mxu1 %v5335_v42 }
  0xd9   : > { %865 = vmatpush.msrb.mxu2 %v5337_v39  ;;  %885 = vmatpush.msrb.mxu3 %v5339_v40 }
  0xda   : > { %826 = vmatpush.msrb.mxu0 %v5341_v41  ;;  %846 = vmatpush.msrb.mxu1 %v5343_v56 }
  0xdb   : > { %866 = vmatpush.msrb.mxu2 %v5347_v57  ;;  %886 = vmatpush.msrb.mxu3 %v5349_v0 }
  0xdc   : > { %827 = vmatpush.msrb.mxu0 %v5353_v12  ;;  %847 = vmatpush.msrb.mxu1 %v5355_v58 }
  0xdd   : > { %867 = vmatpush.msrb.mxu2 %v5359_v55  ;;  %887 = vmatpush.msrb.mxu3 %v5361_v53 }
  0xde   : > { %828 = vmatpush.msrb.mxu0 %v5365_v51  ;;  %848 = vmatpush.msrb.mxu1 %v5367_v50 }
  0xdf   : > { %868 = vmatpush.msrb.mxu2 %v5371_v8  ;;  %888 = vmatpush.msrb.mxu3 %v5373_v60  ;;  %v5401_v60 = vld [vmem:[#allocation3 + $0x4e0] sm:$0xff]  ;;  %v5403_v8 = vld [vmem:[#allocation3 + $0x4e8] sm:$0xff] }
  0xe0   : > { %744 = vmatmul.f32.vlgmr.msra.gmra.mxu0 %v647_v43  ;;  %764 = vmatmul.f32.vlgmr.msra.gmra.mxu1 %v647_v43  ;;  %9340 = vst [vmem:[#allocation110_spill] sm:$0xff] %v5401_v60 }
  0xe1   : > { %784 = vmatmul.f32.vlgmr.msra.gmra.mxu2 %v647_v43  ;;  %804 = vmatmul.f32.vlgmr.msra.gmra.mxu3 %v647_v43  ;;  %9341 = vst [vmem:[#allocation111_spill] sm:$0xff] %v5403_v8  ;;  %v5407_v43 = vld [vmem:[#allocation3 + $0x4f0] sm:$0xff] }
  0xe2   : > { %829 = vmatpush.msrb.mxu0 %v5381_v52  ;;  %849 = vmatpush.msrb.mxu1 %v5383_v54  ;;  %9342 = vst [vmem:[#allocation112_spill] sm:$0xff] %v5407_v43  ;;  %v5409_v52 = vld [vmem:[#allocation3 + $0x4f8] sm:$0xff]  ;;  %v5413_v54 = vld [vmem:[#allocation3 + $0x460] sm:$0xff] }
  0xe3   : > { %869 = vmatpush.msrb.mxu2 %v5385_v4  ;;  %889 = vmatpush.msrb.mxu3 %v5387_v47  ;;  %9343 = vst [vmem:[#allocation113_spill] sm:$0xff] %v5409_v52  ;;  %v5415_v4 = vld [vmem:[#allocation3 + $0x468] sm:$0xff]  ;;  %v5419_v47 = vld [vmem:[#allocation3 + $0x470] sm:$0xff] }
  0xe4   : > { %830 = vmatpush.msrb.mxu0 %v5389_v48  ;;  %850 = vmatpush.msrb.mxu1 %v5391_v49  ;;  %9344 = vst [vmem:[#allocation114_spill] sm:$0xff] %v5413_v54  ;;  %v5421_v48 = vld [vmem:[#allocation3 + $0x478] sm:$0xff]  ;;  %v5425_v49 = vld [vmem:[#allocation3 + $0x3e0] sm:$0xff] }
  0xe5   : > { %870 = vmatpush.msrb.mxu2 %v5395_v44  ;;  %890 = vmatpush.msrb.mxu3 %v5397_v45  ;;  %9345 = vst [vmem:[#allocation115_spill] sm:$0xff] %v5415_v4  ;;  %v5427_v44 = vld [vmem:[#allocation3 + $0x3e8] sm:$0xff]  ;;  %v5431_v45 = vld [vmem:[#allocation3 + $0x3f0] sm:$0xff] }
  0xe6   : > { %831 = vmatpush.msrb.mxu0 %v5401_v60  ;;  %851 = vmatpush.msrb.mxu1 %v5403_v8  ;;  %9346 = vst [vmem:[#allocation116_spill] sm:$0xff] %v5419_v47  ;;  %v5433_v60 = vld [vmem:[#allocation3 + $0x3f8] sm:$0xff]  ;;  %v5437_v8 = vld [vmem:[#allocation3 + $0x360] sm:$0xff] }
  0xe7   : > { %9347 = vst [vmem:[#allocation117_spill] sm:$0xff] %v5421_v48  ;;  %871 = vmatpush.msrb.mxu2 %v5407_v43  ;;  %891 = vmatpush.msrb.mxu3 %v5409_v52  ;;  %v5439_v43 = vld [vmem:[#allocation3 + $0x368] sm:$0xff]  ;;  %v5443_v52 = vld [vmem:[#allocation3 + $0x370] sm:$0xff] }
  0xe8   : > { %9348 = vst [vmem:[#allocation118_spill] sm:$0xff] %v5425_v49  ;;  %832 = vmatpush.msrb.mxu0 %v5413_v54  ;;  %852 = vmatpush.msrb.mxu1 %v5415_v4  ;;  %v5445_v54 = vld [vmem:[#allocation3 + $0x378] sm:$0xff]  ;;  %v5449_v4 = vld [vmem:[#allocation3 + $0x2e0] sm:$0xff] }
  0xe9   : > { %9349 = vst [vmem:[#allocation119_spill] sm:$0xff] %v5427_v44  ;;  %872 = vmatpush.msrb.mxu2 %v5419_v47  ;;  %892 = vmatpush.msrb.mxu3 %v5421_v48  ;;  %v5451_v47 = vld [vmem:[#allocation3 + $0x2e8] sm:$0xff]  ;;  %v5455_v48 = vld [vmem:[#allocation3 + $0x2f0] sm:$0xff] }
  0xea   : > { %9350 = vst [vmem:[#allocation120_spill] sm:$0xff] %v5431_v45  ;;  %833 = vmatpush.msrb.mxu0 %v5425_v49  ;;  %853 = vmatpush.msrb.mxu1 %v5427_v44  ;;  %v5457_v49 = vld [vmem:[#allocation3 + $0x2f8] sm:$0xff]  ;;  %v5461_v44 = vld [vmem:[#allocation3 + $0x260] sm:$0xff] }
  0xeb   : > { %9351 = vst [vmem:[#allocation121_spill] sm:$0xff] %v5433_v60  ;;  %873 = vmatpush.msrb.mxu2 %v5431_v45  ;;  %893 = vmatpush.msrb.mxu3 %v5433_v60  ;;  %v5463_v45 = vld [vmem:[#allocation3 + $0x268] sm:$0xff]  ;;  %v5467_v60 = vld [vmem:[#allocation3 + $0x270] sm:$0xff] }
  0xec   : > { %9352 = vst [vmem:[#allocation122_spill] sm:$0xff] %v5437_v8  ;;  %834 = vmatpush.msrb.mxu0 %v5437_v8  ;;  %854 = vmatpush.msrb.mxu1 %v5439_v43  ;;  %v5469_v8 = vld [vmem:[#allocation3 + $0x278] sm:$0xff] }
  0xed   : > { %9353 = vst [vmem:[#allocation123_spill] sm:$0xff] %v5439_v43  ;;  %874 = vmatpush.msrb.mxu2 %v5443_v52  ;;  %894 = vmatpush.msrb.mxu3 %v5445_v54  ;;  %v5473_v43 = vld [vmem:[#allocation3 + $0x1e0] sm:$0xff] }
  0xee   : > { %9354 = vst [vmem:[#allocation124_spill] sm:$0xff] %v5443_v52  ;;  %835 = vmatpush.msrb.mxu0 %v5449_v4  ;;  %855 = vmatpush.msrb.mxu1 %v5451_v47  ;;  %v5475_v52 = vld [vmem:[#allocation3 + $0x1e8] sm:$0xff] }
  0xef   : > { %9355 = vst [vmem:[#allocation125_spill] sm:$0xff] %v5445_v54  ;;  %875 = vmatpush.msrb.mxu2 %v5455_v48  ;;  %895 = vmatpush.msrb.mxu3 %v5457_v49  ;;  %v5479_v54 = vld [vmem:[#allocation3 + $0x1f0] sm:$0xff] }
  0xf0   : > { %9356 = vst [vmem:[#allocation126_spill] sm:$0xff] %v5449_v4  ;;  %836 = vmatpush.msrb.mxu0 %v5461_v44  ;;  %856 = vmatpush.msrb.mxu1 %v5463_v45  ;;  %v5481_v4 = vld [vmem:[#allocation3 + $0x1f8] sm:$0xff] }
  0xf1   : > { %9357 = vst [vmem:[#allocation127_spill] sm:$0xff] %v5451_v47  ;;  %876 = vmatpush.msrb.mxu2 %v5467_v60  ;;  %896 = vmatpush.msrb.mxu3 %v5469_v8  ;;  %v5485_v47 = vld [vmem:[#allocation3 + $0x160] sm:$0xff] }
  0xf2   : > { %9358 = vst [vmem:[#allocation128_spill] sm:$0xff] %v5455_v48  ;;  %v5487_v48 = vld [vmem:[#allocation3 + $0x168] sm:$0xff]  ;;  %837 = vmatpush.msrb.mxu0 %v5473_v43  ;;  %857 = vmatpush.msrb.mxu1 %v5475_v52 }
  0xf3   : > { %9359 = vst [vmem:[#allocation129_spill] sm:$0xff] %v5457_v49  ;;  %v5491_v49 = vld [vmem:[#allocation3 + $0x170] sm:$0xff]  ;;  %877 = vmatpush.msrb.mxu2 %v5479_v54  ;;  %897 = vmatpush.msrb.mxu3 %v5481_v4 }
  0xf4   : > { %9360 = vst [vmem:[#allocation130_spill] sm:$0xff] %v5461_v44  ;;  %v5493_v44 = vld [vmem:[#allocation3 + $0x178] sm:$0xff]  ;;  %838 = vmatpush.msrb.mxu0 %v5485_v47  ;;  %858 = vmatpush.msrb.mxu1 %v5487_v48 }
  0xf5   : > { %9361 = vst [vmem:[#allocation131_spill] sm:$0xff] %v5463_v45  ;;  %v5497_v45 = vld [vmem:[#allocation3 + $0xe0] sm:$0xff]  ;;  %878 = vmatpush.msrb.mxu2 %v5491_v49  ;;  %898 = vmatpush.msrb.mxu3 %v5493_v44 }
  0xf6   : > { %9362 = vst [vmem:[#allocation132_spill] sm:$0xff] %v5467_v60  ;;  %v5499_v60 = vld [vmem:[#allocation3 + $0xe8] sm:$0xff]  ;;  %839 = vmatpush.msrb.mxu0 %v5497_v45 }
  0xf7   : > { %9363 = vst [vmem:[#allocation133_spill] sm:$0xff] %v5469_v8  ;;  %v5503_v8 = vld [vmem:[#allocation3 + $0xf0] sm:$0xff]  ;;  %859 = vmatpush.msrb.mxu1 %v5499_v60 }
  0xf8   : > { %9364 = vst [vmem:[#allocation134_spill] sm:$0xff] %v5473_v43  ;;  %v5505_v43 = vld [vmem:[#allocation3 + $0xf8] sm:$0xff]  ;;  %879 = vmatpush.msrb.mxu2 %v5503_v8 }
  0xf9   : > { %9365 = vst [vmem:[#allocation135_spill] sm:$0xff] %v5475_v52  ;;  %v5509_v52 = vld [vmem:[#allocation3 + $0x60] sm:$0xff]  ;;  %899 = vmatpush.msrb.mxu3 %v5505_v43 }
  0xfa   : > { %9366 = vst [vmem:[#allocation136_spill] sm:$0xff] %v5479_v54  ;;  %v5511_v54 = vld [vmem:[#allocation3 + $0x68] sm:$0xff]  ;;  %840 = vmatpush.msrb.mxu0 %v5509_v52 }
  0xfb   : > { %9367 = vst [vmem:[#allocation137_spill] sm:$0xff] %v5481_v4  ;;  %v5515_v4 = vld [vmem:[#allocation3 + $0x70] sm:$0xff]  ;;  %860 = vmatpush.msrb.mxu1 %v5511_v54 }
  0xfc   : > { %9368 = vst [vmem:[#allocation138_spill] sm:$0xff] %v5485_v47  ;;  %v5517_v47 = vld [vmem:[#allocation3 + $0x78] sm:$0xff]  ;;  %880 = vmatpush.msrb.mxu2 %v5515_v4  ;;  %1036 = vmatpush.msra.mxu0 %v4925_v61  ;;  %v9370_v61 = vld [vmem:[#allocation6_spill] sm:$0xff] }
  0xfd   : > { %9369 = vst [vmem:[#allocation139_spill] sm:$0xff] %v5493_v44  ;;  %900 = vmatpush.msrb.mxu3 %v5517_v47  ;;  %v4868_v44 = vmov 0.0   ;;  %1056 = vmatpush.msra.mxu1 %v4927_v62  ;;  %v9371_v62 = vld [vmem:[#allocation7_spill] sm:$0xff] }
  0xfe   : > { %841 = vmatmul.f32.vlgmr.msrb.gmra.mxu0 %v4868_v44  ;;  %861 = vmatmul.f32.vlgmr.msrb.gmra.mxu1 %v4868_v44 }
  0xff   : > { %881 = vmatmul.f32.vlgmr.msrb.gmra.mxu2 %v4868_v44  ;;  %901 = vmatmul.f32.vlgmr.msrb.gmra.mxu3 %v4868_v44  ;;  %v9408_v44 = vld [vmem:[#allocation44_spill] sm:$0xff] }
 0x100   : > { %1076 = vmatpush.msra.mxu2 %v4963_v15  ;;  %1096 = vmatpush.msra.mxu3 %v4929_v63  ;;  %v9372_v63 = vld [vmem:[#allocation8_spill] sm:$0xff] }
 0x101   : > { %1037 = vmatpush.msra.mxu0 %v4931_v1  ;;  %1057 = vmatpush.msra.mxu1 %v4934_v2  ;;  %v9373_v1 = vld [vmem:[#allocation9_spill] sm:$0xff]  ;;  %v9374_v2 = vld [vmem:[#allocation10_spill] sm:$0xff]  ;;  %v9384_v15 = vld [vmem:[#allocation20_spill] sm:$0xff] }
 0x102   : > { %1077 = vmatpush.msra.mxu2 %v4974_v19  ;;  %1097 = vmatpush.msra.mxu3 %v4936_v3  ;;  %v9375_v3 = vld [vmem:[#allocation11_spill] sm:$0xff]  ;;  %v9388_v19 = vld [vmem:[#allocation24_spill] sm:$0xff] }
 0x103   : > { %1038 = vmatpush.msra.mxu0 %v4940_v5  ;;  %1058 = vmatpush.msra.mxu1 %v4943_v6  ;;  %v9376_v5 = vld [vmem:[#allocation12_spill] sm:$0xff]  ;;  %v9377_v6 = vld [vmem:[#allocation13_spill] sm:$0xff] }
 0x104   : > { %1078 = vmatpush.msra.mxu2 %v4985_v23  ;;  %1098 = vmatpush.msra.mxu3 %v4945_v7  ;;  %v9378_v7 = vld [vmem:[#allocation14_spill] sm:$0xff]  ;;  %v9392_v23 = vld [vmem:[#allocation28_spill] sm:$0xff] }
 0x105   : > { %1039 = vmatpush.msra.mxu0 %v4949_v9  ;;  %1059 = vmatpush.msra.mxu1 %v4952_v10  ;;  %v9379_v9 = vld [vmem:[#allocation15_spill] sm:$0xff]  ;;  %v9380_v10 = vld [vmem:[#allocation16_spill] sm:$0xff] }
 0x106   : > { %1079 = vmatpush.msra.mxu2 %v4997_v27  ;;  %1099 = vmatpush.msra.mxu3 %v4954_v11  ;;  %v9381_v11 = vld [vmem:[#allocation17_spill] sm:$0xff]  ;;  %v9396_v27 = vld [vmem:[#allocation32_spill] sm:$0xff] }
 0x107   : > { %1040 = vmatpush.msra.mxu0 %v4958_v13  ;;  %1060 = vmatpush.msra.mxu1 %v4961_v14  ;;  %v9382_v13 = vld [vmem:[#allocation18_spill] sm:$0xff]  ;;  %v9383_v14 = vld [vmem:[#allocation19_spill] sm:$0xff] }
 0x108   : > { %1080 = vmatpush.msra.mxu2 %v5009_v31  ;;  %1100 = vmatpush.msra.mxu3 %v4967_v16  ;;  %v9385_v16 = vld [vmem:[#allocation21_spill] sm:$0xff]  ;;  %v9400_v31 = vld [vmem:[#allocation36_spill] sm:$0xff] }
 0x109   : > { %1041 = vmatpush.msra.mxu0 %v4970_v17  ;;  %1061 = vmatpush.msra.mxu1 %v4972_v18  ;;  %v9386_v17 = vld [vmem:[#allocation22_spill] sm:$0xff]  ;;  %v9387_v18 = vld [vmem:[#allocation23_spill] sm:$0xff] }
 0x10a   : > { %1081 = vmatpush.msra.mxu2 %v5017_v33  ;;  %1101 = vmatpush.msra.mxu3 %v4977_v20  ;;  %v9389_v20 = vld [vmem:[#allocation25_spill] sm:$0xff]  ;;  %v9402_v33 = vld [vmem:[#allocation38_spill] sm:$0xff] }
 0x10b   : > { %1042 = vmatpush.msra.mxu0 %v4981_v21  ;;  %1062 = vmatpush.msra.mxu1 %v4983_v22  ;;  %v9390_v21 = vld [vmem:[#allocation26_spill] sm:$0xff]  ;;  %v9391_v22 = vld [vmem:[#allocation27_spill] sm:$0xff] }
 0x10c   : > { %1082 = vmatpush.msra.mxu2 %v5023_v34  ;;  %1102 = vmatpush.msra.mxu3 %v4989_v24  ;;  %v9393_v24 = vld [vmem:[#allocation29_spill] sm:$0xff]  ;;  %v9403_v34 = vld [vmem:[#allocation39_spill] sm:$0xff] }
 0x10d   : > { %1043 = vmatpush.msra.mxu0 %v4993_v25  ;;  %1063 = vmatpush.msra.mxu1 %v4995_v26  ;;  %v9394_v25 = vld [vmem:[#allocation30_spill] sm:$0xff]  ;;  %v9395_v26 = vld [vmem:[#allocation31_spill] sm:$0xff] }
 0x10e   : > { %1083 = vmatpush.msra.mxu2 %v5026_v35  ;;  %1103 = vmatpush.msra.mxu3 %v5001_v28  ;;  %v9397_v28 = vld [vmem:[#allocation33_spill] sm:$0xff]  ;;  %v9404_v35 = vld [vmem:[#allocation40_spill] sm:$0xff] }
 0x10f   : > { %1044 = vmatpush.msra.mxu0 %v5005_v29  ;;  %1064 = vmatpush.msra.mxu1 %v5007_v30  ;;  %v9398_v29 = vld [vmem:[#allocation34_spill] sm:$0xff]  ;;  %v9399_v30 = vld [vmem:[#allocation35_spill] sm:$0xff] }
 0x110   : > { %1084 = vmatpush.msra.mxu2 %v5029_v36  ;;  %1104 = vmatpush.msra.mxu3 %v5013_v32  ;;  %v9401_v32 = vld [vmem:[#allocation37_spill] sm:$0xff] }
 0x111   : > { %1045 = vmatpush.msra.mxu0 %v5033_v37  ;;  %1065 = vmatpush.msra.mxu1 %v5035_v38  ;;  %v9405_v36 = vld [vmem:[#allocation41_spill] sm:$0xff]  ;;  %v9406_v37 = vld [vmem:[#allocation42_spill] sm:$0xff]  ;;  %v9407_v38 = vld [vmem:[#allocation43_spill] sm:$0xff] }
 0x112   : > { %1085 = vmatpush.msra.mxu2 %v9370_v61  ;;  %1105 = vmatpush.msra.mxu3 %v9371_v62  ;;  %v9409_v61 = vld [vmem:[#allocation45_spill] sm:$0xff]  ;;  %v9410_v62 = vld [vmem:[#allocation46_spill] sm:$0xff] }
 0x113   : > { %1046 = vmatpush.msra.mxu0 %v9372_v63  ;;  %1066 = vmatpush.msra.mxu1 %v9373_v1  ;;  %v9411_v63 = vld [vmem:[#allocation47_spill] sm:$0xff]  ;;  %v9412_v1 = vld [vmem:[#allocation48_spill] sm:$0xff] }
 0x114   : > { %1086 = vmatpush.msra.mxu2 %v9374_v2  ;;  %1106 = vmatpush.msra.mxu3 %v9375_v3  ;;  %v9413_v2 = vld [vmem:[#allocation49_spill] sm:$0xff]  ;;  %v9414_v3 = vld [vmem:[#allocation50_spill] sm:$0xff] }
 0x115   : > { %1047 = vmatpush.msra.mxu0 %v9376_v5  ;;  %1067 = vmatpush.msra.mxu1 %v9377_v6  ;;  %v9415_v5 = vld [vmem:[#allocation51_spill] sm:$0xff]  ;;  %v9416_v6 = vld [vmem:[#allocation52_spill] sm:$0xff] }
 0x116   : > { %1087 = vmatpush.msra.mxu2 %v9378_v7  ;;  %1107 = vmatpush.msra.mxu3 %v9379_v9  ;;  %v9417_v7 = vld [vmem:[#allocation53_spill] sm:$0xff]  ;;  %v9418_v9 = vld [vmem:[#allocation54_spill] sm:$0xff] }
 0x117   : > { %1048 = vmatpush.msra.mxu0 %v9380_v10  ;;  %1068 = vmatpush.msra.mxu1 %v9381_v11  ;;  %v9419_v10 = vld [vmem:[#allocation55_spill] sm:$0xff]  ;;  %v9420_v11 = vld [vmem:[#allocation56_spill] sm:$0xff] }
 0x118   : > { %1088 = vmatpush.msra.mxu2 %v9382_v13  ;;  %1108 = vmatpush.msra.mxu3 %v9383_v14  ;;  %v9421_v13 = vld [vmem:[#allocation57_spill] sm:$0xff]  ;;  %v9422_v14 = vld [vmem:[#allocation58_spill] sm:$0xff] }
 0x119   : > { %1049 = vmatpush.msra.mxu0 %v9384_v15  ;;  %1069 = vmatpush.msra.mxu1 %v9385_v16  ;;  %v9423_v15 = vld [vmem:[#allocation59_spill] sm:$0xff]  ;;  %v9424_v16 = vld [vmem:[#allocation60_spill] sm:$0xff] }
 0x11a   : > { %1089 = vmatpush.msra.mxu2 %v9386_v17  ;;  %1109 = vmatpush.msra.mxu3 %v9387_v18  ;;  %v9425_v17 = vld [vmem:[#allocation61_spill] sm:$0xff]  ;;  %v9426_v18 = vld [vmem:[#allocation62_spill] sm:$0xff] }
 0x11b   : > { %1050 = vmatpush.msra.mxu0 %v9388_v19  ;;  %1070 = vmatpush.msra.mxu1 %v9389_v20  ;;  %v9427_v19 = vld [vmem:[#allocation63_spill] sm:$0xff]  ;;  %v9428_v20 = vld [vmem:[#allocation64_spill] sm:$0xff] }
 0x11c   : > { %1090 = vmatpush.msra.mxu2 %v9390_v21  ;;  %1110 = vmatpush.msra.mxu3 %v9391_v22  ;;  %v9429_v21 = vld [vmem:[#allocation65_spill] sm:$0xff]  ;;  %v9430_v22 = vld [vmem:[#allocation66_spill] sm:$0xff] }
 0x11d   : > { %1051 = vmatpush.msra.mxu0 %v9392_v23  ;;  %1071 = vmatpush.msra.mxu1 %v9393_v24  ;;  %v9431_v23 = vld [vmem:[#allocation67_spill] sm:$0xff]  ;;  %v9432_v24 = vld [vmem:[#allocation68_spill] sm:$0xff] }
 0x11e   : > { %1091 = vmatpush.msra.mxu2 %v9394_v25  ;;  %1111 = vmatpush.msra.mxu3 %v9395_v26  ;;  %v9433_v25 = vld [vmem:[#allocation69_spill] sm:$0xff]  ;;  %v9434_v26 = vld [vmem:[#allocation70_spill] sm:$0xff] }
 0x11f   : > { %1116 = vmatpush.msrb.mxu0 %v9396_v27  ;;  %1136 = vmatpush.msrb.mxu1 %v9397_v28  ;;  %v9435_v27 = vld [vmem:[#allocation71_spill] sm:$0xff]  ;;  %v9436_v28 = vld [vmem:[#allocation72_spill] sm:$0xff] }
 0x120   : > { %1156 = vmatpush.msrb.mxu2 %v9398_v29  ;;  %1176 = vmatpush.msrb.mxu3 %v9399_v30  ;;  %v9437_v29 = vld [vmem:[#allocation73_spill] sm:$0xff]  ;;  %v9438_v30 = vld [vmem:[#allocation75_spill] sm:$0xff] }
 0x121   : > { %1117 = vmatpush.msrb.mxu0 %v9400_v31  ;;  %1137 = vmatpush.msrb.mxu1 %v9401_v32  ;;  %v9439_v31 = vld [vmem:[#allocation76_spill] sm:$0xff]  ;;  %v9440_v32 = vld [vmem:[#allocation78_spill] sm:$0xff] }
 0x122   : > { %1157 = vmatpush.msrb.mxu2 %v9402_v33  ;;  %1177 = vmatpush.msrb.mxu3 %v9403_v34  ;;  %v9441_v33 = vld [vmem:[#allocation79_spill] sm:$0xff]  ;;  %v9442_v34 = vld [vmem:[#allocation80_spill] sm:$0xff] }
 0x123   : > { %1118 = vmatpush.msrb.mxu0 %v9404_v35  ;;  %1138 = vmatpush.msrb.mxu1 %v9405_v36  ;;  %v9443_v35 = vld [vmem:[#allocation81_spill] sm:$0xff]  ;;  %v9444_v36 = vld [vmem:[#allocation82_spill] sm:$0xff] }
 0x124   : > { %1158 = vmatpush.msrb.mxu2 %v9406_v37  ;;  %1178 = vmatpush.msrb.mxu3 %v9407_v38  ;;  %v9445_v37 = vld [vmem:[#allocation83_spill] sm:$0xff]  ;;  %v9446_v38 = vld [vmem:[#allocation84_spill] sm:$0xff] }
 0x125   : > { %1119 = vmatpush.msrb.mxu0 %v9408_v44  ;;  %1139 = vmatpush.msrb.mxu1 %v9409_v61  ;;  %v9447_v44 = vld [vmem:[#allocation85_spill] sm:$0xff]  ;;  %v9448_v61 = vld [vmem:[#allocation86_spill] sm:$0xff] }
 0x126   : > { %1159 = vmatpush.msrb.mxu2 %v9410_v62  ;;  %1179 = vmatpush.msrb.mxu3 %v9411_v63  ;;  %v9449_v62 = vld [vmem:[#allocation87_spill] sm:$0xff]  ;;  %v9450_v63 = vld [vmem:[#allocation88_spill] sm:$0xff] }
 0x127   : > { %1120 = vmatpush.msrb.mxu0 %v9412_v1  ;;  %1140 = vmatpush.msrb.mxu1 %v9413_v2  ;;  %v9451_v1 = vld [vmem:[#allocation89_spill] sm:$0xff]  ;;  %v9452_v2 = vld [vmem:[#allocation91_spill] sm:$0xff] }
 0x128   : > { %1160 = vmatpush.msrb.mxu2 %v9414_v3  ;;  %1180 = vmatpush.msrb.mxu3 %v9415_v5  ;;  %v9453_v3 = vld [vmem:[#allocation92_spill] sm:$0xff]  ;;  %v9454_v5 = vld [vmem:[#allocation93_spill] sm:$0xff] }
 0x129   : > { %1121 = vmatpush.msrb.mxu0 %v9416_v6  ;;  %1141 = vmatpush.msrb.mxu1 %v9417_v7  ;;  %v9455_v6 = vld [vmem:[#allocation94_spill] sm:$0xff]  ;;  %v9456_v7 = vld [vmem:[#allocation95_spill] sm:$0xff] }
 0x12a   : > { %1161 = vmatpush.msrb.mxu2 %v9418_v9  ;;  %1181 = vmatpush.msrb.mxu3 %v9419_v10  ;;  %v9457_v9 = vld [vmem:[#allocation96_spill] sm:$0xff]  ;;  %v9458_v10 = vld [vmem:[#allocation97_spill] sm:$0xff] }
 0x12b   : > { %1122 = vmatpush.msrb.mxu0 %v9420_v11  ;;  %1142 = vmatpush.msrb.mxu1 %v9421_v13  ;;  %v9459_v11 = vld [vmem:[#allocation98_spill] sm:$0xff] }
 0x12c   : > { %1162 = vmatpush.msrb.mxu2 %v9422_v14  ;;  %1182 = vmatpush.msrb.mxu3 %v9423_v15  ;;  %v9460_v15 = vld [vmem:[#allocation74_spill] sm:$0xff] }
 0x12d   : > { %1123 = vmatpush.msrb.mxu0 %v9424_v16  ;;  %1143 = vmatpush.msrb.mxu1 %v9425_v17  ;;  %v9461_v17 = vld [vmem:[#allocation77_spill] sm:$0xff] }
 0x12e   : > { %1163 = vmatpush.msrb.mxu2 %v9426_v18  ;;  %1183 = vmatpush.msrb.mxu3 %v9427_v19 }
 0x12f   : > { %1124 = vmatpush.msrb.mxu0 %v9428_v20  ;;  %1144 = vmatpush.msrb.mxu1 %v9429_v21 }
 0x130   : > { %1164 = vmatpush.msrb.mxu2 %v9430_v22  ;;  %1184 = vmatpush.msrb.mxu3 %v9431_v23  ;;  %v9462_v22 = vld [vmem:[#allocation90_spill] sm:$0xff] }
 0x131   : > { %1125 = vmatpush.msrb.mxu0 %v9432_v24  ;;  %1145 = vmatpush.msrb.mxu1 %v9433_v25 }
 0x132   : > { %1165 = vmatpush.msrb.mxu2 %v9434_v26  ;;  %1185 = vmatpush.msrb.mxu3 %v9435_v27 }
 0x133   : > { %1126 = vmatpush.msrb.mxu0 %v9436_v28  ;;  %1146 = vmatpush.msrb.mxu1 %v9437_v29 }
 0x134   : > { %1166 = vmatpush.msrb.mxu2 %v9438_v30  ;;  %1186 = vmatpush.msrb.mxu3 %v9439_v31 }
 0x135   : > { %1127 = vmatpush.msrb.mxu0 %v9440_v32  ;;  %1147 = vmatpush.msrb.mxu1 %v9441_v33  ;;  %v9463_v33 = vld [vmem:[#allocation99_spill] sm:$0xff] }
 0x136   : > { %1167 = vmatpush.msrb.mxu2 %v9442_v34  ;;  %1187 = vmatpush.msrb.mxu3 %v9443_v35 }
 0x137   : > { %1128 = vmatpush.msrb.mxu0 %v9444_v36  ;;  %1148 = vmatpush.msrb.mxu1 %v9445_v37 }
 0x138   : > { %1168 = vmatpush.msrb.mxu2 %v9446_v38  ;;  %1188 = vmatpush.msrb.mxu3 %v9447_v44 }
 0x139   : > { %1129 = vmatpush.msrb.mxu0 %v9448_v61  ;;  %1149 = vmatpush.msrb.mxu1 %v9449_v62 }
 0x13a   : > { %1169 = vmatpush.msrb.mxu2 %v9450_v63  ;;  %1189 = vmatpush.msrb.mxu3 %v9451_v1 }
 0x13b   : > { %1130 = vmatpush.msrb.mxu0 %v9452_v2  ;;  %1150 = vmatpush.msrb.mxu1 %v9453_v3 }
 0x13c   : > { %1170 = vmatpush.msrb.mxu2 %v9454_v5  ;;  %1190 = vmatpush.msrb.mxu3 %v9455_v6 }
 0x13d   : > { %1131 = vmatpush.msrb.mxu0 %v9456_v7  ;;  %1151 = vmatpush.msrb.mxu1 %v9457_v9 }
 0x13e   : > { %1171 = vmatpush.msrb.mxu2 %v9458_v10  ;;  %1191 = vmatpush.msrb.mxu3 %v9459_v11  ;;  %v5664_v11 = vld [vmem:[%s8720_s2 + $0x4] sm:$0xf] }
 0x153   : > { %v665_v13 = vpop.f32.mrf.mxu0  ;;  %v685_v14 = vpop.f32.mrf.mxu1 }
 0x154   : > { %v808_v16 = vadd.f32 %v665_v13, %v9460_v15  ;;  %v809_v18 = vadd.f32 %v685_v14, %v9461_v17 }
 0x156   : > { %v3924_v19 = vmul.f32 -1.442695, %v808_v16  ;;  %v3925_v20 = vmul.f32 -1.442695, %v809_v18 }
 0x158   : > { %4007 = vpow2.f32 %v3924_v19 }
 0x159   : > { %4009 = vpow2.f32 %v3925_v20 }
 0x15a   : > { %v725_v21 = vpop.f32.mrf.mxu3  ;;  %v705_v29 = vpop.f32.mrf.mxu2 }
 0x15b   : > { %v811_v23 = vadd.f32 %v725_v21, %v9462_v22  ;;  %v810_v34 = vadd.f32 %v705_v29, %v9463_v33 }
 0x15d   : > { %v3926_v24 = vmul.f32 -1.442695, %v811_v23  ;;  %v745_v13 = vpop.f32.mrf.mxu0  ;;  %v765_v14 = vpop.f32.mrf.mxu1 }
 0x15e   : > { %v4008_v25 = vpop.eup %4007 }
 0x15f   : > { %v4010_v26 = vpop.eup %4009  ;;  %v976_v27 = vadd.f32 1.0, %v4008_v25  ;;  %4011 = vpow2.f32 %v3926_v24 }
 0x160   : > { %v995_v28 = vadd.f32 1.0, %v4010_v26  ;;  %v5667_v26 = vperm.slane %v5664_v11, 0 }
 0x161   : > { %4013 = vrcp.f32 %v976_v27  ;;  %v988_v61 = vand.u32 2147483648, %v976_v27  ;;  %v986_v1 = vand.u32 2147483647, %v976_v27  ;;  %vm982_vm14 = vweird.f32 %v976_v27 }
 0x162   : > { %4015 = vrcp.f32 %v995_v28  ;;  %v1007_v62 = vand.u32 2147483648, %v995_v28  ;;  %v1005_v3 = vand.u32 2147483647, %v995_v28  ;;  %vm1001_vm15 = vweird.f32 %v995_v28  ;;  %9464 = vst [vmem:[#allocation6_spill] sm:$0xff] %v5667_v26 }
 0x163   : > { %v989_v7 = vor.u32 1.1754944e-38, %v988_v61  ;;  %vm987_vm2 = vcmp.eq.f32.partialorder %v986_v1, 8.507059e+37 }
 0x164   : > { %v1008_v16 = vor.u32 1.1754944e-38, %v1007_v62  ;;  %vm1006_vm3 = vcmp.eq.f32.partialorder %v1005_v3, 8.507059e+37 }
 0x165   : > { %v4012_v30 = vpop.eup %4011 }
 0x166   : > { %v5656_v31 = vadd.f32 1.0, %v4012_v30 }
 0x167   : > { %v4014_v32 = vpop.eup %4013 }
 0x168   : > { %v4016_v35 = vpop.eup %4015  ;;  %v978_v36 = vmul.f32 %v4014_v32, %v976_v27  ;;  %4017 = vrcp.f32 %v5656_v31  ;;  %vm983_vm12 = vweird.f32 %v4014_v32  ;;  %v5670_v27 = vperm.slane %v5664_v11, 1 }
 0x169   : > { %v997_v37 = vmul.f32 %v4016_v35, %v995_v28  ;;  %4019 = vtanh.f32 %v810_v34  ;;  %vm1002_vm13 = vweird.f32 %v4016_v35  ;;  %vm984_vm0 = vmor %vm982_vm14, %vm983_vm12  ;;  %v821_v34 = vadd.f32 %v5667_v26, %v745_v13 }
 0x16a   : > { %v979_v38 = vsub.f32 1.0, %v978_v36  ;;  %vm1003_vm1 = vmor %vm1001_vm15, %vm1002_vm13  ;;  %9465 = vst [vmem:[#allocation7_spill] sm:$0xff] %v5670_v27  ;;  %v805_v36 = vpop.f32.mrf.mxu3  ;;  %vm1021_vm5 = vweird.f32 %v5656_v31 }
 0x16b   : > { %v998_v44 = vsub.f32 1.0, %v997_v37  ;;  %v1027_v37 = vand.u32 2147483648, %v5656_v31 }
 0x16c   : > { %v980_v63 = vmul.f32 %v4014_v32, %v979_v38 }
 0x16d   : > { %v999_v2 = vmul.f32 %v4016_v35, %v998_v44 }
 0x16e   : > { %v4018_v5 = vpop.eup %4017  ;;  %v981_v6 = vadd.f32 %v4014_v32, %v980_v63  ;;  %v5682_v63 = vperm.slane %v5664_v11, 3 }
 0x16f   : > { %v1000_v9 = vadd.f32 %v4016_v35, %v999_v2  ;;  %v1017_v10 = vmul.f32 %v4018_v5, %v5656_v31  ;;  %v4020_v19 = vpop.eup %4019  ;;  %vm1022_vm4 = vweird.f32 %v4018_v5 }
 0x170   : > { %v985_v18 = vsel %vm984_vm0, %v4014_v32, %v981_v6  ;;  %vm1023_vm6 = vmor %vm1021_vm5, %vm1022_vm4  ;;  %9466 = vst [vmem:[#allocation8_spill] sm:$0xff] %v5682_v63  ;;  %v1028_v6 = vor.u32 1.1754944e-38, %v1027_v37 }
 0x171   : > { %v990_v20 = vsel %vm987_vm2, %v989_v7, %v985_v18  ;;  %v1004_v21 = vsel %vm1003_vm1, %v4016_v35, %v1000_v9  ;;  %v1018_v23 = vsub.f32 1.0, %v1017_v10  ;;  %v822_v35 = vadd.f32 %v5670_v27, %v765_v14 }
 0x172   : > { %v1009_v24 = vsel %vm1006_vm3, %v1008_v16, %v1004_v21  ;;  %v1032_v25 = vmul.f32 %v4020_v19, %v990_v20  ;;  %v824_v10 = vadd.f32 %v5682_v63, %v805_v36  ;;  %v785_v16 = vpop.f32.mrf.mxu2 }
 0x173   : > { %v1031_v28 = vmul.f32 %v1009_v24, %v5330_v59  ;;  %v1019_v29 = vmul.f32 %v4018_v5, %v1018_v23  ;;  %v1025_v59 = vand.u32 2147483647, %v5656_v31  ;;  %v5696_v23 = vperm.slane %v5664_v11, 2  ;;  %v9473_v11 = vld [vmem:[#allocation105_spill] sm:$0xff] }
 0x175   : > { %v5673_v30 = vadd.f32 %v1032_v25, %v1031_v28  ;;  %v1020_v32 = vadd.f32 %v4018_v5, %v1019_v29  ;;  %vm1026_vm7 = vcmp.eq.f32.partialorder %v1025_v59, 8.507059e+37  ;;  %9467 = vst [vmem:[#allocation9_spill] sm:$0xff] %v5696_v23  ;;  %v9474_v25 = vld [vmem:[#allocation106_spill] sm:$0xff]  ;;  %v9475_v28 = vld [vmem:[#allocation107_spill] sm:$0xff] }
 0x176   : > { %v9479_v59 = vld [vmem:[#allocation111_spill] sm:$0xff] }
 0x177   : > { %4021 = vtanh.f32 %v5673_v30  ;;  %v1024_v1 = vsel %vm1023_vm6, %v4018_v5, %v1020_v32 }
 0x178   : > { %v1029_v9 = vsel %vm1026_vm7, %v1028_v6, %v1024_v1  ;;  %v9480_v1 = vld [vmem:[#allocation112_spill] sm:$0xff] }
 0x17b   : > { %v842_v38 = vpop.f32.mrf.mxu0  ;;  %v862_v44 = vpop.f32.mrf.mxu1 }
 0x17c   : > { %v905_v61 = vadd.f32 %v842_v38, %v821_v34  ;;  %v906_v62 = vadd.f32 %v862_v44, %v822_v35  ;;  %v9476_v34 = vld [vmem:[#allocation108_spill] sm:$0xff]  ;;  %v9477_v35 = vld [vmem:[#allocation109_spill] sm:$0xff]  ;;  %v9478_v44 = vld [vmem:[#allocation110_spill] sm:$0xff] }
 0x17d   : > { %v4022_v7 = vpop.eup %4021 }
 0x17e   : > { %v3921_v2 = vmul.f32 -1.442695, %v905_v61  ;;  %v3922_v3 = vmul.f32 -1.442695, %v906_v62  ;;  %v1035_v13 = vmul.f32 %v4022_v7, %v1029_v9  ;;  %v9482_v7 = vld [vmem:[#allocation114_spill] sm:$0xff]  ;;  %v9483_v9 = vld [vmem:[#allocation115_spill] sm:$0xff] }
 0x180   : > { %4023 = vpow2.f32 %v3921_v2  ;;  %1052 = vmatmul.f32.vlgmr.msra.gmra.mxu0 %v1035_v13  ;;  %1072 = vmatmul.f32.vlgmr.msra.gmra.mxu1 %v1035_v13  ;;  %v9481_v2 = vld [vmem:[#allocation113_spill] sm:$0xff] }
 0x181   : > { %4025 = vpow2.f32 %v3922_v3  ;;  %1092 = vmatmul.f32.vlgmr.msra.gmra.mxu2 %v1035_v13  ;;  %1112 = vmatmul.f32.vlgmr.msra.gmra.mxu3 %v1035_v13 }
 0x182   : > { %v902_v14 = vpop.f32.mrf.mxu3  ;;  %1204 = vmatpush.msra.mxu0 %v5333_v46  ;;  %1224 = vmatpush.msra.mxu1 %v5335_v42  ;;  %v882_v46 = vpop.f32.mrf.mxu2 }
 0x183   : > { %v908_v31 = vadd.f32 %v902_v14, %v824_v10  ;;  %1244 = vmatpush.msra.mxu2 %v5337_v39  ;;  %1264 = vmatpush.msra.mxu3 %v5339_v40  ;;  %v823_v39 = vadd.f32 %v5696_v23, %v785_v16  ;;  %v9468_v40 = vld [vmem:[#allocation100_spill] sm:$0xff]  ;;  %v9485_v16 = vld [vmem:[#allocation117_spill] sm:$0xff] }
 0x184   : > { %1205 = vmatpush.msra.mxu0 %v5341_v41  ;;  %1225 = vmatpush.msra.mxu1 %v5343_v56  ;;  %v9469_v41 = vld [vmem:[#allocation101_spill] sm:$0xff] }
 0x185   : > { %v3923_v18 = vmul.f32 -1.442695, %v908_v31  ;;  %1245 = vmatpush.msra.mxu2 %v5347_v57  ;;  %1265 = vmatpush.msra.mxu3 %v5349_v0  ;;  %v907_v0 = vadd.f32 %v882_v46, %v823_v39  ;;  %v9484_v31 = vld [vmem:[#allocation116_spill] sm:$0xff] }
 0x186   : > { %v4024_v5 = vpop.eup %4023  ;;  %1206 = vmatpush.msra.mxu0 %v5353_v12  ;;  %1226 = vmatpush.msra.mxu1 %v5355_v58 }
 0x187   : > { %v4026_v19 = vpop.eup %4025  ;;  %v5687_v20 = vadd.f32 1.0, %v4024_v5  ;;  %4027 = vpow2.f32 %v3923_v18  ;;  %1246 = vmatpush.msra.mxu2 %v5359_v55  ;;  %1266 = vmatpush.msra.mxu3 %v5361_v53  ;;  %v9470_v55 = vld [vmem:[#allocation102_spill] sm:$0xff]  ;;  %v9471_v53 = vld [vmem:[#allocation103_spill] sm:$0xff] }
 0x188   : > { %v5691_v21 = vadd.f32 1.0, %v4026_v19  ;;  %1207 = vmatpush.msra.mxu0 %v5365_v51  ;;  %1227 = vmatpush.msra.mxu1 %v5367_v50  ;;  %v9472_v50 = vld [vmem:[#allocation104_spill] sm:$0xff]  ;;  %v9486_v19 = vld [vmem:[#allocation118_spill] sm:$0xff] }
 0x189   : > { %4029 = vrcp.f32 %v5687_v20  ;;  %1247 = vmatpush.msra.mxu2 %v9468_v40  ;;  %1267 = vmatpush.msra.mxu3 %v9469_v41  ;;  %v924_v32 = vand.u32 2147483648, %v5687_v20  ;;  %v922_v38 = vand.u32 2147483647, %v5687_v20  ;;  %vm918_vm10 = vweird.f32 %v5687_v20  ;;  %v9488_v40 = vld [vmem:[#allocation120_spill] sm:$0xff]  ;;  %v9489_v41 = vld [vmem:[#allocation121_spill] sm:$0xff] }
 0x18a   : > { %4031 = vrcp.f32 %v5691_v21  ;;  %1132 = vmatmul.f32.vlgmr.msrb.gmra.mxu0 %v1035_v13  ;;  %1152 = vmatmul.f32.vlgmr.msrb.gmra.mxu1 %v1035_v13  ;;  %v943_v36 = vand.u32 2147483648, %v5691_v21  ;;  %v941_v62 = vand.u32 2147483647, %v5691_v21  ;;  %vm937_vm11 = vweird.f32 %v5691_v21 }
 0x18b   : > { %1172 = vmatmul.f32.vlgmr.msrb.gmra.mxu2 %v1035_v13  ;;  %1192 = vmatmul.f32.vlgmr.msrb.gmra.mxu3 %v1035_v13  ;;  %v925_v10 = vor.u32 1.1754944e-38, %v924_v32  ;;  %vm923_vm13 = vcmp.eq.f32.partialorder %v922_v38, 8.507059e+37  ;;  %v9498_v32 = vld [vmem:[#allocation130_spill] sm:$0xff]  ;;  %v9501_v38 = vld [vmem:[#allocation133_spill] sm:$0xff] }
 0x18c   : > { %1208 = vmatpush.msra.mxu0 %v9470_v55  ;;  %1228 = vmatpush.msra.mxu1 %v9471_v53  ;;  %v944_v18 = vor.u32 1.1754944e-38, %v943_v36  ;;  %vm942_vm15 = vcmp.eq.f32.partialorder %v941_v62, 8.507059e+37  ;;  %v9490_v55 = vld [vmem:[#allocation122_spill] sm:$0xff] }
 0x18d   : > { %v4028_v42 = vpop.eup %4027  ;;  %1248 = vmatpush.msra.mxu2 %v9472_v50  ;;  %1268 = vmatpush.msra.mxu3 %v9473_v11  ;;  %v9492_v50 = vld [vmem:[#allocation124_spill] sm:$0xff]  ;;  %v9493_v11 = vld [vmem:[#allocation125_spill] sm:$0xff]  ;;  %v5930_v62 = vld [vmem:[#allocation3 + $0x220] sm:$0xff] }
 0x18e   : > { %v5711_v56 = vadd.f32 1.0, %v4028_v42  ;;  %1209 = vmatpush.msra.mxu0 %v9474_v25  ;;  %1229 = vmatpush.msra.mxu1 %v9475_v28  ;;  %v9496_v28 = vld [vmem:[#allocation128_spill] sm:$0xff]  ;;  %9523 = vst [vmem:[#allocation23_spill] sm:$0xff] %v5930_v62 }
 0x18f   : > { %v4030_v57 = vpop.eup %4029  ;;  %1249 = vmatpush.msra.mxu2 %v9476_v34  ;;  %1269 = vmatpush.msra.mxu3 %v9477_v35  ;;  %v9499_v34 = vld [vmem:[#allocation131_spill] sm:$0xff] }
 0x190   : > { %v4032_v12 = vpop.eup %4031  ;;  %v914_v58 = vmul.f32 %v4030_v57, %v5687_v20  ;;  %4033 = vrcp.f32 %v5711_v56  ;;  %vm919_vm8 = vweird.f32 %v4030_v57  ;;  %1210 = vmatpush.msra.mxu0 %v9478_v44  ;;  %1230 = vmatpush.msra.mxu1 %v9479_v59  ;;  %v9487_v20 = vld [vmem:[#allocation119_spill] sm:$0xff]  ;;  %v963_v36 = vand.u32 2147483648, %v5711_v56  ;;  %v9502_v44 = vld [vmem:[#allocation134_spill] sm:$0xff] }
 0x191   : > { %v933_v51 = vmul.f32 %v4032_v12, %v5691_v21  ;;  %4035 = vtanh.f32 %v907_v0  ;;  %vm938_vm9 = vweird.f32 %v4032_v12  ;;  %1250 = vmatpush.msra.mxu2 %v9480_v1  ;;  %1270 = vmatpush.msra.mxu3 %v9481_v2  ;;  %vm920_vm12 = vmor %vm918_vm10, %vm919_vm8  ;;  %vm957_vm1 = vweird.f32 %v5711_v56  ;;  %v9503_v59 = vld [vmem:[#allocation135_spill] sm:$0xff]  ;;  %v9506_v1 = vld [vmem:[#allocation136_spill] sm:$0xff] }
 0x192   : > { %v915_v24 = vsub.f32 1.0, %v914_v58  ;;  %1211 = vmatpush.msra.mxu0 %v9482_v7  ;;  %1231 = vmatpush.msra.mxu1 %v9483_v9  ;;  %vm939_vm14 = vmor %vm937_vm11, %vm938_vm9  ;;  %v9507_v2 = vld [vmem:[#allocation137_spill] sm:$0xff]  ;;  %v964_v9 = vor.u32 1.1754944e-38, %v963_v36  ;;  %v5912_v36 = vld [vmem:[#allocation3 + $0x330] sm:$0xff] }
 0x193   : > { %v934_v29 = vsub.f32 1.0, %v933_v51  ;;  %1251 = vmatpush.msra.mxu2 %v9484_v31  ;;  %1271 = vmatpush.msra.mxu3 %v9485_v16  ;;  %v5831_v31 = vld [vmem:[#allocation3 + $0x6b8] sm:$0xff]  ;;  %v5834_v16 = vld [vmem:[#allocation3 + $0x620] sm:$0xff]  ;;  %9517 = vst [vmem:[#allocation17_spill] sm:$0xff] %v5912_v36 }
 0x194   : > { %v916_v37 = vmul.f32 %v4030_v57, %v915_v24  ;;  %1212 = vmatpush.msra.mxu0 %v9486_v19  ;;  %1232 = vmatpush.msra.mxu1 %v9487_v20  ;;  %v9495_v24 = vld [vmem:[#allocation127_spill] sm:$0xff]  ;;  %v5843_v19 = vld [vmem:[#allocation3 + $0x638] sm:$0xff]  ;;  %v5846_v20 = vld [vmem:[#allocation3 + $0x5a0] sm:$0xff] }
 0x195   : > { %v935_v61 = vmul.f32 %v4032_v12, %v934_v29  ;;  %1252 = vmatpush.msra.mxu2 %v9488_v40  ;;  %1272 = vmatpush.msra.mxu3 %v9489_v41  ;;  %v9497_v29 = vld [vmem:[#allocation129_spill] sm:$0xff]  ;;  %v5861_v40 = vld [vmem:[#allocation3 + $0x528] sm:$0xff]  ;;  %v5864_v41 = vld [vmem:[#allocation3 + $0x530] sm:$0xff] }
 0x196   : > { %v5732_v3 = vpop.eup %4033  ;;  %v917_v6 = vadd.f32 %v4030_v57, %v916_v37  ;;  %1213 = vmatpush.msra.mxu0 %v9490_v55  ;;  %v9500_v37 = vld [vmem:[#allocation132_spill] sm:$0xff]  ;;  %v5873_v55 = vld [vmem:[#allocation3 + $0x4a8] sm:$0xff] }
 0x197   : > { %v936_v13 = vadd.f32 %v4032_v12, %v935_v61  ;;  %v953_v14 = vmul.f32 %v5732_v3, %v5711_v56  ;;  %v4036_v21 = vpop.eup %4035  ;;  %1253 = vmatpush.msra.mxu2 %v9492_v50  ;;  %1273 = vmatpush.msra.mxu3 %v9493_v11  ;;  %vm958_vm0 = vweird.f32 %v5732_v3  ;;  %v961_v61 = vand.u32 2147483647, %v5711_v56  ;;  %v9509_v56 = vld [vmem:[#allocation139_spill] sm:$0xff]  ;;  %v5888_v11 = vld [vmem:[#allocation3 + $0x430] sm:$0xff] }
 0x198   : > { %v921_v5 = vsel %vm920_vm12, %v4030_v57, %v917_v6  ;;  %v9491_v57 = vld [vmem:[#allocation123_spill] sm:$0xff]  ;;  %vm5771_vm2 = vmor %vm957_vm1, %vm958_vm0  ;;  %v9508_v6 = vld [vmem:[#allocation138_spill] sm:$0xff] }
 0x199   : > { %v926_v46 = vsel %vm923_vm13, %v925_v10, %v921_v5  ;;  %v940_v42 = vsel %vm939_vm14, %v4032_v12, %v936_v13  ;;  %v954_v39 = vsub.f32 1.0, %v953_v14  ;;  %1233 = vmatpush.msra.mxu1 %v9491_v57  ;;  %v9494_v12 = vld [vmem:[#allocation126_spill] sm:$0xff]  ;;  %1254 = vmatpush.msra.mxu2 %v9496_v28  ;;  %vm962_vm3 = vcmp.eq.f32.partialorder %v961_v61, 8.507059e+37  ;;  %v5825_v13 = vld [vmem:[#allocation3 + $0x6a8] sm:$0xff]  ;;  %v5828_v14 = vld [vmem:[#allocation3 + $0x6b0] sm:$0xff] }
 0x19a   : > { %v945_v0 = vsel %vm942_vm15, %v944_v18, %v940_v42  ;;  %v968_v58 = vmul.f32 %v4036_v21, %v926_v46  ;;  %1214 = vmatpush.msra.mxu0 %v9494_v12  ;;  %1274 = vmatpush.msra.mxu3 %v9497_v29  ;;  %v5837_v18 = vld [vmem:[#allocation3 + $0x628] sm:$0xff]  ;;  %v5840_v5 = vld [vmem:[#allocation3 + $0x630] sm:$0xff]  ;;  %v5855_v42 = vld [vmem:[#allocation3 + $0x5b8] sm:$0xff] }
 0x19b   : > { %v967_v53 = vmul.f32 0.0, %v945_v0  ;;  %v955_v51 = vmul.f32 %v5732_v3, %v954_v39  ;;  %1234 = vmatpush.msra.mxu1 %v9495_v24  ;;  %1255 = vmatpush.msra.mxu2 %v9500_v37  ;;  %v5849_v21 = vld [vmem:[#allocation3 + $0x5a8] sm:$0xff]  ;;  %v5852_v46 = vld [vmem:[#allocation3 + $0x5b0] sm:$0xff]  ;;  %v5858_v39 = vld [vmem:[#allocation3 + $0x520] sm:$0xff] }
 0x19c   : > { %1215 = vmatpush.msra.mxu0 %v9498_v32  ;;  %1275 = vmatpush.msra.mxu3 %v9501_v38  ;;  %v5867_v0 = vld [vmem:[#allocation3 + $0x538] sm:$0xff]  ;;  %v5876_v57 = vld [vmem:[#allocation3 + $0x4b0] sm:$0xff]  ;;  %v5885_v50 = vld [vmem:[#allocation3 + $0x428] sm:$0xff] }
 0x19d   : > { %v5755_v25 = vadd.f32 %v968_v58, %v967_v53  ;;  %1235 = vmatpush.msra.mxu1 %v9499_v34  ;;  %v956_v35 = vadd.f32 %v5732_v3, %v955_v51  ;;  %1256 = vmatpush.msra.mxu2 %v9506_v1  ;;  %v5870_v58 = vld [vmem:[#allocation3 + $0x4a0] sm:$0xff]  ;;  %v5879_v53 = vld [vmem:[#allocation3 + $0x4b8] sm:$0xff]  ;;  %v5897_v28 = vld [vmem:[#allocation3 + $0x3a8] sm:$0xff] }
 0x19e   : > { %1216 = vmatpush.msra.mxu0 %v9502_v44  ;;  %1276 = vmatpush.msra.mxu3 %v9507_v2  ;;  %v5882_v51 = vld [vmem:[#allocation3 + $0x420] sm:$0xff]  ;;  %v5891_v12 = vld [vmem:[#allocation3 + $0x438] sm:$0xff]  ;;  %9512 = vst [vmem:[#allocation12_spill] sm:$0xff] %v5897_v28  ;;  %v5900_v29 = vld [vmem:[#allocation3 + $0x3b0] sm:$0xff] }
 0x19f   : > { %4037 = vtanh.f32 %v5755_v25  ;;  %1236 = vmatpush.msra.mxu1 %v9503_v59  ;;  %v960_v7 = vsel %vm5771_vm2, %v5732_v3, %v956_v35  ;;  %1257 = vmatpush.msra.mxu2 %v5491_v49  ;;  %v5816_v49 = vld [vmem:[#allocation3 + $0x730] sm:$0xff]  ;;  %v5894_v24 = vld [vmem:[#allocation3 + $0x3a0] sm:$0xff]  ;;  %9513 = vst [vmem:[#allocation13_spill] sm:$0xff] %v5900_v29  ;;  %v5903_v32 = vld [vmem:[#allocation3 + $0x3b8] sm:$0xff] }
 0x1a0   : > { %1217 = vmatpush.msra.mxu0 %v9508_v6  ;;  %1277 = vmatpush.msra.mxu3 %v9509_v56  ;;  %9511 = vst [vmem:[#allocation11_spill] sm:$0xff] %v5894_v24  ;;  %v5906_v34 = vld [vmem:[#allocation3 + $0x320] sm:$0xff]  ;;  %v5909_v35 = vld [vmem:[#allocation3 + $0x328] sm:$0xff]  ;;  %v5915_v37 = vld [vmem:[#allocation3 + $0x338] sm:$0xff] }
 0x1a1   : > { %1237 = vmatpush.msra.mxu1 %v5487_v48  ;;  %1258 = vmatpush.msra.mxu2 %v5503_v8  ;;  %v965_v48 = vsel %vm962_vm3, %v964_v9, %v960_v7  ;;  %v5798_v8 = vld [vmem:[#allocation3 + $0x7a0] sm:$0xff]  ;;  %9514 = vst [vmem:[#allocation14_spill] sm:$0xff] %v5903_v32  ;;  %v5921_v44 = vld [vmem:[#allocation3 + $0x2a8] sm:$0xff]  ;;  %v5924_v59 = vld [vmem:[#allocation3 + $0x2b0] sm:$0xff] }
 0x1a2   : > { %1218 = vmatpush.msra.mxu0 %v5497_v45  ;;  %1278 = vmatpush.msra.mxu3 %v5505_v43  ;;  %v5819_v45 = vld [vmem:[#allocation3 + $0x738] sm:$0xff]  ;;  %v5822_v43 = vld [vmem:[#allocation3 + $0x6a0] sm:$0xff]  ;;  %9515 = vst [vmem:[#allocation15_spill] sm:$0xff] %v5906_v34  ;;  %v5933_v1 = vld [vmem:[#allocation3 + $0x228] sm:$0xff] }
 0x1a3   : > { %1238 = vmatpush.msra.mxu1 %v5499_v60  ;;  %1259 = vmatpush.msra.mxu2 %v5515_v4  ;;  %v5801_v60 = vld [vmem:[#allocation3 + $0x7a8] sm:$0xff]  ;;  %v5810_v4 = vld [vmem:[#allocation3 + $0x720] sm:$0xff]  ;;  %9516 = vst [vmem:[#allocation16_spill] sm:$0xff] %v5909_v35  ;;  %v5927_v61 = vld [vmem:[#allocation3 + $0x2b8] sm:$0xff] }
 0x1a4   : > { %1219 = vmatpush.msra.mxu0 %v5509_v52  ;;  %1279 = vmatpush.msra.mxu3 %v5517_v47  ;;  %v5804_v52 = vld [vmem:[#allocation3 + $0x7b0] sm:$0xff]  ;;  %v5813_v47 = vld [vmem:[#allocation3 + $0x728] sm:$0xff]  ;;  %9518 = vst [vmem:[#allocation18_spill] sm:$0xff] %v5915_v37  ;;  %v5918_v38 = vld [vmem:[#allocation3 + $0x2a0] sm:$0xff] }
 0x1a5   : > { %v4038_v10 = vpop.eup %4037  ;;  %1239 = vmatpush.msra.mxu1 %v5511_v54  ;;  %1455 = vmatpush.msrb.mxu2 %v5804_v52  ;;  %v5807_v54 = vld [vmem:[#allocation3 + $0x7b8] sm:$0xff]  ;;  %9519 = vst [vmem:[#allocation19_spill] sm:$0xff] %v5918_v38  ;;  %v5936_v2 = vld [vmem:[#allocation3 + $0x230] sm:$0xff]  ;;  %v5942_v7 = vld [vmem:[#allocation3 + $0x1a0] sm:$0xff] }
 0x1a6   : > { %v5790_v3 = vmul.f32 %v4038_v10, %v965_v48  ;;  %1415 = vmatpush.msrb.mxu0 %v5798_v8  ;;  %1475 = vmatpush.msrb.mxu3 %v5807_v54  ;;  %9520 = vst [vmem:[#allocation20_spill] sm:$0xff] %v5921_v44  ;;  %v5939_v6 = vld [vmem:[#allocation3 + $0x238] sm:$0xff]  ;;  %v5945_v9 = vld [vmem:[#allocation3 + $0x1a8] sm:$0xff]  ;;  %v5948_v56 = vld [vmem:[#allocation3 + $0x1b0] sm:$0xff] }
 0x1a7   : > { %1435 = vmatpush.msrb.mxu1 %v5801_v60  ;;  %1456 = vmatpush.msrb.mxu2 %v5816_v49  ;;  %9521 = vst [vmem:[#allocation21_spill] sm:$0xff] %v5924_v59  ;;  %v5951_v10 = vld [vmem:[#allocation3 + $0x1b8] sm:$0xff]  ;;  %v5954_v48 = vld [vmem:[#allocation3 + $0x120] sm:$0xff] }
 0x1a8   : > { %9510 = vst [vmem:[#allocation10_spill] sm:$0xff] %v5790_v3  ;;  %1220 = vmatmul.f32.vlgmr.msra.gmra.mxu0 %v5790_v3  ;;  %1240 = vmatmul.f32.vlgmr.msra.gmra.mxu1 %v5790_v3 }
 0x1a9   : > { %1260 = vmatmul.f32.vlgmr.msra.gmra.mxu2 %v5790_v3  ;;  %1280 = vmatmul.f32.vlgmr.msra.gmra.mxu3 %v5790_v3  ;;  %9522 = vst [vmem:[#allocation22_spill] sm:$0xff] %v5927_v61  ;;  %v5957_v3 = vld [vmem:[#allocation3 + $0x128] sm:$0xff] }
 0x1aa   : > { %1416 = vmatpush.msrb.mxu0 %v5810_v4  ;;  %1436 = vmatpush.msrb.mxu1 %v5813_v47  ;;  %9524 = vst [vmem:[#allocation24_spill] sm:$0xff] %v5933_v1 }
 0x1ab   : > { %1476 = vmatpush.msrb.mxu3 %v5819_v45  ;;  %1457 = vmatpush.msrb.mxu2 %v5828_v14  ;;  %9525 = vst [vmem:[#allocation25_spill] sm:$0xff] %v5936_v2 }
 0x1ac   : > { %1417 = vmatpush.msrb.mxu0 %v5822_v43  ;;  %1437 = vmatpush.msrb.mxu1 %v5825_v13  ;;  %9526 = vst [vmem:[#allocation26_spill] sm:$0xff] %v5939_v6 }
 0x1ad   : > { %1477 = vmatpush.msrb.mxu3 %v5831_v31  ;;  %1458 = vmatpush.msrb.mxu2 %v5840_v5  ;;  %9527 = vst [vmem:[#allocation27_spill] sm:$0xff] %v5942_v7 }
 0x1ae   : > { %1418 = vmatpush.msrb.mxu0 %v5834_v16  ;;  %1438 = vmatpush.msrb.mxu1 %v5837_v18  ;;  %9528 = vst [vmem:[#allocation28_spill] sm:$0xff] %v5945_v9 }
 0x1af   : > { %1478 = vmatpush.msrb.mxu3 %v5843_v19  ;;  %1459 = vmatpush.msrb.mxu2 %v5852_v46  ;;  %9529 = vst [vmem:[#allocation29_spill] sm:$0xff] %v5948_v56 }
 0x1b0   : > { %1419 = vmatpush.msrb.mxu0 %v5846_v20  ;;  %1439 = vmatpush.msrb.mxu1 %v5849_v21  ;;  %9530 = vst [vmem:[#allocation30_spill] sm:$0xff] %v5951_v10 }
 0x1b1   : > { %1479 = vmatpush.msrb.mxu3 %v5855_v42  ;;  %1460 = vmatpush.msrb.mxu2 %v5864_v41  ;;  %9531 = vst [vmem:[#allocation31_spill] sm:$0xff] %v5954_v48 }
 0x1b2   : > { %1420 = vmatpush.msrb.mxu0 %v5858_v39  ;;  %1440 = vmatpush.msrb.mxu1 %v5861_v40  ;;  %9532 = vst [vmem:[#allocation32_spill] sm:$0xff] %v5957_v3 }
 0x1b3   : > { %1480 = vmatpush.msrb.mxu3 %v5867_v0  ;;  %1461 = vmatpush.msrb.mxu2 %v5876_v57 }
 0x1b4   : > { %1421 = vmatpush.msrb.mxu0 %v5870_v58  ;;  %1441 = vmatpush.msrb.mxu1 %v5873_v55 }
 0x1b5   : > { %1481 = vmatpush.msrb.mxu3 %v5879_v53  ;;  %1462 = vmatpush.msrb.mxu2 %v5888_v11 }
 0x1b6   : > { %1422 = vmatpush.msrb.mxu0 %v5882_v51  ;;  %1442 = vmatpush.msrb.mxu1 %v5885_v50 }
 0x1b7   : > { %1482 = vmatpush.msrb.mxu3 %v5891_v12  ;;  %1463 = vmatpush.msrb.mxu2 %v5900_v29 }
 0x1b8   : > { %1423 = vmatpush.msrb.mxu0 %v5894_v24  ;;  %1443 = vmatpush.msrb.mxu1 %v5897_v28 }
 0x1b9   : > { %1483 = vmatpush.msrb.mxu3 %v5903_v32  ;;  %1464 = vmatpush.msrb.mxu2 %v5912_v36 }
 0x1ba   : > { %1424 = vmatpush.msrb.mxu0 %v5906_v34  ;;  %1444 = vmatpush.msrb.mxu1 %v5909_v35 }
 0x1bb   : > { %1484 = vmatpush.msrb.mxu3 %v5915_v37  ;;  %1465 = vmatpush.msrb.mxu2 %v5924_v59 }
 0x1bc   : > { %1425 = vmatpush.msrb.mxu0 %v5918_v38  ;;  %1445 = vmatpush.msrb.mxu1 %v5921_v44 }
 0x1bd   : > { %1485 = vmatpush.msrb.mxu3 %v5927_v61  ;;  %1466 = vmatpush.msrb.mxu2 %v5936_v2 }
 0x1be   : > { %1426 = vmatpush.msrb.mxu0 %v5930_v62  ;;  %1446 = vmatpush.msrb.mxu1 %v5933_v1 }
 0x1bf   : > { %1486 = vmatpush.msrb.mxu3 %v5939_v6  ;;  %1467 = vmatpush.msrb.mxu2 %v5948_v56  ;;  %v5966_v56 = vld [vmem:[#allocation3 + $0xa0] sm:$0xff] }
 0x1c0   : > { %1427 = vmatpush.msrb.mxu0 %v5942_v7  ;;  %1447 = vmatpush.msrb.mxu1 %v5945_v9  ;;  %v5960_v7 = vld [vmem:[#allocation3 + $0x130] sm:$0xff]  ;;  %v5963_v9 = vld [vmem:[#allocation3 + $0x138] sm:$0xff]  ;;  %9535 = vst [vmem:[#allocation35_spill] sm:$0xff] %v5966_v56 }
 0x1c1   : > { %1487 = vmatpush.msrb.mxu3 %v5951_v10  ;;  %9533 = vst [vmem:[#allocation33_spill] sm:$0xff] %v5960_v7  ;;  %1468 = vmatpush.msrb.mxu2 %v5960_v7  ;;  %v5969_v10 = vld [vmem:[#allocation3 + $0xa8] sm:$0xff]  ;;  %v5978_v7 = vld [vmem:[#allocation3 + $0x20] sm:$0xff] }
 0x1c2   : > { %1428 = vmatpush.msrb.mxu0 %v5954_v48  ;;  %1448 = vmatpush.msrb.mxu1 %v5957_v3  ;;  %9534 = vst [vmem:[#allocation34_spill] sm:$0xff] %v5963_v9  ;;  %v5972_v48 = vld [vmem:[#allocation3 + $0xb0] sm:$0xff]  ;;  %v5975_v3 = vld [vmem:[#allocation3 + $0xb8] sm:$0xff] }
 0x1c3   : > { %1488 = vmatpush.msrb.mxu3 %v5963_v9  ;;  %9536 = vst [vmem:[#allocation36_spill] sm:$0xff] %v5969_v10  ;;  %1469 = vmatpush.msrb.mxu2 %v5972_v48  ;;  %v5981_v9 = vld [vmem:[#allocation3 + $0x28] sm:$0xff] }
 0x1c4   : > { %1429 = vmatpush.msrb.mxu0 %v5966_v56  ;;  %1449 = vmatpush.msrb.mxu1 %v5969_v10  ;;  %9537 = vst [vmem:[#allocation37_spill] sm:$0xff] %v5972_v48  ;;  %v5984_v56 = vld [vmem:[#allocation3 + $0x30] sm:$0xff]  ;;  %v5987_v10 = vld [vmem:[#allocation3 + $0x38] sm:$0xff]  ;;  %v5990_v48 = vld [vmem:[#allocation3 + $0x7c0] sm:$0xff] }
 0x1c5   : > { %9538 = vst [vmem:[#allocation38_spill] sm:$0xff] %v5975_v3  ;;  %1489 = vmatpush.msrb.mxu3 %v5975_v3  ;;  %1470 = vmatpush.msrb.mxu2 %v5984_v56  ;;  %v5993_v3 = vld [vmem:[#allocation3 + $0x7c8] sm:$0xff] }
 0x1c6   : > { %9539 = vst [vmem:[#allocation39_spill] sm:$0xff] %v5978_v7  ;;  %1430 = vmatpush.msrb.mxu0 %v5978_v7  ;;  %1450 = vmatpush.msrb.mxu1 %v5981_v9  ;;  %v5996_v7 = vld [vmem:[#allocation3 + $0x7d0] sm:$0xff] }
 0x1c7   : > { %9540 = vst [vmem:[#allocation40_spill] sm:$0xff] %v5981_v9  ;;  %1490 = vmatpush.msrb.mxu3 %v5987_v10  ;;  %1535 = vmatpush.msra.mxu2 %v5996_v7  ;;  %v5999_v9 = vld [vmem:[#allocation3 + $0x7d8] sm:$0xff] }
 0x1c8   : > { %9541 = vst [vmem:[#allocation41_spill] sm:$0xff] %v5984_v56  ;;  %1495 = vmatpush.msra.mxu0 %v5990_v48  ;;  %1515 = vmatpush.msra.mxu1 %v5993_v3  ;;  %v6002_v56 = vld [vmem:[#allocation3 + $0x740] sm:$0xff] }
 0x1c9   : > { %9542 = vst [vmem:[#allocation42_spill] sm:$0xff] %v5987_v10  ;;  %1555 = vmatpush.msra.mxu3 %v5999_v9  ;;  %v6005_v10 = vld [vmem:[#allocation3 + $0x748] sm:$0xff] }
 0x1ca   : > { %9543 = vst [vmem:[#allocation43_spill] sm:$0xff] %v5990_v48  ;;  %1496 = vmatpush.msra.mxu0 %v6002_v56  ;;  %1516 = vmatpush.msra.mxu1 %v6005_v10  ;;  %v6008_v48 = vld [vmem:[#allocation3 + $0x750] sm:$0xff] }
 0x1cb   : > { %9544 = vst [vmem:[#allocation44_spill] sm:$0xff] %v5993_v3  ;;  %1536 = vmatpush.msra.mxu2 %v6008_v48  ;;  %v6011_v3 = vld [vmem:[#allocation3 + $0x758] sm:$0xff] }
 0x1cc   : > { %9545 = vst [vmem:[#allocation45_spill] sm:$0xff] %v5996_v7  ;;  %1556 = vmatpush.msra.mxu3 %v6011_v3  ;;  %v6014_v7 = vld [vmem:[#allocation3 + $0x6c0] sm:$0xff] }
 0x1cd   : > { %9546 = vst [vmem:[#allocation46_spill] sm:$0xff] %v5999_v9  ;;  %1497 = vmatpush.msra.mxu0 %v6014_v7  ;;  %v6017_v9 = vld [vmem:[#allocation3 + $0x6c8] sm:$0xff] }
 0x1ce   : > { %9547 = vst [vmem:[#allocation47_spill] sm:$0xff] %v6002_v56  ;;  %1517 = vmatpush.msra.mxu1 %v6017_v9  ;;  %v6020_v56 = vld [vmem:[#allocation3 + $0x6d0] sm:$0xff] }
 0x1cf   : > { %9548 = vst [vmem:[#allocation48_spill] sm:$0xff] %v6005_v10  ;;  %1537 = vmatpush.msra.mxu2 %v6020_v56  ;;  %v6023_v10 = vld [vmem:[#allocation3 + $0x6d8] sm:$0xff] }
 0x1d0   : > { %9549 = vst [vmem:[#allocation49_spill] sm:$0xff] %v6008_v48  ;;  %1557 = vmatpush.msra.mxu3 %v6023_v10  ;;  %v6026_v48 = vld [vmem:[#allocation3 + $0x640] sm:$0xff] }
 0x1d1   : > { %9550 = vst [vmem:[#allocation50_spill] sm:$0xff] %v6011_v3  ;;  %1498 = vmatpush.msra.mxu0 %v6026_v48  ;;  %v6029_v3 = vld [vmem:[#allocation3 + $0x648] sm:$0xff] }
 0x1d2   : > { %9551 = vst [vmem:[#allocation51_spill] sm:$0xff] %v6014_v7  ;;  %1518 = vmatpush.msra.mxu1 %v6029_v3  ;;  %v6032_v7 = vld [vmem:[#allocation3 + $0x650] sm:$0xff] }
 0x1d3   : > { %9552 = vst [vmem:[#allocation52_spill] sm:$0xff] %v6017_v9  ;;  %1538 = vmatpush.msra.mxu2 %v6032_v7  ;;  %v6035_v9 = vld [vmem:[#allocation3 + $0x658] sm:$0xff] }
 0x1d4   : > { %9553 = vst [vmem:[#allocation53_spill] sm:$0xff] %v6020_v56  ;;  %1558 = vmatpush.msra.mxu3 %v6035_v9  ;;  %v6038_v56 = vld [vmem:[#allocation3 + $0x5c0] sm:$0xff] }
 0x1d5   : > { %9554 = vst [vmem:[#allocation54_spill] sm:$0xff] %v6023_v10  ;;  %1499 = vmatpush.msra.mxu0 %v6038_v56  ;;  %v6041_v10 = vld [vmem:[#allocation3 + $0x5c8] sm:$0xff] }
 0x1d6   : > { %9555 = vst [vmem:[#allocation55_spill] sm:$0xff] %v6026_v48  ;;  %1519 = vmatpush.msra.mxu1 %v6041_v10  ;;  %v6044_v48 = vld [vmem:[#allocation3 + $0x5d0] sm:$0xff] }
 0x1d7   : > { %9556 = vst [vmem:[#allocation56_spill] sm:$0xff] %v6029_v3  ;;  %1539 = vmatpush.msra.mxu2 %v6044_v48  ;;  %v6047_v3 = vld [vmem:[#allocation3 + $0x5d8] sm:$0xff] }
 0x1d8   : > { %9557 = vst [vmem:[#allocation57_spill] sm:$0xff] %v6032_v7  ;;  %1559 = vmatpush.msra.mxu3 %v6047_v3  ;;  %v6050_v7 = vld [vmem:[#allocation3 + $0x540] sm:$0xff] }
 0x1d9   : > { %9558 = vst [vmem:[#allocation58_spill] sm:$0xff] %v6035_v9  ;;  %1500 = vmatpush.msra.mxu0 %v6050_v7  ;;  %v6053_v9 = vld [vmem:[#allocation3 + $0x548] sm:$0xff] }
 0x1da   : > { %9559 = vst [vmem:[#allocation59_spill] sm:$0xff] %v6038_v56  ;;  %1520 = vmatpush.msra.mxu1 %v6053_v9  ;;  %v6056_v56 = vld [vmem:[#allocation3 + $0x550] sm:$0xff] }
 0x1db   : > { %9560 = vst [vmem:[#allocation60_spill] sm:$0xff] %v6041_v10  ;;  %1540 = vmatpush.msra.mxu2 %v6056_v56  ;;  %v6059_v10 = vld [vmem:[#allocation3 + $0x558] sm:$0xff] }
 0x1dc   : > { %9561 = vst [vmem:[#allocation61_spill] sm:$0xff] %v6044_v48  ;;  %1560 = vmatpush.msra.mxu3 %v6059_v10  ;;  %v6062_v48 = vld [vmem:[#allocation3 + $0x4c0] sm:$0xff] }
 0x1dd   : > { %9562 = vst [vmem:[#allocation62_spill] sm:$0xff] %v6047_v3  ;;  %1501 = vmatpush.msra.mxu0 %v6062_v48  ;;  %v6065_v3 = vld [vmem:[#allocation3 + $0x4c8] sm:$0xff] }
 0x1de   : > { %9563 = vst [vmem:[#allocation63_spill] sm:$0xff] %v6050_v7  ;;  %1521 = vmatpush.msra.mxu1 %v6065_v3  ;;  %v6068_v7 = vld [vmem:[#allocation3 + $0x4d0] sm:$0xff] }
 0x1df   : > { %9564 = vst [vmem:[#allocation64_spill] sm:$0xff] %v6053_v9  ;;  %1541 = vmatpush.msra.mxu2 %v6068_v7  ;;  %v6071_v9 = vld [vmem:[#allocation3 + $0x4d8] sm:$0xff] }
 0x1e0   : > { %9565 = vst [vmem:[#allocation65_spill] sm:$0xff] %v6056_v56  ;;  %1561 = vmatpush.msra.mxu3 %v6071_v9  ;;  %v6074_v56 = vld [vmem:[#allocation3 + $0x440] sm:$0xff] }
 0x1e1   : > { %9566 = vst [vmem:[#allocation66_spill] sm:$0xff] %v6059_v10  ;;  %1502 = vmatpush.msra.mxu0 %v6074_v56  ;;  %v6077_v10 = vld [vmem:[#allocation3 + $0x448] sm:$0xff] }
 0x1e2   : > { %9567 = vst [vmem:[#allocation67_spill] sm:$0xff] %v6062_v48  ;;  %1522 = vmatpush.msra.mxu1 %v6077_v10  ;;  %v6080_v48 = vld [vmem:[#allocation3 + $0x450] sm:$0xff] }
 0x1e3   : > { %9568 = vst [vmem:[#allocation68_spill] sm:$0xff] %v6065_v3  ;;  %1542 = vmatpush.msra.mxu2 %v6080_v48  ;;  %v6083_v3 = vld [vmem:[#allocation3 + $0x458] sm:$0xff] }
 0x1e4   : > { %9569 = vst [vmem:[#allocation69_spill] sm:$0xff] %v6068_v7  ;;  %1562 = vmatpush.msra.mxu3 %v6083_v3  ;;  %v6086_v7 = vld [vmem:[#allocation3 + $0x3c0] sm:$0xff] }
 0x1e5   : > { %9570 = vst [vmem:[#allocation70_spill] sm:$0xff] %v6071_v9  ;;  %1503 = vmatpush.msra.mxu0 %v6086_v7  ;;  %v6089_v9 = vld [vmem:[#allocation3 + $0x3c8] sm:$0xff] }
 0x1e6   : > { %9571 = vst [vmem:[#allocation71_spill] sm:$0xff] %v6074_v56  ;;  %1523 = vmatpush.msra.mxu1 %v6089_v9  ;;  %v6092_v56 = vld [vmem:[#allocation3 + $0x3d0] sm:$0xff] }
 0x1e7   : > { %9572 = vst [vmem:[#allocation72_spill] sm:$0xff] %v6077_v10  ;;  %1543 = vmatpush.msra.mxu2 %v6092_v56  ;;  %v6095_v10 = vld [vmem:[#allocation3 + $0x3d8] sm:$0xff] }
 0x1e8   : > { %9573 = vst [vmem:[#allocation73_spill] sm:$0xff] %v6080_v48  ;;  %1563 = vmatpush.msra.mxu3 %v6095_v10  ;;  %v6098_v48 = vld [vmem:[#allocation3 + $0x340] sm:$0xff] }
 0x1e9   : > { %9574 = vst [vmem:[#allocation75_spill] sm:$0xff] %v6083_v3  ;;  %1504 = vmatpush.msra.mxu0 %v6098_v48  ;;  %v6101_v3 = vld [vmem:[#allocation3 + $0x348] sm:$0xff] }
 0x1ea   : > { %9575 = vst [vmem:[#allocation76_spill] sm:$0xff] %v6086_v7  ;;  %1524 = vmatpush.msra.mxu1 %v6101_v3  ;;  %v6104_v7 = vld [vmem:[#allocation3 + $0x350] sm:$0xff] }
 0x1eb   : > { %9576 = vst [vmem:[#allocation78_spill] sm:$0xff] %v6089_v9  ;;  %1544 = vmatpush.msra.mxu2 %v6104_v7  ;;  %v6107_v9 = vld [vmem:[#allocation3 + $0x358] sm:$0xff] }
 0x1ec   : > { %9577 = vst [vmem:[#allocation79_spill] sm:$0xff] %v6092_v56  ;;  %1564 = vmatpush.msra.mxu3 %v6107_v9  ;;  %v6110_v56 = vld [vmem:[#allocation3 + $0x2c0] sm:$0xff] }
 0x1ed   : > { %9578 = vst [vmem:[#allocation80_spill] sm:$0xff] %v6095_v10  ;;  %1505 = vmatpush.msra.mxu0 %v6110_v56  ;;  %v6113_v10 = vld [vmem:[#allocation3 + $0x2c8] sm:$0xff] }
 0x1ee   : > { %9579 = vst [vmem:[#allocation81_spill] sm:$0xff] %v6098_v48  ;;  %1525 = vmatpush.msra.mxu1 %v6113_v10  ;;  %v6116_v48 = vld [vmem:[#allocation3 + $0x2d0] sm:$0xff] }
 0x1ef   : > { %9580 = vst [vmem:[#allocation82_spill] sm:$0xff] %v6101_v3  ;;  %1545 = vmatpush.msra.mxu2 %v6116_v48  ;;  %v6119_v3 = vld [vmem:[#allocation3 + $0x2d8] sm:$0xff] }
 0x1f0   : > { %9581 = vst [vmem:[#allocation83_spill] sm:$0xff] %v6104_v7  ;;  %1565 = vmatpush.msra.mxu3 %v6119_v3  ;;  %v6122_v7 = vld [vmem:[#allocation3 + $0x240] sm:$0xff] }
 0x1f1   : > { %9582 = vst [vmem:[#allocation84_spill] sm:$0xff] %v6107_v9  ;;  %1506 = vmatpush.msra.mxu0 %v6122_v7  ;;  %v6125_v9 = vld [vmem:[#allocation3 + $0x248] sm:$0xff] }
 0x1f2   : > { %9583 = vst [vmem:[#allocation85_spill] sm:$0xff] %v6110_v56  ;;  %1526 = vmatpush.msra.mxu1 %v6125_v9  ;;  %v6128_v56 = vld [vmem:[#allocation3 + $0x250] sm:$0xff] }
 0x1f3   : > { %9584 = vst [vmem:[#allocation86_spill] sm:$0xff] %v6113_v10  ;;  %1546 = vmatpush.msra.mxu2 %v6128_v56  ;;  %v6131_v10 = vld [vmem:[#allocation3 + $0x258] sm:$0xff] }
 0x1f4   : > { %9585 = vst [vmem:[#allocation87_spill] sm:$0xff] %v6116_v48  ;;  %1566 = vmatpush.msra.mxu3 %v6131_v10  ;;  %v6134_v48 = vld [vmem:[#allocation3 + $0x1c0] sm:$0xff] }
 0x1f5   : > { %9586 = vst [vmem:[#allocation88_spill] sm:$0xff] %v6119_v3  ;;  %1507 = vmatpush.msra.mxu0 %v6134_v48  ;;  %v6137_v3 = vld [vmem:[#allocation3 + $0x1c8] sm:$0xff] }
 0x1f6   : > { %9587 = vst [vmem:[#allocation89_spill] sm:$0xff] %v6122_v7  ;;  %1527 = vmatpush.msra.mxu1 %v6137_v3  ;;  %v6140_v7 = vld [vmem:[#allocation3 + $0x1d0] sm:$0xff] }
 0x1f7   : > { %9588 = vst [vmem:[#allocation91_spill] sm:$0xff] %v6125_v9  ;;  %1547 = vmatpush.msra.mxu2 %v6140_v7  ;;  %v6143_v9 = vld [vmem:[#allocation3 + $0x1d8] sm:$0xff] }
 0x1f8   : > { %9589 = vst [vmem:[#allocation92_spill] sm:$0xff] %v6128_v56  ;;  %1567 = vmatpush.msra.mxu3 %v6143_v9  ;;  %v6146_v56 = vld [vmem:[#allocation3 + $0x140] sm:$0xff] }
 0x1f9   : > { %9590 = vst [vmem:[#allocation93_spill] sm:$0xff] %v6131_v10  ;;  %1508 = vmatpush.msra.mxu0 %v6146_v56  ;;  %v6149_v10 = vld [vmem:[#allocation3 + $0x148] sm:$0xff] }
 0x1fa   : > { %9591 = vst [vmem:[#allocation94_spill] sm:$0xff] %v6134_v48  ;;  %1528 = vmatpush.msra.mxu1 %v6149_v10  ;;  %v6152_v48 = vld [vmem:[#allocation3 + $0x150] sm:$0xff] }
 0x1fb   : > { %9592 = vst [vmem:[#allocation95_spill] sm:$0xff] %v6137_v3  ;;  %1548 = vmatpush.msra.mxu2 %v6152_v48  ;;  %v6155_v3 = vld [vmem:[#allocation3 + $0x158] sm:$0xff] }
 0x1fc   : > { %9593 = vst [vmem:[#allocation96_spill] sm:$0xff] %v6140_v7  ;;  %1568 = vmatpush.msra.mxu3 %v6155_v3  ;;  %v6158_v7 = vld [vmem:[#allocation3 + $0xc0] sm:$0xff] }
 0x1fd   : > { %9594 = vst [vmem:[#allocation97_spill] sm:$0xff] %v6143_v9  ;;  %1509 = vmatpush.msra.mxu0 %v6158_v7  ;;  %v6161_v9 = vld [vmem:[#allocation3 + $0xc8] sm:$0xff]  ;;  %v1073_v6 = vpop.f32.mrf.mxu1 }
 0x1fe   : > { %9595 = vst [vmem:[#allocation98_spill] sm:$0xff] %v6146_v56  ;;  %1529 = vmatpush.msra.mxu1 %v6161_v9  ;;  %v6164_v56 = vld [vmem:[#allocation3 + $0xd0] sm:$0xff]  ;;  %v1197_v2 = vadd.f32 %v1073_v6, %v9461_v17 }
 0x1ff   : > { %9596 = vst [vmem:[#allocation100_spill] sm:$0xff] %v6149_v10  ;;  %1549 = vmatpush.msra.mxu2 %v6164_v56  ;;  %v6167_v10 = vld [vmem:[#allocation3 + $0xd8] sm:$0xff] }
 0x200   : > { %9597 = vst [vmem:[#allocation101_spill] sm:$0xff] %v6152_v48  ;;  %1569 = vmatpush.msra.mxu3 %v6167_v10  ;;  %v6170_v48 = vld [vmem:[#allocation3 + $0x40] sm:$0xff] }
 0x201   : > { %9598 = vst [vmem:[#allocation102_spill] sm:$0xff] %v6155_v3  ;;  %1510 = vmatpush.msra.mxu0 %v6170_v48  ;;  %v6173_v3 = vld [vmem:[#allocation3 + $0x48] sm:$0xff] }
 0x202   : > { %9599 = vst [vmem:[#allocation103_spill] sm:$0xff] %v6158_v7  ;;  %1530 = vmatpush.msra.mxu1 %v6173_v3  ;;  %v6176_v7 = vld [vmem:[#allocation3 + $0x50] sm:$0xff] }
 0x203   : > { %9600 = vst [vmem:[#allocation104_spill] sm:$0xff] %v6161_v9  ;;  %1550 = vmatpush.msra.mxu2 %v6176_v7  ;;  %v6179_v9 = vld [vmem:[#allocation3 + $0x58] sm:$0xff] }
 0x204   : > { %9601 = vst [vmem:[#allocation105_spill] sm:$0xff] %v6164_v56  ;;  %1570 = vmatpush.msra.mxu3 %v6179_v9  ;;  %v1053_v56 = vpop.f32.mrf.mxu0  ;;  %v1113_v62 = vpop.f32.mrf.mxu3 }
 0x205   : > { %9602 = vst [vmem:[#allocation106_spill] sm:$0xff] %v6167_v10  ;;  %v1196_v10 = vadd.f32 %v1053_v56, %v9460_v15 }
 0x206   : > { %9603 = vst [vmem:[#allocation107_spill] sm:$0xff] %v6170_v48  ;;  %v3931_v48 = vmul.f32 -1.442695, %v1197_v2 }
 0x207   : > { %9604 = vst [vmem:[#allocation108_spill] sm:$0xff] %v6173_v3  ;;  %v3930_v1 = vmul.f32 -1.442695, %v1196_v10  ;;  %v1199_v3 = vadd.f32 %v1113_v62, %v9462_v22 }
 0x208   : > { %9605 = vst [vmem:[#allocation109_spill] sm:$0xff] %v6176_v7 }
 0x209   : > { %9606 = vst [vmem:[#allocation110_spill] sm:$0xff] %v6179_v9  ;;  %4039 = vpow2.f32 %v3930_v1  ;;  %v3932_v61 = vmul.f32 -1.442695, %v1199_v3  ;;  %v1093_v9 = vpop.f32.mrf.mxu2 }
 0x20a   : > { %4041 = vpow2.f32 %v3931_v48  ;;  %v1198_v6 = vadd.f32 %v1093_v9, %v9463_v33 }
 0x20b   : > { %4043 = vpow2.f32 %v3932_v61 }
 0x20c   : > { %v1133_v34 = vpop.f32.mrf.mxu0 }
 0x20f   : > { %v4040_v59 = vpop.eup %4039 }
 0x210   : > { %v4042_v7 = vpop.eup %4041  ;;  %v1355_v44 = vadd.f32 1.0, %v4040_v59 }
 0x211   : > { %v1374_v38 = vadd.f32 1.0, %v4042_v7  ;;  %v4044_v37 = vpop.eup %4043 }
 0x212   : > { %4045 = vrcp.f32 %v1355_v44  ;;  %v1394_v56 = vadd.f32 1.0, %v4044_v37  ;;  %v1367_v3 = vand.u32 2147483648, %v1355_v44  ;;  %v1365_v61 = vand.u32 2147483647, %v1355_v44 }
 0x213   : > { %4047 = vrcp.f32 %v1374_v38  ;;  %v1386_v22 = vand.u32 2147483648, %v1374_v38  ;;  %v1384_v17 = vand.u32 2147483647, %v1374_v38  ;;  %vm1361_vm6 = vweird.f32 %v1355_v44 }
 0x214   : > { %4049 = vrcp.f32 %v1394_v56  ;;  %vm1380_vm7 = vweird.f32 %v1374_v38  ;;  %v1368_v9 = vor.u32 1.1754944e-38, %v1367_v3  ;;  %vm1366_vm10 = vcmp.eq.f32.partialorder %v1365_v61, 8.507059e+37 }
 0x215   : > { %4051 = vtanh.f32 %v1198_v6  ;;  %vm1385_vm11 = vcmp.eq.f32.partialorder %v1384_v17, 8.507059e+37  ;;  %v1406_v61 = vand.u32 2147483648, %v1394_v56  ;;  %vm1400_vm13 = vweird.f32 %v1394_v56 }
 0x218   : > { %v4046_v15 = vpop.eup %4045 }
 0x219   : > { %v4048_v2 = vpop.eup %4047  ;;  %v1357_v1 = vmul.f32 %v4046_v15, %v1355_v44  ;;  %vm1362_vm4 = vweird.f32 %v4046_v15 }
 0x21a   : > { %v1376_v10 = vmul.f32 %v4048_v2, %v1374_v38  ;;  %vm1381_vm5 = vweird.f32 %v4048_v2  ;;  %v4050_v36 = vpop.eup %4049  ;;  %vm1363_vm8 = vmor %vm1361_vm6, %vm1362_vm4 }
 0x21b   : > { %v1358_v48 = vsub.f32 1.0, %v1357_v1  ;;  %v1396_v35 = vmul.f32 %v4050_v36, %v1394_v56  ;;  %v1153_v1 = vpop.f32.mrf.mxu1  ;;  %vm1382_vm9 = vmor %vm1380_vm7, %vm1381_vm5  ;;  %vm1401_vm12 = vweird.f32 %v4050_v36 }
 0x21c   : > { %v1377_v62 = vsub.f32 1.0, %v1376_v10  ;;  %v1387_v10 = vor.u32 1.1754944e-38, %v1386_v22  ;;  %v1201_v22 = vadd.f32 %v1153_v1, %v5670_v27  ;;  %vm1402_vm14 = vmor %vm1400_vm13, %vm1401_vm12 }
 0x21d   : > { %v1359_v59 = vmul.f32 %v4046_v15, %v1358_v48  ;;  %v4052_v48 = vpop.eup %4051 }
 0x21e   : > { %v1378_v7 = vmul.f32 %v4048_v2, %v1377_v62  ;;  %v1397_v62 = vsub.f32 1.0, %v1396_v35 }
 0x21f   : > { %v1360_v37 = vadd.f32 %v4046_v15, %v1359_v59 }
 0x220   : > { %v1379_v33 = vadd.f32 %v4048_v2, %v1378_v7  ;;  %v1398_v38 = vmul.f32 %v4050_v36, %v1397_v62  ;;  %v1200_v7 = vadd.f32 %v1133_v34, %v5667_v26  ;;  %v6193_v62 = vld [vmem:[#allocation3 + $0x7e0] sm:$0xff] }
 0x221   : > { %v1364_v6 = vsel %vm1363_vm8, %v4046_v15, %v1360_v37  ;;  %v1193_v15 = vpop.f32.mrf.mxu3 }
 0x222   : > { %v1369_v32 = vsel %vm1366_vm10, %v1368_v9, %v1364_v6  ;;  %v1383_v29 = vsel %vm1382_vm9, %v4048_v2, %v1379_v33  ;;  %v1399_v3 = vadd.f32 %v4050_v36, %v1398_v38  ;;  %v1407_v2 = vor.u32 1.1754944e-38, %v1406_v61  ;;  %v6209_v61 = vld [vmem:[#allocation3 + $0x760] sm:$0xff] }
 0x223   : > { %v1388_v28 = vsel %vm1385_vm11, %v1387_v10, %v1383_v29  ;;  %v1411_v24 = vmul.f32 %v4052_v48, %v1369_v32  ;;  %v1404_v29 = vand.u32 2147483647, %v1394_v56  ;;  %v1203_v9 = vadd.f32 %v1193_v15, %v5682_v63  ;;  %v1173_v48 = vpop.f32.mrf.mxu2 }
 0x224   : > { %v1410_v44 = vmul.f32 %v1388_v28, %v5673_v30  ;;  %v1403_v30 = vsel %vm1402_vm14, %v4050_v36, %v1399_v3 }
 0x225   : > { %v1221_v33 = vpop.f32.mrf.mxu0  ;;  %v1241_v17 = vpop.f32.mrf.mxu1  ;;  %vm1405_vm15 = vcmp.eq.f32.partialorder %v1404_v29, 8.507059e+37  ;;  %v6219_v29 = vld [vmem:[#allocation3 + $0x778] sm:$0xff] }
 0x226   : > { %v6187_v59 = vadd.f32 %v1411_v24, %v1410_v44  ;;  %v1284_v32 = vadd.f32 %v1221_v33, %v1200_v7  ;;  %v1285_v35 = vadd.f32 %v1241_v17, %v1201_v22  ;;  %v1408_v37 = vsel %vm1405_vm15, %v1407_v2, %v1403_v30  ;;  %v6196_v44 = vld [vmem:[#allocation3 + $0x7e8] sm:$0xff]  ;;  %v6201_v7 = vld [vmem:[#allocation3 + $0x7f0] sm:$0xff]  ;;  %v6204_v22 = vld [vmem:[#allocation3 + $0x7f8] sm:$0xff]  ;;  %9608 = vst [vmem:[#allocation112_spill] sm:$0xff] %v6219_v29 }
 0x227   : > { %v6212_v33 = vld [vmem:[#allocation3 + $0x768] sm:$0xff]  ;;  %v6216_v17 = vld [vmem:[#allocation3 + $0x770] sm:$0xff]  ;;  %v6235_v2 = vld [vmem:[#allocation3 + $0x660] sm:$0xff] }
 0x228   : > { %4053 = vtanh.f32 %v6187_v59  ;;  %v3927_v24 = vmul.f32 -1.442695, %v1284_v32  ;;  %v3928_v28 = vmul.f32 -1.442695, %v1285_v35  ;;  %9607 = vst [vmem:[#allocation111_spill] sm:$0xff] %v6216_v17  ;;  %v6223_v32 = vld [vmem:[#allocation3 + $0x6e0] sm:$0xff] }
 0x229   : > { %9609 = vst [vmem:[#allocation113_spill] sm:$0xff] %v6223_v32  ;;  %v6226_v35 = vld [vmem:[#allocation3 + $0x6e8] sm:$0xff]  ;;  %v6229_v30 = vld [vmem:[#allocation3 + $0x6f0] sm:$0xff] }
 0x22a   : > { %4055 = vpow2.f32 %v3927_v24  ;;  %9610 = vst [vmem:[#allocation114_spill] sm:$0xff] %v6226_v35  ;;  %v6232_v24 = vld [vmem:[#allocation3 + $0x6f8] sm:$0xff] }
 0x22b   : > { %4057 = vpow2.f32 %v3928_v28  ;;  %9611 = vst [vmem:[#allocation115_spill] sm:$0xff] %v6229_v30 }
 0x22c   : > { %v1281_v10 = vpop.f32.mrf.mxu3  ;;  %9612 = vst [vmem:[#allocation116_spill] sm:$0xff] %v6232_v24  ;;  %v1261_v28 = vpop.f32.mrf.mxu2 }
 0x22d   : > { %v1287_v6 = vadd.f32 %v1281_v10, %v1203_v9  ;;  %9613 = vst [vmem:[#allocation117_spill] sm:$0xff] %v6235_v2  ;;  %v1202_v9 = vadd.f32 %v1173_v48, %v5696_v23  ;;  %v6242_v10 = vld [vmem:[#allocation3 + $0x670] sm:$0xff]  ;;  %v6271_v23 = vld [vmem:[#allocation3 + $0x560] sm:$0xff] }
 0x22e   : > { %v4054_v34 = vpop.eup %4053  ;;  %9615 = vst [vmem:[#allocation119_spill] sm:$0xff] %v6242_v10 }
 0x22f   : > { %v1414_v1 = vmul.f32 %v4054_v34, %v1408_v37  ;;  %v3929_v56 = vmul.f32 -1.442695, %v1287_v6  ;;  %v6238_v34 = vld [vmem:[#allocation3 + $0x668] sm:$0xff]  ;;  %v6245_v6 = vld [vmem:[#allocation3 + $0x678] sm:$0xff]  ;;  %9621 = vst [vmem:[#allocation125_spill] sm:$0xff] %v6271_v23 }
 0x230   : > { %v4056_v36 = vpop.eup %4055  ;;  %9614 = vst [vmem:[#allocation118_spill] sm:$0xff] %v6238_v34 }
 0x231   : > { %1431 = vmatmul.f32.vlgmr.msrb.gmra.mxu0 %v1414_v1  ;;  %1451 = vmatmul.f32.vlgmr.msrb.gmra.mxu1 %v1414_v1  ;;  %v4058_v38 = vpop.eup %4057  ;;  %v6199_v3 = vadd.f32 1.0, %v4056_v36  ;;  %4059 = vpow2.f32 %v3929_v56  ;;  %9616 = vst [vmem:[#allocation120_spill] sm:$0xff] %v6245_v6 }
 0x232   : > { %1471 = vmatmul.f32.vlgmr.msrb.gmra.mxu2 %v1414_v1  ;;  %1491 = vmatmul.f32.vlgmr.msrb.gmra.mxu3 %v1414_v1  ;;  %v6207_v15 = vadd.f32 1.0, %v4058_v38  ;;  %v1286_v38 = vadd.f32 %v1261_v28, %v1202_v9  ;;  %v6265_v9 = vld [vmem:[#allocation3 + $0x5f0] sm:$0xff] }
 0x233   : > { %1583 = vmatpush.msrb.mxu0 %v6193_v62  ;;  %1603 = vmatpush.msrb.mxu1 %v6196_v44  ;;  %4061 = vrcp.f32 %v6199_v3  ;;  %9619 = vst [vmem:[#allocation123_spill] sm:$0xff] %v6265_v9  ;;  %vm1297_vm2 = vweird.f32 %v6199_v3 }
 0x234   : > { %1623 = vmatpush.msrb.mxu2 %v6201_v7  ;;  %1643 = vmatpush.msrb.mxu3 %v6204_v22  ;;  %4063 = vrcp.f32 %v6207_v15  ;;  %vm1316_vm3 = vweird.f32 %v6207_v15 }
 0x235   : > { %1584 = vmatpush.msrb.mxu0 %v6209_v61  ;;  %1604 = vmatpush.msrb.mxu1 %v6212_v33 }
 0x236   : > { %1624 = vmatpush.msrb.mxu2 %v6216_v17  ;;  %1644 = vmatpush.msrb.mxu3 %v6219_v29  ;;  %v6347_v17 = vld [vmem:[#allocation3 + $0x3f0] sm:$0xff] }
 0x237   : > { %1585 = vmatpush.msrb.mxu0 %v6223_v32  ;;  %1605 = vmatpush.msrb.mxu1 %v6226_v35  ;;  %v4060_v37 = vpop.eup %4059  ;;  %v6323_v35 = vld [vmem:[#allocation3 + $0x470] sm:$0xff] }
 0x238   : > { %1625 = vmatpush.msrb.mxu2 %v6229_v30  ;;  %1645 = vmatpush.msrb.mxu3 %v6232_v24  ;;  %v6248_v56 = vadd.f32 1.0, %v4060_v37  ;;  %v6260_v37 = vld [vmem:[#allocation3 + $0x5e8] sm:$0xff]  ;;  %v6278_v24 = vld [vmem:[#allocation3 + $0x570] sm:$0xff]  ;;  %9633 = vst [vmem:[#allocation135_spill] sm:$0xff] %v6323_v35 }
 0x239   : > { %1586 = vmatpush.msrb.mxu0 %v6235_v2  ;;  %1606 = vmatpush.msrb.mxu1 %v6238_v34  ;;  %v6250_v36 = vpop.eup %4061  ;;  %9618 = vst [vmem:[#allocation122_spill] sm:$0xff] %v6260_v37  ;;  %v1303_v2 = vand.u32 2147483648, %v6199_v3 }
 0x23a   : > { %1626 = vmatpush.msrb.mxu2 %v6242_v10  ;;  %1646 = vmatpush.msrb.mxu3 %v6245_v6  ;;  %v6252_v34 = vpop.eup %4063  ;;  %v1293_v48 = vmul.f32 %v6250_v36, %v6199_v3  ;;  %4065 = vrcp.f32 %v6248_v56  ;;  %v6257_v10 = vld [vmem:[#allocation3 + $0x5e0] sm:$0xff]  ;;  %9623 = vst [vmem:[#allocation127_spill] sm:$0xff] %v6278_v24  ;;  %vm1298_vm0 = vweird.f32 %v6250_v36  ;;  %vm1336_vm9 = vweird.f32 %v6248_v56 }
 0x23b   : > { %1511 = vmatmul.f32.vlgmr.msra.gmra.mxu0 %v1414_v1  ;;  %1531 = vmatmul.f32.vlgmr.msra.gmra.mxu1 %v1414_v1  ;;  %9617 = vst [vmem:[#allocation121_spill] sm:$0xff] %v6257_v10  ;;  %v1312_v28 = vmul.f32 %v6252_v34, %v6207_v15  ;;  %4067 = vtanh.f32 %v1286_v38  ;;  %v6291_v38 = vld [vmem:[#allocation3 + $0x4e8] sm:$0xff]  ;;  %vm1317_vm1 = vweird.f32 %v6252_v34  ;;  %vm6316_vm4 = vmor %vm1297_vm2, %vm1298_vm0 }
 0x23c   : > { %1551 = vmatmul.f32.vlgmr.msra.gmra.mxu2 %v1414_v1  ;;  %1571 = vmatmul.f32.vlgmr.msra.gmra.mxu3 %v1414_v1  ;;  %v6268_v1 = vld [vmem:[#allocation3 + $0x5f8] sm:$0xff]  ;;  %v1294_v6 = vsub.f32 1.0, %v1293_v48  ;;  %v1322_v48 = vand.u32 2147483648, %v6207_v15  ;;  %9626 = vst [vmem:[#allocation130_spill] sm:$0xff] %v6291_v38  ;;  %vm6331_vm5 = vmor %vm1316_vm3, %vm1317_vm1 }
 0x23d   : > { %1587 = vmatpush.msrb.mxu0 %v6257_v10  ;;  %1607 = vmatpush.msrb.mxu1 %v6260_v37  ;;  %9620 = vst [vmem:[#allocation124_spill] sm:$0xff] %v6268_v1  ;;  %v6274_v10 = vld [vmem:[#allocation3 + $0x568] sm:$0xff]  ;;  %v1313_v37 = vsub.f32 1.0, %v1312_v28  ;;  %v6288_v28 = vld [vmem:[#allocation3 + $0x4e0] sm:$0xff] }
 0x23e   : > { %1627 = vmatpush.msrb.mxu2 %v6265_v9  ;;  %1647 = vmatpush.msrb.mxu3 %v6268_v1  ;;  %9622 = vst [vmem:[#allocation126_spill] sm:$0xff] %v6274_v10  ;;  %v6281_v9 = vld [vmem:[#allocation3 + $0x578] sm:$0xff]  ;;  %v6297_v1 = vld [vmem:[#allocation3 + $0x4f0] sm:$0xff] }
 0x23f   : > { %1588 = vmatpush.msrb.mxu0 %v6271_v23  ;;  %1608 = vmatpush.msrb.mxu1 %v6274_v10  ;;  %9624 = vst [vmem:[#allocation128_spill] sm:$0xff] %v6281_v9  ;;  %v1295_v23 = vmul.f32 %v6250_v36, %v1294_v6  ;;  %v1301_v10 = vand.u32 2147483647, %v6199_v3  ;;  %v6300_v6 = vld [vmem:[#allocation3 + $0x4f8] sm:$0xff] }
 0x240   : > { %1628 = vmatpush.msrb.mxu2 %v6278_v24  ;;  %1648 = vmatpush.msrb.mxu3 %v6281_v9  ;;  %9625 = vst [vmem:[#allocation129_spill] sm:$0xff] %v6288_v28  ;;  %v1314_v24 = vmul.f32 %v6252_v34, %v1313_v37  ;;  %v1320_v9 = vand.u32 2147483647, %v6207_v15  ;;  %v6303_v30 = vpop.eup %4065  ;;  %v6310_v37 = vld [vmem:[#allocation3 + $0x468] sm:$0xff]  ;;  %v6378_v15 = vld [vmem:[#allocation3 + $0x2f8] sm:$0xff] }
 0x241   : > { %1589 = vmatpush.msrb.mxu0 %v6288_v28  ;;  %1609 = vmatpush.msrb.mxu1 %v6291_v38  ;;  %9627 = vst [vmem:[#allocation131_spill] sm:$0xff] %v6297_v1  ;;  %v1296_v28 = vadd.f32 %v6250_v36, %v1295_v23  ;;  %v6307_v38 = vld [vmem:[#allocation3 + $0x460] sm:$0xff]  ;;  %v1332_v3 = vmul.f32 %v6303_v30, %v6248_v56  ;;  %vm1302_vm6 = vcmp.eq.f32.partialorder %v1301_v10, 8.507059e+37  ;;  %v6350_v10 = vld [vmem:[#allocation3 + $0x3f8] sm:$0xff]  ;;  %vm1337_vm8 = vweird.f32 %v6303_v30 }
 0x242   : > { %1629 = vmatpush.msrb.mxu2 %v6297_v1  ;;  %9628 = vst [vmem:[#allocation132_spill] sm:$0xff] %v6300_v6  ;;  %1649 = vmatpush.msrb.mxu3 %v6300_v6  ;;  %v1304_v1 = vor.u32 1.1754944e-38, %v1303_v2  ;;  %v1315_v23 = vadd.f32 %v6252_v34, %v1314_v24  ;;  %v1323_v2 = vor.u32 1.1754944e-38, %v1322_v48  ;;  %vm1321_vm7 = vcmp.eq.f32.partialorder %v1320_v9, 8.507059e+37  ;;  %v6353_v6 = vld [vmem:[#allocation3 + $0x360] sm:$0xff]  ;;  %vm6407_vm10 = vmor %vm1336_vm9, %vm1337_vm8 }
 0x243   : > { %9629 = vst [vmem:[#allocation133_spill] sm:$0xff] %v6307_v38  ;;  %1590 = vmatpush.msrb.mxu0 %v6307_v38  ;;  %1610 = vmatpush.msrb.mxu1 %v6310_v37  ;;  %v6326_v38 = vld [vmem:[#allocation3 + $0x478] sm:$0xff]  ;;  %v1300_v24 = vsel %vm6316_vm4, %v6250_v36, %v1296_v28  ;;  %v1333_v48 = vsub.f32 1.0, %v1332_v3 }
 0x244   : > { %9630 = vst [vmem:[#allocation134_spill] sm:$0xff] %v6310_v37  ;;  %1630 = vmatpush.msrb.mxu2 %v6323_v35  ;;  %1650 = vmatpush.msrb.mxu3 %v6326_v38  ;;  %v6338_v37 = vld [vmem:[#allocation3 + $0x3e0] sm:$0xff]  ;;  %v6341_v35 = vld [vmem:[#allocation3 + $0x3e8] sm:$0xff]  ;;  %v1305_v32 = vsel %vm1302_vm6, %v1304_v1, %v1300_v24  ;;  %v1319_v29 = vsel %vm6331_vm5, %v6252_v34, %v1315_v23  ;;  %v6361_v23 = vld [vmem:[#allocation3 + $0x370] sm:$0xff] }
 0x245   : > { %9634 = vst [vmem:[#allocation136_spill] sm:$0xff] %v6326_v38  ;;  %1591 = vmatpush.msrb.mxu0 %v6338_v37  ;;  %1611 = vmatpush.msrb.mxu1 %v6341_v35  ;;  %v4068_v38 = vpop.eup %4067  ;;  %v1324_v36 = vsel %vm1321_vm7, %v1323_v2, %v1319_v29  ;;  %v6356_v1 = vld [vmem:[#allocation3 + $0x368] sm:$0xff]  ;;  %v1334_v9 = vmul.f32 %v6303_v30, %v1333_v48  ;;  %v6364_v3 = vld [vmem:[#allocation3 + $0x378] sm:$0xff]  ;;  %v6367_v29 = vld [vmem:[#allocation3 + $0x2e0] sm:$0xff] }
 0x246   : > { %1631 = vmatpush.msrb.mxu2 %v6347_v17  ;;  %1651 = vmatpush.msrb.mxu3 %v6350_v10  ;;  %v1347_v28 = vmul.f32 %v4068_v38, %v1305_v32  ;;  %v1346_v34 = vmul.f32 %v1324_v36, %v5755_v25  ;;  %v6370_v32 = vld [vmem:[#allocation3 + $0x2e8] sm:$0xff]  ;;  %v6375_v25 = vld [vmem:[#allocation3 + $0x2f0] sm:$0xff]  ;;  %9639 = vst [vmem:[#allocation139_spill] sm:$0xff] %v6378_v15  ;;  %v6382_v2 = vld [vmem:[#allocation3 + $0x260] sm:$0xff]  ;;  %v1342_v36 = vand.u32 2147483648, %v6248_v56 }
 0x247   : > { %1592 = vmatpush.msrb.mxu0 %v6353_v6  ;;  %1612 = vmatpush.msrb.mxu1 %v6356_v1  ;;  %9637 = vst [vmem:[#allocation137_spill] sm:$0xff] %v6370_v32  ;;  %v6385_v24 = vld [vmem:[#allocation3 + $0x268] sm:$0xff]  ;;  %v1335_v48 = vadd.f32 %v6303_v30, %v1334_v9  ;;  %v1340_v9 = vand.u32 2147483647, %v6248_v56 }
 0x248   : > { %1632 = vmatpush.msrb.mxu2 %v6361_v23  ;;  %1652 = vmatpush.msrb.mxu3 %v6364_v3  ;;  %v6373_v38 = vadd.f32 %v1347_v28, %v1346_v34  ;;  %9638 = vst [vmem:[#allocation138_spill] sm:$0xff] %v6375_v25  ;;  %v6391_v28 = vld [vmem:[#allocation3 + $0x270] sm:$0xff]  ;;  %v6394_v34 = vld [vmem:[#allocation3 + $0x278] sm:$0xff] }
 0x249   : > { %1593 = vmatpush.msrb.mxu0 %v6367_v29  ;;  %1613 = vmatpush.msrb.mxu1 %v6370_v32  ;;  %9640 = vst [vmem:[#allocation140_spill] sm:$0xff] %v6382_v2  ;;  %v1339_v56 = vsel %vm6407_vm10, %v6303_v30, %v1335_v48  ;;  %v6426_v32 = vld [vmem:[#allocation3 + $0x170] sm:$0xff]  ;;  %vm1341_vm11 = vcmp.eq.f32.partialorder %v1340_v9, 8.507059e+37  ;;  %v6441_v48 = vld [vmem:[#allocation3 + $0xf8] sm:$0xff] }
 0x24a   : > { %1633 = vmatpush.msrb.mxu2 %v6375_v25  ;;  %1653 = vmatpush.msrb.mxu3 %v6378_v15  ;;  %9641 = vst [vmem:[#allocation141_spill] sm:$0xff] %v6385_v24  ;;  %4069 = vtanh.f32 %v6373_v38  ;;  %v6411_v15 = vld [vmem:[#allocation3 + $0x1f0] sm:$0xff]  ;;  %v1343_v25 = vor.u32 1.1754944e-38, %v1342_v36 }
 0x24b   : > { %1594 = vmatpush.msrb.mxu0 %v6382_v2  ;;  %1614 = vmatpush.msrb.mxu1 %v6385_v24  ;;  %9642 = vst [vmem:[#allocation142_spill] sm:$0xff] %v6391_v28  ;;  %v6398_v2 = vld [vmem:[#allocation3 + $0x1e0] sm:$0xff]  ;;  %v6401_v24 = vld [vmem:[#allocation3 + $0x1e8] sm:$0xff]  ;;  %v6438_v30 = vld [vmem:[#allocation3 + $0xf0] sm:$0xff] }
 0x24c   : > { %1634 = vmatpush.msrb.mxu2 %v6391_v28  ;;  %9643 = vst [vmem:[#allocation143_spill] sm:$0xff] %v6394_v34  ;;  %1654 = vmatpush.msrb.mxu3 %v6394_v34  ;;  %v6414_v34 = vld [vmem:[#allocation3 + $0x1f8] sm:$0xff]  ;;  %v1344_v36 = vsel %vm1341_vm11, %v1343_v25, %v1339_v56  ;;  %v6452_v9 = vld [vmem:[#allocation3 + $0x70] sm:$0xff]  ;;  %v9688_v25 = vld [vmem:[#allocation43_spill] sm:$0xff] }
 0x24d   : > { %9644 = vst [vmem:[#allocation144_spill] sm:$0xff] %v6398_v2  ;;  %1595 = vmatpush.msrb.mxu0 %v6398_v2  ;;  %1615 = vmatpush.msrb.mxu1 %v6401_v24  ;;  %v6417_v2 = vld [vmem:[#allocation3 + $0x160] sm:$0xff]  ;;  %v9689_v56 = vld [vmem:[#allocation44_spill] sm:$0xff] }
 0x24e   : > { %9645 = vst [vmem:[#allocation145_spill] sm:$0xff] %v6401_v24  ;;  %1635 = vmatpush.msrb.mxu2 %v6411_v15  ;;  %1655 = vmatpush.msrb.mxu3 %v6414_v34  ;;  %v6420_v24 = vld [vmem:[#allocation3 + $0x168] sm:$0xff] }
 0x24f   : > { %9648 = vst [vmem:[#allocation146_spill] sm:$0xff] %v6411_v15  ;;  %1596 = vmatpush.msrb.mxu0 %v6417_v2  ;;  %1616 = vmatpush.msrb.mxu1 %v6420_v24  ;;  %v6429_v15 = vld [vmem:[#allocation3 + $0x178] sm:$0xff] }
 0x250   : > { %9649 = vst [vmem:[#allocation147_spill] sm:$0xff] %v6414_v34  ;;  %1636 = vmatpush.msrb.mxu2 %v6426_v32  ;;  %1656 = vmatpush.msrb.mxu3 %v6429_v15  ;;  %v6432_v34 = vld [vmem:[#allocation3 + $0xe0] sm:$0xff]  ;;  %v4070_v28 = vpop.eup %4069 }
 0x251   : > { %9650 = vst [vmem:[#allocation148_spill] sm:$0xff] %v6417_v2  ;;  %1597 = vmatpush.msrb.mxu0 %v6432_v34  ;;  %v6435_v2 = vld [vmem:[#allocation3 + $0xe8] sm:$0xff] }
 0x252   : > { %9651 = vst [vmem:[#allocation149_spill] sm:$0xff] %v6429_v15  ;;  %1617 = vmatpush.msrb.mxu1 %v6435_v2  ;;  %1637 = vmatpush.msrb.mxu2 %v6438_v30  ;;  %v6444_v15 = vld [vmem:[#allocation3 + $0x60] sm:$0xff] }
 0x253   : > { %9652 = vst [vmem:[#allocation150_spill] sm:$0xff] %v6432_v34  ;;  %1657 = vmatpush.msrb.mxu3 %v6441_v48  ;;  %1598 = vmatpush.msrb.mxu0 %v6444_v15  ;;  %v6447_v34 = vld [vmem:[#allocation3 + $0x68] sm:$0xff] }
 0x254   : > { %9653 = vst [vmem:[#allocation151_spill] sm:$0xff] %v6435_v2  ;;  %1618 = vmatpush.msrb.mxu1 %v6447_v34  ;;  %v6450_v2 = vmul.f32 %v4070_v28, %v1344_v36  ;;  %1638 = vmatpush.msrb.mxu2 %v6452_v9  ;;  %v9690_v28 = vld [vmem:[#allocation45_spill] sm:$0xff]  ;;  %v9691_v36 = vld [vmem:[#allocation46_spill] sm:$0xff] }
 0x255   : > { %9654 = vst [vmem:[#allocation152_spill] sm:$0xff] %v6438_v30  ;;  %v6455_v30 = vld [vmem:[#allocation3 + $0x78] sm:$0xff]  ;;  %1794 = vmatpush.msra.mxu0 %v5798_v8  ;;  %v9656_v8 = vld [vmem:[#allocation11_spill] sm:$0xff] }
 0x256   : > { %9655 = vst [vmem:[#allocation153_spill] sm:$0xff] %v6450_v2  ;;  %1658 = vmatpush.msrb.mxu3 %v6455_v30  ;;  %1599 = vmatmul.f32.vlgmr.msrb.gmra.mxu0 %v6450_v2 }
 0x257   : > { %1619 = vmatmul.f32.vlgmr.msrb.gmra.mxu1 %v6450_v2  ;;  %1639 = vmatmul.f32.vlgmr.msrb.gmra.mxu2 %v6450_v2 }
 0x258   : > { %1659 = vmatmul.f32.vlgmr.msrb.gmra.mxu3 %v6450_v2  ;;  %1814 = vmatpush.msra.mxu1 %v5801_v60  ;;  %v9657_v60 = vld [vmem:[#allocation12_spill] sm:$0xff]  ;;  %v6871_v2 = vld [vmem:[#allocation3 + $0x128] sm:$0xff] }
 0x259   : > { %1834 = vmatpush.msra.mxu2 %v5804_v52  ;;  %1854 = vmatpush.msra.mxu3 %v5807_v54  ;;  %v9658_v52 = vld [vmem:[#allocation13_spill] sm:$0xff]  ;;  %v9659_v54 = vld [vmem:[#allocation14_spill] sm:$0xff] }
 0x25a   : > { %1795 = vmatpush.msra.mxu0 %v5810_v4  ;;  %1815 = vmatpush.msra.mxu1 %v5813_v47  ;;  %v9660_v4 = vld [vmem:[#allocation15_spill] sm:$0xff]  ;;  %v9661_v47 = vld [vmem:[#allocation16_spill] sm:$0xff] }
 0x25b   : > { %1835 = vmatpush.msra.mxu2 %v5816_v49  ;;  %1855 = vmatpush.msra.mxu3 %v5819_v45  ;;  %v9662_v49 = vld [vmem:[#allocation17_spill] sm:$0xff]  ;;  %v9663_v45 = vld [vmem:[#allocation18_spill] sm:$0xff] }
 0x25c   : > { %1796 = vmatpush.msra.mxu0 %v5822_v43  ;;  %1816 = vmatpush.msra.mxu1 %v5825_v13  ;;  %v9664_v43 = vld [vmem:[#allocation19_spill] sm:$0xff]  ;;  %v9665_v13 = vld [vmem:[#allocation20_spill] sm:$0xff] }
 0x25d   : > { %1836 = vmatpush.msra.mxu2 %v5828_v14  ;;  %1856 = vmatpush.msra.mxu3 %v5831_v31  ;;  %v9666_v14 = vld [vmem:[#allocation21_spill] sm:$0xff]  ;;  %v9667_v31 = vld [vmem:[#allocation22_spill] sm:$0xff] }
 0x25e   : > { %1797 = vmatpush.msra.mxu0 %v5834_v16  ;;  %1817 = vmatpush.msra.mxu1 %v5837_v18  ;;  %v9668_v16 = vld [vmem:[#allocation23_spill] sm:$0xff]  ;;  %v9669_v18 = vld [vmem:[#allocation24_spill] sm:$0xff] }
 0x25f   : > { %1837 = vmatpush.msra.mxu2 %v5840_v5  ;;  %1857 = vmatpush.msra.mxu3 %v5843_v19  ;;  %v9670_v5 = vld [vmem:[#allocation25_spill] sm:$0xff]  ;;  %v9671_v19 = vld [vmem:[#allocation26_spill] sm:$0xff] }
 0x260   : > { %1798 = vmatpush.msra.mxu0 %v5846_v20  ;;  %1818 = vmatpush.msra.mxu1 %v5849_v21  ;;  %v9672_v20 = vld [vmem:[#allocation27_spill] sm:$0xff]  ;;  %v9673_v21 = vld [vmem:[#allocation28_spill] sm:$0xff] }
 0x261   : > { %1838 = vmatpush.msra.mxu2 %v5852_v46  ;;  %1858 = vmatpush.msra.mxu3 %v5855_v42  ;;  %v9674_v46 = vld [vmem:[#allocation29_spill] sm:$0xff]  ;;  %v9675_v42 = vld [vmem:[#allocation30_spill] sm:$0xff] }
 0x262   : > { %1799 = vmatpush.msra.mxu0 %v5858_v39  ;;  %1819 = vmatpush.msra.mxu1 %v5861_v40  ;;  %v9676_v39 = vld [vmem:[#allocation31_spill] sm:$0xff]  ;;  %v9677_v40 = vld [vmem:[#allocation32_spill] sm:$0xff] }
 0x263   : > { %1839 = vmatpush.msra.mxu2 %v5864_v41  ;;  %1859 = vmatpush.msra.mxu3 %v5867_v0  ;;  %v9678_v41 = vld [vmem:[#allocation33_spill] sm:$0xff]  ;;  %v9679_v0 = vld [vmem:[#allocation34_spill] sm:$0xff] }
 0x264   : > { %1800 = vmatpush.msra.mxu0 %v5870_v58  ;;  %1820 = vmatpush.msra.mxu1 %v5873_v55  ;;  %v9680_v58 = vld [vmem:[#allocation35_spill] sm:$0xff]  ;;  %v9681_v55 = vld [vmem:[#allocation36_spill] sm:$0xff]  ;;  %9823 = vst [vmem:[#allocation33_spill] sm:$0xff] %v6871_v2 }
 0x265   : > { %1840 = vmatpush.msra.mxu2 %v5876_v57  ;;  %1860 = vmatpush.msra.mxu3 %v5879_v53  ;;  %v9682_v57 = vld [vmem:[#allocation37_spill] sm:$0xff]  ;;  %v9683_v53 = vld [vmem:[#allocation38_spill] sm:$0xff] }
 0x266   : > { %1801 = vmatpush.msra.mxu0 %v5882_v51  ;;  %1821 = vmatpush.msra.mxu1 %v5885_v50  ;;  %v9684_v51 = vld [vmem:[#allocation39_spill] sm:$0xff]  ;;  %v9685_v50 = vld [vmem:[#allocation40_spill] sm:$0xff] }
 0x267   : > { %1841 = vmatpush.msra.mxu2 %v5888_v11  ;;  %1861 = vmatpush.msra.mxu3 %v5891_v12  ;;  %v9686_v11 = vld [vmem:[#allocation41_spill] sm:$0xff]  ;;  %v9687_v12 = vld [vmem:[#allocation42_spill] sm:$0xff] }
 0x268   : > { %1802 = vmatpush.msra.mxu0 %v9656_v8  ;;  %1822 = vmatpush.msra.mxu1 %v9657_v60  ;;  %v9692_v8 = vld [vmem:[#allocation47_spill] sm:$0xff]  ;;  %v9693_v60 = vld [vmem:[#allocation48_spill] sm:$0xff] }
 0x269   : > { %1842 = vmatpush.msra.mxu2 %v9658_v52  ;;  %1862 = vmatpush.msra.mxu3 %v9659_v54  ;;  %v9694_v52 = vld [vmem:[#allocation49_spill] sm:$0xff]  ;;  %v9695_v54 = vld [vmem:[#allocation50_spill] sm:$0xff] }
 0x26a   : > { %1803 = vmatpush.msra.mxu0 %v9660_v4  ;;  %1823 = vmatpush.msra.mxu1 %v9661_v47  ;;  %v9696_v4 = vld [vmem:[#allocation51_spill] sm:$0xff]  ;;  %v9697_v47 = vld [vmem:[#allocation52_spill] sm:$0xff] }
 0x26b   : > { %1843 = vmatpush.msra.mxu2 %v9662_v49  ;;  %1863 = vmatpush.msra.mxu3 %v9663_v45  ;;  %v9698_v49 = vld [vmem:[#allocation53_spill] sm:$0xff]  ;;  %v9699_v45 = vld [vmem:[#allocation54_spill] sm:$0xff] }
 0x26c   : > { %1804 = vmatpush.msra.mxu0 %v9664_v43  ;;  %1824 = vmatpush.msra.mxu1 %v9665_v13  ;;  %v9700_v43 = vld [vmem:[#allocation55_spill] sm:$0xff]  ;;  %v9701_v13 = vld [vmem:[#allocation56_spill] sm:$0xff] }
 0x26d   : > { %1844 = vmatpush.msra.mxu2 %v9666_v14  ;;  %1864 = vmatpush.msra.mxu3 %v9667_v31  ;;  %v9702_v14 = vld [vmem:[#allocation57_spill] sm:$0xff]  ;;  %v9703_v31 = vld [vmem:[#allocation58_spill] sm:$0xff] }
 0x26e   : > { %1805 = vmatpush.msra.mxu0 %v9668_v16  ;;  %1825 = vmatpush.msra.mxu1 %v9669_v18  ;;  %v9704_v16 = vld [vmem:[#allocation59_spill] sm:$0xff]  ;;  %v9705_v18 = vld [vmem:[#allocation60_spill] sm:$0xff] }
 0x26f   : > { %1845 = vmatpush.msra.mxu2 %v9670_v5  ;;  %1865 = vmatpush.msra.mxu3 %v9671_v19  ;;  %v9706_v5 = vld [vmem:[#allocation61_spill] sm:$0xff]  ;;  %v9707_v19 = vld [vmem:[#allocation62_spill] sm:$0xff] }
 0x270   : > { %1806 = vmatpush.msra.mxu0 %v9672_v20  ;;  %1826 = vmatpush.msra.mxu1 %v9673_v21  ;;  %v9708_v20 = vld [vmem:[#allocation63_spill] sm:$0xff]  ;;  %v9709_v21 = vld [vmem:[#allocation64_spill] sm:$0xff] }
 0x271   : > { %1846 = vmatpush.msra.mxu2 %v9674_v46  ;;  %1866 = vmatpush.msra.mxu3 %v9675_v42  ;;  %v9710_v46 = vld [vmem:[#allocation65_spill] sm:$0xff]  ;;  %v9711_v42 = vld [vmem:[#allocation66_spill] sm:$0xff] }
 0x272   : > { %1807 = vmatpush.msra.mxu0 %v9676_v39  ;;  %1827 = vmatpush.msra.mxu1 %v9677_v40  ;;  %v9712_v39 = vld [vmem:[#allocation67_spill] sm:$0xff]  ;;  %v9713_v40 = vld [vmem:[#allocation68_spill] sm:$0xff] }
 0x273   : > { %1847 = vmatpush.msra.mxu2 %v9678_v41  ;;  %1867 = vmatpush.msra.mxu3 %v9679_v0  ;;  %v9714_v41 = vld [vmem:[#allocation69_spill] sm:$0xff]  ;;  %v9715_v0 = vld [vmem:[#allocation70_spill] sm:$0xff] }
 0x274   : > { %1808 = vmatpush.msra.mxu0 %v9680_v58  ;;  %1828 = vmatpush.msra.mxu1 %v9681_v55  ;;  %v9716_v58 = vld [vmem:[#allocation71_spill] sm:$0xff]  ;;  %v9717_v55 = vld [vmem:[#allocation72_spill] sm:$0xff] }
 0x275   : > { %1848 = vmatpush.msra.mxu2 %v9682_v57  ;;  %1868 = vmatpush.msra.mxu3 %v9683_v53  ;;  %v9718_v57 = vld [vmem:[#allocation73_spill] sm:$0xff]  ;;  %v9719_v53 = vld [vmem:[#allocation75_spill] sm:$0xff] }
 0x276   : > { %1809 = vmatpush.msra.mxu0 %v9684_v51  ;;  %1829 = vmatpush.msra.mxu1 %v9685_v50  ;;  %v9720_v51 = vld [vmem:[#allocation76_spill] sm:$0xff]  ;;  %v9721_v50 = vld [vmem:[#allocation78_spill] sm:$0xff] }
 0x277   : > { %1849 = vmatpush.msra.mxu2 %v9686_v11  ;;  %1869 = vmatpush.msra.mxu3 %v9687_v12  ;;  %v9722_v11 = vld [vmem:[#allocation79_spill] sm:$0xff]  ;;  %v9723_v12 = vld [vmem:[#allocation80_spill] sm:$0xff] }
 0x278   : > { %1874 = vmatpush.msrb.mxu0 %v9688_v25  ;;  %1894 = vmatpush.msrb.mxu1 %v9689_v56  ;;  %v9724_v25 = vld [vmem:[#allocation81_spill] sm:$0xff]  ;;  %v9725_v56 = vld [vmem:[#allocation82_spill] sm:$0xff] }
 0x279   : > { %1914 = vmatpush.msrb.mxu2 %v9690_v28  ;;  %1934 = vmatpush.msrb.mxu3 %v9691_v36  ;;  %v9726_v28 = vld [vmem:[#allocation83_spill] sm:$0xff]  ;;  %v9727_v36 = vld [vmem:[#allocation84_spill] sm:$0xff] }
 0x27a   : > { %1875 = vmatpush.msrb.mxu0 %v9692_v8  ;;  %1895 = vmatpush.msrb.mxu1 %v9693_v60  ;;  %v9728_v8 = vld [vmem:[#allocation85_spill] sm:$0xff]  ;;  %v9729_v60 = vld [vmem:[#allocation86_spill] sm:$0xff] }
 0x27b   : > { %1915 = vmatpush.msrb.mxu2 %v9694_v52  ;;  %1935 = vmatpush.msrb.mxu3 %v9695_v54  ;;  %v9730_v52 = vld [vmem:[#allocation87_spill] sm:$0xff]  ;;  %v9731_v54 = vld [vmem:[#allocation88_spill] sm:$0xff] }
 0x27c   : > { %1876 = vmatpush.msrb.mxu0 %v9696_v4  ;;  %1896 = vmatpush.msrb.mxu1 %v9697_v47  ;;  %v9732_v4 = vld [vmem:[#allocation89_spill] sm:$0xff]  ;;  %v9733_v47 = vld [vmem:[#allocation91_spill] sm:$0xff] }
 0x27d   : > { %1916 = vmatpush.msrb.mxu2 %v9698_v49  ;;  %1936 = vmatpush.msrb.mxu3 %v9699_v45  ;;  %v9734_v49 = vld [vmem:[#allocation92_spill] sm:$0xff]  ;;  %v9735_v45 = vld [vmem:[#allocation93_spill] sm:$0xff] }
 0x27e   : > { %1877 = vmatpush.msrb.mxu0 %v9700_v43  ;;  %1897 = vmatpush.msrb.mxu1 %v9701_v13  ;;  %v9736_v43 = vld [vmem:[#allocation94_spill] sm:$0xff]  ;;  %v9737_v13 = vld [vmem:[#allocation95_spill] sm:$0xff] }
 0x27f   : > { %1917 = vmatpush.msrb.mxu2 %v9702_v14  ;;  %1937 = vmatpush.msrb.mxu3 %v9703_v31  ;;  %v9738_v14 = vld [vmem:[#allocation96_spill] sm:$0xff]  ;;  %v9739_v31 = vld [vmem:[#allocation97_spill] sm:$0xff] }
 0x280   : > { %1878 = vmatpush.msrb.mxu0 %v9704_v16  ;;  %1898 = vmatpush.msrb.mxu1 %v9705_v18  ;;  %v9740_v16 = vld [vmem:[#allocation98_spill] sm:$0xff]  ;;  %v9741_v18 = vld [vmem:[#allocation100_spill] sm:$0xff] }
 0x281   : > { %1918 = vmatpush.msrb.mxu2 %v9706_v5  ;;  %1938 = vmatpush.msrb.mxu3 %v9707_v19  ;;  %v9742_v5 = vld [vmem:[#allocation101_spill] sm:$0xff]  ;;  %v9743_v19 = vld [vmem:[#allocation102_spill] sm:$0xff] }
 0x282   : > { %1879 = vmatpush.msrb.mxu0 %v9708_v20  ;;  %1899 = vmatpush.msrb.mxu1 %v9709_v21  ;;  %v9744_v20 = vld [vmem:[#allocation103_spill] sm:$0xff]  ;;  %v9745_v21 = vld [vmem:[#allocation104_spill] sm:$0xff] }
 0x283   : > { %1919 = vmatpush.msrb.mxu2 %v9710_v46  ;;  %1939 = vmatpush.msrb.mxu3 %v9711_v42  ;;  %v9746_v46 = vld [vmem:[#allocation105_spill] sm:$0xff]  ;;  %v9747_v42 = vld [vmem:[#allocation106_spill] sm:$0xff] }
 0x284   : > { %1880 = vmatpush.msrb.mxu0 %v9712_v39  ;;  %1900 = vmatpush.msrb.mxu1 %v9713_v40  ;;  %v9748_v39 = vld [vmem:[#allocation107_spill] sm:$0xff]  ;;  %v9749_v40 = vld [vmem:[#allocation108_spill] sm:$0xff] }
 0x285   : > { %1920 = vmatpush.msrb.mxu2 %v9714_v41  ;;  %1940 = vmatpush.msrb.mxu3 %v9715_v0  ;;  %v9750_v41 = vld [vmem:[#allocation109_spill] sm:$0xff]  ;;  %v9751_v0 = vld [vmem:[#allocation110_spill] sm:$0xff] }
 0x286   : > { %1881 = vmatpush.msrb.mxu0 %v9716_v58  ;;  %1901 = vmatpush.msrb.mxu1 %v9717_v55 }
 0x287   : > { %1921 = vmatpush.msrb.mxu2 %v9718_v57  ;;  %1941 = vmatpush.msrb.mxu3 %v9719_v53  ;;  %v9752_v57 = vld [vmem:[#allocation74_spill] sm:$0xff] }
 0x288   : > { %1882 = vmatpush.msrb.mxu0 %v9720_v51  ;;  %1902 = vmatpush.msrb.mxu1 %v9721_v50  ;;  %v9753_v51 = vld [vmem:[#allocation77_spill] sm:$0xff] }
 0x289   : > { %1922 = vmatpush.msrb.mxu2 %v9722_v11  ;;  %1942 = vmatpush.msrb.mxu3 %v9723_v12 }
 0x28a   : > { %1883 = vmatpush.msrb.mxu0 %v9724_v25  ;;  %1903 = vmatpush.msrb.mxu1 %v9725_v56  ;;  %v9754_v56 = vld [vmem:[#allocation90_spill] sm:$0xff] }
 0x28b   : > { %1923 = vmatpush.msrb.mxu2 %v9726_v28  ;;  %1943 = vmatpush.msrb.mxu3 %v9727_v36 }
 0x28c   : > { %1884 = vmatpush.msrb.mxu0 %v9728_v8  ;;  %1904 = vmatpush.msrb.mxu1 %v9729_v60 }
 0x28d   : > { %1924 = vmatpush.msrb.mxu2 %v9730_v52  ;;  %1944 = vmatpush.msrb.mxu3 %v9731_v54 }
 0x28e   : > { %1885 = vmatpush.msrb.mxu0 %v9732_v4  ;;  %1905 = vmatpush.msrb.mxu1 %v9733_v47 }
 0x28f   : > { %1925 = vmatpush.msrb.mxu2 %v9734_v49  ;;  %1945 = vmatpush.msrb.mxu3 %v9735_v45 }
 0x290   : > { %1886 = vmatpush.msrb.mxu0 %v9736_v43  ;;  %1906 = vmatpush.msrb.mxu1 %v9737_v13  ;;  %v9755_v43 = vld [vmem:[#allocation99_spill] sm:$0xff] }
 0x291   : > { %1926 = vmatpush.msrb.mxu2 %v9738_v14  ;;  %1946 = vmatpush.msrb.mxu3 %v9739_v31 }
 0x292   : > { %1887 = vmatpush.msrb.mxu0 %v9740_v16  ;;  %1907 = vmatpush.msrb.mxu1 %v9741_v18 }
 0x293   : > { %1927 = vmatpush.msrb.mxu2 %v9742_v5  ;;  %1947 = vmatpush.msrb.mxu3 %v9743_v19 }
 0x294   : > { %1888 = vmatpush.msrb.mxu0 %v9744_v20  ;;  %1908 = vmatpush.msrb.mxu1 %v9745_v21 }
 0x295   : > { %1928 = vmatpush.msrb.mxu2 %v9746_v46  ;;  %1948 = vmatpush.msrb.mxu3 %v9747_v42 }
 0x296   : > { %1889 = vmatpush.msrb.mxu0 %v9748_v39  ;;  %1909 = vmatpush.msrb.mxu1 %v9749_v40 }
 0x297   : > { %1929 = vmatpush.msrb.mxu2 %v9750_v41  ;;  %1949 = vmatpush.msrb.mxu3 %v9751_v0 }
 0x2ae   : > { %v1432_v58 = vpop.f32.mrf.mxu0  ;;  %v1452_v55 = vpop.f32.mrf.mxu1 }
 0x2af   : > { %v1575_v53 = vadd.f32 %v1432_v58, %v9752_v57  ;;  %v1576_v50 = vadd.f32 %v1452_v55, %v9753_v51 }
 0x2b1   : > { %v3936_v11 = vmul.f32 -1.442695, %v1575_v53  ;;  %v3937_v12 = vmul.f32 -1.442695, %v1576_v50 }
 0x2b3   : > { %4071 = vpow2.f32 %v3936_v11 }
 0x2b4   : > { %4073 = vpow2.f32 %v3937_v12 }
 0x2b5   : > { %v1492_v25 = vpop.f32.mrf.mxu3  ;;  %v1472_v4 = vpop.f32.mrf.mxu2 }
 0x2b6   : > { %v1578_v28 = vadd.f32 %v1492_v25, %v9754_v56  ;;  %v1577_v13 = vadd.f32 %v1472_v4, %v9755_v43 }
 0x2b8   : > { %v3938_v36 = vmul.f32 -1.442695, %v1578_v28  ;;  %v1512_v53 = vpop.f32.mrf.mxu0  ;;  %v1532_v50 = vpop.f32.mrf.mxu1 }
 0x2b9   : > { %v4072_v8 = vpop.eup %4071 }
 0x2ba   : > { %v4074_v60 = vpop.eup %4073  ;;  %v1734_v52 = vadd.f32 1.0, %v4072_v8  ;;  %4075 = vpow2.f32 %v3938_v36 }
 0x2bb   : > { %v1753_v54 = vadd.f32 1.0, %v4074_v60 }
 0x2bc   : > { %4077 = vrcp.f32 %v1734_v52  ;;  %v1746_v19 = vand.u32 2147483648, %v1734_v52  ;;  %v1744_v46 = vand.u32 2147483647, %v1734_v52  ;;  %vm1740_vm14 = vweird.f32 %v1734_v52 }
 0x2bd   : > { %4079 = vrcp.f32 %v1753_v54  ;;  %v1765_v20 = vand.u32 2147483648, %v1753_v54  ;;  %v1763_v39 = vand.u32 2147483647, %v1753_v54  ;;  %vm1759_vm15 = vweird.f32 %v1753_v54 }
 0x2be   : > { %v1747_v0 = vor.u32 1.1754944e-38, %v1746_v19  ;;  %vm1745_vm2 = vcmp.eq.f32.partialorder %v1744_v46, 8.507059e+37 }
 0x2bf   : > { %v1766_v11 = vor.u32 1.1754944e-38, %v1765_v20  ;;  %vm1764_vm3 = vcmp.eq.f32.partialorder %v1763_v39, 8.507059e+37 }
 0x2c0   : > { %v4076_v47 = vpop.eup %4075 }
 0x2c1   : > { %v1773_v49 = vadd.f32 1.0, %v4076_v47 }
 0x2c2   : > { %v4078_v45 = vpop.eup %4077 }
 0x2c3   : > { %v4080_v14 = vpop.eup %4079  ;;  %v1736_v31 = vmul.f32 %v4078_v45, %v1734_v52  ;;  %4081 = vrcp.f32 %v1773_v49  ;;  %vm1741_vm12 = vweird.f32 %v4078_v45  ;;  %vm1779_vm5 = vweird.f32 %v1773_v49 }
 0x2c4   : > { %v1755_v16 = vmul.f32 %v4080_v14, %v1753_v54  ;;  %4083 = vtanh.f32 %v1577_v13  ;;  %vm1760_vm13 = vweird.f32 %v4080_v14  ;;  %vm1742_vm0 = vmor %vm1740_vm14, %vm1741_vm12  ;;  %v1783_v19 = vand.u32 2147483647, %v1773_v49 }
 0x2c5   : > { %v1737_v18 = vsub.f32 1.0, %v1736_v31  ;;  %vm1761_vm1 = vmor %vm1759_vm15, %vm1760_vm13  ;;  %v1579_v31 = vadd.f32 %v1512_v53, %v5667_v26 }
 0x2c6   : > { %v1756_v5 = vsub.f32 1.0, %v1755_v16  ;;  %v1580_v16 = vadd.f32 %v1532_v50, %v5670_v27  ;;  %vm1784_vm7 = vcmp.eq.f32.partialorder %v1783_v19, 8.507059e+37  ;;  %v9767_v19 = vld [vmem:[#allocation121_spill] sm:$0xff] }
 0x2c7   : > { %v1738_v21 = vmul.f32 %v4078_v45, %v1737_v18  ;;  %v1785_v18 = vand.u32 2147483648, %v1773_v49 }
 0x2c8   : > { %v1757_v42 = vmul.f32 %v4080_v14, %v1756_v5 }
 0x2c9   : > { %v4082_v40 = vpop.eup %4081  ;;  %v1739_v41 = vadd.f32 %v4078_v45, %v1738_v21  ;;  %v1786_v39 = vor.u32 1.1754944e-38, %v1785_v18 }
 0x2ca   : > { %v1758_v58 = vadd.f32 %v4080_v14, %v1757_v42  ;;  %v1775_v55 = vmul.f32 %v4082_v40, %v1773_v49  ;;  %v4084_v25 = vpop.eup %4083  ;;  %vm1780_vm4 = vweird.f32 %v4082_v40 }
 0x2cb   : > { %v1743_v12 = vsel %vm1742_vm0, %v4078_v45, %v1739_v41  ;;  %v1572_v45 = vpop.f32.mrf.mxu3  ;;  %vm1781_vm6 = vmor %vm1779_vm5, %vm1780_vm4 }
 0x2cc   : > { %v1748_v28 = vsel %vm1745_vm2, %v1747_v0, %v1743_v12  ;;  %v1762_v36 = vsel %vm1761_vm1, %v4080_v14, %v1758_v58  ;;  %v1776_v8 = vsub.f32 1.0, %v1775_v55  ;;  %v1582_v58 = vadd.f32 %v1572_v45, %v5682_v63 }
 0x2cd   : > { %v1767_v60 = vsel %vm1764_vm3, %v1766_v11, %v1762_v36  ;;  %v1790_v4 = vmul.f32 %v4084_v25, %v1748_v28  ;;  %v1552_v11 = vpop.f32.mrf.mxu2  ;;  %v9756_v36 = vld [vmem:[#allocation111_spill] sm:$0xff] }
 0x2ce   : > { %v1789_v52 = vmul.f32 %v1767_v60, %v6187_v59  ;;  %v1777_v54 = vmul.f32 %v4082_v40, %v1776_v8  ;;  %v9759_v8 = vld [vmem:[#allocation114_spill] sm:$0xff] }
 0x2d0   : > { %v6595_v47 = vadd.f32 %v1790_v4, %v1789_v52  ;;  %v1778_v13 = vadd.f32 %v4082_v40, %v1777_v54  ;;  %v9764_v52 = vld [vmem:[#allocation9_spill] sm:$0xff] }
 0x2d1   : > { %v1581_v54 = vadd.f32 %v1552_v11, %v9764_v52 }
 0x2d2   : > { %4085 = vtanh.f32 %v6595_v47  ;;  %v1782_v59 = vsel %vm1781_vm6, %v4082_v40, %v1778_v13  ;;  %v9765_v13 = vld [vmem:[#allocation119_spill] sm:$0xff] }
 0x2d3   : > { %v1600_v14 = vpop.f32.mrf.mxu0  ;;  %v1787_v0 = vsel %vm1784_vm7, %v1786_v39, %v1782_v59  ;;  %v9769_v59 = vld [vmem:[#allocation123_spill] sm:$0xff]  ;;  %v9771_v39 = vld [vmem:[#allocation125_spill] sm:$0xff] }
 0x2d4   : > { %v1620_v5 = vpop.f32.mrf.mxu1  ;;  %v1663_v20 = vadd.f32 %v1600_v14, %v1579_v31  ;;  %v9766_v31 = vld [vmem:[#allocation120_spill] sm:$0xff] }
 0x2d5   : > { %v1664_v21 = vadd.f32 %v1620_v5, %v1580_v16 }
 0x2d6   : > { %v3933_v46 = vmul.f32 -1.442695, %v1663_v20  ;;  %v9768_v20 = vld [vmem:[#allocation122_spill] sm:$0xff] }
 0x2d7   : > { %v3934_v42 = vmul.f32 -1.442695, %v1664_v21 }
 0x2d8   : > { %4087 = vpow2.f32 %v3933_v46  ;;  %v4086_v41 = vpop.eup %4085  ;;  %v9770_v46 = vld [vmem:[#allocation124_spill] sm:$0xff] }
 0x2d9   : > { %4089 = vpow2.f32 %v3934_v42  ;;  %v1793_v55 = vmul.f32 %v4086_v41, %v1787_v0  ;;  %v9772_v41 = vld [vmem:[#allocation126_spill] sm:$0xff] }
 0x2da   : > { %v1640_v60 = vpop.f32.mrf.mxu2 }
 0x2db   : > { %v1660_v53 = vpop.f32.mrf.mxu3  ;;  %1810 = vmatmul.f32.vlgmr.msra.gmra.mxu0 %v1793_v55  ;;  %1830 = vmatmul.f32.vlgmr.msra.gmra.mxu1 %v1793_v55  ;;  %v1665_v18 = vadd.f32 %v1640_v60, %v1581_v54  ;;  %v9779_v60 = vld [vmem:[#allocation133_spill] sm:$0xff] }
 0x2dc   : > { %v1666_v50 = vadd.f32 %v1660_v53, %v1582_v58  ;;  %1850 = vmatmul.f32.vlgmr.msra.gmra.mxu2 %v1793_v55  ;;  %1870 = vmatmul.f32.vlgmr.msra.gmra.mxu3 %v1793_v55  ;;  %v9774_v53 = vld [vmem:[#allocation128_spill] sm:$0xff] }
 0x2dd   : > { %1962 = vmatpush.msra.mxu0 %v6193_v62  ;;  %1982 = vmatpush.msra.mxu1 %v6196_v44  ;;  %v9757_v62 = vld [vmem:[#allocation112_spill] sm:$0xff]  ;;  %v9758_v44 = vld [vmem:[#allocation113_spill] sm:$0xff] }
 0x2de   : > { %v3935_v49 = vmul.f32 -1.442695, %v1666_v50  ;;  %v4088_v40 = vpop.eup %4087  ;;  %2002 = vmatpush.msra.mxu2 %v6201_v7  ;;  %2022 = vmatpush.msra.mxu3 %v6204_v22  ;;  %v9760_v7 = vld [vmem:[#allocation115_spill] sm:$0xff]  ;;  %v9761_v22 = vld [vmem:[#allocation116_spill] sm:$0xff] }
 0x2df   : > { %v4090_v12 = vpop.eup %4089  ;;  %v6603_v25 = vadd.f32 1.0, %v4088_v40  ;;  %1963 = vmatpush.msra.mxu0 %v6209_v61  ;;  %1983 = vmatpush.msra.mxu1 %v6212_v33  ;;  %v9762_v61 = vld [vmem:[#allocation117_spill] sm:$0xff]  ;;  %v9763_v33 = vld [vmem:[#allocation118_spill] sm:$0xff] }
 0x2e0   : > { %4091 = vpow2.f32 %v3935_v49  ;;  %v6607_v28 = vadd.f32 1.0, %v4090_v12  ;;  %2003 = vmatpush.msra.mxu2 %v9756_v36  ;;  %2023 = vmatpush.msra.mxu3 %v9757_v62  ;;  %v9775_v40 = vld [vmem:[#allocation129_spill] sm:$0xff]  ;;  %v9776_v12 = vld [vmem:[#allocation130_spill] sm:$0xff] }
 0x2e1   : > { %4093 = vrcp.f32 %v6603_v25  ;;  %1964 = vmatpush.msra.mxu0 %v9758_v44  ;;  %1984 = vmatpush.msra.mxu1 %v9759_v8  ;;  %v1682_v58 = vand.u32 2147483648, %v6603_v25  ;;  %v1680_v49 = vand.u32 2147483647, %v6603_v25  ;;  %v9777_v44 = vld [vmem:[#allocation131_spill] sm:$0xff]  ;;  %v9778_v8 = vld [vmem:[#allocation132_spill] sm:$0xff]  ;;  %vm1676_vm10 = vweird.f32 %v6603_v25 }
 0x2e2   : > { %4095 = vrcp.f32 %v6607_v28  ;;  %2004 = vmatpush.msra.mxu2 %v9760_v7  ;;  %2024 = vmatpush.msra.mxu3 %v9761_v22  ;;  %v1701_v50 = vand.u32 2147483648, %v6607_v28  ;;  %v1699_v62 = vand.u32 2147483647, %v6607_v28  ;;  %vm1695_vm11 = vweird.f32 %v6607_v28 }
 0x2e3   : > { %1965 = vmatpush.msra.mxu0 %v9762_v61  ;;  %1985 = vmatpush.msra.mxu1 %v9763_v33  ;;  %v9780_v61 = vld [vmem:[#allocation134_spill] sm:$0xff]  ;;  %v1683_v33 = vor.u32 1.1754944e-38, %v1682_v58  ;;  %vm1681_vm14 = vcmp.eq.f32.partialorder %v1680_v49, 8.507059e+37  ;;  %v9795_v58 = vld [vmem:[#allocation147_spill] sm:$0xff] }
 0x2e4   : > { %2005 = vmatpush.msra.mxu2 %v9765_v13  ;;  %2025 = vmatpush.msra.mxu3 %v9766_v31  ;;  %v9781_v13 = vld [vmem:[#allocation135_spill] sm:$0xff]  ;;  %v9782_v31 = vld [vmem:[#allocation136_spill] sm:$0xff]  ;;  %vm1700_vm15 = vcmp.eq.f32.partialorder %v1699_v62, 8.507059e+37 }
 0x2e5   : > { %1890 = vmatmul.f32.vlgmr.msrb.gmra.mxu0 %v1793_v55  ;;  %1910 = vmatmul.f32.vlgmr.msrb.gmra.mxu1 %v1793_v55  ;;  %v9799_v49 = vld [vmem:[#allocation151_spill] sm:$0xff]  ;;  %v6730_v62 = vld [vmem:[#allocation3 + $0x730] sm:$0xff] }
 0x2e6   : > { %v4092_v4 = vpop.eup %4091  ;;  %1930 = vmatmul.f32.vlgmr.msrb.gmra.mxu2 %v1793_v55  ;;  %1950 = vmatmul.f32.vlgmr.msrb.gmra.mxu3 %v1793_v55  ;;  %v9773_v55 = vld [vmem:[#allocation127_spill] sm:$0xff] }
 0x2e7   : > { %v6624_v16 = vadd.f32 1.0, %v4092_v4  ;;  %v4094_v45 = vpop.eup %4093  ;;  %1966 = vmatpush.msra.mxu0 %v9767_v19  ;;  %1986 = vmatpush.msra.mxu1 %v9768_v20 }
 0x2e8   : > { %v4096_v14 = vpop.eup %4095  ;;  %v1672_v5 = vmul.f32 %v4094_v45, %v6603_v25  ;;  %2006 = vmatpush.msra.mxu2 %v9769_v59  ;;  %2026 = vmatpush.msra.mxu3 %v9770_v46  ;;  %vm1677_vm8 = vweird.f32 %v4094_v45  ;;  %v1702_v25 = vor.u32 1.1754944e-38, %v1701_v50  ;;  %v9790_v46 = vld [vmem:[#allocation144_spill] sm:$0xff] }
 0x2e9   : > { %4097 = vrcp.f32 %v6624_v16  ;;  %v1691_v21 = vmul.f32 %v4096_v14, %v6607_v28  ;;  %1967 = vmatpush.msra.mxu0 %v9771_v39  ;;  %1987 = vmatpush.msra.mxu1 %v9772_v41  ;;  %vm1696_vm9 = vweird.f32 %v4096_v14  ;;  %vm1678_vm12 = vmor %vm1676_vm10, %vm1677_vm8  ;;  %vm1715_vm1 = vweird.f32 %v6624_v16  ;;  %v6832_v41 = vld [vmem:[#allocation3 + $0x2a0] sm:$0xff] }
 0x2ea   : > { %v1673_v42 = vsub.f32 1.0, %v1672_v5  ;;  %4099 = vtanh.f32 %v1665_v18  ;;  %2007 = vmatpush.msra.mxu2 %v9773_v55  ;;  %2027 = vmatpush.msra.mxu3 %v9774_v53  ;;  %vm1697_vm13 = vmor %vm1695_vm11, %vm1696_vm9  ;;  %v1719_v39 = vand.u32 2147483647, %v6624_v16  ;;  %v9796_v55 = vld [vmem:[#allocation148_spill] sm:$0xff]  ;;  %9810 = vst [vmem:[#allocation20_spill] sm:$0xff] %v6832_v41 }
 0x2eb   : > { %v1692_v0 = vsub.f32 1.0, %v1691_v21  ;;  %1968 = vmatpush.msra.mxu0 %v9775_v40  ;;  %1988 = vmatpush.msra.mxu1 %v9776_v12  ;;  %v9800_v12 = vld [vmem:[#allocation152_spill] sm:$0xff] }
 0x2ec   : > { %v1674_v11 = vmul.f32 %v4094_v45, %v1673_v42  ;;  %2008 = vmatpush.msra.mxu2 %v9777_v44  ;;  %2028 = vmatpush.msra.mxu3 %v9778_v8  ;;  %v9791_v42 = vld [vmem:[#allocation145_spill] sm:$0xff]  ;;  %vm1720_vm3 = vcmp.eq.f32.partialorder %v1719_v39, 8.507059e+37  ;;  %v6736_v8 = vld [vmem:[#allocation3 + $0x6a0] sm:$0xff] }
 0x2ed   : > { %v1693_v36 = vmul.f32 %v4096_v14, %v1692_v0  ;;  %1969 = vmatpush.msra.mxu0 %v9779_v60  ;;  %1989 = vmatpush.msra.mxu1 %v9780_v61  ;;  %v9794_v0 = vld [vmem:[#allocation146_spill] sm:$0xff]  ;;  %v6733_v44 = vld [vmem:[#allocation3 + $0x738] sm:$0xff] }
 0x2ee   : > { %v1675_v22 = vadd.f32 %v4094_v45, %v1674_v11  ;;  %2009 = vmatpush.msra.mxu2 %v9781_v13  ;;  %2029 = vmatpush.msra.mxu3 %v9782_v31  ;;  %v9798_v11 = vld [vmem:[#allocation150_spill] sm:$0xff]  ;;  %v6745_v60 = vld [vmem:[#allocation3 + $0x6b8] sm:$0xff]  ;;  %v6763_v31 = vld [vmem:[#allocation3 + $0x5a8] sm:$0xff] }
 0x2ef   : > { %v6645_v7 = vpop.eup %4097  ;;  %v1694_v4 = vadd.f32 %v4096_v14, %v1693_v36  ;;  %1970 = vmatpush.msra.mxu0 %v6338_v37  ;;  %1990 = vmatpush.msra.mxu1 %v6341_v35  ;;  %v9783_v35 = vld [vmem:[#allocation137_spill] sm:$0xff]  ;;  %v6748_v61 = vld [vmem:[#allocation3 + $0x620] sm:$0xff] }
 0x2f0   : > { %v1711_v54 = vmul.f32 %v6645_v7, %v6624_v16  ;;  %v1679_v18 = vsel %vm1678_vm12, %v4094_v45, %v1675_v22  ;;  %v4100_v28 = vpop.eup %4099  ;;  %2010 = vmatpush.msra.mxu2 %v6347_v17  ;;  %2030 = vmatpush.msra.mxu3 %v6350_v10  ;;  %v9784_v10 = vld [vmem:[#allocation138_spill] sm:$0xff]  ;;  %vm1716_vm0 = vweird.f32 %v6645_v7  ;;  %v6742_v22 = vld [vmem:[#allocation3 + $0x6b0] sm:$0xff]  ;;  %v6829_v39 = vld [vmem:[#allocation3 + $0x338] sm:$0xff] }
 0x2f1   : > { %v1684_v5 = vsel %vm1681_vm14, %v1683_v33, %v1679_v18  ;;  %v1698_v19 = vsel %vm1697_vm13, %v4096_v14, %v1694_v4  ;;  %1971 = vmatpush.msra.mxu0 %v6353_v6  ;;  %1991 = vmatpush.msra.mxu1 %v6356_v1  ;;  %v9785_v14 = vld [vmem:[#allocation139_spill] sm:$0xff]  ;;  %v9786_v6 = vld [vmem:[#allocation140_spill] sm:$0xff]  ;;  %v9787_v1 = vld [vmem:[#allocation141_spill] sm:$0xff]  ;;  %9809 = vst [vmem:[#allocation19_spill] sm:$0xff] %v6829_v39 }
 0x2f2   : > { %v1712_v20 = vsub.f32 1.0, %v1711_v54  ;;  %v1703_v21 = vsel %vm1700_vm15, %v1702_v25, %v1698_v19  ;;  %v1726_v59 = vmul.f32 %v4100_v28, %v1684_v5  ;;  %2011 = vmatpush.msra.mxu2 %v6361_v23  ;;  %2031 = vmatpush.msra.mxu3 %v6364_v3  ;;  %v1721_v3 = vand.u32 2147483648, %v6624_v16  ;;  %vm6685_vm2 = vmor %vm1715_vm1, %vm1716_vm0  ;;  %v9797_v16 = vld [vmem:[#allocation149_spill] sm:$0xff]  ;;  %v6751_v33 = vld [vmem:[#allocation3 + $0x628] sm:$0xff] }
 0x2f3   : > { %v1725_v45 = vmul.f32 %v1703_v21, %v6373_v38  ;;  %1972 = vmatpush.msra.mxu0 %v6367_v29  ;;  %1992 = vmatpush.msra.mxu1 %v9783_v35  ;;  %v9788_v29 = vld [vmem:[#allocation142_spill] sm:$0xff]  ;;  %v9789_v38 = vld [vmem:[#allocation143_spill] sm:$0xff]  ;;  %v6754_v4 = vld [vmem:[#allocation3 + $0x630] sm:$0xff] }
 0x2f4   : > { %v1713_v37 = vmul.f32 %v6645_v7, %v1712_v20  ;;  %2012 = vmatpush.msra.mxu2 %v9784_v10  ;;  %2032 = vmatpush.msra.mxu3 %v9785_v14  ;;  %v1722_v50 = vor.u32 1.1754944e-38, %v1721_v3  ;;  %v6757_v54 = vld [vmem:[#allocation3 + $0x638] sm:$0xff]  ;;  %v6760_v13 = vld [vmem:[#allocation3 + $0x5a0] sm:$0xff]  ;;  %v6766_v25 = vld [vmem:[#allocation3 + $0x5b0] sm:$0xff] }
 0x2f5   : > { %v6669_v17 = vadd.f32 %v1726_v59, %v1725_v45  ;;  %1973 = vmatpush.msra.mxu0 %v9786_v6  ;;  %1993 = vmatpush.msra.mxu1 %v9787_v1  ;;  %v6769_v18 = vld [vmem:[#allocation3 + $0x5b8] sm:$0xff]  ;;  %v6772_v28 = vld [vmem:[#allocation3 + $0x520] sm:$0xff]  ;;  %v6775_v5 = vld [vmem:[#allocation3 + $0x528] sm:$0xff] }
 0x2f6   : > { %v1714_v23 = vadd.f32 %v6645_v7, %v1713_v37  ;;  %2013 = vmatpush.msra.mxu2 %v9788_v29  ;;  %2033 = vmatpush.msra.mxu3 %v9789_v38  ;;  %v6778_v19 = vld [vmem:[#allocation3 + $0x530] sm:$0xff]  ;;  %v6781_v20 = vld [vmem:[#allocation3 + $0x538] sm:$0xff]  ;;  %v6784_v21 = vld [vmem:[#allocation3 + $0x4a0] sm:$0xff] }
 0x2f7   : > { %4101 = vtanh.f32 %v6669_v17  ;;  %1974 = vmatpush.msra.mxu0 %v9790_v46  ;;  %1994 = vmatpush.msra.mxu1 %v9791_v42  ;;  %v6787_v59 = vld [vmem:[#allocation3 + $0x4a8] sm:$0xff]  ;;  %v6790_v45 = vld [vmem:[#allocation3 + $0x4b0] sm:$0xff]  ;;  %v6793_v37 = vld [vmem:[#allocation3 + $0x4b8] sm:$0xff] }
 0x2f8   : > { %2014 = vmatpush.msra.mxu2 %v9794_v0  ;;  %2034 = vmatpush.msra.mxu3 %v9795_v58  ;;  %v1718_v53 = vsel %vm6685_vm2, %v6645_v7, %v1714_v23  ;;  %v6739_v7 = vld [vmem:[#allocation3 + $0x6a8] sm:$0xff]  ;;  %v6796_v35 = vld [vmem:[#allocation3 + $0x420] sm:$0xff]  ;;  %v6802_v14 = vld [vmem:[#allocation3 + $0x430] sm:$0xff] }
 0x2f9   : > { %1975 = vmatpush.msra.mxu0 %v9796_v55  ;;  %1995 = vmatpush.msra.mxu1 %v6420_v24  ;;  %v1723_v24 = vsel %vm1720_vm3, %v1722_v50, %v1718_v53  ;;  %v6799_v10 = vld [vmem:[#allocation3 + $0x428] sm:$0xff]  ;;  %v6805_v6 = vld [vmem:[#allocation3 + $0x438] sm:$0xff]  ;;  %v6808_v1 = vld [vmem:[#allocation3 + $0x3a0] sm:$0xff] }
 0x2fa   : > { %2015 = vmatpush.msra.mxu2 %v6426_v32  ;;  %2035 = vmatpush.msra.mxu3 %v9797_v16  ;;  %v6712_v32 = vld [vmem:[#allocation3 + $0x7a0] sm:$0xff]  ;;  %9802 = vst [vmem:[#allocation12_spill] sm:$0xff] %v6808_v1  ;;  %v6811_v23 = vld [vmem:[#allocation3 + $0x3a8] sm:$0xff]  ;;  %v6814_v3 = vld [vmem:[#allocation3 + $0x3b0] sm:$0xff] }
 0x2fb   : > { %1976 = vmatpush.msra.mxu0 %v9798_v11  ;;  %1996 = vmatpush.msra.mxu1 %v9799_v49  ;;  %9803 = vst [vmem:[#allocation13_spill] sm:$0xff] %v6811_v23  ;;  %v6817_v29 = vld [vmem:[#allocation3 + $0x3b8] sm:$0xff]  ;;  %v6820_v38 = vld [vmem:[#allocation3 + $0x320] sm:$0xff]  ;;  %v6823_v46 = vld [vmem:[#allocation3 + $0x328] sm:$0xff] }
 0x2fc   : > { %2016 = vmatpush.msra.mxu2 %v9800_v12  ;;  %2036 = vmatpush.msra.mxu3 %v6441_v48  ;;  %v6724_v48 = vld [vmem:[#allocation3 + $0x720] sm:$0xff]  ;;  %9804 = vst [vmem:[#allocation14_spill] sm:$0xff] %v6814_v3  ;;  %v6826_v42 = vld [vmem:[#allocation3 + $0x330] sm:$0xff]  ;;  %v6835_v0 = vld [vmem:[#allocation3 + $0x2a8] sm:$0xff] }
 0x2fd   : > { %v4102_v40 = vpop.eup %4101  ;;  %1977 = vmatpush.msra.mxu0 %v6444_v15  ;;  %1997 = vmatpush.msra.mxu1 %v6447_v34  ;;  %v6715_v15 = vld [vmem:[#allocation3 + $0x7a8] sm:$0xff]  ;;  %v6718_v34 = vld [vmem:[#allocation3 + $0x7b0] sm:$0xff]  ;;  %9805 = vst [vmem:[#allocation15_spill] sm:$0xff] %v6817_v29  ;;  %v6841_v55 = vld [vmem:[#allocation3 + $0x2b8] sm:$0xff] }
 0x2fe   : > { %v6704_v36 = vmul.f32 %v4102_v40, %v1723_v24  ;;  %2017 = vmatpush.msra.mxu2 %v6452_v9  ;;  %2037 = vmatpush.msra.mxu3 %v6455_v30  ;;  %v6721_v30 = vld [vmem:[#allocation3 + $0x7b8] sm:$0xff]  ;;  %v6727_v9 = vld [vmem:[#allocation3 + $0x728] sm:$0xff]  ;;  %9806 = vst [vmem:[#allocation16_spill] sm:$0xff] %v6820_v38  ;;  %v6838_v58 = vld [vmem:[#allocation3 + $0x2b0] sm:$0xff] }
 0x2ff   : > { %2173 = vmatpush.msrb.mxu0 %v6712_v32  ;;  %2193 = vmatpush.msrb.mxu1 %v6715_v15  ;;  %9807 = vst [vmem:[#allocation17_spill] sm:$0xff] %v6823_v46  ;;  %v6844_v53 = vld [vmem:[#allocation3 + $0x220] sm:$0xff]  ;;  %v6847_v50 = vld [vmem:[#allocation3 + $0x228] sm:$0xff]  ;;  %v6850_v16 = vld [vmem:[#allocation3 + $0x230] sm:$0xff] }
 0x300   : > { %9801 = vst [vmem:[#allocation11_spill] sm:$0xff] %v6704_v36  ;;  %1978 = vmatmul.f32.vlgmr.msra.gmra.mxu0 %v6704_v36  ;;  %1998 = vmatmul.f32.vlgmr.msra.gmra.mxu1 %v6704_v36  ;;  %v6853_v11 = vld [vmem:[#allocation3 + $0x238] sm:$0xff]  ;;  %v6856_v49 = vld [vmem:[#allocation3 + $0x1a0] sm:$0xff]  ;;  %v6859_v40 = vld [vmem:[#allocation3 + $0x1a8] sm:$0xff] }
 0x301   : > { %2018 = vmatmul.f32.vlgmr.msra.gmra.mxu2 %v6704_v36  ;;  %2038 = vmatmul.f32.vlgmr.msra.gmra.mxu3 %v6704_v36  ;;  %9808 = vst [vmem:[#allocation18_spill] sm:$0xff] %v6826_v42  ;;  %v6862_v12 = vld [vmem:[#allocation3 + $0x1b0] sm:$0xff]  ;;  %v6865_v24 = vld [vmem:[#allocation3 + $0x1b8] sm:$0xff]  ;;  %v6868_v36 = vld [vmem:[#allocation3 + $0x120] sm:$0xff] }
 0x302   : > { %2213 = vmatpush.msrb.mxu2 %v6718_v34  ;;  %2233 = vmatpush.msrb.mxu3 %v6721_v30  ;;  %9811 = vst [vmem:[#allocation21_spill] sm:$0xff] %v6835_v0 }
 0x303   : > { %2174 = vmatpush.msrb.mxu0 %v6724_v48  ;;  %2194 = vmatpush.msrb.mxu1 %v6727_v9  ;;  %9812 = vst [vmem:[#allocation22_spill] sm:$0xff] %v6838_v58 }
 0x304   : > { %2214 = vmatpush.msrb.mxu2 %v6730_v62  ;;  %2234 = vmatpush.msrb.mxu3 %v6733_v44  ;;  %9813 = vst [vmem:[#allocation23_spill] sm:$0xff] %v6841_v55 }
 0x305   : > { %2175 = vmatpush.msrb.mxu0 %v6736_v8  ;;  %2195 = vmatpush.msrb.mxu1 %v6739_v7  ;;  %9814 = vst [vmem:[#allocation24_spill] sm:$0xff] %v6844_v53 }
 0x306   : > { %2215 = vmatpush.msrb.mxu2 %v6742_v22  ;;  %2235 = vmatpush.msrb.mxu3 %v6745_v60  ;;  %9815 = vst [vmem:[#allocation25_spill] sm:$0xff] %v6847_v50 }
 0x307   : > { %2176 = vmatpush.msrb.mxu0 %v6748_v61  ;;  %2196 = vmatpush.msrb.mxu1 %v6751_v33  ;;  %9816 = vst [vmem:[#allocation26_spill] sm:$0xff] %v6850_v16 }
 0x308   : > { %2216 = vmatpush.msrb.mxu2 %v6754_v4  ;;  %2236 = vmatpush.msrb.mxu3 %v6757_v54  ;;  %9817 = vst [vmem:[#allocation27_spill] sm:$0xff] %v6853_v11 }
 0x309   : > { %2177 = vmatpush.msrb.mxu0 %v6760_v13  ;;  %2197 = vmatpush.msrb.mxu1 %v6763_v31  ;;  %9818 = vst [vmem:[#allocation28_spill] sm:$0xff] %v6856_v49 }
 0x30a   : > { %2217 = vmatpush.msrb.mxu2 %v6766_v25  ;;  %2237 = vmatpush.msrb.mxu3 %v6769_v18  ;;  %9819 = vst [vmem:[#allocation29_spill] sm:$0xff] %v6859_v40 }
 0x30b   : > { %2178 = vmatpush.msrb.mxu0 %v6772_v28  ;;  %2198 = vmatpush.msrb.mxu1 %v6775_v5  ;;  %9820 = vst [vmem:[#allocation30_spill] sm:$0xff] %v6862_v12 }
 0x30c   : > { %2218 = vmatpush.msrb.mxu2 %v6778_v19  ;;  %2238 = vmatpush.msrb.mxu3 %v6781_v20  ;;  %9821 = vst [vmem:[#allocation31_spill] sm:$0xff] %v6865_v24 }
 0x30d   : > { %2179 = vmatpush.msrb.mxu0 %v6784_v21  ;;  %2199 = vmatpush.msrb.mxu1 %v6787_v59  ;;  %9822 = vst [vmem:[#allocation32_spill] sm:$0xff] %v6868_v36 }
 0x30e   : > { %2219 = vmatpush.msrb.mxu2 %v6790_v45  ;;  %2239 = vmatpush.msrb.mxu3 %v6793_v37 }
 0x30f   : > { %2180 = vmatpush.msrb.mxu0 %v6796_v35  ;;  %2200 = vmatpush.msrb.mxu1 %v6799_v10 }
 0x310   : > { %2220 = vmatpush.msrb.mxu2 %v6802_v14  ;;  %2240 = vmatpush.msrb.mxu3 %v6805_v6 }
 0x311   : > { %2181 = vmatpush.msrb.mxu0 %v6808_v1  ;;  %2201 = vmatpush.msrb.mxu1 %v6811_v23 }
 0x312   : > { %2221 = vmatpush.msrb.mxu2 %v6814_v3  ;;  %2241 = vmatpush.msrb.mxu3 %v6817_v29 }
 0x313   : > { %2182 = vmatpush.msrb.mxu0 %v6820_v38  ;;  %2202 = vmatpush.msrb.mxu1 %v6823_v46 }
 0x314   : > { %2222 = vmatpush.msrb.mxu2 %v6826_v42  ;;  %2242 = vmatpush.msrb.mxu3 %v6829_v39 }
 0x315   : > { %2183 = vmatpush.msrb.mxu0 %v6832_v41  ;;  %2203 = vmatpush.msrb.mxu1 %v6835_v0 }
 0x316   : > { %2223 = vmatpush.msrb.mxu2 %v6838_v58  ;;  %2243 = vmatpush.msrb.mxu3 %v6841_v55 }
 0x317   : > { %2184 = vmatpush.msrb.mxu0 %v6844_v53  ;;  %2204 = vmatpush.msrb.mxu1 %v6847_v50 }
 0x318   : > { %2224 = vmatpush.msrb.mxu2 %v6850_v16  ;;  %2244 = vmatpush.msrb.mxu3 %v6853_v11 }
 0x319   : > { %2185 = vmatpush.msrb.mxu0 %v6856_v49  ;;  %2205 = vmatpush.msrb.mxu1 %v6859_v40  ;;  %v6874_v49 = vld [vmem:[#allocation3 + $0x130] sm:$0xff]  ;;  %v6877_v40 = vld [vmem:[#allocation3 + $0x138] sm:$0xff] }
 0x31a   : > { %2225 = vmatpush.msrb.mxu2 %v6862_v12  ;;  %2245 = vmatpush.msrb.mxu3 %v6865_v24  ;;  %9824 = vst [vmem:[#allocation34_spill] sm:$0xff] %v6874_v49  ;;  %v6880_v12 = vld [vmem:[#allocation3 + $0xa0] sm:$0xff]  ;;  %v6883_v24 = vld [vmem:[#allocation3 + $0xa8] sm:$0xff] }
 0x31b   : > { %2186 = vmatpush.msrb.mxu0 %v6868_v36  ;;  %2206 = vmatpush.msrb.mxu1 %v6871_v2  ;;  %9825 = vst [vmem:[#allocation35_spill] sm:$0xff] %v6877_v40  ;;  %v6886_v36 = vld [vmem:[#allocation3 + $0xb0] sm:$0xff]  ;;  %v6889_v2 = vld [vmem:[#allocation3 + $0xb8] sm:$0xff] }
 0x31c   : > { %2226 = vmatpush.msrb.mxu2 %v6874_v49  ;;  %2246 = vmatpush.msrb.mxu3 %v6877_v40  ;;  %9826 = vst [vmem:[#allocation36_spill] sm:$0xff] %v6880_v12  ;;  %v6892_v49 = vld [vmem:[#allocation3 + $0x20] sm:$0xff]  ;;  %v6895_v40 = vld [vmem:[#allocation3 + $0x28] sm:$0xff] }
 0x31d   : > { %2187 = vmatpush.msrb.mxu0 %v6880_v12  ;;  %9827 = vst [vmem:[#allocation37_spill] sm:$0xff] %v6883_v24  ;;  %2207 = vmatpush.msrb.mxu1 %v6883_v24  ;;  %v6898_v12 = vld [vmem:[#allocation3 + $0x30] sm:$0xff]  ;;  %v6901_v24 = vld [vmem:[#allocation3 + $0x38] sm:$0xff] }
 0x31e   : > { %9828 = vst [vmem:[#allocation38_spill] sm:$0xff] %v6886_v36  ;;  %2227 = vmatpush.msrb.mxu2 %v6886_v36  ;;  %2247 = vmatpush.msrb.mxu3 %v6889_v2  ;;  %v6904_v36 = vld [vmem:[#allocation3 + $0x7c0] sm:$0xff] }
 0x31f   : > { %9829 = vst [vmem:[#allocation39_spill] sm:$0xff] %v6889_v2  ;;  %2188 = vmatpush.msrb.mxu0 %v6892_v49  ;;  %2208 = vmatpush.msrb.mxu1 %v6895_v40  ;;  %v6907_v2 = vld [vmem:[#allocation3 + $0x7c8] sm:$0xff] }
 0x320   : > { %9830 = vst [vmem:[#allocation40_spill] sm:$0xff] %v6892_v49  ;;  %2228 = vmatpush.msrb.mxu2 %v6898_v12  ;;  %2248 = vmatpush.msrb.mxu3 %v6901_v24  ;;  %v6910_v49 = vld [vmem:[#allocation3 + $0x7d0] sm:$0xff] }
 0x321   : > { %9831 = vst [vmem:[#allocation41_spill] sm:$0xff] %v6895_v40  ;;  %2253 = vmatpush.msra.mxu0 %v6904_v36  ;;  %2273 = vmatpush.msra.mxu1 %v6907_v2  ;;  %v6913_v40 = vld [vmem:[#allocation3 + $0x7d8] sm:$0xff] }
 0x322   : > { %9832 = vst [vmem:[#allocation42_spill] sm:$0xff] %v6898_v12  ;;  %2293 = vmatpush.msra.mxu2 %v6910_v49  ;;  %2313 = vmatpush.msra.mxu3 %v6913_v40  ;;  %v6916_v12 = vld [vmem:[#allocation3 + $0x740] sm:$0xff] }
 0x323   : > { %9833 = vst [vmem:[#allocation43_spill] sm:$0xff] %v6901_v24  ;;  %2254 = vmatpush.msra.mxu0 %v6916_v12  ;;  %v6919_v24 = vld [vmem:[#allocation3 + $0x748] sm:$0xff] }
 0x324   : > { %9834 = vst [vmem:[#allocation44_spill] sm:$0xff] %v6904_v36  ;;  %2274 = vmatpush.msra.mxu1 %v6919_v24  ;;  %v6922_v36 = vld [vmem:[#allocation3 + $0x750] sm:$0xff] }
 0x325   : > { %9835 = vst [vmem:[#allocation45_spill] sm:$0xff] %v6907_v2  ;;  %2294 = vmatpush.msra.mxu2 %v6922_v36  ;;  %v6925_v2 = vld [vmem:[#allocation3 + $0x758] sm:$0xff] }
 0x326   : > { %9836 = vst [vmem:[#allocation46_spill] sm:$0xff] %v6910_v49  ;;  %2314 = vmatpush.msra.mxu3 %v6925_v2  ;;  %v6928_v49 = vld [vmem:[#allocation3 + $0x6c0] sm:$0xff] }
 0x327   : > { %9837 = vst [vmem:[#allocation47_spill] sm:$0xff] %v6913_v40  ;;  %2255 = vmatpush.msra.mxu0 %v6928_v49  ;;  %v6931_v40 = vld [vmem:[#allocation3 + $0x6c8] sm:$0xff] }
 0x328   : > { %9838 = vst [vmem:[#allocation48_spill] sm:$0xff] %v6916_v12  ;;  %2275 = vmatpush.msra.mxu1 %v6931_v40  ;;  %v6934_v12 = vld [vmem:[#allocation3 + $0x6d0] sm:$0xff] }
 0x329   : > { %9839 = vst [vmem:[#allocation49_spill] sm:$0xff] %v6919_v24  ;;  %2295 = vmatpush.msra.mxu2 %v6934_v12  ;;  %v6937_v24 = vld [vmem:[#allocation3 + $0x6d8] sm:$0xff] }
 0x32a   : > { %9840 = vst [vmem:[#allocation50_spill] sm:$0xff] %v6922_v36  ;;  %2315 = vmatpush.msra.mxu3 %v6937_v24  ;;  %v6940_v36 = vld [vmem:[#allocation3 + $0x640] sm:$0xff] }
 0x32b   : > { %9841 = vst [vmem:[#allocation51_spill] sm:$0xff] %v6925_v2  ;;  %2256 = vmatpush.msra.mxu0 %v6940_v36  ;;  %v6943_v2 = vld [vmem:[#allocation3 + $0x648] sm:$0xff] }
 0x32c   : > { %9842 = vst [vmem:[#allocation52_spill] sm:$0xff] %v6928_v49  ;;  %2276 = vmatpush.msra.mxu1 %v6943_v2  ;;  %v6946_v49 = vld [vmem:[#allocation3 + $0x650] sm:$0xff] }
 0x32d   : > { %9843 = vst [vmem:[#allocation53_spill] sm:$0xff] %v6931_v40  ;;  %2296 = vmatpush.msra.mxu2 %v6946_v49  ;;  %v6949_v40 = vld [vmem:[#allocation3 + $0x658] sm:$0xff] }
 0x32e   : > { %9844 = vst [vmem:[#allocation54_spill] sm:$0xff] %v6934_v12  ;;  %2316 = vmatpush.msra.mxu3 %v6949_v40  ;;  %v6952_v12 = vld [vmem:[#allocation3 + $0x5c0] sm:$0xff] }
 0x32f   : > { %9845 = vst [vmem:[#allocation55_spill] sm:$0xff] %v6937_v24  ;;  %2257 = vmatpush.msra.mxu0 %v6952_v12  ;;  %v6955_v24 = vld [vmem:[#allocation3 + $0x5c8] sm:$0xff] }
 0x330   : > { %9846 = vst [vmem:[#allocation56_spill] sm:$0xff] %v6940_v36  ;;  %2277 = vmatpush.msra.mxu1 %v6955_v24  ;;  %v6958_v36 = vld [vmem:[#allocation3 + $0x5d0] sm:$0xff] }
 0x331   : > { %9847 = vst [vmem:[#allocation57_spill] sm:$0xff] %v6943_v2  ;;  %2297 = vmatpush.msra.mxu2 %v6958_v36  ;;  %v6961_v2 = vld [vmem:[#allocation3 + $0x5d8] sm:$0xff] }
 0x332   : > { %9848 = vst [vmem:[#allocation58_spill] sm:$0xff] %v6946_v49  ;;  %2317 = vmatpush.msra.mxu3 %v6961_v2  ;;  %v6964_v49 = vld [vmem:[#allocation3 + $0x540] sm:$0xff] }
 0x333   : > { %9849 = vst [vmem:[#allocation59_spill] sm:$0xff] %v6949_v40  ;;  %2258 = vmatpush.msra.mxu0 %v6964_v49  ;;  %v6967_v40 = vld [vmem:[#allocation3 + $0x548] sm:$0xff] }
 0x334   : > { %9850 = vst [vmem:[#allocation60_spill] sm:$0xff] %v6952_v12  ;;  %2278 = vmatpush.msra.mxu1 %v6967_v40  ;;  %v6970_v12 = vld [vmem:[#allocation3 + $0x550] sm:$0xff] }
 0x335   : > { %9851 = vst [vmem:[#allocation61_spill] sm:$0xff] %v6955_v24  ;;  %2298 = vmatpush.msra.mxu2 %v6970_v12  ;;  %v6973_v24 = vld [vmem:[#allocation3 + $0x558] sm:$0xff] }
 0x336   : > { %9852 = vst [vmem:[#allocation62_spill] sm:$0xff] %v6958_v36  ;;  %2318 = vmatpush.msra.mxu3 %v6973_v24  ;;  %v6976_v36 = vld [vmem:[#allocation3 + $0x4c0] sm:$0xff] }
 0x337   : > { %9853 = vst [vmem:[#allocation63_spill] sm:$0xff] %v6961_v2  ;;  %2259 = vmatpush.msra.mxu0 %v6976_v36  ;;  %v6979_v2 = vld [vmem:[#allocation3 + $0x4c8] sm:$0xff] }
 0x338   : > { %9854 = vst [vmem:[#allocation64_spill] sm:$0xff] %v6964_v49  ;;  %2279 = vmatpush.msra.mxu1 %v6979_v2  ;;  %v6982_v49 = vld [vmem:[#allocation3 + $0x4d0] sm:$0xff] }
 0x339   : > { %9855 = vst [vmem:[#allocation65_spill] sm:$0xff] %v6967_v40  ;;  %2299 = vmatpush.msra.mxu2 %v6982_v49  ;;  %v6985_v40 = vld [vmem:[#allocation3 + $0x4d8] sm:$0xff] }
 0x33a   : > { %9856 = vst [vmem:[#allocation66_spill] sm:$0xff] %v6970_v12  ;;  %2319 = vmatpush.msra.mxu3 %v6985_v40  ;;  %v6988_v12 = vld [vmem:[#allocation3 + $0x440] sm:$0xff] }
 0x33b   : > { %9857 = vst [vmem:[#allocation67_spill] sm:$0xff] %v6973_v24  ;;  %2260 = vmatpush.msra.mxu0 %v6988_v12  ;;  %v6991_v24 = vld [vmem:[#allocation3 + $0x448] sm:$0xff] }
 0x33c   : > { %9858 = vst [vmem:[#allocation68_spill] sm:$0xff] %v6976_v36  ;;  %2280 = vmatpush.msra.mxu1 %v6991_v24  ;;  %v6994_v36 = vld [vmem:[#allocation3 + $0x450] sm:$0xff] }
 0x33d   : > { %9859 = vst [vmem:[#allocation69_spill] sm:$0xff] %v6979_v2  ;;  %2300 = vmatpush.msra.mxu2 %v6994_v36  ;;  %v6997_v2 = vld [vmem:[#allocation3 + $0x458] sm:$0xff] }
 0x33e   : > { %9860 = vst [vmem:[#allocation70_spill] sm:$0xff] %v6982_v49  ;;  %2320 = vmatpush.msra.mxu3 %v6997_v2  ;;  %v7000_v49 = vld [vmem:[#allocation3 + $0x3c0] sm:$0xff] }
 0x33f   : > { %9861 = vst [vmem:[#allocation71_spill] sm:$0xff] %v6985_v40  ;;  %2261 = vmatpush.msra.mxu0 %v7000_v49  ;;  %v7003_v40 = vld [vmem:[#allocation3 + $0x3c8] sm:$0xff] }
 0x340   : > { %9862 = vst [vmem:[#allocation72_spill] sm:$0xff] %v6988_v12  ;;  %2281 = vmatpush.msra.mxu1 %v7003_v40  ;;  %v7006_v12 = vld [vmem:[#allocation3 + $0x3d0] sm:$0xff] }
 0x341   : > { %9863 = vst [vmem:[#allocation73_spill] sm:$0xff] %v6991_v24  ;;  %2301 = vmatpush.msra.mxu2 %v7006_v12  ;;  %v7009_v24 = vld [vmem:[#allocation3 + $0x3d8] sm:$0xff] }
 0x342   : > { %9864 = vst [vmem:[#allocation75_spill] sm:$0xff] %v6994_v36  ;;  %2321 = vmatpush.msra.mxu3 %v7009_v24  ;;  %v7012_v36 = vld [vmem:[#allocation3 + $0x340] sm:$0xff] }
 0x343   : > { %9865 = vst [vmem:[#allocation76_spill] sm:$0xff] %v6997_v2  ;;  %2262 = vmatpush.msra.mxu0 %v7012_v36  ;;  %v7015_v2 = vld [vmem:[#allocation3 + $0x348] sm:$0xff] }
 0x344   : > { %9866 = vst [vmem:[#allocation78_spill] sm:$0xff] %v7000_v49  ;;  %2282 = vmatpush.msra.mxu1 %v7015_v2  ;;  %v7018_v49 = vld [vmem:[#allocation3 + $0x350] sm:$0xff] }
 0x345   : > { %9867 = vst [vmem:[#allocation79_spill] sm:$0xff] %v7003_v40  ;;  %2302 = vmatpush.msra.mxu2 %v7018_v49  ;;  %v7021_v40 = vld [vmem:[#allocation3 + $0x358] sm:$0xff] }
 0x346   : > { %9868 = vst [vmem:[#allocation80_spill] sm:$0xff] %v7006_v12  ;;  %2322 = vmatpush.msra.mxu3 %v7021_v40  ;;  %v7024_v12 = vld [vmem:[#allocation3 + $0x2c0] sm:$0xff] }
 0x347   : > { %9869 = vst [vmem:[#allocation81_spill] sm:$0xff] %v7009_v24  ;;  %2263 = vmatpush.msra.mxu0 %v7024_v12  ;;  %v7027_v24 = vld [vmem:[#allocation3 + $0x2c8] sm:$0xff] }
 0x348   : > { %9870 = vst [vmem:[#allocation82_spill] sm:$0xff] %v7012_v36  ;;  %2283 = vmatpush.msra.mxu1 %v7027_v24  ;;  %v7030_v36 = vld [vmem:[#allocation3 + $0x2d0] sm:$0xff] }
 0x349   : > { %9871 = vst [vmem:[#allocation83_spill] sm:$0xff] %v7015_v2  ;;  %2303 = vmatpush.msra.mxu2 %v7030_v36  ;;  %v7033_v2 = vld [vmem:[#allocation3 + $0x2d8] sm:$0xff] }
 0x34a   : > { %9872 = vst [vmem:[#allocation84_spill] sm:$0xff] %v7018_v49  ;;  %2323 = vmatpush.msra.mxu3 %v7033_v2  ;;  %v7036_v49 = vld [vmem:[#allocation3 + $0x240] sm:$0xff] }
 0x34b   : > { %9873 = vst [vmem:[#allocation85_spill] sm:$0xff] %v7021_v40  ;;  %2264 = vmatpush.msra.mxu0 %v7036_v49  ;;  %v7039_v40 = vld [vmem:[#allocation3 + $0x248] sm:$0xff] }
 0x34c   : > { %9874 = vst [vmem:[#allocation86_spill] sm:$0xff] %v7024_v12  ;;  %2284 = vmatpush.msra.mxu1 %v7039_v40  ;;  %v7042_v12 = vld [vmem:[#allocation3 + $0x250] sm:$0xff] }
 0x34d   : > { %9875 = vst [vmem:[#allocation87_spill] sm:$0xff] %v7027_v24  ;;  %2304 = vmatpush.msra.mxu2 %v7042_v12  ;;  %v7045_v24 = vld [vmem:[#allocation3 + $0x258] sm:$0xff] }
 0x34e   : > { %9876 = vst [vmem:[#allocation88_spill] sm:$0xff] %v7030_v36  ;;  %2324 = vmatpush.msra.mxu3 %v7045_v24  ;;  %v7048_v36 = vld [vmem:[#allocation3 + $0x1c0] sm:$0xff] }
 0x34f   : > { %9877 = vst [vmem:[#allocation89_spill] sm:$0xff] %v7033_v2  ;;  %2265 = vmatpush.msra.mxu0 %v7048_v36  ;;  %v7051_v2 = vld [vmem:[#allocation3 + $0x1c8] sm:$0xff] }
 0x350   : > { %9878 = vst [vmem:[#allocation91_spill] sm:$0xff] %v7036_v49  ;;  %2285 = vmatpush.msra.mxu1 %v7051_v2  ;;  %v7054_v49 = vld [vmem:[#allocation3 + $0x1d0] sm:$0xff] }
 0x351   : > { %9879 = vst [vmem:[#allocation92_spill] sm:$0xff] %v7039_v40  ;;  %2305 = vmatpush.msra.mxu2 %v7054_v49  ;;  %v7057_v40 = vld [vmem:[#allocation3 + $0x1d8] sm:$0xff] }
 0x352   : > { %9880 = vst [vmem:[#allocation93_spill] sm:$0xff] %v7042_v12  ;;  %2325 = vmatpush.msra.mxu3 %v7057_v40  ;;  %v7060_v12 = vld [vmem:[#allocation3 + $0x140] sm:$0xff] }
 0x353   : > { %9881 = vst [vmem:[#allocation94_spill] sm:$0xff] %v7045_v24  ;;  %2266 = vmatpush.msra.mxu0 %v7060_v12  ;;  %v7063_v24 = vld [vmem:[#allocation3 + $0x148] sm:$0xff] }
 0x354   : > { %9882 = vst [vmem:[#allocation95_spill] sm:$0xff] %v7048_v36  ;;  %2286 = vmatpush.msra.mxu1 %v7063_v24  ;;  %v7066_v36 = vld [vmem:[#allocation3 + $0x150] sm:$0xff] }
 0x355   : > { %9883 = vst [vmem:[#allocation96_spill] sm:$0xff] %v7051_v2  ;;  %2306 = vmatpush.msra.mxu2 %v7066_v36  ;;  %v7069_v2 = vld [vmem:[#allocation3 + $0x158] sm:$0xff] }
 0x356   : > { %9884 = vst [vmem:[#allocation97_spill] sm:$0xff] %v7054_v49  ;;  %2326 = vmatpush.msra.mxu3 %v7069_v2  ;;  %v7072_v49 = vld [vmem:[#allocation3 + $0xc0] sm:$0xff] }
 0x357   : > { %9885 = vst [vmem:[#allocation98_spill] sm:$0xff] %v7057_v40  ;;  %2267 = vmatpush.msra.mxu0 %v7072_v49  ;;  %v7075_v40 = vld [vmem:[#allocation3 + $0xc8] sm:$0xff] }
 0x358   : > { %9886 = vst [vmem:[#allocation100_spill] sm:$0xff] %v7060_v12  ;;  %2287 = vmatpush.msra.mxu1 %v7075_v40  ;;  %v7078_v12 = vld [vmem:[#allocation3 + $0xd0] sm:$0xff]  ;;  %v1831_v11 = vpop.f32.mrf.mxu1 }
 0x359   : > { %9887 = vst [vmem:[#allocation101_spill] sm:$0xff] %v7063_v24  ;;  %2307 = vmatpush.msra.mxu2 %v7078_v12  ;;  %v7081_v24 = vld [vmem:[#allocation3 + $0xd8] sm:$0xff]  ;;  %v1955_v16 = vadd.f32 %v1831_v11, %v9753_v51 }
 0x35a   : > { %9888 = vst [vmem:[#allocation102_spill] sm:$0xff] %v7066_v36  ;;  %2327 = vmatpush.msra.mxu3 %v7081_v24  ;;  %v7084_v36 = vld [vmem:[#allocation3 + $0x40] sm:$0xff] }
 0x35b   : > { %9889 = vst [vmem:[#allocation103_spill] sm:$0xff] %v7069_v2  ;;  %2268 = vmatpush.msra.mxu0 %v7084_v36  ;;  %v7087_v2 = vld [vmem:[#allocation3 + $0x48] sm:$0xff] }
 0x35c   : > { %9890 = vst [vmem:[#allocation104_spill] sm:$0xff] %v7072_v49  ;;  %2288 = vmatpush.msra.mxu1 %v7087_v2  ;;  %v7090_v49 = vld [vmem:[#allocation3 + $0x50] sm:$0xff] }
 0x35d   : > { %9891 = vst [vmem:[#allocation105_spill] sm:$0xff] %v7075_v40  ;;  %2308 = vmatpush.msra.mxu2 %v7090_v49  ;;  %v7093_v40 = vld [vmem:[#allocation3 + $0x58] sm:$0xff] }
 0x35e   : > { %9892 = vst [vmem:[#allocation106_spill] sm:$0xff] %v7078_v12  ;;  %2328 = vmatpush.msra.mxu3 %v7093_v40  ;;  %v1811_v12 = vpop.f32.mrf.mxu0 }
 0x35f   : > { %9893 = vst [vmem:[#allocation107_spill] sm:$0xff] %v7081_v24  ;;  %v1954_v24 = vadd.f32 %v1811_v12, %v9752_v57  ;;  %v1871_v53 = vpop.f32.mrf.mxu3 }
 0x360   : > { %9894 = vst [vmem:[#allocation108_spill] sm:$0xff] %v7084_v36  ;;  %v3943_v36 = vmul.f32 -1.442695, %v1955_v16 }
 0x361   : > { %9895 = vst [vmem:[#allocation109_spill] sm:$0xff] %v7087_v2  ;;  %v3942_v50 = vmul.f32 -1.442695, %v1954_v24  ;;  %v1957_v2 = vadd.f32 %v1871_v53, %v9754_v56 }
 0x362   : > { %9896 = vst [vmem:[#allocation110_spill] sm:$0xff] %v7090_v49 }
 0x363   : > { %9897 = vst [vmem:[#allocation111_spill] sm:$0xff] %v7093_v40  ;;  %4103 = vpow2.f32 %v3942_v50  ;;  %v3944_v55 = vmul.f32 -1.442695, %v1957_v2  ;;  %v1851_v40 = vpop.f32.mrf.mxu2 }
 0x364   : > { %4105 = vpow2.f32 %v3943_v36  ;;  %v1956_v11 = vadd.f32 %v1851_v40, %v9755_v43 }
 0x365   : > { %4107 = vpow2.f32 %v3944_v55 }
 0x366   : > { %v1891_v38 = vpop.f32.mrf.mxu0 }
 0x369   : > { %v4104_v58 = vpop.eup %4103 }
 0x36a   : > { %v4106_v49 = vpop.eup %4105  ;;  %v2113_v0 = vadd.f32 1.0, %v4104_v58 }
 0x36b   : > { %v2132_v41 = vadd.f32 1.0, %v4106_v49  ;;  %v4108_v39 = vpop.eup %4107 }
 0x36c   : > { %4109 = vrcp.f32 %v2113_v0  ;;  %v2152_v12 = vadd.f32 1.0, %v4108_v39  ;;  %v2125_v2 = vand.u32 2147483648, %v2113_v0  ;;  %v2123_v55 = vand.u32 2147483647, %v2113_v0 }
 0x36d   : > { %4111 = vrcp.f32 %v2132_v41  ;;  %v2144_v56 = vand.u32 2147483648, %v2132_v41  ;;  %v2142_v51 = vand.u32 2147483647, %v2132_v41  ;;  %vm2119_vm6 = vweird.f32 %v2113_v0 }
 0x36e   : > { %4113 = vrcp.f32 %v2152_v12  ;;  %vm2138_vm7 = vweird.f32 %v2132_v41  ;;  %v2126_v40 = vor.u32 1.1754944e-38, %v2125_v2  ;;  %vm2124_vm10 = vcmp.eq.f32.partialorder %v2123_v55, 8.507059e+37 }
 0x36f   : > { %4115 = vtanh.f32 %v1956_v11  ;;  %vm2143_vm11 = vcmp.eq.f32.partialorder %v2142_v51, 8.507059e+37  ;;  %v2164_v55 = vand.u32 2147483648, %v2152_v12  ;;  %vm2158_vm13 = vweird.f32 %v2152_v12 }
 0x372   : > { %v4110_v57 = vpop.eup %4109 }
 0x373   : > { %v4112_v16 = vpop.eup %4111  ;;  %v2115_v50 = vmul.f32 %v4110_v57, %v2113_v0  ;;  %vm2120_vm4 = vweird.f32 %v4110_v57 }
 0x374   : > { %v2134_v36 = vmul.f32 %v4112_v16, %v2132_v41  ;;  %vm2139_vm5 = vweird.f32 %v4112_v16  ;;  %v4114_v42 = vpop.eup %4113  ;;  %vm2121_vm8 = vmor %vm2119_vm6, %vm2120_vm4 }
 0x375   : > { %v2116_v24 = vsub.f32 1.0, %v2115_v50  ;;  %v2154_v46 = vmul.f32 %v4114_v42, %v2152_v12  ;;  %v1911_v50 = vpop.f32.mrf.mxu1  ;;  %vm2140_vm9 = vmor %vm2138_vm7, %vm2139_vm5  ;;  %vm2159_vm12 = vweird.f32 %v4114_v42 }
 0x376   : > { %v2135_v53 = vsub.f32 1.0, %v2134_v36  ;;  %v2145_v36 = vor.u32 1.1754944e-38, %v2144_v56  ;;  %v1959_v56 = vadd.f32 %v1911_v50, %v5670_v27  ;;  %vm2160_vm14 = vmor %vm2158_vm13, %vm2159_vm12 }
 0x377   : > { %v2117_v58 = vmul.f32 %v4110_v57, %v2116_v24  ;;  %v4116_v24 = vpop.eup %4115 }
 0x378   : > { %v2136_v49 = vmul.f32 %v4112_v16, %v2135_v53  ;;  %v2155_v53 = vsub.f32 1.0, %v2154_v46 }
 0x379   : > { %v2118_v39 = vadd.f32 %v4110_v57, %v2117_v58 }
 0x37a   : > { %v2137_v43 = vadd.f32 %v4112_v16, %v2136_v49  ;;  %v2156_v41 = vmul.f32 %v4114_v42, %v2155_v53  ;;  %v1958_v49 = vadd.f32 %v1891_v38, %v5667_v26  ;;  %v7107_v53 = vld [vmem:[#allocation3 + $0x7e0] sm:$0xff] }
 0x37b   : > { %v2122_v11 = vsel %vm2121_vm8, %v4110_v57, %v2118_v39  ;;  %v1951_v57 = vpop.f32.mrf.mxu3 }
 0x37c   : > { %v2127_v29 = vsel %vm2124_vm10, %v2126_v40, %v2122_v11  ;;  %v2141_v3 = vsel %vm2140_vm9, %v4112_v16, %v2137_v43  ;;  %v2157_v2 = vadd.f32 %v4114_v42, %v2156_v41  ;;  %v2165_v16 = vor.u32 1.1754944e-38, %v2164_v55  ;;  %v7123_v55 = vld [vmem:[#allocation3 + $0x760] sm:$0xff] }
 0x37d   : > { %v2146_v23 = vsel %vm2143_vm11, %v2145_v36, %v2141_v3  ;;  %v2169_v1 = vmul.f32 %v4116_v24, %v2127_v29  ;;  %v1979_v43 = vpop.f32.mrf.mxu0  ;;  %v1999_v51 = vpop.f32.mrf.mxu1  ;;  %v2162_v3 = vand.u32 2147483647, %v2152_v12  ;;  %v1961_v40 = vadd.f32 %v1951_v57, %v5682_v63 }
 0x37e   : > { %v2168_v0 = vmul.f32 %v2146_v23, %v6595_v47  ;;  %v2042_v29 = vadd.f32 %v1979_v43, %v1958_v49  ;;  %v2043_v46 = vadd.f32 %v1999_v51, %v1959_v56  ;;  %v2161_v47 = vsel %vm2160_vm14, %v4114_v42, %v2157_v2  ;;  %v1931_v24 = vpop.f32.mrf.mxu2  ;;  %v7115_v49 = vld [vmem:[#allocation3 + $0x7f0] sm:$0xff]  ;;  %v7118_v56 = vld [vmem:[#allocation3 + $0x7f8] sm:$0xff]  ;;  %v7126_v43 = vld [vmem:[#allocation3 + $0x768] sm:$0xff] }
 0x37f   : > { %vm2163_vm15 = vcmp.eq.f32.partialorder %v2162_v3, 8.507059e+37  ;;  %v7130_v51 = vld [vmem:[#allocation3 + $0x770] sm:$0xff]  ;;  %v7133_v3 = vld [vmem:[#allocation3 + $0x778] sm:$0xff] }
 0x380   : > { %v7101_v58 = vadd.f32 %v2169_v1, %v2168_v0  ;;  %v3939_v1 = vmul.f32 -1.442695, %v2042_v29  ;;  %v3940_v23 = vmul.f32 -1.442695, %v2043_v46  ;;  %v2166_v39 = vsel %vm2163_vm15, %v2165_v16, %v2161_v47  ;;  %v7110_v0 = vld [vmem:[#allocation3 + $0x7e8] sm:$0xff]  ;;  %9898 = vst [vmem:[#allocation112_spill] sm:$0xff] %v7130_v51 }
 0x381   : > { %9899 = vst [vmem:[#allocation113_spill] sm:$0xff] %v7133_v3  ;;  %v7137_v29 = vld [vmem:[#allocation3 + $0x6e0] sm:$0xff]  ;;  %v7140_v46 = vld [vmem:[#allocation3 + $0x6e8] sm:$0xff]  ;;  %v7143_v47 = vld [vmem:[#allocation3 + $0x6f0] sm:$0xff] }
 0x382   : > { %4117 = vtanh.f32 %v7101_v58  ;;  %9900 = vst [vmem:[#allocation114_spill] sm:$0xff] %v7137_v29  ;;  %v7149_v16 = vld [vmem:[#allocation3 + $0x660] sm:$0xff] }
 0x383   : > { %4119 = vpow2.f32 %v3939_v1  ;;  %9901 = vst [vmem:[#allocation115_spill] sm:$0xff] %v7140_v46  ;;  %v7146_v1 = vld [vmem:[#allocation3 + $0x6f8] sm:$0xff] }
 0x384   : > { %4121 = vpow2.f32 %v3940_v23  ;;  %v2039_v36 = vpop.f32.mrf.mxu3  ;;  %9902 = vst [vmem:[#allocation116_spill] sm:$0xff] %v7143_v47 }
 0x385   : > { %v2045_v11 = vadd.f32 %v2039_v36, %v1961_v40  ;;  %9903 = vst [vmem:[#allocation117_spill] sm:$0xff] %v7146_v1  ;;  %v1960_v40 = vadd.f32 %v1931_v24, %v9764_v52  ;;  %v7156_v36 = vld [vmem:[#allocation3 + $0x670] sm:$0xff]  ;;  %v7185_v52 = vld [vmem:[#allocation3 + $0x560] sm:$0xff] }
 0x386   : > { %v2019_v23 = vpop.f32.mrf.mxu2  ;;  %9904 = vst [vmem:[#allocation118_spill] sm:$0xff] %v7149_v16 }
 0x387   : > { %v3941_v12 = vmul.f32 -1.442695, %v2045_v11  ;;  %9906 = vst [vmem:[#allocation120_spill] sm:$0xff] %v7156_v36  ;;  %v7159_v11 = vld [vmem:[#allocation3 + $0x678] sm:$0xff] }
 0x388   : > { %v4118_v38 = vpop.eup %4117  ;;  %9907 = vst [vmem:[#allocation121_spill] sm:$0xff] %v7159_v11 }
 0x389   : > { %v2172_v50 = vmul.f32 %v4118_v38, %v2166_v39  ;;  %v4120_v42 = vpop.eup %4119  ;;  %4123 = vpow2.f32 %v3941_v12  ;;  %v7152_v38 = vld [vmem:[#allocation3 + $0x668] sm:$0xff]  ;;  %9912 = vst [vmem:[#allocation126_spill] sm:$0xff] %v7185_v52 }
 0x38a   : > { %v4122_v41 = vpop.eup %4121  ;;  %v7113_v2 = vadd.f32 1.0, %v4120_v42  ;;  %9905 = vst [vmem:[#allocation119_spill] sm:$0xff] %v7152_v38 }
 0x38b   : > { %2189 = vmatmul.f32.vlgmr.msrb.gmra.mxu0 %v2172_v50  ;;  %2209 = vmatmul.f32.vlgmr.msrb.gmra.mxu1 %v2172_v50  ;;  %v7121_v57 = vadd.f32 1.0, %v4122_v41  ;;  %v2044_v41 = vadd.f32 %v2019_v23, %v1960_v40  ;;  %v7179_v40 = vld [vmem:[#allocation3 + $0x5f0] sm:$0xff] }
 0x38c   : > { %2229 = vmatmul.f32.vlgmr.msrb.gmra.mxu2 %v2172_v50  ;;  %2249 = vmatmul.f32.vlgmr.msrb.gmra.mxu3 %v2172_v50  ;;  %4125 = vrcp.f32 %v7113_v2  ;;  %9910 = vst [vmem:[#allocation124_spill] sm:$0xff] %v7179_v40  ;;  %vm2055_vm2 = vweird.f32 %v7113_v2 }
 0x38d   : > { %2341 = vmatpush.msrb.mxu0 %v7107_v53  ;;  %2361 = vmatpush.msrb.mxu1 %v7110_v0  ;;  %4127 = vrcp.f32 %v7121_v57  ;;  %vm2074_vm3 = vweird.f32 %v7121_v57 }
 0x38e   : > { %2381 = vmatpush.msrb.mxu2 %v7115_v49  ;;  %2401 = vmatpush.msrb.mxu3 %v7118_v56 }
 0x38f   : > { %2342 = vmatpush.msrb.mxu0 %v7123_v55  ;;  %2362 = vmatpush.msrb.mxu1 %v7126_v43  ;;  %v4124_v39 = vpop.eup %4123 }
 0x390   : > { %2382 = vmatpush.msrb.mxu2 %v7130_v51  ;;  %2402 = vmatpush.msrb.mxu3 %v7133_v3  ;;  %v7162_v12 = vadd.f32 1.0, %v4124_v39  ;;  %v7174_v39 = vld [vmem:[#allocation3 + $0x5e8] sm:$0xff]  ;;  %v7261_v51 = vld [vmem:[#allocation3 + $0x3f0] sm:$0xff] }
 0x391   : > { %2343 = vmatpush.msrb.mxu0 %v7137_v29  ;;  %2363 = vmatpush.msrb.mxu1 %v7140_v46  ;;  %9909 = vst [vmem:[#allocation123_spill] sm:$0xff] %v7174_v39  ;;  %v7237_v46 = vld [vmem:[#allocation3 + $0x470] sm:$0xff] }
 0x392   : > { %2383 = vmatpush.msrb.mxu2 %v7143_v47  ;;  %2403 = vmatpush.msrb.mxu3 %v7146_v1  ;;  %v7164_v42 = vpop.eup %4125  ;;  %4129 = vrcp.f32 %v7162_v12  ;;  %v7192_v1 = vld [vmem:[#allocation3 + $0x570] sm:$0xff]  ;;  %9924 = vst [vmem:[#allocation136_spill] sm:$0xff] %v7237_v46  ;;  %vm2094_vm9 = vweird.f32 %v7162_v12 }
 0x393   : > { %2344 = vmatpush.msrb.mxu0 %v7149_v16  ;;  %2364 = vmatpush.msrb.mxu1 %v7152_v38  ;;  %v7166_v38 = vpop.eup %4127  ;;  %v2051_v24 = vmul.f32 %v7164_v42, %v7113_v2  ;;  %v2061_v16 = vand.u32 2147483648, %v7113_v2  ;;  %4131 = vtanh.f32 %v2044_v41  ;;  %9914 = vst [vmem:[#allocation128_spill] sm:$0xff] %v7192_v1  ;;  %vm2056_vm0 = vweird.f32 %v7164_v42  ;;  %v7205_v41 = vld [vmem:[#allocation3 + $0x4e8] sm:$0xff] }
 0x394   : > { %2384 = vmatpush.msrb.mxu2 %v7156_v36  ;;  %2404 = vmatpush.msrb.mxu3 %v7159_v11  ;;  %v7171_v36 = vld [vmem:[#allocation3 + $0x5e0] sm:$0xff]  ;;  %v2070_v23 = vmul.f32 %v7166_v38, %v7121_v57  ;;  %9917 = vst [vmem:[#allocation131_spill] sm:$0xff] %v7205_v41  ;;  %vm2075_vm1 = vweird.f32 %v7166_v38  ;;  %vm7230_vm4 = vmor %vm2055_vm2, %vm2056_vm0 }
 0x395   : > { %2269 = vmatmul.f32.vlgmr.msra.gmra.mxu0 %v2172_v50  ;;  %2289 = vmatmul.f32.vlgmr.msra.gmra.mxu1 %v2172_v50  ;;  %9908 = vst [vmem:[#allocation122_spill] sm:$0xff] %v7171_v36  ;;  %v2052_v11 = vsub.f32 1.0, %v2051_v24  ;;  %v2080_v24 = vand.u32 2147483648, %v7121_v57  ;;  %vm7245_vm5 = vmor %vm2074_vm3, %vm2075_vm1 }
 0x396   : > { %2309 = vmatmul.f32.vlgmr.msra.gmra.mxu2 %v2172_v50  ;;  %2329 = vmatmul.f32.vlgmr.msra.gmra.mxu3 %v2172_v50  ;;  %v7182_v50 = vld [vmem:[#allocation3 + $0x5f8] sm:$0xff] }
 0x397   : > { %2345 = vmatpush.msrb.mxu0 %v7171_v36  ;;  %2365 = vmatpush.msrb.mxu1 %v7174_v39  ;;  %9911 = vst [vmem:[#allocation125_spill] sm:$0xff] %v7182_v50  ;;  %v7188_v36 = vld [vmem:[#allocation3 + $0x568] sm:$0xff]  ;;  %v2071_v39 = vsub.f32 1.0, %v2070_v23  ;;  %v7202_v23 = vld [vmem:[#allocation3 + $0x4e0] sm:$0xff] }
 0x398   : > { %2385 = vmatpush.msrb.mxu2 %v7179_v40  ;;  %2405 = vmatpush.msrb.mxu3 %v7182_v50  ;;  %9913 = vst [vmem:[#allocation127_spill] sm:$0xff] %v7188_v36  ;;  %v7195_v40 = vld [vmem:[#allocation3 + $0x578] sm:$0xff]  ;;  %v7211_v50 = vld [vmem:[#allocation3 + $0x4f0] sm:$0xff]  ;;  %v7217_v47 = vpop.eup %4129 }
 0x399   : > { %2346 = vmatpush.msrb.mxu0 %v7185_v52  ;;  %2366 = vmatpush.msrb.mxu1 %v7188_v36  ;;  %9915 = vst [vmem:[#allocation129_spill] sm:$0xff] %v7195_v40  ;;  %v2053_v52 = vmul.f32 %v7164_v42, %v2052_v11  ;;  %v2059_v36 = vand.u32 2147483647, %v7113_v2  ;;  %v7214_v11 = vld [vmem:[#allocation3 + $0x4f8] sm:$0xff]  ;;  %v2090_v2 = vmul.f32 %v7217_v47, %v7162_v12  ;;  %vm2095_vm8 = vweird.f32 %v7217_v47 }
 0x39a   : > { %2386 = vmatpush.msrb.mxu2 %v7192_v1  ;;  %2406 = vmatpush.msrb.mxu3 %v7195_v40  ;;  %9916 = vst [vmem:[#allocation130_spill] sm:$0xff] %v7202_v23  ;;  %v2072_v1 = vmul.f32 %v7166_v38, %v2071_v39  ;;  %v2078_v40 = vand.u32 2147483647, %v7121_v57  ;;  %v7224_v39 = vld [vmem:[#allocation3 + $0x468] sm:$0xff]  ;;  %v7292_v57 = vld [vmem:[#allocation3 + $0x2f8] sm:$0xff]  ;;  %vm7321_vm10 = vmor %vm2094_vm9, %vm2095_vm8 }
 0x39b   : > { %2347 = vmatpush.msrb.mxu0 %v7202_v23  ;;  %2367 = vmatpush.msrb.mxu1 %v7205_v41  ;;  %9918 = vst [vmem:[#allocation132_spill] sm:$0xff] %v7211_v50  ;;  %v2054_v23 = vadd.f32 %v7164_v42, %v2053_v52  ;;  %v7221_v41 = vld [vmem:[#allocation3 + $0x460] sm:$0xff]  ;;  %vm2060_vm6 = vcmp.eq.f32.partialorder %v2059_v36, 8.507059e+37  ;;  %v7264_v36 = vld [vmem:[#allocation3 + $0x3f8] sm:$0xff] }
 0x39c   : > { %2387 = vmatpush.msrb.mxu2 %v7211_v50  ;;  %9919 = vst [vmem:[#allocation133_spill] sm:$0xff] %v7214_v11  ;;  %2407 = vmatpush.msrb.mxu3 %v7214_v11  ;;  %v2062_v50 = vor.u32 1.1754944e-38, %v2061_v16  ;;  %v2073_v52 = vadd.f32 %v7166_v38, %v2072_v1  ;;  %v2081_v16 = vor.u32 1.1754944e-38, %v2080_v24  ;;  %vm2079_vm7 = vcmp.eq.f32.partialorder %v2078_v40, 8.507059e+37  ;;  %v7267_v11 = vld [vmem:[#allocation3 + $0x360] sm:$0xff] }
 0x39d   : > { %9920 = vst [vmem:[#allocation134_spill] sm:$0xff] %v7221_v41  ;;  %2348 = vmatpush.msrb.mxu0 %v7221_v41  ;;  %2368 = vmatpush.msrb.mxu1 %v7224_v39  ;;  %v7240_v41 = vld [vmem:[#allocation3 + $0x478] sm:$0xff]  ;;  %v2058_v1 = vsel %vm7230_vm4, %v7164_v42, %v2054_v23  ;;  %v2091_v24 = vsub.f32 1.0, %v2090_v2 }
 0x39e   : > { %9921 = vst [vmem:[#allocation135_spill] sm:$0xff] %v7224_v39  ;;  %2388 = vmatpush.msrb.mxu2 %v7237_v46  ;;  %2408 = vmatpush.msrb.mxu3 %v7240_v41  ;;  %v7252_v39 = vld [vmem:[#allocation3 + $0x3e0] sm:$0xff]  ;;  %v7255_v46 = vld [vmem:[#allocation3 + $0x3e8] sm:$0xff]  ;;  %v2063_v29 = vsel %vm2060_vm6, %v2062_v50, %v2058_v1  ;;  %v2077_v3 = vsel %vm7245_vm5, %v7166_v38, %v2073_v52  ;;  %v7275_v52 = vld [vmem:[#allocation3 + $0x370] sm:$0xff] }
 0x39f   : > { %9925 = vst [vmem:[#allocation137_spill] sm:$0xff] %v7240_v41  ;;  %2349 = vmatpush.msrb.mxu0 %v7252_v39  ;;  %2369 = vmatpush.msrb.mxu1 %v7255_v46  ;;  %v4132_v41 = vpop.eup %4131  ;;  %v2082_v42 = vsel %vm2079_vm7, %v2081_v16, %v2077_v3  ;;  %v7270_v50 = vld [vmem:[#allocation3 + $0x368] sm:$0xff]  ;;  %v2092_v40 = vmul.f32 %v7217_v47, %v2091_v24  ;;  %v7278_v2 = vld [vmem:[#allocation3 + $0x378] sm:$0xff]  ;;  %v7281_v3 = vld [vmem:[#allocation3 + $0x2e0] sm:$0xff] }
 0x3a0   : > { %2389 = vmatpush.msrb.mxu2 %v7261_v51  ;;  %2409 = vmatpush.msrb.mxu3 %v7264_v36  ;;  %v2105_v23 = vmul.f32 %v4132_v41, %v2063_v29  ;;  %v2104_v38 = vmul.f32 %v2082_v42, %v6669_v17  ;;  %v7284_v29 = vld [vmem:[#allocation3 + $0x2e8] sm:$0xff]  ;;  %v7289_v17 = vld [vmem:[#allocation3 + $0x2f0] sm:$0xff]  ;;  %9930 = vst [vmem:[#allocation140_spill] sm:$0xff] %v7292_v57  ;;  %v7296_v16 = vld [vmem:[#allocation3 + $0x260] sm:$0xff]  ;;  %v2100_v42 = vand.u32 2147483648, %v7162_v12 }
 0x3a1   : > { %2350 = vmatpush.msrb.mxu0 %v7267_v11  ;;  %2370 = vmatpush.msrb.mxu1 %v7270_v50  ;;  %9928 = vst [vmem:[#allocation138_spill] sm:$0xff] %v7284_v29  ;;  %v7299_v1 = vld [vmem:[#allocation3 + $0x268] sm:$0xff]  ;;  %v2093_v24 = vadd.f32 %v7217_v47, %v2092_v40  ;;  %v2098_v40 = vand.u32 2147483647, %v7162_v12 }
 0x3a2   : > { %2390 = vmatpush.msrb.mxu2 %v7275_v52  ;;  %2410 = vmatpush.msrb.mxu3 %v7278_v2  ;;  %v7287_v41 = vadd.f32 %v2105_v23, %v2104_v38  ;;  %9929 = vst [vmem:[#allocation139_spill] sm:$0xff] %v7289_v17  ;;  %v7305_v23 = vld [vmem:[#allocation3 + $0x270] sm:$0xff]  ;;  %v7308_v38 = vld [vmem:[#allocation3 + $0x278] sm:$0xff] }
 0x3a3   : > { %2351 = vmatpush.msrb.mxu0 %v7281_v3  ;;  %2371 = vmatpush.msrb.mxu1 %v7284_v29  ;;  %9931 = vst [vmem:[#allocation141_spill] sm:$0xff] %v7296_v16  ;;  %v2097_v12 = vsel %vm7321_vm10, %v7217_v47, %v2093_v24  ;;  %v7340_v29 = vld [vmem:[#allocation3 + $0x170] sm:$0xff]  ;;  %vm2099_vm11 = vcmp.eq.f32.partialorder %v2098_v40, 8.507059e+37  ;;  %v7355_v24 = vld [vmem:[#allocation3 + $0xf8] sm:$0xff] }
 0x3a4   : > { %2391 = vmatpush.msrb.mxu2 %v7289_v17  ;;  %2411 = vmatpush.msrb.mxu3 %v7292_v57  ;;  %9932 = vst [vmem:[#allocation142_spill] sm:$0xff] %v7299_v1  ;;  %4133 = vtanh.f32 %v7287_v41  ;;  %v7325_v57 = vld [vmem:[#allocation3 + $0x1f0] sm:$0xff]  ;;  %v2101_v17 = vor.u32 1.1754944e-38, %v2100_v42 }
 0x3a5   : > { %2352 = vmatpush.msrb.mxu0 %v7296_v16  ;;  %2372 = vmatpush.msrb.mxu1 %v7299_v1  ;;  %9933 = vst [vmem:[#allocation143_spill] sm:$0xff] %v7305_v23  ;;  %v7312_v16 = vld [vmem:[#allocation3 + $0x1e0] sm:$0xff]  ;;  %v7315_v1 = vld [vmem:[#allocation3 + $0x1e8] sm:$0xff]  ;;  %v7352_v47 = vld [vmem:[#allocation3 + $0xf0] sm:$0xff] }
 0x3a6   : > { %2392 = vmatpush.msrb.mxu2 %v7305_v23  ;;  %9934 = vst [vmem:[#allocation144_spill] sm:$0xff] %v7308_v38  ;;  %2412 = vmatpush.msrb.mxu3 %v7308_v38  ;;  %v7328_v38 = vld [vmem:[#allocation3 + $0x1f8] sm:$0xff]  ;;  %v2102_v42 = vsel %vm2099_vm11, %v2101_v17, %v2097_v12  ;;  %v7366_v40 = vld [vmem:[#allocation3 + $0x70] sm:$0xff] }
 0x3a7   : > { %9935 = vst [vmem:[#allocation145_spill] sm:$0xff] %v7312_v16  ;;  %2353 = vmatpush.msrb.mxu0 %v7312_v16  ;;  %2373 = vmatpush.msrb.mxu1 %v7315_v1  ;;  %v7331_v16 = vld [vmem:[#allocation3 + $0x160] sm:$0xff]  ;;  %v9979_v17 = vld [vmem:[#allocation44_spill] sm:$0xff]  ;;  %v9980_v12 = vld [vmem:[#allocation45_spill] sm:$0xff] }
 0x3a8   : > { %9936 = vst [vmem:[#allocation146_spill] sm:$0xff] %v7315_v1  ;;  %2393 = vmatpush.msrb.mxu2 %v7325_v57  ;;  %2413 = vmatpush.msrb.mxu3 %v7328_v38  ;;  %v7334_v1 = vld [vmem:[#allocation3 + $0x168] sm:$0xff] }
 0x3a9   : > { %9939 = vst [vmem:[#allocation147_spill] sm:$0xff] %v7325_v57  ;;  %2354 = vmatpush.msrb.mxu0 %v7331_v16  ;;  %2374 = vmatpush.msrb.mxu1 %v7334_v1  ;;  %v7343_v57 = vld [vmem:[#allocation3 + $0x178] sm:$0xff] }
 0x3aa   : > { %9940 = vst [vmem:[#allocation148_spill] sm:$0xff] %v7328_v38  ;;  %2394 = vmatpush.msrb.mxu2 %v7340_v29  ;;  %2414 = vmatpush.msrb.mxu3 %v7343_v57  ;;  %v7346_v38 = vld [vmem:[#allocation3 + $0xe0] sm:$0xff]  ;;  %v4134_v23 = vpop.eup %4133 }
 0x3ab   : > { %9941 = vst [vmem:[#allocation149_spill] sm:$0xff] %v7331_v16  ;;  %2355 = vmatpush.msrb.mxu0 %v7346_v38  ;;  %v7349_v16 = vld [vmem:[#allocation3 + $0xe8] sm:$0xff] }
 0x3ac   : > { %9942 = vst [vmem:[#allocation150_spill] sm:$0xff] %v7343_v57  ;;  %2375 = vmatpush.msrb.mxu1 %v7349_v16  ;;  %2395 = vmatpush.msrb.mxu2 %v7352_v47  ;;  %v7358_v57 = vld [vmem:[#allocation3 + $0x60] sm:$0xff] }
 0x3ad   : > { %9943 = vst [vmem:[#allocation151_spill] sm:$0xff] %v7346_v38  ;;  %2415 = vmatpush.msrb.mxu3 %v7355_v24  ;;  %2356 = vmatpush.msrb.mxu0 %v7358_v57  ;;  %v7361_v38 = vld [vmem:[#allocation3 + $0x68] sm:$0xff] }
 0x3ae   : > { %9944 = vst [vmem:[#allocation152_spill] sm:$0xff] %v7349_v16  ;;  %2376 = vmatpush.msrb.mxu1 %v7361_v38  ;;  %v7364_v16 = vmul.f32 %v4134_v23, %v2102_v42  ;;  %2396 = vmatpush.msrb.mxu2 %v7366_v40  ;;  %v9981_v23 = vld [vmem:[#allocation46_spill] sm:$0xff]  ;;  %v9982_v42 = vld [vmem:[#allocation47_spill] sm:$0xff] }
 0x3af   : > { %9945 = vst [vmem:[#allocation154_spill] sm:$0xff] %v7352_v47  ;;  %v7369_v47 = vld [vmem:[#allocation3 + $0x78] sm:$0xff]  ;;  %2552 = vmatpush.msra.mxu0 %v6712_v32  ;;  %v9947_v32 = vld [vmem:[#allocation12_spill] sm:$0xff] }
 0x3b0   : > { %9946 = vst [vmem:[#allocation155_spill] sm:$0xff] %v7364_v16  ;;  %2416 = vmatpush.msrb.mxu3 %v7369_v47  ;;  %2357 = vmatmul.f32.vlgmr.msrb.gmra.mxu0 %v7364_v16 }
 0x3b1   : > { %2377 = vmatmul.f32.vlgmr.msrb.gmra.mxu1 %v7364_v16  ;;  %2397 = vmatmul.f32.vlgmr.msrb.gmra.mxu2 %v7364_v16 }
 0x3b2   : > { %2417 = vmatmul.f32.vlgmr.msrb.gmra.mxu3 %v7364_v16  ;;  %2572 = vmatpush.msra.mxu1 %v6715_v15  ;;  %v9948_v15 = vld [vmem:[#allocation13_spill] sm:$0xff]  ;;  %v7785_v16 = vld [vmem:[#allocation3 + $0x148] sm:$0xff] }
 0x3b3   : > { %2592 = vmatpush.msra.mxu2 %v6718_v34  ;;  %2612 = vmatpush.msra.mxu3 %v6721_v30  ;;  %v9949_v34 = vld [vmem:[#allocation14_spill] sm:$0xff]  ;;  %v9950_v30 = vld [vmem:[#allocation15_spill] sm:$0xff] }
 0x3b4   : > { %2553 = vmatpush.msra.mxu0 %v6724_v48  ;;  %2573 = vmatpush.msra.mxu1 %v6727_v9  ;;  %v9951_v48 = vld [vmem:[#allocation16_spill] sm:$0xff]  ;;  %v9952_v9 = vld [vmem:[#allocation17_spill] sm:$0xff] }
 0x3b5   : > { %2593 = vmatpush.msra.mxu2 %v6730_v62  ;;  %2613 = vmatpush.msra.mxu3 %v6733_v44  ;;  %v9953_v62 = vld [vmem:[#allocation18_spill] sm:$0xff]  ;;  %v9954_v44 = vld [vmem:[#allocation19_spill] sm:$0xff] }
 0x3b6   : > { %2554 = vmatpush.msra.mxu0 %v6736_v8  ;;  %2574 = vmatpush.msra.mxu1 %v6739_v7  ;;  %v9955_v8 = vld [vmem:[#allocation20_spill] sm:$0xff]  ;;  %v9956_v7 = vld [vmem:[#allocation21_spill] sm:$0xff] }
 0x3b7   : > { %2594 = vmatpush.msra.mxu2 %v6742_v22  ;;  %2614 = vmatpush.msra.mxu3 %v6745_v60  ;;  %v9957_v22 = vld [vmem:[#allocation22_spill] sm:$0xff]  ;;  %v9958_v60 = vld [vmem:[#allocation23_spill] sm:$0xff] }
 0x3b8   : > { %2555 = vmatpush.msra.mxu0 %v6748_v61  ;;  %2575 = vmatpush.msra.mxu1 %v6751_v33  ;;  %v9959_v61 = vld [vmem:[#allocation24_spill] sm:$0xff]  ;;  %v9960_v33 = vld [vmem:[#allocation25_spill] sm:$0xff] }
 0x3b9   : > { %2595 = vmatpush.msra.mxu2 %v6754_v4  ;;  %2615 = vmatpush.msra.mxu3 %v6757_v54  ;;  %v9961_v4 = vld [vmem:[#allocation26_spill] sm:$0xff]  ;;  %v9962_v54 = vld [vmem:[#allocation27_spill] sm:$0xff] }
 0x3ba   : > { %2556 = vmatpush.msra.mxu0 %v6760_v13  ;;  %2576 = vmatpush.msra.mxu1 %v6763_v31  ;;  %v9963_v13 = vld [vmem:[#allocation28_spill] sm:$0xff]  ;;  %v9964_v31 = vld [vmem:[#allocation29_spill] sm:$0xff] }
 0x3bb   : > { %2596 = vmatpush.msra.mxu2 %v6766_v25  ;;  %2616 = vmatpush.msra.mxu3 %v6769_v18  ;;  %v9965_v25 = vld [vmem:[#allocation30_spill] sm:$0xff]  ;;  %v9966_v18 = vld [vmem:[#allocation31_spill] sm:$0xff] }
 0x3bc   : > { %2557 = vmatpush.msra.mxu0 %v6772_v28  ;;  %2577 = vmatpush.msra.mxu1 %v6775_v5  ;;  %v9967_v28 = vld [vmem:[#allocation32_spill] sm:$0xff]  ;;  %v9968_v5 = vld [vmem:[#allocation33_spill] sm:$0xff] }
 0x3bd   : > { %2597 = vmatpush.msra.mxu2 %v6778_v19  ;;  %2617 = vmatpush.msra.mxu3 %v6781_v20  ;;  %v9969_v19 = vld [vmem:[#allocation34_spill] sm:$0xff]  ;;  %v9970_v20 = vld [vmem:[#allocation35_spill] sm:$0xff] }
 0x3be   : > { %2558 = vmatpush.msra.mxu0 %v6784_v21  ;;  %2578 = vmatpush.msra.mxu1 %v6787_v59  ;;  %v9971_v21 = vld [vmem:[#allocation36_spill] sm:$0xff]  ;;  %v9972_v59 = vld [vmem:[#allocation37_spill] sm:$0xff]  ;;  %10114 = vst [vmem:[#allocation34_spill] sm:$0xff] %v7785_v16 }
 0x3bf   : > { %2598 = vmatpush.msra.mxu2 %v6790_v45  ;;  %2618 = vmatpush.msra.mxu3 %v6793_v37  ;;  %v9973_v45 = vld [vmem:[#allocation38_spill] sm:$0xff]  ;;  %v9974_v37 = vld [vmem:[#allocation39_spill] sm:$0xff] }
 0x3c0   : > { %2559 = vmatpush.msra.mxu0 %v6796_v35  ;;  %2579 = vmatpush.msra.mxu1 %v6799_v10  ;;  %v9975_v35 = vld [vmem:[#allocation40_spill] sm:$0xff]  ;;  %v9976_v10 = vld [vmem:[#allocation41_spill] sm:$0xff] }
 0x3c1   : > { %2599 = vmatpush.msra.mxu2 %v6802_v14  ;;  %2619 = vmatpush.msra.mxu3 %v6805_v6  ;;  %v9977_v14 = vld [vmem:[#allocation42_spill] sm:$0xff]  ;;  %v9978_v6 = vld [vmem:[#allocation43_spill] sm:$0xff] }
 0x3c2   : > { %2560 = vmatpush.msra.mxu0 %v9947_v32  ;;  %2580 = vmatpush.msra.mxu1 %v9948_v15  ;;  %v9983_v32 = vld [vmem:[#allocation48_spill] sm:$0xff]  ;;  %v9984_v15 = vld [vmem:[#allocation49_spill] sm:$0xff] }
 0x3c3   : > { %2600 = vmatpush.msra.mxu2 %v9949_v34  ;;  %2620 = vmatpush.msra.mxu3 %v9950_v30  ;;  %v9985_v34 = vld [vmem:[#allocation50_spill] sm:$0xff]  ;;  %v9986_v30 = vld [vmem:[#allocation51_spill] sm:$0xff] }
 0x3c4   : > { %2561 = vmatpush.msra.mxu0 %v9951_v48  ;;  %2581 = vmatpush.msra.mxu1 %v9952_v9  ;;  %v9987_v48 = vld [vmem:[#allocation52_spill] sm:$0xff]  ;;  %v9988_v9 = vld [vmem:[#allocation53_spill] sm:$0xff] }
 0x3c5   : > { %2601 = vmatpush.msra.mxu2 %v9953_v62  ;;  %2621 = vmatpush.msra.mxu3 %v9954_v44  ;;  %v9989_v62 = vld [vmem:[#allocation54_spill] sm:$0xff]  ;;  %v9990_v44 = vld [vmem:[#allocation55_spill] sm:$0xff] }
 0x3c6   : > { %2562 = vmatpush.msra.mxu0 %v9955_v8  ;;  %2582 = vmatpush.msra.mxu1 %v9956_v7  ;;  %v9991_v8 = vld [vmem:[#allocation56_spill] sm:$0xff]  ;;  %v9992_v7 = vld [vmem:[#allocation57_spill] sm:$0xff] }
 0x3c7   : > { %2602 = vmatpush.msra.mxu2 %v9957_v22  ;;  %2622 = vmatpush.msra.mxu3 %v9958_v60  ;;  %v9993_v22 = vld [vmem:[#allocation58_spill] sm:$0xff]  ;;  %v9994_v60 = vld [vmem:[#allocation59_spill] sm:$0xff] }
 0x3c8   : > { %2563 = vmatpush.msra.mxu0 %v9959_v61  ;;  %2583 = vmatpush.msra.mxu1 %v9960_v33  ;;  %v9995_v61 = vld [vmem:[#allocation60_spill] sm:$0xff]  ;;  %v9996_v33 = vld [vmem:[#allocation61_spill] sm:$0xff] }
 0x3c9   : > { %2603 = vmatpush.msra.mxu2 %v9961_v4  ;;  %2623 = vmatpush.msra.mxu3 %v9962_v54  ;;  %v9997_v4 = vld [vmem:[#allocation62_spill] sm:$0xff]  ;;  %v9998_v54 = vld [vmem:[#allocation63_spill] sm:$0xff] }
 0x3ca   : > { %2564 = vmatpush.msra.mxu0 %v9963_v13  ;;  %2584 = vmatpush.msra.mxu1 %v9964_v31  ;;  %v9999_v13 = vld [vmem:[#allocation64_spill] sm:$0xff]  ;;  %v10000_v31 = vld [vmem:[#allocation65_spill] sm:$0xff] }
 0x3cb   : > { %2604 = vmatpush.msra.mxu2 %v9965_v25  ;;  %2624 = vmatpush.msra.mxu3 %v9966_v18  ;;  %v10001_v25 = vld [vmem:[#allocation66_spill] sm:$0xff]  ;;  %v10002_v18 = vld [vmem:[#allocation67_spill] sm:$0xff] }
 0x3cc   : > { %2565 = vmatpush.msra.mxu0 %v9967_v28  ;;  %2585 = vmatpush.msra.mxu1 %v9968_v5  ;;  %v10003_v28 = vld [vmem:[#allocation68_spill] sm:$0xff]  ;;  %v10004_v5 = vld [vmem:[#allocation69_spill] sm:$0xff] }
 0x3cd   : > { %2605 = vmatpush.msra.mxu2 %v9969_v19  ;;  %2625 = vmatpush.msra.mxu3 %v9970_v20  ;;  %v10005_v19 = vld [vmem:[#allocation70_spill] sm:$0xff]  ;;  %v10006_v20 = vld [vmem:[#allocation71_spill] sm:$0xff] }
 0x3ce   : > { %2566 = vmatpush.msra.mxu0 %v9971_v21  ;;  %2586 = vmatpush.msra.mxu1 %v9972_v59  ;;  %v10007_v21 = vld [vmem:[#allocation72_spill] sm:$0xff]  ;;  %v10008_v59 = vld [vmem:[#allocation73_spill] sm:$0xff] }
 0x3cf   : > { %2606 = vmatpush.msra.mxu2 %v9973_v45  ;;  %2626 = vmatpush.msra.mxu3 %v9974_v37  ;;  %v10009_v45 = vld [vmem:[#allocation75_spill] sm:$0xff]  ;;  %v10010_v37 = vld [vmem:[#allocation76_spill] sm:$0xff] }
 0x3d0   : > { %2567 = vmatpush.msra.mxu0 %v9975_v35  ;;  %2587 = vmatpush.msra.mxu1 %v9976_v10  ;;  %v10011_v35 = vld [vmem:[#allocation78_spill] sm:$0xff]  ;;  %v10012_v10 = vld [vmem:[#allocation79_spill] sm:$0xff] }
 0x3d1   : > { %2607 = vmatpush.msra.mxu2 %v9977_v14  ;;  %2627 = vmatpush.msra.mxu3 %v9978_v6  ;;  %v10013_v14 = vld [vmem:[#allocation80_spill] sm:$0xff]  ;;  %v10014_v6 = vld [vmem:[#allocation81_spill] sm:$0xff] }
 0x3d2   : > { %2632 = vmatpush.msrb.mxu0 %v9979_v17  ;;  %2652 = vmatpush.msrb.mxu1 %v9980_v12  ;;  %v10015_v17 = vld [vmem:[#allocation82_spill] sm:$0xff]  ;;  %v10016_v12 = vld [vmem:[#allocation83_spill] sm:$0xff] }
 0x3d3   : > { %2672 = vmatpush.msrb.mxu2 %v9981_v23  ;;  %2692 = vmatpush.msrb.mxu3 %v9982_v42  ;;  %v10017_v23 = vld [vmem:[#allocation84_spill] sm:$0xff]  ;;  %v10018_v42 = vld [vmem:[#allocation85_spill] sm:$0xff] }
 0x3d4   : > { %2633 = vmatpush.msrb.mxu0 %v9983_v32  ;;  %2653 = vmatpush.msrb.mxu1 %v9984_v15  ;;  %v10019_v32 = vld [vmem:[#allocation86_spill] sm:$0xff]  ;;  %v10020_v15 = vld [vmem:[#allocation87_spill] sm:$0xff] }
 0x3d5   : > { %2673 = vmatpush.msrb.mxu2 %v9985_v34  ;;  %2693 = vmatpush.msrb.mxu3 %v9986_v30  ;;  %v10021_v34 = vld [vmem:[#allocation88_spill] sm:$0xff]  ;;  %v10022_v30 = vld [vmem:[#allocation89_spill] sm:$0xff] }
 0x3d6   : > { %2634 = vmatpush.msrb.mxu0 %v9987_v48  ;;  %2654 = vmatpush.msrb.mxu1 %v9988_v9  ;;  %v10023_v48 = vld [vmem:[#allocation91_spill] sm:$0xff]  ;;  %v10024_v9 = vld [vmem:[#allocation92_spill] sm:$0xff] }
 0x3d7   : > { %2674 = vmatpush.msrb.mxu2 %v9989_v62  ;;  %2694 = vmatpush.msrb.mxu3 %v9990_v44  ;;  %v10025_v62 = vld [vmem:[#allocation93_spill] sm:$0xff]  ;;  %v10026_v44 = vld [vmem:[#allocation94_spill] sm:$0xff] }
 0x3d8   : > { %2635 = vmatpush.msrb.mxu0 %v9991_v8  ;;  %2655 = vmatpush.msrb.mxu1 %v9992_v7  ;;  %v10027_v8 = vld [vmem:[#allocation95_spill] sm:$0xff]  ;;  %v10028_v7 = vld [vmem:[#allocation96_spill] sm:$0xff] }
 0x3d9   : > { %2675 = vmatpush.msrb.mxu2 %v9993_v22  ;;  %2695 = vmatpush.msrb.mxu3 %v9994_v60  ;;  %v10029_v22 = vld [vmem:[#allocation97_spill] sm:$0xff]  ;;  %v10030_v60 = vld [vmem:[#allocation98_spill] sm:$0xff] }
 0x3da   : > { %2636 = vmatpush.msrb.mxu0 %v9995_v61  ;;  %2656 = vmatpush.msrb.mxu1 %v9996_v33  ;;  %v10031_v61 = vld [vmem:[#allocation100_spill] sm:$0xff]  ;;  %v10032_v33 = vld [vmem:[#allocation101_spill] sm:$0xff] }
 0x3db   : > { %2676 = vmatpush.msrb.mxu2 %v9997_v4  ;;  %2696 = vmatpush.msrb.mxu3 %v9998_v54  ;;  %v10033_v4 = vld [vmem:[#allocation102_spill] sm:$0xff]  ;;  %v10034_v54 = vld [vmem:[#allocation103_spill] sm:$0xff] }
 0x3dc   : > { %2637 = vmatpush.msrb.mxu0 %v9999_v13  ;;  %2657 = vmatpush.msrb.mxu1 %v10000_v31  ;;  %v10035_v13 = vld [vmem:[#allocation104_spill] sm:$0xff]  ;;  %v10036_v31 = vld [vmem:[#allocation105_spill] sm:$0xff] }
 0x3dd   : > { %2677 = vmatpush.msrb.mxu2 %v10001_v25  ;;  %2697 = vmatpush.msrb.mxu3 %v10002_v18  ;;  %v10037_v25 = vld [vmem:[#allocation106_spill] sm:$0xff]  ;;  %v10038_v18 = vld [vmem:[#allocation107_spill] sm:$0xff] }
 0x3de   : > { %2638 = vmatpush.msrb.mxu0 %v10003_v28  ;;  %2658 = vmatpush.msrb.mxu1 %v10004_v5  ;;  %v10039_v28 = vld [vmem:[#allocation108_spill] sm:$0xff]  ;;  %v10040_v5 = vld [vmem:[#allocation109_spill] sm:$0xff] }
 0x3df   : > { %2678 = vmatpush.msrb.mxu2 %v10005_v19  ;;  %2698 = vmatpush.msrb.mxu3 %v10006_v20  ;;  %v10041_v19 = vld [vmem:[#allocation110_spill] sm:$0xff]  ;;  %v10042_v20 = vld [vmem:[#allocation111_spill] sm:$0xff] }
 0x3e0   : > { %2639 = vmatpush.msrb.mxu0 %v10007_v21  ;;  %2659 = vmatpush.msrb.mxu1 %v10008_v59 }
 0x3e1   : > { %2679 = vmatpush.msrb.mxu2 %v10009_v45  ;;  %2699 = vmatpush.msrb.mxu3 %v10010_v37  ;;  %v10043_v45 = vld [vmem:[#allocation74_spill] sm:$0xff] }
 0x3e2   : > { %2640 = vmatpush.msrb.mxu0 %v10011_v35  ;;  %2660 = vmatpush.msrb.mxu1 %v10012_v10  ;;  %v10044_v35 = vld [vmem:[#allocation77_spill] sm:$0xff] }
 0x3e3   : > { %2680 = vmatpush.msrb.mxu2 %v10013_v14  ;;  %2700 = vmatpush.msrb.mxu3 %v10014_v6 }
 0x3e4   : > { %2641 = vmatpush.msrb.mxu0 %v10015_v17  ;;  %2661 = vmatpush.msrb.mxu1 %v10016_v12  ;;  %v10045_v12 = vld [vmem:[#allocation90_spill] sm:$0xff] }
 0x3e5   : > { %2681 = vmatpush.msrb.mxu2 %v10017_v23  ;;  %2701 = vmatpush.msrb.mxu3 %v10018_v42 }
 0x3e6   : > { %2642 = vmatpush.msrb.mxu0 %v10019_v32  ;;  %2662 = vmatpush.msrb.mxu1 %v10020_v15 }
 0x3e7   : > { %2682 = vmatpush.msrb.mxu2 %v10021_v34  ;;  %2702 = vmatpush.msrb.mxu3 %v10022_v30 }
 0x3e8   : > { %2643 = vmatpush.msrb.mxu0 %v10023_v48  ;;  %2663 = vmatpush.msrb.mxu1 %v10024_v9 }
 0x3e9   : > { %2683 = vmatpush.msrb.mxu2 %v10025_v62  ;;  %2703 = vmatpush.msrb.mxu3 %v10026_v44 }
 0x3ea   : > { %2644 = vmatpush.msrb.mxu0 %v10027_v8  ;;  %2664 = vmatpush.msrb.mxu1 %v10028_v7  ;;  %v10046_v8 = vld [vmem:[#allocation99_spill] sm:$0xff] }
 0x3eb   : > { %2684 = vmatpush.msrb.mxu2 %v10029_v22  ;;  %2704 = vmatpush.msrb.mxu3 %v10030_v60 }
 0x3ec   : > { %2645 = vmatpush.msrb.mxu0 %v10031_v61  ;;  %2665 = vmatpush.msrb.mxu1 %v10032_v33 }
 0x3ed   : > { %2685 = vmatpush.msrb.mxu2 %v10033_v4  ;;  %2705 = vmatpush.msrb.mxu3 %v10034_v54 }
 0x3ee   : > { %2646 = vmatpush.msrb.mxu0 %v10035_v13  ;;  %2666 = vmatpush.msrb.mxu1 %v10036_v31 }
 0x3ef   : > { %2686 = vmatpush.msrb.mxu2 %v10037_v25  ;;  %2706 = vmatpush.msrb.mxu3 %v10038_v18 }
 0x3f0   : > { %2647 = vmatpush.msrb.mxu0 %v10039_v28  ;;  %2667 = vmatpush.msrb.mxu1 %v10040_v5 }
 0x3f1   : > { %2687 = vmatpush.msrb.mxu2 %v10041_v19  ;;  %2707 = vmatpush.msrb.mxu3 %v10042_v20 }
 0x408   : > { %v2190_v21 = vpop.f32.mrf.mxu0  ;;  %v2210_v59 = vpop.f32.mrf.mxu1 }
 0x409   : > { %v2333_v37 = vadd.f32 %v2190_v21, %v10043_v45  ;;  %v2334_v10 = vadd.f32 %v2210_v59, %v10044_v35 }
 0x40b   : > { %v3948_v14 = vmul.f32 -1.442695, %v2333_v37  ;;  %v3949_v6 = vmul.f32 -1.442695, %v2334_v10 }
 0x40d   : > { %4135 = vpow2.f32 %v3948_v14 }
 0x40e   : > { %4137 = vpow2.f32 %v3949_v6 }
 0x40f   : > { %v2250_v17 = vpop.f32.mrf.mxu3  ;;  %v2230_v48 = vpop.f32.mrf.mxu2 }
 0x410   : > { %v2336_v23 = vadd.f32 %v2250_v17, %v10045_v12  ;;  %v2335_v7 = vadd.f32 %v2230_v48, %v10046_v8 }
 0x412   : > { %v3950_v42 = vmul.f32 -1.442695, %v2336_v23  ;;  %v2270_v37 = vpop.f32.mrf.mxu0  ;;  %v2290_v10 = vpop.f32.mrf.mxu1 }
 0x413   : > { %v4136_v32 = vpop.eup %4135 }
 0x414   : > { %v4138_v15 = vpop.eup %4137  ;;  %v2492_v34 = vadd.f32 1.0, %v4136_v32  ;;  %4139 = vpow2.f32 %v3950_v42 }
 0x415   : > { %v2511_v30 = vadd.f32 1.0, %v4138_v15 }
 0x416   : > { %4141 = vrcp.f32 %v2492_v34  ;;  %v2504_v54 = vand.u32 2147483648, %v2492_v34  ;;  %v2502_v25 = vand.u32 2147483647, %v2492_v34  ;;  %vm2498_vm14 = vweird.f32 %v2492_v34 }
 0x417   : > { %4143 = vrcp.f32 %v2511_v30  ;;  %v2523_v13 = vand.u32 2147483648, %v2511_v30  ;;  %v2521_v28 = vand.u32 2147483647, %v2511_v30  ;;  %vm2517_vm15 = vweird.f32 %v2511_v30 }
 0x418   : > { %v2505_v20 = vor.u32 1.1754944e-38, %v2504_v54  ;;  %vm2503_vm2 = vcmp.eq.f32.partialorder %v2502_v25, 8.507059e+37 }
 0x419   : > { %v2524_v14 = vor.u32 1.1754944e-38, %v2523_v13  ;;  %vm2522_vm3 = vcmp.eq.f32.partialorder %v2521_v28, 8.507059e+37 }
 0x41a   : > { %v4140_v9 = vpop.eup %4139 }
 0x41b   : > { %v2531_v62 = vadd.f32 1.0, %v4140_v9 }
 0x41c   : > { %v4142_v44 = vpop.eup %4141 }
 0x41d   : > { %v4144_v22 = vpop.eup %4143  ;;  %v2494_v60 = vmul.f32 %v4142_v44, %v2492_v34  ;;  %4145 = vrcp.f32 %v2531_v62  ;;  %vm2499_vm12 = vweird.f32 %v4142_v44  ;;  %vm2537_vm5 = vweird.f32 %v2531_v62 }
 0x41e   : > { %v2513_v61 = vmul.f32 %v4144_v22, %v2511_v30  ;;  %4147 = vtanh.f32 %v2335_v7  ;;  %vm2518_vm13 = vweird.f32 %v4144_v22  ;;  %vm2500_vm0 = vmor %vm2498_vm14, %vm2499_vm12  ;;  %v2541_v54 = vand.u32 2147483647, %v2531_v62 }
 0x41f   : > { %v2495_v33 = vsub.f32 1.0, %v2494_v60  ;;  %vm2519_vm1 = vmor %vm2517_vm15, %vm2518_vm13  ;;  %v2337_v60 = vadd.f32 %v2270_v37, %v5667_v26 }
 0x420   : > { %v2514_v4 = vsub.f32 1.0, %v2513_v61  ;;  %v2338_v61 = vadd.f32 %v2290_v10, %v5670_v27  ;;  %vm2542_vm7 = vcmp.eq.f32.partialorder %v2541_v54, 8.507059e+37  ;;  %v10058_v54 = vld [vmem:[#allocation122_spill] sm:$0xff] }
 0x421   : > { %v2496_v31 = vmul.f32 %v4142_v44, %v2495_v33  ;;  %v2543_v33 = vand.u32 2147483648, %v2531_v62 }
 0x422   : > { %v2515_v18 = vmul.f32 %v4144_v22, %v2514_v4 }
 0x423   : > { %v4146_v5 = vpop.eup %4145  ;;  %v2497_v19 = vadd.f32 %v4142_v44, %v2496_v31  ;;  %v2544_v28 = vor.u32 1.1754944e-38, %v2543_v33 }
 0x424   : > { %v2516_v21 = vadd.f32 %v4144_v22, %v2515_v18  ;;  %v2533_v59 = vmul.f32 %v4146_v5, %v2531_v62  ;;  %v4148_v17 = vpop.eup %4147  ;;  %vm2538_vm4 = vweird.f32 %v4146_v5 }
 0x425   : > { %v2501_v6 = vsel %vm2500_vm0, %v4142_v44, %v2497_v19  ;;  %v2330_v44 = vpop.f32.mrf.mxu3  ;;  %vm2539_vm6 = vmor %vm2537_vm5, %vm2538_vm4 }
 0x426   : > { %v2506_v23 = vsel %vm2503_vm2, %v2505_v20, %v2501_v6  ;;  %v2520_v42 = vsel %vm2519_vm1, %v4144_v22, %v2516_v21  ;;  %v2534_v32 = vsub.f32 1.0, %v2533_v59  ;;  %v2340_v21 = vadd.f32 %v2330_v44, %v5682_v63 }
 0x427   : > { %v2525_v15 = vsel %vm2522_vm3, %v2524_v14, %v2520_v42  ;;  %v2548_v48 = vmul.f32 %v4148_v17, %v2506_v23  ;;  %v2310_v14 = vpop.f32.mrf.mxu2  ;;  %v10047_v42 = vld [vmem:[#allocation112_spill] sm:$0xff] }
 0x428   : > { %v2547_v34 = vmul.f32 %v2525_v15, %v7101_v58  ;;  %v2535_v30 = vmul.f32 %v4146_v5, %v2534_v32  ;;  %v10050_v32 = vld [vmem:[#allocation115_spill] sm:$0xff] }
 0x42a   : > { %v7509_v9 = vadd.f32 %v2548_v48, %v2547_v34  ;;  %v2536_v7 = vadd.f32 %v4146_v5, %v2535_v30  ;;  %v10055_v34 = vld [vmem:[#allocation9_spill] sm:$0xff] }
 0x42b   : > { %v2339_v30 = vadd.f32 %v2310_v14, %v10055_v34 }
 0x42c   : > { %4149 = vtanh.f32 %v7509_v9  ;;  %v2540_v58 = vsel %vm2539_vm6, %v4146_v5, %v2536_v7  ;;  %v10056_v7 = vld [vmem:[#allocation120_spill] sm:$0xff] }
 0x42d   : > { %v2358_v22 = vpop.f32.mrf.mxu0  ;;  %v2545_v20 = vsel %vm2542_vm7, %v2544_v28, %v2540_v58  ;;  %v10060_v58 = vld [vmem:[#allocation124_spill] sm:$0xff]  ;;  %v10062_v28 = vld [vmem:[#allocation126_spill] sm:$0xff] }
 0x42e   : > { %v2378_v4 = vpop.f32.mrf.mxu1  ;;  %v2421_v13 = vadd.f32 %v2358_v22, %v2337_v60  ;;  %v10057_v60 = vld [vmem:[#allocation121_spill] sm:$0xff] }
 0x42f   : > { %v2422_v31 = vadd.f32 %v2378_v4, %v2338_v61 }
 0x430   : > { %v3945_v25 = vmul.f32 -1.442695, %v2421_v13  ;;  %v10059_v13 = vld [vmem:[#allocation123_spill] sm:$0xff] }
 0x431   : > { %v3946_v18 = vmul.f32 -1.442695, %v2422_v31 }
 0x432   : > { %4151 = vpow2.f32 %v3945_v25  ;;  %v4150_v19 = vpop.eup %4149  ;;  %v10061_v25 = vld [vmem:[#allocation125_spill] sm:$0xff] }
 0x433   : > { %4153 = vpow2.f32 %v3946_v18  ;;  %v2551_v59 = vmul.f32 %v4150_v19, %v2545_v20  ;;  %v10063_v19 = vld [vmem:[#allocation127_spill] sm:$0xff] }
 0x434   : > { %v2398_v15 = vpop.f32.mrf.mxu2 }
 0x435   : > { %v2418_v37 = vpop.f32.mrf.mxu3  ;;  %2568 = vmatmul.f32.vlgmr.msra.gmra.mxu0 %v2551_v59  ;;  %2588 = vmatmul.f32.vlgmr.msra.gmra.mxu1 %v2551_v59  ;;  %v2423_v33 = vadd.f32 %v2398_v15, %v2339_v30  ;;  %v10070_v15 = vld [vmem:[#allocation134_spill] sm:$0xff] }
 0x436   : > { %v2424_v10 = vadd.f32 %v2418_v37, %v2340_v21  ;;  %2608 = vmatmul.f32.vlgmr.msra.gmra.mxu2 %v2551_v59  ;;  %2628 = vmatmul.f32.vlgmr.msra.gmra.mxu3 %v2551_v59  ;;  %v10065_v37 = vld [vmem:[#allocation129_spill] sm:$0xff] }
 0x437   : > { %2720 = vmatpush.msra.mxu0 %v7107_v53  ;;  %2740 = vmatpush.msra.mxu1 %v7110_v0  ;;  %v10048_v53 = vld [vmem:[#allocation113_spill] sm:$0xff]  ;;  %v10049_v0 = vld [vmem:[#allocation114_spill] sm:$0xff] }
 0x438   : > { %v3947_v62 = vmul.f32 -1.442695, %v2424_v10  ;;  %v4152_v5 = vpop.eup %4151  ;;  %2760 = vmatpush.msra.mxu2 %v7115_v49  ;;  %2780 = vmatpush.msra.mxu3 %v7118_v56  ;;  %v10051_v49 = vld [vmem:[#allocation116_spill] sm:$0xff]  ;;  %v10052_v56 = vld [vmem:[#allocation117_spill] sm:$0xff] }
 0x439   : > { %v4154_v6 = vpop.eup %4153  ;;  %v7517_v17 = vadd.f32 1.0, %v4152_v5  ;;  %2721 = vmatpush.msra.mxu0 %v7123_v55  ;;  %2741 = vmatpush.msra.mxu1 %v7126_v43  ;;  %v10053_v55 = vld [vmem:[#allocation118_spill] sm:$0xff]  ;;  %v10054_v43 = vld [vmem:[#allocation119_spill] sm:$0xff] }
 0x43a   : > { %4155 = vpow2.f32 %v3947_v62  ;;  %v7521_v23 = vadd.f32 1.0, %v4154_v6  ;;  %2761 = vmatpush.msra.mxu2 %v10047_v42  ;;  %2781 = vmatpush.msra.mxu3 %v10048_v53  ;;  %v10066_v5 = vld [vmem:[#allocation130_spill] sm:$0xff]  ;;  %v10067_v6 = vld [vmem:[#allocation131_spill] sm:$0xff] }
 0x43b   : > { %4157 = vrcp.f32 %v7517_v17  ;;  %2722 = vmatpush.msra.mxu0 %v10049_v0  ;;  %2742 = vmatpush.msra.mxu1 %v10050_v32  ;;  %v2440_v21 = vand.u32 2147483648, %v7517_v17  ;;  %v2438_v62 = vand.u32 2147483647, %v7517_v17  ;;  %v10068_v0 = vld [vmem:[#allocation132_spill] sm:$0xff]  ;;  %v10069_v32 = vld [vmem:[#allocation133_spill] sm:$0xff]  ;;  %vm2434_vm10 = vweird.f32 %v7517_v17 }
 0x43c   : > { %4159 = vrcp.f32 %v7521_v23  ;;  %2762 = vmatpush.msra.mxu2 %v10051_v49  ;;  %2782 = vmatpush.msra.mxu3 %v10052_v56  ;;  %v2459_v10 = vand.u32 2147483648, %v7521_v23  ;;  %v2457_v53 = vand.u32 2147483647, %v7521_v23  ;;  %vm2453_vm11 = vweird.f32 %v7521_v23 }
 0x43d   : > { %2723 = vmatpush.msra.mxu0 %v10053_v55  ;;  %2743 = vmatpush.msra.mxu1 %v10054_v43  ;;  %v10071_v55 = vld [vmem:[#allocation135_spill] sm:$0xff]  ;;  %v2441_v43 = vor.u32 1.1754944e-38, %v2440_v21  ;;  %vm2439_vm14 = vcmp.eq.f32.partialorder %v2438_v62, 8.507059e+37  ;;  %v10086_v21 = vld [vmem:[#allocation148_spill] sm:$0xff] }
 0x43e   : > { %2763 = vmatpush.msra.mxu2 %v10056_v7  ;;  %2783 = vmatpush.msra.mxu3 %v10057_v60  ;;  %v10072_v7 = vld [vmem:[#allocation136_spill] sm:$0xff]  ;;  %v10073_v60 = vld [vmem:[#allocation137_spill] sm:$0xff]  ;;  %vm2458_vm15 = vcmp.eq.f32.partialorder %v2457_v53, 8.507059e+37  ;;  %v4635_v53 = vld [vmem:[#allocation3 + $0x720] sm:$0xff] }
 0x43f   : > { %2648 = vmatmul.f32.vlgmr.msrb.gmra.mxu0 %v2551_v59  ;;  %2668 = vmatmul.f32.vlgmr.msrb.gmra.mxu1 %v2551_v59  ;;  %v10090_v62 = vld [vmem:[#allocation152_spill] sm:$0xff] }
 0x440   : > { %v4156_v48 = vpop.eup %4155  ;;  %2688 = vmatmul.f32.vlgmr.msrb.gmra.mxu2 %v2551_v59  ;;  %2708 = vmatmul.f32.vlgmr.msrb.gmra.mxu3 %v2551_v59  ;;  %v10064_v59 = vld [vmem:[#allocation128_spill] sm:$0xff] }
 0x441   : > { %v7538_v61 = vadd.f32 1.0, %v4156_v48  ;;  %v4158_v44 = vpop.eup %4157  ;;  %2724 = vmatpush.msra.mxu0 %v10058_v54  ;;  %2744 = vmatpush.msra.mxu1 %v10059_v13 }
 0x442   : > { %v4160_v22 = vpop.eup %4159  ;;  %v2430_v4 = vmul.f32 %v4158_v44, %v7517_v17  ;;  %2764 = vmatpush.msra.mxu2 %v10060_v58  ;;  %2784 = vmatpush.msra.mxu3 %v10061_v25  ;;  %vm2435_vm8 = vweird.f32 %v4158_v44  ;;  %v2460_v17 = vor.u32 1.1754944e-38, %v2459_v10  ;;  %v10081_v25 = vld [vmem:[#allocation145_spill] sm:$0xff] }
 0x443   : > { %4161 = vrcp.f32 %v7538_v61  ;;  %v2449_v31 = vmul.f32 %v4160_v22, %v7521_v23  ;;  %2725 = vmatpush.msra.mxu0 %v10062_v28  ;;  %2745 = vmatpush.msra.mxu1 %v10063_v19  ;;  %vm2454_vm9 = vweird.f32 %v4160_v22  ;;  %vm2436_vm12 = vmor %vm2434_vm10, %vm2435_vm8  ;;  %vm2473_vm1 = vweird.f32 %v7538_v61  ;;  %v4671_v19 = vld [vmem:[#allocation3 + $0x2a0] sm:$0xff] }
 0x444   : > { %v2431_v18 = vsub.f32 1.0, %v2430_v4  ;;  %4163 = vtanh.f32 %v2423_v33  ;;  %2765 = vmatpush.msra.mxu2 %v10064_v59  ;;  %2785 = vmatpush.msra.mxu3 %v10065_v37  ;;  %vm2455_vm13 = vmor %vm2453_vm11, %vm2454_vm9  ;;  %v2477_v28 = vand.u32 2147483647, %v7538_v61  ;;  %v10087_v59 = vld [vmem:[#allocation149_spill] sm:$0xff] }
 0x445   : > { %v2450_v20 = vsub.f32 1.0, %v2449_v31  ;;  %2726 = vmatpush.msra.mxu0 %v10066_v5  ;;  %2746 = vmatpush.msra.mxu1 %v10067_v6  ;;  %v10091_v6 = vld [vmem:[#allocation154_spill] sm:$0xff] }
 0x446   : > { %v2432_v14 = vmul.f32 %v4158_v44, %v2431_v18  ;;  %2766 = vmatpush.msra.mxu2 %v10068_v0  ;;  %2786 = vmatpush.msra.mxu3 %v10069_v32  ;;  %v10082_v18 = vld [vmem:[#allocation146_spill] sm:$0xff]  ;;  %vm2478_vm3 = vcmp.eq.f32.partialorder %v2477_v28, 8.507059e+37  ;;  %v4638_v0 = vld [vmem:[#allocation3 + $0x738] sm:$0xff] }
 0x447   : > { %v2451_v42 = vmul.f32 %v4160_v22, %v2450_v20  ;;  %2727 = vmatpush.msra.mxu0 %v10070_v15  ;;  %2747 = vmatpush.msra.mxu1 %v10071_v55  ;;  %v10085_v20 = vld [vmem:[#allocation147_spill] sm:$0xff]  ;;  %v4639_v32 = vld [vmem:[#allocation3 + $0x6a0] sm:$0xff]  ;;  %v4642_v15 = vld [vmem:[#allocation3 + $0x6b8] sm:$0xff] }
 0x448   : > { %v2433_v56 = vadd.f32 %v4158_v44, %v2432_v14  ;;  %2767 = vmatpush.msra.mxu2 %v10072_v7  ;;  %2787 = vmatpush.msra.mxu3 %v10073_v60  ;;  %v10089_v14 = vld [vmem:[#allocation151_spill] sm:$0xff]  ;;  %v4643_v55 = vld [vmem:[#allocation3 + $0x620] sm:$0xff]  ;;  %v4670_v28 = vld [vmem:[#allocation3 + $0x338] sm:$0xff] }
 0x449   : > { %v7559_v49 = vpop.eup %4161  ;;  %v2452_v48 = vadd.f32 %v4160_v22, %v2451_v42  ;;  %2728 = vmatpush.msra.mxu0 %v7252_v39  ;;  %2748 = vmatpush.msra.mxu1 %v7255_v46  ;;  %v10074_v46 = vld [vmem:[#allocation138_spill] sm:$0xff]  ;;  %v4648_v60 = vld [vmem:[#allocation3 + $0x5a8] sm:$0xff] }
 0x44a   : > { %v2469_v30 = vmul.f32 %v7559_v49, %v7538_v61  ;;  %v2437_v33 = vsel %vm2436_vm12, %v4158_v44, %v2433_v56  ;;  %v4164_v23 = vpop.eup %4163  ;;  %2768 = vmatpush.msra.mxu2 %v7261_v51  ;;  %2788 = vmatpush.msra.mxu3 %v7264_v36  ;;  %v10075_v36 = vld [vmem:[#allocation139_spill] sm:$0xff]  ;;  %vm2474_vm0 = vweird.f32 %v7559_v49  ;;  %v4641_v56 = vld [vmem:[#allocation3 + $0x6b0] sm:$0xff]  ;;  %v4647_v7 = vld [vmem:[#allocation3 + $0x5a0] sm:$0xff] }
 0x44b   : > { %v2442_v4 = vsel %vm2439_vm14, %v2441_v43, %v2437_v33  ;;  %v2456_v54 = vsel %vm2455_vm13, %v4160_v22, %v2452_v48  ;;  %2729 = vmatpush.msra.mxu0 %v7267_v11  ;;  %2749 = vmatpush.msra.mxu1 %v7270_v50  ;;  %v10076_v22 = vld [vmem:[#allocation140_spill] sm:$0xff]  ;;  %v10077_v11 = vld [vmem:[#allocation141_spill] sm:$0xff]  ;;  %v10078_v50 = vld [vmem:[#allocation142_spill] sm:$0xff] }
 0x44c   : > { %v2470_v13 = vsub.f32 1.0, %v2469_v30  ;;  %v2461_v31 = vsel %vm2458_vm15, %v2460_v17, %v2456_v54  ;;  %v2484_v58 = vmul.f32 %v4164_v23, %v2442_v4  ;;  %2769 = vmatpush.msra.mxu2 %v7275_v52  ;;  %2789 = vmatpush.msra.mxu3 %v7278_v2  ;;  %v2479_v2 = vand.u32 2147483648, %v7538_v61  ;;  %vm7599_vm2 = vmor %vm2473_vm1, %vm2474_vm0  ;;  %v10088_v61 = vld [vmem:[#allocation150_spill] sm:$0xff]  ;;  %v4644_v43 = vld [vmem:[#allocation3 + $0x628] sm:$0xff] }
 0x44d   : > { %v2483_v44 = vmul.f32 %v2461_v31, %v7287_v41  ;;  %2730 = vmatpush.msra.mxu0 %v7281_v3  ;;  %2750 = vmatpush.msra.mxu1 %v10074_v46  ;;  %v10079_v3 = vld [vmem:[#allocation143_spill] sm:$0xff]  ;;  %v10080_v41 = vld [vmem:[#allocation144_spill] sm:$0xff]  ;;  %v4646_v30 = vld [vmem:[#allocation3 + $0x638] sm:$0xff] }
 0x44e   : > { %v2471_v39 = vmul.f32 %v7559_v49, %v2470_v13  ;;  %2770 = vmatpush.msra.mxu2 %v10075_v36  ;;  %2790 = vmatpush.msra.mxu3 %v10076_v22  ;;  %v2480_v10 = vor.u32 1.1754944e-38, %v2479_v2  ;;  %v4645_v48 = vld [vmem:[#allocation3 + $0x630] sm:$0xff]  ;;  %v4650_v33 = vld [vmem:[#allocation3 + $0x5b8] sm:$0xff]  ;;  %v4651_v23 = vld [vmem:[#allocation3 + $0x520] sm:$0xff] }
 0x44f   : > { %v7583_v51 = vadd.f32 %v2484_v58, %v2483_v44  ;;  %2731 = vmatpush.msra.mxu0 %v10077_v11  ;;  %2751 = vmatpush.msra.mxu1 %v10078_v50  ;;  %v4649_v17 = vld [vmem:[#allocation3 + $0x5b0] sm:$0xff]  ;;  %v4652_v4 = vld [vmem:[#allocation3 + $0x528] sm:$0xff]  ;;  %v4654_v13 = vld [vmem:[#allocation3 + $0x538] sm:$0xff] }
 0x450   : > { %v2472_v52 = vadd.f32 %v7559_v49, %v2471_v39  ;;  %2771 = vmatpush.msra.mxu2 %v10079_v3  ;;  %2791 = vmatpush.msra.mxu3 %v10080_v41  ;;  %v4653_v54 = vld [vmem:[#allocation3 + $0x530] sm:$0xff]  ;;  %v4655_v31 = vld [vmem:[#allocation3 + $0x4a0] sm:$0xff]  ;;  %v4656_v58 = vld [vmem:[#allocation3 + $0x4a8] sm:$0xff] }
 0x451   : > { %4165 = vtanh.f32 %v7583_v51  ;;  %2732 = vmatpush.msra.mxu0 %v10081_v25  ;;  %2752 = vmatpush.msra.mxu1 %v10082_v18  ;;  %v4657_v44 = vld [vmem:[#allocation3 + $0x4b0] sm:$0xff]  ;;  %v4658_v39 = vld [vmem:[#allocation3 + $0x4b8] sm:$0xff]  ;;  %v4659_v46 = vld [vmem:[#allocation3 + $0x420] sm:$0xff] }
 0x452   : > { %2772 = vmatpush.msra.mxu2 %v10085_v20  ;;  %2792 = vmatpush.msra.mxu3 %v10086_v21  ;;  %v2476_v37 = vsel %vm7599_vm2, %v7559_v49, %v2472_v52  ;;  %v4640_v49 = vld [vmem:[#allocation3 + $0x6a8] sm:$0xff]  ;;  %v4661_v22 = vld [vmem:[#allocation3 + $0x430] sm:$0xff]  ;;  %v4662_v11 = vld [vmem:[#allocation3 + $0x438] sm:$0xff] }
 0x453   : > { %2733 = vmatpush.msra.mxu0 %v10087_v59  ;;  %2753 = vmatpush.msra.mxu1 %v7334_v1  ;;  %v2481_v1 = vsel %vm2478_vm3, %v2480_v10, %v2476_v37  ;;  %v4660_v36 = vld [vmem:[#allocation3 + $0x428] sm:$0xff]  ;;  %v4663_v50 = vld [vmem:[#allocation3 + $0x3a0] sm:$0xff]  ;;  %v4665_v2 = vld [vmem:[#allocation3 + $0x3b0] sm:$0xff] }
 0x454   : > { %2773 = vmatpush.msra.mxu2 %v7340_v29  ;;  %2793 = vmatpush.msra.mxu3 %v10088_v61  ;;  %v4631_v29 = vld [vmem:[#allocation3 + $0x7a0] sm:$0xff]  ;;  %v4664_v52 = vld [vmem:[#allocation3 + $0x3a8] sm:$0xff]  ;;  %v4666_v3 = vld [vmem:[#allocation3 + $0x3b8] sm:$0xff] }
 0x455   : > { %2734 = vmatpush.msra.mxu0 %v10089_v14  ;;  %2754 = vmatpush.msra.mxu1 %v10090_v62  ;;  %v4667_v41 = vld [vmem:[#allocation3 + $0x320] sm:$0xff]  ;;  %v4668_v25 = vld [vmem:[#allocation3 + $0x328] sm:$0xff]  ;;  %v4669_v18 = vld [vmem:[#allocation3 + $0x330] sm:$0xff] }
 0x456   : > { %2774 = vmatpush.msra.mxu2 %v10091_v6  ;;  %2794 = vmatpush.msra.mxu3 %v7355_v24  ;;  %v4632_v24 = vld [vmem:[#allocation3 + $0x7a8] sm:$0xff]  ;;  %v4673_v21 = vld [vmem:[#allocation3 + $0x2b0] sm:$0xff]  ;;  %v4674_v59 = vld [vmem:[#allocation3 + $0x2b8] sm:$0xff] }
 0x457   : > { %v4166_v5 = vpop.eup %4165  ;;  %2735 = vmatpush.msra.mxu0 %v7358_v57  ;;  %2755 = vmatpush.msra.mxu1 %v7361_v38  ;;  %v4633_v57 = vld [vmem:[#allocation3 + $0x7b0] sm:$0xff]  ;;  %v4634_v38 = vld [vmem:[#allocation3 + $0x7b8] sm:$0xff]  ;;  %v4672_v20 = vld [vmem:[#allocation3 + $0x2a8] sm:$0xff] }
 0x458   : > { %v7618_v42 = vmul.f32 %v4166_v5, %v2481_v1  ;;  %2775 = vmatpush.msra.mxu2 %v7366_v40  ;;  %2795 = vmatpush.msra.mxu3 %v7369_v47  ;;  %v4636_v40 = vld [vmem:[#allocation3 + $0x728] sm:$0xff]  ;;  %v4637_v47 = vld [vmem:[#allocation3 + $0x730] sm:$0xff]  ;;  %v4675_v37 = vld [vmem:[#allocation3 + $0x220] sm:$0xff] }
 0x459   : > { %2931 = vmatpush.msrb.mxu0 %v4631_v29  ;;  %2951 = vmatpush.msrb.mxu1 %v4632_v24  ;;  %v4676_v10 = vld [vmem:[#allocation3 + $0x228] sm:$0xff]  ;;  %v4677_v61 = vld [vmem:[#allocation3 + $0x230] sm:$0xff]  ;;  %v4678_v14 = vld [vmem:[#allocation3 + $0x238] sm:$0xff] }
 0x45a   : > { %10092 = vst [vmem:[#allocation12_spill] sm:$0xff] %v7618_v42  ;;  %2736 = vmatmul.f32.vlgmr.msra.gmra.mxu0 %v7618_v42  ;;  %2756 = vmatmul.f32.vlgmr.msra.gmra.mxu1 %v7618_v42  ;;  %v4679_v62 = vld [vmem:[#allocation3 + $0x1a0] sm:$0xff]  ;;  %v4680_v5 = vld [vmem:[#allocation3 + $0x1a8] sm:$0xff]  ;;  %v4681_v6 = vld [vmem:[#allocation3 + $0x1b0] sm:$0xff] }
 0x45b   : > { %2776 = vmatmul.f32.vlgmr.msra.gmra.mxu2 %v7618_v42  ;;  %2796 = vmatmul.f32.vlgmr.msra.gmra.mxu3 %v7618_v42  ;;  %v4682_v1 = vld [vmem:[#allocation3 + $0x1b8] sm:$0xff]  ;;  %v4683_v29 = vld [vmem:[#allocation3 + $0x120] sm:$0xff]  ;;  %v4684_v24 = vld [vmem:[#allocation3 + $0x128] sm:$0xff] }
 0x45c   : > { %2971 = vmatpush.msrb.mxu2 %v4633_v57  ;;  %2991 = vmatpush.msrb.mxu3 %v4634_v38  ;;  %v4685_v57 = vld [vmem:[#allocation3 + $0x130] sm:$0xff]  ;;  %v4686_v38 = vld [vmem:[#allocation3 + $0x138] sm:$0xff]  ;;  %v7782_v42 = vld [vmem:[#allocation3 + $0x140] sm:$0xff] }
 0x45d   : > { %2932 = vmatpush.msrb.mxu0 %v4635_v53  ;;  %2952 = vmatpush.msrb.mxu1 %v4636_v40  ;;  %v4687_v53 = vld [vmem:[#allocation3 + $0xa0] sm:$0xff]  ;;  %v4688_v40 = vld [vmem:[#allocation3 + $0xa8] sm:$0xff]  ;;  %10113 = vst [vmem:[#allocation33_spill] sm:$0xff] %v7782_v42 }
 0x45e   : > { %2972 = vmatpush.msrb.mxu2 %v4637_v47  ;;  %2992 = vmatpush.msrb.mxu3 %v4638_v0  ;;  %v4689_v47 = vld [vmem:[#allocation3 + $0xb0] sm:$0xff]  ;;  %v4690_v0 = vld [vmem:[#allocation3 + $0xb8] sm:$0xff] }
 0x45f   : > { %2933 = vmatpush.msrb.mxu0 %v4639_v32  ;;  %2953 = vmatpush.msrb.mxu1 %v4640_v49  ;;  %v4691_v32 = vld [vmem:[#allocation3 + $0x20] sm:$0xff]  ;;  %v4692_v49 = vld [vmem:[#allocation3 + $0x28] sm:$0xff] }
 0x460   : > { %2973 = vmatpush.msrb.mxu2 %v4641_v56  ;;  %2993 = vmatpush.msrb.mxu3 %v4642_v15  ;;  %v4693_v56 = vld [vmem:[#allocation3 + $0x30] sm:$0xff]  ;;  %v4694_v15 = vld [vmem:[#allocation3 + $0x38] sm:$0xff] }
 0x461   : > { %2934 = vmatpush.msrb.mxu0 %v4643_v55  ;;  %2954 = vmatpush.msrb.mxu1 %v4644_v43  ;;  %v7626_v55 = vld [vmem:[#allocation3 + $0x7c0] sm:$0xff]  ;;  %v7629_v43 = vld [vmem:[#allocation3 + $0x7c8] sm:$0xff] }
 0x462   : > { %2974 = vmatpush.msrb.mxu2 %v4645_v48  ;;  %2994 = vmatpush.msrb.mxu3 %v4646_v30  ;;  %v7632_v48 = vld [vmem:[#allocation3 + $0x7d0] sm:$0xff]  ;;  %v7635_v30 = vld [vmem:[#allocation3 + $0x7d8] sm:$0xff] }
 0x463   : > { %2935 = vmatpush.msrb.mxu0 %v4647_v7  ;;  %2955 = vmatpush.msrb.mxu1 %v4648_v60  ;;  %v7638_v7 = vld [vmem:[#allocation3 + $0x740] sm:$0xff]  ;;  %v7641_v60 = vld [vmem:[#allocation3 + $0x748] sm:$0xff] }
 0x464   : > { %2975 = vmatpush.msrb.mxu2 %v4649_v17  ;;  %2995 = vmatpush.msrb.mxu3 %v4650_v33  ;;  %v7644_v17 = vld [vmem:[#allocation3 + $0x750] sm:$0xff]  ;;  %v7647_v33 = vld [vmem:[#allocation3 + $0x758] sm:$0xff] }
 0x465   : > { %2936 = vmatpush.msrb.mxu0 %v4651_v23  ;;  %2956 = vmatpush.msrb.mxu1 %v4652_v4  ;;  %v7650_v23 = vld [vmem:[#allocation3 + $0x6c0] sm:$0xff]  ;;  %v7653_v4 = vld [vmem:[#allocation3 + $0x6c8] sm:$0xff] }
 0x466   : > { %2976 = vmatpush.msrb.mxu2 %v4653_v54  ;;  %2996 = vmatpush.msrb.mxu3 %v4654_v13  ;;  %v7656_v54 = vld [vmem:[#allocation3 + $0x6d0] sm:$0xff]  ;;  %v7659_v13 = vld [vmem:[#allocation3 + $0x6d8] sm:$0xff] }
 0x467   : > { %2937 = vmatpush.msrb.mxu0 %v4655_v31  ;;  %2957 = vmatpush.msrb.mxu1 %v4656_v58  ;;  %v7662_v31 = vld [vmem:[#allocation3 + $0x640] sm:$0xff]  ;;  %v7665_v58 = vld [vmem:[#allocation3 + $0x648] sm:$0xff] }
 0x468   : > { %2977 = vmatpush.msrb.mxu2 %v4657_v44  ;;  %2997 = vmatpush.msrb.mxu3 %v4658_v39  ;;  %v7668_v44 = vld [vmem:[#allocation3 + $0x650] sm:$0xff]  ;;  %v7671_v39 = vld [vmem:[#allocation3 + $0x658] sm:$0xff] }
 0x469   : > { %2938 = vmatpush.msrb.mxu0 %v4659_v46  ;;  %2958 = vmatpush.msrb.mxu1 %v4660_v36  ;;  %v7674_v46 = vld [vmem:[#allocation3 + $0x5c0] sm:$0xff]  ;;  %v7677_v36 = vld [vmem:[#allocation3 + $0x5c8] sm:$0xff] }
 0x46a   : > { %2978 = vmatpush.msrb.mxu2 %v4661_v22  ;;  %2998 = vmatpush.msrb.mxu3 %v4662_v11  ;;  %v7680_v22 = vld [vmem:[#allocation3 + $0x5d0] sm:$0xff]  ;;  %v7683_v11 = vld [vmem:[#allocation3 + $0x5d8] sm:$0xff] }
 0x46b   : > { %2939 = vmatpush.msrb.mxu0 %v4663_v50  ;;  %2959 = vmatpush.msrb.mxu1 %v4664_v52  ;;  %v7686_v50 = vld [vmem:[#allocation3 + $0x540] sm:$0xff]  ;;  %v7689_v52 = vld [vmem:[#allocation3 + $0x548] sm:$0xff] }
 0x46c   : > { %2979 = vmatpush.msrb.mxu2 %v4665_v2  ;;  %2999 = vmatpush.msrb.mxu3 %v4666_v3  ;;  %v7692_v2 = vld [vmem:[#allocation3 + $0x550] sm:$0xff]  ;;  %v7695_v3 = vld [vmem:[#allocation3 + $0x558] sm:$0xff] }
 0x46d   : > { %2940 = vmatpush.msrb.mxu0 %v4667_v41  ;;  %2960 = vmatpush.msrb.mxu1 %v4668_v25  ;;  %v7698_v41 = vld [vmem:[#allocation3 + $0x4c0] sm:$0xff]  ;;  %v7701_v25 = vld [vmem:[#allocation3 + $0x4c8] sm:$0xff] }
 0x46e   : > { %2980 = vmatpush.msrb.mxu2 %v4669_v18  ;;  %3000 = vmatpush.msrb.mxu3 %v4670_v28  ;;  %v7704_v18 = vld [vmem:[#allocation3 + $0x4d0] sm:$0xff]  ;;  %v7707_v28 = vld [vmem:[#allocation3 + $0x4d8] sm:$0xff] }
 0x46f   : > { %2941 = vmatpush.msrb.mxu0 %v4671_v19  ;;  %2961 = vmatpush.msrb.mxu1 %v4672_v20  ;;  %v7710_v19 = vld [vmem:[#allocation3 + $0x440] sm:$0xff]  ;;  %v7713_v20 = vld [vmem:[#allocation3 + $0x448] sm:$0xff] }
 0x470   : > { %2981 = vmatpush.msrb.mxu2 %v4673_v21  ;;  %3001 = vmatpush.msrb.mxu3 %v4674_v59  ;;  %v7716_v21 = vld [vmem:[#allocation3 + $0x450] sm:$0xff]  ;;  %v7719_v59 = vld [vmem:[#allocation3 + $0x458] sm:$0xff] }
 0x471   : > { %2942 = vmatpush.msrb.mxu0 %v4675_v37  ;;  %2962 = vmatpush.msrb.mxu1 %v4676_v10  ;;  %v7722_v37 = vld [vmem:[#allocation3 + $0x3c0] sm:$0xff]  ;;  %v7725_v10 = vld [vmem:[#allocation3 + $0x3c8] sm:$0xff] }
 0x472   : > { %2982 = vmatpush.msrb.mxu2 %v4677_v61  ;;  %3002 = vmatpush.msrb.mxu3 %v4678_v14  ;;  %10093 = vst [vmem:[#allocation13_spill] sm:$0xff] %v7722_v37  ;;  %v7728_v61 = vld [vmem:[#allocation3 + $0x3d0] sm:$0xff]  ;;  %v7731_v14 = vld [vmem:[#allocation3 + $0x3d8] sm:$0xff] }
 0x473   : > { %2943 = vmatpush.msrb.mxu0 %v4679_v62  ;;  %2963 = vmatpush.msrb.mxu1 %v4680_v5  ;;  %10094 = vst [vmem:[#allocation14_spill] sm:$0xff] %v7725_v10  ;;  %v7734_v62 = vld [vmem:[#allocation3 + $0x340] sm:$0xff]  ;;  %v7737_v5 = vld [vmem:[#allocation3 + $0x348] sm:$0xff] }
 0x474   : > { %2983 = vmatpush.msrb.mxu2 %v4681_v6  ;;  %3003 = vmatpush.msrb.mxu3 %v4682_v1  ;;  %10095 = vst [vmem:[#allocation15_spill] sm:$0xff] %v7728_v61  ;;  %v7740_v6 = vld [vmem:[#allocation3 + $0x350] sm:$0xff]  ;;  %v7743_v1 = vld [vmem:[#allocation3 + $0x358] sm:$0xff] }
 0x475   : > { %2944 = vmatpush.msrb.mxu0 %v4683_v29  ;;  %2964 = vmatpush.msrb.mxu1 %v4684_v24  ;;  %10096 = vst [vmem:[#allocation16_spill] sm:$0xff] %v7731_v14  ;;  %v7746_v29 = vld [vmem:[#allocation3 + $0x2c0] sm:$0xff]  ;;  %v7749_v24 = vld [vmem:[#allocation3 + $0x2c8] sm:$0xff] }
 0x476   : > { %2984 = vmatpush.msrb.mxu2 %v4685_v57  ;;  %3004 = vmatpush.msrb.mxu3 %v4686_v38  ;;  %10097 = vst [vmem:[#allocation17_spill] sm:$0xff] %v7734_v62  ;;  %v7752_v57 = vld [vmem:[#allocation3 + $0x2d0] sm:$0xff]  ;;  %v7755_v38 = vld [vmem:[#allocation3 + $0x2d8] sm:$0xff] }
 0x477   : > { %2945 = vmatpush.msrb.mxu0 %v4687_v53  ;;  %2965 = vmatpush.msrb.mxu1 %v4688_v40  ;;  %10098 = vst [vmem:[#allocation18_spill] sm:$0xff] %v7737_v5  ;;  %v7758_v53 = vld [vmem:[#allocation3 + $0x240] sm:$0xff]  ;;  %v7761_v40 = vld [vmem:[#allocation3 + $0x248] sm:$0xff] }
 0x478   : > { %2985 = vmatpush.msrb.mxu2 %v4689_v47  ;;  %3005 = vmatpush.msrb.mxu3 %v4690_v0  ;;  %10099 = vst [vmem:[#allocation19_spill] sm:$0xff] %v7740_v6  ;;  %v7764_v47 = vld [vmem:[#allocation3 + $0x250] sm:$0xff]  ;;  %v7767_v0 = vld [vmem:[#allocation3 + $0x258] sm:$0xff] }
 0x479   : > { %2946 = vmatpush.msrb.mxu0 %v4691_v32  ;;  %2966 = vmatpush.msrb.mxu1 %v4692_v49  ;;  %10100 = vst [vmem:[#allocation20_spill] sm:$0xff] %v7743_v1  ;;  %v7770_v32 = vld [vmem:[#allocation3 + $0x1c0] sm:$0xff]  ;;  %v7773_v49 = vld [vmem:[#allocation3 + $0x1c8] sm:$0xff] }
 0x47a   : > { %2986 = vmatpush.msrb.mxu2 %v4693_v56  ;;  %3006 = vmatpush.msrb.mxu3 %v4694_v15  ;;  %10101 = vst [vmem:[#allocation21_spill] sm:$0xff] %v7746_v29  ;;  %v7776_v56 = vld [vmem:[#allocation3 + $0x1d0] sm:$0xff]  ;;  %v7779_v15 = vld [vmem:[#allocation3 + $0x1d8] sm:$0xff] }
 0x47b   : > { %3011 = vmatpush.msra.mxu0 %v7626_v55  ;;  %3031 = vmatpush.msra.mxu1 %v7629_v43  ;;  %10102 = vst [vmem:[#allocation22_spill] sm:$0xff] %v7749_v24 }
 0x47c   : > { %3051 = vmatpush.msra.mxu2 %v7632_v48  ;;  %3071 = vmatpush.msra.mxu3 %v7635_v30  ;;  %10103 = vst [vmem:[#allocation23_spill] sm:$0xff] %v7752_v57 }
 0x47d   : > { %3012 = vmatpush.msra.mxu0 %v7638_v7  ;;  %3032 = vmatpush.msra.mxu1 %v7641_v60  ;;  %10104 = vst [vmem:[#allocation24_spill] sm:$0xff] %v7755_v38 }
 0x47e   : > { %3052 = vmatpush.msra.mxu2 %v7644_v17  ;;  %3072 = vmatpush.msra.mxu3 %v7647_v33  ;;  %10105 = vst [vmem:[#allocation25_spill] sm:$0xff] %v7758_v53 }
 0x47f   : > { %3013 = vmatpush.msra.mxu0 %v7650_v23  ;;  %3033 = vmatpush.msra.mxu1 %v7653_v4  ;;  %10106 = vst [vmem:[#allocation26_spill] sm:$0xff] %v7761_v40 }
 0x480   : > { %3053 = vmatpush.msra.mxu2 %v7656_v54  ;;  %3073 = vmatpush.msra.mxu3 %v7659_v13  ;;  %10107 = vst [vmem:[#allocation27_spill] sm:$0xff] %v7764_v47 }
 0x481   : > { %3014 = vmatpush.msra.mxu0 %v7662_v31  ;;  %3034 = vmatpush.msra.mxu1 %v7665_v58  ;;  %10108 = vst [vmem:[#allocation28_spill] sm:$0xff] %v7767_v0 }
 0x482   : > { %3054 = vmatpush.msra.mxu2 %v7668_v44  ;;  %3074 = vmatpush.msra.mxu3 %v7671_v39  ;;  %10109 = vst [vmem:[#allocation29_spill] sm:$0xff] %v7770_v32 }
 0x483   : > { %3015 = vmatpush.msra.mxu0 %v7674_v46  ;;  %3035 = vmatpush.msra.mxu1 %v7677_v36  ;;  %10110 = vst [vmem:[#allocation30_spill] sm:$0xff] %v7773_v49 }
 0x484   : > { %3055 = vmatpush.msra.mxu2 %v7680_v22  ;;  %3075 = vmatpush.msra.mxu3 %v7683_v11  ;;  %10111 = vst [vmem:[#allocation31_spill] sm:$0xff] %v7776_v56 }
 0x485   : > { %3016 = vmatpush.msra.mxu0 %v7686_v50  ;;  %3036 = vmatpush.msra.mxu1 %v7689_v52  ;;  %10112 = vst [vmem:[#allocation32_spill] sm:$0xff] %v7779_v15 }
 0x486   : > { %3056 = vmatpush.msra.mxu2 %v7692_v2  ;;  %3076 = vmatpush.msra.mxu3 %v7695_v3 }
 0x487   : > { %3017 = vmatpush.msra.mxu0 %v7698_v41  ;;  %3037 = vmatpush.msra.mxu1 %v7701_v25 }
 0x488   : > { %3057 = vmatpush.msra.mxu2 %v7704_v18  ;;  %3077 = vmatpush.msra.mxu3 %v7707_v28 }
 0x489   : > { %3018 = vmatpush.msra.mxu0 %v7710_v19  ;;  %3038 = vmatpush.msra.mxu1 %v7713_v20 }
 0x48a   : > { %3058 = vmatpush.msra.mxu2 %v7716_v21  ;;  %3078 = vmatpush.msra.mxu3 %v7719_v59 }
 0x48b   : > { %3019 = vmatpush.msra.mxu0 %v7722_v37  ;;  %3039 = vmatpush.msra.mxu1 %v7725_v10 }
 0x48c   : > { %3059 = vmatpush.msra.mxu2 %v7728_v61  ;;  %3079 = vmatpush.msra.mxu3 %v7731_v14 }
 0x48d   : > { %3020 = vmatpush.msra.mxu0 %v7734_v62  ;;  %3040 = vmatpush.msra.mxu1 %v7737_v5 }
 0x48e   : > { %3060 = vmatpush.msra.mxu2 %v7740_v6  ;;  %3080 = vmatpush.msra.mxu3 %v7743_v1 }
 0x48f   : > { %3021 = vmatpush.msra.mxu0 %v7746_v29  ;;  %3041 = vmatpush.msra.mxu1 %v7749_v24 }
 0x490   : > { %3061 = vmatpush.msra.mxu2 %v7752_v57  ;;  %3081 = vmatpush.msra.mxu3 %v7755_v38 }
 0x491   : > { %3022 = vmatpush.msra.mxu0 %v7758_v53  ;;  %3042 = vmatpush.msra.mxu1 %v7761_v40 }
 0x492   : > { %3062 = vmatpush.msra.mxu2 %v7764_v47  ;;  %3082 = vmatpush.msra.mxu3 %v7767_v0 }
 0x493   : > { %3023 = vmatpush.msra.mxu0 %v7770_v32  ;;  %3043 = vmatpush.msra.mxu1 %v7773_v49  ;;  %v7788_v32 = vld [vmem:[#allocation3 + $0x150] sm:$0xff]  ;;  %v7791_v49 = vld [vmem:[#allocation3 + $0x158] sm:$0xff] }
 0x494   : > { %3063 = vmatpush.msra.mxu2 %v7776_v56  ;;  %3083 = vmatpush.msra.mxu3 %v7779_v15  ;;  %10115 = vst [vmem:[#allocation35_spill] sm:$0xff] %v7788_v32  ;;  %v7794_v56 = vld [vmem:[#allocation3 + $0xc0] sm:$0xff]  ;;  %v7797_v15 = vld [vmem:[#allocation3 + $0xc8] sm:$0xff] }
 0x495   : > { %3024 = vmatpush.msra.mxu0 %v7782_v42  ;;  %3044 = vmatpush.msra.mxu1 %v7785_v16  ;;  %10116 = vst [vmem:[#allocation36_spill] sm:$0xff] %v7791_v49  ;;  %v7800_v42 = vld [vmem:[#allocation3 + $0xd0] sm:$0xff]  ;;  %v7803_v16 = vld [vmem:[#allocation3 + $0xd8] sm:$0xff] }
 0x496   : > { %3064 = vmatpush.msra.mxu2 %v7788_v32  ;;  %3084 = vmatpush.msra.mxu3 %v7791_v49  ;;  %10117 = vst [vmem:[#allocation37_spill] sm:$0xff] %v7794_v56  ;;  %v7806_v32 = vld [vmem:[#allocation3 + $0x40] sm:$0xff]  ;;  %v7809_v49 = vld [vmem:[#allocation3 + $0x48] sm:$0xff] }
 0x497   : > { %3025 = vmatpush.msra.mxu0 %v7794_v56  ;;  %10118 = vst [vmem:[#allocation38_spill] sm:$0xff] %v7797_v15  ;;  %3045 = vmatpush.msra.mxu1 %v7797_v15  ;;  %v7812_v56 = vld [vmem:[#allocation3 + $0x50] sm:$0xff]  ;;  %v7815_v15 = vld [vmem:[#allocation3 + $0x58] sm:$0xff] }
 0x498   : > { %10119 = vst [vmem:[#allocation39_spill] sm:$0xff] %v7800_v42  ;;  %3065 = vmatpush.msra.mxu2 %v7800_v42  ;;  %3085 = vmatpush.msra.mxu3 %v7803_v16 }
 0x499   : > { %10120 = vst [vmem:[#allocation40_spill] sm:$0xff] %v7803_v16  ;;  %3026 = vmatpush.msra.mxu0 %v7806_v32  ;;  %3046 = vmatpush.msra.mxu1 %v7809_v49 }
 0x49a   : > { %10121 = vst [vmem:[#allocation41_spill] sm:$0xff] %v7806_v32  ;;  %3066 = vmatpush.msra.mxu2 %v7812_v56  ;;  %3086 = vmatpush.msra.mxu3 %v7815_v15 }
 0x49b   : > { %10122 = vst [vmem:[#allocation42_spill] sm:$0xff] %v7809_v49 }
 0x49c   : > { %10123 = vst [vmem:[#allocation43_spill] sm:$0xff] %v7812_v56 }
 0x49d   : > { %10124 = vst [vmem:[#allocation44_spill] sm:$0xff] %v7815_v15 }
 0x4b2   : > { %v2569_v42 = vpop.f32.mrf.mxu0  ;;  %v2589_v0 = vpop.f32.mrf.mxu1 }
 0x4b3   : > { %v2712_v16 = vadd.f32 %v2569_v42, %v10043_v45  ;;  %v2713_v47 = vadd.f32 %v2589_v0, %v10044_v35 }
 0x4b5   : > { %v3954_v40 = vmul.f32 -1.442695, %v2712_v16  ;;  %v3955_v32 = vmul.f32 -1.442695, %v2713_v47 }
 0x4b7   : > { %4167 = vpow2.f32 %v3954_v40 }
 0x4b8   : > { %4169 = vpow2.f32 %v3955_v32 }
 0x4b9   : > { %v2629_v53 = vpop.f32.mrf.mxu3  ;;  %v2609_v15 = vpop.f32.mrf.mxu2 }
 0x4ba   : > { %v2715_v49 = vadd.f32 %v2629_v53, %v10045_v12  ;;  %v2714_v16 = vadd.f32 %v2609_v15, %v10046_v8 }
 0x4bc   : > { %v3956_v38 = vmul.f32 -1.442695, %v2715_v49  ;;  %v2649_v62 = vpop.f32.mrf.mxu0 }
 0x4bd   : > { %v4168_v57 = vpop.eup %4167 }
 0x4be   : > { %v4170_v56 = vpop.eup %4169  ;;  %v2871_v24 = vadd.f32 1.0, %v4168_v57  ;;  %4171 = vpow2.f32 %v3956_v38 }
 0x4bf   : > { %v2890_v29 = vadd.f32 1.0, %v4170_v56 }
 0x4c0   : > { %4173 = vrcp.f32 %v2871_v24  ;;  %v2883_v49 = vand.u32 2147483648, %v2871_v24  ;;  %v2881_v38 = vand.u32 2147483647, %v2871_v24  ;;  %vm2877_vm6 = vweird.f32 %v2871_v24 }
 0x4c1   : > { %4175 = vrcp.f32 %v2890_v29  ;;  %v2902_v12 = vand.u32 2147483648, %v2890_v29  ;;  %v2900_v35 = vand.u32 2147483647, %v2890_v29  ;;  %vm2896_vm7 = vweird.f32 %v2890_v29 }
 0x4c2   : > { %v2884_v15 = vor.u32 1.1754944e-38, %v2883_v49  ;;  %vm2882_vm10 = vcmp.eq.f32.partialorder %v2881_v38, 8.507059e+37 }
 0x4c3   : > { %vm2901_vm11 = vcmp.eq.f32.partialorder %v2900_v35, 8.507059e+37 }
 0x4c4   : > { %v4172_v1 = vpop.eup %4171 }
 0x4c5   : > { %v2910_v42 = vadd.f32 1.0, %v4172_v1 }
 0x4c6   : > { %v4174_v45 = vpop.eup %4173 }
 0x4c7   : > { %v4176_v47 = vpop.eup %4175  ;;  %v2873_v40 = vmul.f32 %v4174_v45, %v2871_v24  ;;  %4177 = vrcp.f32 %v2910_v42  ;;  %vm2878_vm4 = vweird.f32 %v4174_v45  ;;  %v2922_v38 = vand.u32 2147483648, %v2910_v42 }
 0x4c8   : > { %v2892_v0 = vmul.f32 %v4176_v47, %v2890_v29  ;;  %4179 = vtanh.f32 %v2714_v16  ;;  %vm2897_vm5 = vweird.f32 %v4176_v47  ;;  %vm2879_vm8 = vmor %vm2877_vm6, %vm2878_vm4  ;;  %vm2916_vm13 = vweird.f32 %v2910_v42 }
 0x4c9   : > { %v2874_v32 = vsub.f32 1.0, %v2873_v40  ;;  %v2669_v40 = vpop.f32.mrf.mxu1  ;;  %vm2898_vm9 = vmor %vm2896_vm7, %vm2897_vm5 }
 0x4ca   : > { %v2893_v53 = vsub.f32 1.0, %v2892_v0  ;;  %v2903_v0 = vor.u32 1.1754944e-38, %v2902_v12  ;;  %v2717_v12 = vadd.f32 %v2669_v40, %v5670_v27 }
 0x4cb   : > { %v2875_v57 = vmul.f32 %v4174_v45, %v2874_v32 }
 0x4cc   : > { %v2894_v56 = vmul.f32 %v4176_v47, %v2893_v53 }
 0x4cd   : > { %v4178_v6 = vpop.eup %4177  ;;  %v2876_v1 = vadd.f32 %v4174_v45, %v2875_v57 }
 0x4ce   : > { %v2895_v8 = vadd.f32 %v4176_v47, %v2894_v56  ;;  %v2912_v5 = vmul.f32 %v4178_v6, %v2910_v42  ;;  %v4180_v32 = vpop.eup %4179  ;;  %vm2917_vm12 = vweird.f32 %v4178_v6  ;;  %v2716_v56 = vadd.f32 %v2649_v62, %v5667_v26  ;;  %v7907_v26 = vld [vmem:[#allocation3 + $0x560] sm:$0xff] }
 0x4cf   : > { %v2880_v16 = vsel %vm2879_vm8, %v4174_v45, %v2876_v1  ;;  %v2709_v45 = vpop.f32.mrf.mxu3  ;;  %vm2918_vm14 = vmor %vm2916_vm13, %vm2917_vm12  ;;  %10136 = vst [vmem:[#allocation56_spill] sm:$0xff] %v7907_v26 }
 0x4d0   : > { %v2885_v14 = vsel %vm2882_vm10, %v2884_v15, %v2880_v16  ;;  %v2899_v61 = vsel %vm2898_vm9, %v4176_v47, %v2895_v8  ;;  %v2913_v53 = vsub.f32 1.0, %v2912_v5  ;;  %v2923_v47 = vor.u32 1.1754944e-38, %v2922_v38  ;;  %v7845_v38 = vld [vmem:[#allocation3 + $0x760] sm:$0xff] }
 0x4d1   : > { %v2904_v10 = vsel %vm2901_vm11, %v2903_v0, %v2899_v61  ;;  %v2927_v37 = vmul.f32 %v4180_v32, %v2885_v14  ;;  %v2920_v61 = vand.u32 2147483647, %v2910_v42  ;;  %v2719_v15 = vadd.f32 %v2709_v45, %v5682_v63  ;;  %v2689_v32 = vpop.f32.mrf.mxu2 }
 0x4d2   : > { %v2926_v24 = vmul.f32 %v2904_v10, %v7509_v9  ;;  %v2914_v29 = vmul.f32 %v4178_v6, %v2913_v53  ;;  %v7829_v53 = vld [vmem:[#allocation3 + $0x7e0] sm:$0xff] }
 0x4d3   : > { %vm2921_vm15 = vcmp.eq.f32.partialorder %v2920_v61, 8.507059e+37  ;;  %v7855_v61 = vld [vmem:[#allocation3 + $0x778] sm:$0xff] }
 0x4d4   : > { %v7823_v57 = vadd.f32 %v2927_v37, %v2926_v24  ;;  %v2915_v49 = vadd.f32 %v4178_v6, %v2914_v29  ;;  %v7832_v24 = vld [vmem:[#allocation3 + $0x7e8] sm:$0xff]  ;;  %10126 = vst [vmem:[#allocation46_spill] sm:$0xff] %v7855_v61 }
 0x4d6   : > { %10125 = vst [vmem:[#allocation45_spill] sm:$0xff] %v7823_v57  ;;  %4181 = vtanh.f32 %v7823_v57  ;;  %v2919_v9 = vsel %vm2918_vm14, %v4178_v6, %v2915_v49  ;;  %v7910_v57 = vld [vmem:[#allocation3 + $0x568] sm:$0xff] }
 0x4d7   : > { %v2737_v8 = vpop.f32.mrf.mxu0  ;;  %v2757_v35 = vpop.f32.mrf.mxu1  ;;  %v2924_v1 = vsel %vm2921_vm15, %v2923_v47, %v2919_v9  ;;  %v7865_v9 = vld [vmem:[#allocation3 + $0x6f0] sm:$0xff]  ;;  %v7871_v47 = vld [vmem:[#allocation3 + $0x660] sm:$0xff]  ;;  %10137 = vst [vmem:[#allocation57_spill] sm:$0xff] %v7910_v57 }
 0x4d8   : > { %v2800_v14 = vadd.f32 %v2737_v8, %v2716_v56  ;;  %v2801_v5 = vadd.f32 %v2757_v35, %v2717_v12  ;;  %v7837_v56 = vld [vmem:[#allocation3 + $0x7f0] sm:$0xff]  ;;  %v7840_v12 = vld [vmem:[#allocation3 + $0x7f8] sm:$0xff]  ;;  %v7848_v8 = vld [vmem:[#allocation3 + $0x768] sm:$0xff]  ;;  %10128 = vst [vmem:[#allocation48_spill] sm:$0xff] %v7871_v47 }
 0x4d9   : > { %v7852_v35 = vld [vmem:[#allocation3 + $0x770] sm:$0xff] }
 0x4da   : > { %v3951_v37 = vmul.f32 -1.442695, %v2800_v14  ;;  %v3952_v10 = vmul.f32 -1.442695, %v2801_v5  ;;  %v7859_v14 = vld [vmem:[#allocation3 + $0x6e0] sm:$0xff]  ;;  %v7862_v5 = vld [vmem:[#allocation3 + $0x6e8] sm:$0xff] }
 0x4dc   : > { %4183 = vpow2.f32 %v3951_v37  ;;  %v4182_v62 = vpop.eup %4181  ;;  %v7868_v37 = vld [vmem:[#allocation3 + $0x6f8] sm:$0xff] }
 0x4dd   : > { %4185 = vpow2.f32 %v3952_v10  ;;  %v2930_v40 = vmul.f32 %v4182_v62, %v2924_v1  ;;  %10127 = vst [vmem:[#allocation47_spill] sm:$0xff] %v7868_v37  ;;  %v7874_v62 = vld [vmem:[#allocation3 + $0x668] sm:$0xff] }
 0x4de   : > { %v2797_v0 = vpop.f32.mrf.mxu3  ;;  %v2777_v10 = vpop.f32.mrf.mxu2  ;;  %10129 = vst [vmem:[#allocation49_spill] sm:$0xff] %v7874_v62 }
 0x4df   : > { %v2803_v16 = vadd.f32 %v2797_v0, %v2719_v15  ;;  %2947 = vmatmul.f32.vlgmr.msrb.gmra.mxu0 %v2930_v40  ;;  %2967 = vmatmul.f32.vlgmr.msrb.gmra.mxu1 %v2930_v40  ;;  %v2718_v15 = vadd.f32 %v2689_v32, %v10055_v34  ;;  %v7878_v0 = vld [vmem:[#allocation3 + $0x670] sm:$0xff]  ;;  %v7893_v34 = vld [vmem:[#allocation3 + $0x5e0] sm:$0xff] }
 0x4e0   : > { %2987 = vmatmul.f32.vlgmr.msrb.gmra.mxu2 %v2930_v40  ;;  %3007 = vmatmul.f32.vlgmr.msrb.gmra.mxu3 %v2930_v40  ;;  %10130 = vst [vmem:[#allocation50_spill] sm:$0xff] %v7878_v0 }
 0x4e1   : > { %v3953_v42 = vmul.f32 -1.442695, %v2803_v16  ;;  %3099 = vmatpush.msrb.mxu0 %v7829_v53  ;;  %3119 = vmatpush.msrb.mxu1 %v7832_v24  ;;  %v7881_v16 = vld [vmem:[#allocation3 + $0x678] sm:$0xff]  ;;  %10132 = vst [vmem:[#allocation52_spill] sm:$0xff] %v7893_v34 }
 0x4e2   : > { %v4184_v6 = vpop.eup %4183  ;;  %3139 = vmatpush.msrb.mxu2 %v7837_v56  ;;  %3159 = vmatpush.msrb.mxu3 %v7840_v12  ;;  %10131 = vst [vmem:[#allocation51_spill] sm:$0xff] %v7881_v16 }
 0x4e3   : > { %v4186_v29 = vpop.eup %4185  ;;  %v7835_v49 = vadd.f32 1.0, %v4184_v6  ;;  %4187 = vpow2.f32 %v3953_v42  ;;  %3100 = vmatpush.msrb.mxu0 %v7845_v38  ;;  %3120 = vmatpush.msrb.mxu1 %v7848_v8 }
 0x4e4   : > { %v7843_v45 = vadd.f32 1.0, %v4186_v29  ;;  %3140 = vmatpush.msrb.mxu2 %v7852_v35  ;;  %3160 = vmatpush.msrb.mxu3 %v7855_v61  ;;  %v2802_v29 = vadd.f32 %v2777_v10, %v2718_v15  ;;  %v7901_v15 = vld [vmem:[#allocation3 + $0x5f0] sm:$0xff] }
 0x4e5   : > { %4189 = vrcp.f32 %v7835_v49  ;;  %3101 = vmatpush.msrb.mxu0 %v7859_v14  ;;  %3121 = vmatpush.msrb.mxu1 %v7862_v5  ;;  %10134 = vst [vmem:[#allocation54_spill] sm:$0xff] %v7901_v15  ;;  %vm2813_vm2 = vweird.f32 %v7835_v49 }
 0x4e6   : > { %4191 = vrcp.f32 %v7843_v45  ;;  %3141 = vmatpush.msrb.mxu2 %v7865_v9  ;;  %3161 = vmatpush.msrb.mxu3 %v7868_v37  ;;  %v7914_v37 = vld [vmem:[#allocation3 + $0x570] sm:$0xff]  ;;  %vm2832_vm3 = vweird.f32 %v7843_v45 }
 0x4e7   : > { %3102 = vmatpush.msrb.mxu0 %v7871_v47  ;;  %3122 = vmatpush.msrb.mxu1 %v7874_v62  ;;  %10138 = vst [vmem:[#allocation58_spill] sm:$0xff] %v7914_v37  ;;  %v7983_v47 = vld [vmem:[#allocation3 + $0x3f0] sm:$0xff] }
 0x4e8   : > { %3142 = vmatpush.msrb.mxu2 %v7878_v0  ;;  %3162 = vmatpush.msrb.mxu3 %v7881_v16  ;;  %v7959_v0 = vld [vmem:[#allocation3 + $0x470] sm:$0xff] }
 0x4e9   : > { %v4188_v1 = vpop.eup %4187  ;;  %3027 = vmatmul.f32.vlgmr.msra.gmra.mxu0 %v2930_v40  ;;  %3047 = vmatmul.f32.vlgmr.msra.gmra.mxu1 %v2930_v40  ;;  %10148 = vst [vmem:[#allocation66_spill] sm:$0xff] %v7959_v0 }
 0x4ea   : > { %v7884_v42 = vadd.f32 1.0, %v4188_v1  ;;  %3067 = vmatmul.f32.vlgmr.msra.gmra.mxu2 %v2930_v40  ;;  %3087 = vmatmul.f32.vlgmr.msra.gmra.mxu3 %v2930_v40  ;;  %v7896_v1 = vld [vmem:[#allocation3 + $0x5e8] sm:$0xff]  ;;  %v7904_v40 = vld [vmem:[#allocation3 + $0x5f8] sm:$0xff] }
 0x4eb   : > { %v7886_v6 = vpop.eup %4189  ;;  %3103 = vmatpush.msrb.mxu0 %v7893_v34  ;;  %10133 = vst [vmem:[#allocation53_spill] sm:$0xff] %v7896_v1  ;;  %3123 = vmatpush.msrb.mxu1 %v7896_v1  ;;  %v2819_v1 = vand.u32 2147483648, %v7835_v49 }
 0x4ec   : > { %v7888_v63 = vpop.eup %4191  ;;  %v2809_v32 = vmul.f32 %v7886_v6, %v7835_v49  ;;  %4193 = vrcp.f32 %v7884_v42  ;;  %3143 = vmatpush.msrb.mxu2 %v7901_v15  ;;  %10135 = vst [vmem:[#allocation55_spill] sm:$0xff] %v7904_v40  ;;  %3163 = vmatpush.msrb.mxu3 %v7904_v40  ;;  %v7917_v15 = vld [vmem:[#allocation3 + $0x578] sm:$0xff]  ;;  %vm2814_vm0 = vweird.f32 %v7886_v6  ;;  %vm2852_vm9 = vweird.f32 %v7884_v42 }
 0x4ed   : > { %v2828_v10 = vmul.f32 %v7888_v63, %v7843_v45  ;;  %3104 = vmatpush.msrb.mxu0 %v7907_v26  ;;  %3124 = vmatpush.msrb.mxu1 %v7910_v57  ;;  %4195 = vtanh.f32 %v2802_v29  ;;  %10139 = vst [vmem:[#allocation59_spill] sm:$0xff] %v7917_v15  ;;  %v2817_v57 = vand.u32 2147483647, %v7835_v49  ;;  %v7927_v29 = vld [vmem:[#allocation3 + $0x4e8] sm:$0xff]  ;;  %vm2833_vm1 = vweird.f32 %v7888_v63  ;;  %v7933_v26 = vld [vmem:[#allocation3 + $0x4f0] sm:$0xff]  ;;  %vm7952_vm4 = vmor %vm2813_vm2, %vm2814_vm0 }
 0x4ee   : > { %v2810_v27 = vsub.f32 1.0, %v2809_v32  ;;  %3144 = vmatpush.msrb.mxu2 %v7914_v37  ;;  %3164 = vmatpush.msrb.mxu3 %v7917_v15  ;;  %v2838_v32 = vand.u32 2147483648, %v7843_v45  ;;  %10141 = vst [vmem:[#allocation61_spill] sm:$0xff] %v7927_v29  ;;  %v2836_v15 = vand.u32 2147483647, %v7843_v45  ;;  %vm7967_vm5 = vmor %vm2832_vm3, %vm2833_vm1  ;;  %v8014_v45 = vld [vmem:[#allocation3 + $0x2f8] sm:$0xff] }
 0x4ef   : > { %v2829_v16 = vsub.f32 1.0, %v2828_v10  ;;  %v7924_v10 = vld [vmem:[#allocation3 + $0x4e0] sm:$0xff]  ;;  %3125 = vmatpush.msrb.mxu1 %v7927_v29  ;;  %10142 = vst [vmem:[#allocation62_spill] sm:$0xff] %v7933_v26  ;;  %vm2818_vm6 = vcmp.eq.f32.partialorder %v2817_v57, 8.507059e+37  ;;  %v7986_v57 = vld [vmem:[#allocation3 + $0x3f8] sm:$0xff] }
 0x4f0   : > { %v2811_v40 = vmul.f32 %v7886_v6, %v2810_v27  ;;  %10140 = vst [vmem:[#allocation60_spill] sm:$0xff] %v7924_v10  ;;  %3105 = vmatpush.msrb.mxu0 %v7924_v10  ;;  %3145 = vmatpush.msrb.mxu2 %v7933_v26  ;;  %v7936_v27 = vld [vmem:[#allocation3 + $0x4f8] sm:$0xff]  ;;  %v7943_v29 = vld [vmem:[#allocation3 + $0x460] sm:$0xff]  ;;  %v2820_v26 = vor.u32 1.1754944e-38, %v2819_v1  ;;  %v2839_v1 = vor.u32 1.1754944e-38, %v2838_v32  ;;  %vm2837_vm7 = vcmp.eq.f32.partialorder %v2836_v15, 8.507059e+37 }
 0x4f1   : > { %v2830_v37 = vmul.f32 %v7888_v63, %v2829_v16  ;;  %10143 = vst [vmem:[#allocation63_spill] sm:$0xff] %v7936_v27  ;;  %3165 = vmatpush.msrb.mxu3 %v7936_v27  ;;  %v7946_v16 = vld [vmem:[#allocation3 + $0x468] sm:$0xff]  ;;  %v7989_v27 = vld [vmem:[#allocation3 + $0x360] sm:$0xff] }
 0x4f2   : > { %v7939_v34 = vpop.eup %4193  ;;  %v2812_v10 = vadd.f32 %v7886_v6, %v2811_v40  ;;  %10144 = vst [vmem:[#allocation64_spill] sm:$0xff] %v7943_v29  ;;  %3106 = vmatpush.msrb.mxu0 %v7943_v29  ;;  %3126 = vmatpush.msrb.mxu1 %v7946_v16  ;;  %v7962_v29 = vld [vmem:[#allocation3 + $0x478] sm:$0xff] }
 0x4f3   : > { %10145 = vst [vmem:[#allocation65_spill] sm:$0xff] %v7946_v16  ;;  %v2831_v40 = vadd.f32 %v7888_v63, %v2830_v37  ;;  %v2848_v49 = vmul.f32 %v7939_v34, %v7884_v42  ;;  %3146 = vmatpush.msrb.mxu2 %v7959_v0  ;;  %3166 = vmatpush.msrb.mxu3 %v7962_v29  ;;  %v7974_v16 = vld [vmem:[#allocation3 + $0x3e0] sm:$0xff]  ;;  %v7977_v0 = vld [vmem:[#allocation3 + $0x3e8] sm:$0xff]  ;;  %vm2853_vm8 = vweird.f32 %v7939_v34 }
 0x4f4   : > { %10149 = vst [vmem:[#allocation67_spill] sm:$0xff] %v7962_v29  ;;  %v2816_v37 = vsel %vm7952_vm4, %v7886_v6, %v2812_v10  ;;  %3107 = vmatpush.msrb.mxu0 %v7974_v16  ;;  %3127 = vmatpush.msrb.mxu1 %v7977_v0  ;;  %v4196_v29 = vpop.eup %4195  ;;  %vm8043_vm10 = vmor %vm2852_vm9, %vm2853_vm8 }
 0x4f5   : > { %v2821_v62 = vsel %vm2818_vm6, %v2820_v26, %v2816_v37  ;;  %v2835_v61 = vsel %vm7967_vm5, %v7888_v63, %v2831_v40  ;;  %v2849_v32 = vsub.f32 1.0, %v2848_v49  ;;  %3147 = vmatpush.msrb.mxu2 %v7983_v47  ;;  %3167 = vmatpush.msrb.mxu3 %v7986_v57  ;;  %v7992_v26 = vld [vmem:[#allocation3 + $0x368] sm:$0xff]  ;;  %v7997_v40 = vld [vmem:[#allocation3 + $0x370] sm:$0xff]  ;;  %v8000_v49 = vld [vmem:[#allocation3 + $0x378] sm:$0xff]  ;;  %10154 = vst [vmem:[#allocation70_spill] sm:$0xff] %v8014_v45 }
 0x4f6   : > { %v2840_v6 = vsel %vm2837_vm7, %v2839_v1, %v2835_v61  ;;  %v2863_v10 = vmul.f32 %v4196_v29, %v2821_v62  ;;  %3108 = vmatpush.msrb.mxu0 %v7989_v27  ;;  %3128 = vmatpush.msrb.mxu1 %v7992_v26  ;;  %10152 = vst [vmem:[#allocation68_spill] sm:$0xff] %v8000_v49  ;;  %v8003_v61 = vld [vmem:[#allocation3 + $0x2e0] sm:$0xff]  ;;  %v8006_v62 = vld [vmem:[#allocation3 + $0x2e8] sm:$0xff] }
 0x4f7   : > { %v2862_v63 = vmul.f32 %v2840_v6, %v7583_v51  ;;  %v2850_v15 = vmul.f32 %v7939_v34, %v2849_v32  ;;  %3148 = vmatpush.msrb.mxu2 %v7997_v40  ;;  %3168 = vmatpush.msrb.mxu3 %v8000_v49  ;;  %v8011_v51 = vld [vmem:[#allocation3 + $0x2f0] sm:$0xff]  ;;  %v8018_v1 = vld [vmem:[#allocation3 + $0x260] sm:$0xff]  ;;  %v8021_v37 = vld [vmem:[#allocation3 + $0x268] sm:$0xff]  ;;  %v2858_v6 = vand.u32 2147483648, %v7884_v42 }
 0x4f8   : > { %3109 = vmatpush.msrb.mxu0 %v8003_v61  ;;  %3129 = vmatpush.msrb.mxu1 %v8006_v62  ;;  %10155 = vst [vmem:[#allocation71_spill] sm:$0xff] %v8018_v1 }
 0x4f9   : > { %v8009_v29 = vadd.f32 %v2863_v10, %v2862_v63  ;;  %3149 = vmatpush.msrb.mxu2 %v8011_v51  ;;  %3169 = vmatpush.msrb.mxu3 %v8014_v45  ;;  %10156 = vst [vmem:[#allocation72_spill] sm:$0xff] %v8021_v37  ;;  %v2851_v32 = vadd.f32 %v7939_v34, %v2850_v15  ;;  %v8027_v10 = vld [vmem:[#allocation3 + $0x270] sm:$0xff]  ;;  %v8030_v63 = vld [vmem:[#allocation3 + $0x278] sm:$0xff]  ;;  %v8034_v45 = vld [vmem:[#allocation3 + $0x1e0] sm:$0xff]  ;;  %v2856_v15 = vand.u32 2147483647, %v7884_v42 }
 0x4fa   : > { %3110 = vmatpush.msrb.mxu0 %v8018_v1  ;;  %3130 = vmatpush.msrb.mxu1 %v8021_v37  ;;  %10157 = vst [vmem:[#allocation73_spill] sm:$0xff] %v8027_v10  ;;  %v8037_v37 = vld [vmem:[#allocation3 + $0x1e8] sm:$0xff]  ;;  %v2859_v49 = vor.u32 1.1754944e-38, %v2858_v6  ;;  %v8062_v1 = vld [vmem:[#allocation3 + $0x170] sm:$0xff] }
 0x4fb   : > { %10153 = vst [vmem:[#allocation69_spill] sm:$0xff] %v8009_v29  ;;  %4197 = vtanh.f32 %v8009_v29  ;;  %3150 = vmatpush.msrb.mxu2 %v8027_v10  ;;  %3170 = vmatpush.msrb.mxu3 %v8030_v63  ;;  %v8047_v10 = vld [vmem:[#allocation3 + $0x1f0] sm:$0xff]  ;;  %v2855_v42 = vsel %vm8043_vm10, %v7939_v34, %v2851_v32  ;;  %vm2857_vm11 = vcmp.eq.f32.partialorder %v2856_v15, 8.507059e+37  ;;  %v8077_v32 = vld [vmem:[#allocation3 + $0xf8] sm:$0xff] }
 0x4fc   : > { %10158 = vst [vmem:[#allocation75_spill] sm:$0xff] %v8030_v63  ;;  %3111 = vmatpush.msrb.mxu0 %v8034_v45  ;;  %3131 = vmatpush.msrb.mxu1 %v8037_v37  ;;  %v8050_v63 = vld [vmem:[#allocation3 + $0x1f8] sm:$0xff]  ;;  %v8074_v34 = vld [vmem:[#allocation3 + $0xf0] sm:$0xff]  ;;  %v2860_v6 = vsel %vm2857_vm11, %v2859_v49, %v2855_v42  ;;  %v10213_v42 = vld [vmem:[#allocation58_spill] sm:$0xff] }
 0x4fd   : > { %10159 = vst [vmem:[#allocation76_spill] sm:$0xff] %v8034_v45  ;;  %3151 = vmatpush.msrb.mxu2 %v8047_v10  ;;  %3171 = vmatpush.msrb.mxu3 %v8050_v63  ;;  %v8053_v45 = vld [vmem:[#allocation3 + $0x160] sm:$0xff]  ;;  %v8088_v15 = vld [vmem:[#allocation3 + $0x70] sm:$0xff] }
 0x4fe   : > { %10160 = vst [vmem:[#allocation78_spill] sm:$0xff] %v8037_v37  ;;  %3112 = vmatpush.msrb.mxu0 %v8053_v45  ;;  %v8056_v37 = vld [vmem:[#allocation3 + $0x168] sm:$0xff]  ;;  %v10206_v49 = vld [vmem:[#allocation52_spill] sm:$0xff] }
 0x4ff   : > { %10163 = vst [vmem:[#allocation79_spill] sm:$0xff] %v8047_v10  ;;  %3132 = vmatpush.msrb.mxu1 %v8056_v37  ;;  %3152 = vmatpush.msrb.mxu2 %v8062_v1  ;;  %v8065_v10 = vld [vmem:[#allocation3 + $0x178] sm:$0xff] }
 0x500   : > { %10164 = vst [vmem:[#allocation80_spill] sm:$0xff] %v8050_v63  ;;  %3172 = vmatpush.msrb.mxu3 %v8065_v10  ;;  %v8068_v63 = vld [vmem:[#allocation3 + $0xe0] sm:$0xff] }
 0x501   : > { %10165 = vst [vmem:[#allocation81_spill] sm:$0xff] %v8053_v45  ;;  %3113 = vmatpush.msrb.mxu0 %v8068_v63  ;;  %v8071_v45 = vld [vmem:[#allocation3 + $0xe8] sm:$0xff]  ;;  %v4198_v29 = vpop.eup %4197  ;;  %3153 = vmatpush.msrb.mxu2 %v8074_v34 }
 0x502   : > { %10166 = vst [vmem:[#allocation82_spill] sm:$0xff] %v8065_v10  ;;  %3133 = vmatpush.msrb.mxu1 %v8071_v45  ;;  %3173 = vmatpush.msrb.mxu3 %v8077_v32  ;;  %v8080_v10 = vld [vmem:[#allocation3 + $0x60] sm:$0xff] }
 0x503   : > { %10167 = vst [vmem:[#allocation83_spill] sm:$0xff] %v8068_v63  ;;  %3114 = vmatpush.msrb.mxu0 %v8080_v10  ;;  %v8083_v63 = vld [vmem:[#allocation3 + $0x68] sm:$0xff]  ;;  %3154 = vmatpush.msrb.mxu2 %v8088_v15 }
 0x504   : > { %10168 = vst [vmem:[#allocation84_spill] sm:$0xff] %v8071_v45  ;;  %3134 = vmatpush.msrb.mxu1 %v8083_v63  ;;  %v8086_v45 = vmul.f32 %v4198_v29, %v2860_v6  ;;  %v10214_v29 = vld [vmem:[#allocation60_spill] sm:$0xff]  ;;  %v10215_v6 = vld [vmem:[#allocation55_spill] sm:$0xff] }
 0x505   : > { %10169 = vst [vmem:[#allocation85_spill] sm:$0xff] %v8074_v34  ;;  %v8091_v34 = vld [vmem:[#allocation3 + $0x78] sm:$0xff]  ;;  %3310 = vmatpush.msra.mxu0 %v7626_v55  ;;  %3350 = vmatpush.msra.mxu2 %v7632_v48  ;;  %v10172_v48 = vld [vmem:[#allocation15_spill] sm:$0xff] }
 0x506   : > { %3174 = vmatpush.msrb.mxu3 %v8091_v34  ;;  %3115 = vmatmul.f32.vlgmr.msrb.gmra.mxu0 %v8086_v45  ;;  %v10170_v55 = vld [vmem:[#allocation13_spill] sm:$0xff] }
 0x507   : > { %3135 = vmatmul.f32.vlgmr.msrb.gmra.mxu1 %v8086_v45  ;;  %3155 = vmatmul.f32.vlgmr.msrb.gmra.mxu2 %v8086_v45 }
 0x508   : > { %3175 = vmatmul.f32.vlgmr.msrb.gmra.mxu3 %v8086_v45  ;;  %3330 = vmatpush.msra.mxu1 %v7629_v43  ;;  %v10171_v43 = vld [vmem:[#allocation14_spill] sm:$0xff] }
 0x509   : > { %3370 = vmatpush.msra.mxu3 %v7635_v30  ;;  %3311 = vmatpush.msra.mxu0 %v7638_v7  ;;  %v10173_v30 = vld [vmem:[#allocation16_spill] sm:$0xff]  ;;  %v10174_v7 = vld [vmem:[#allocation17_spill] sm:$0xff] }
 0x50a   : > { %3331 = vmatpush.msra.mxu1 %v7641_v60  ;;  %3351 = vmatpush.msra.mxu2 %v7644_v17  ;;  %v10175_v60 = vld [vmem:[#allocation18_spill] sm:$0xff]  ;;  %v10176_v17 = vld [vmem:[#allocation19_spill] sm:$0xff] }
 0x50b   : > { %3371 = vmatpush.msra.mxu3 %v7647_v33  ;;  %3312 = vmatpush.msra.mxu0 %v7650_v23  ;;  %v10177_v33 = vld [vmem:[#allocation20_spill] sm:$0xff]  ;;  %v10178_v23 = vld [vmem:[#allocation21_spill] sm:$0xff] }
 0x50c   : > { %3332 = vmatpush.msra.mxu1 %v7653_v4  ;;  %3352 = vmatpush.msra.mxu2 %v7656_v54  ;;  %v10179_v4 = vld [vmem:[#allocation22_spill] sm:$0xff]  ;;  %v10180_v54 = vld [vmem:[#allocation23_spill] sm:$0xff] }
 0x50d   : > { %3372 = vmatpush.msra.mxu3 %v7659_v13  ;;  %3313 = vmatpush.msra.mxu0 %v7662_v31  ;;  %v10181_v13 = vld [vmem:[#allocation24_spill] sm:$0xff]  ;;  %v10182_v31 = vld [vmem:[#allocation25_spill] sm:$0xff] }
 0x50e   : > { %3333 = vmatpush.msra.mxu1 %v7665_v58  ;;  %3353 = vmatpush.msra.mxu2 %v7668_v44  ;;  %v10183_v58 = vld [vmem:[#allocation26_spill] sm:$0xff]  ;;  %v10184_v44 = vld [vmem:[#allocation27_spill] sm:$0xff] }
 0x50f   : > { %3373 = vmatpush.msra.mxu3 %v7671_v39  ;;  %3314 = vmatpush.msra.mxu0 %v7674_v46  ;;  %v10185_v39 = vld [vmem:[#allocation28_spill] sm:$0xff]  ;;  %v10186_v46 = vld [vmem:[#allocation29_spill] sm:$0xff] }
 0x510   : > { %3334 = vmatpush.msra.mxu1 %v7677_v36  ;;  %3354 = vmatpush.msra.mxu2 %v7680_v22  ;;  %v10187_v36 = vld [vmem:[#allocation30_spill] sm:$0xff]  ;;  %v10188_v22 = vld [vmem:[#allocation31_spill] sm:$0xff] }
 0x511   : > { %3374 = vmatpush.msra.mxu3 %v7683_v11  ;;  %3315 = vmatpush.msra.mxu0 %v7686_v50  ;;  %v10189_v11 = vld [vmem:[#allocation32_spill] sm:$0xff]  ;;  %v10190_v50 = vld [vmem:[#allocation33_spill] sm:$0xff] }
 0x512   : > { %3335 = vmatpush.msra.mxu1 %v7689_v52  ;;  %3355 = vmatpush.msra.mxu2 %v7692_v2  ;;  %v10191_v52 = vld [vmem:[#allocation34_spill] sm:$0xff]  ;;  %v10192_v2 = vld [vmem:[#allocation35_spill] sm:$0xff] }
 0x513   : > { %3375 = vmatpush.msra.mxu3 %v7695_v3  ;;  %3316 = vmatpush.msra.mxu0 %v7698_v41  ;;  %v10193_v3 = vld [vmem:[#allocation36_spill] sm:$0xff]  ;;  %v10194_v41 = vld [vmem:[#allocation37_spill] sm:$0xff] }
 0x514   : > { %3336 = vmatpush.msra.mxu1 %v7701_v25  ;;  %3356 = vmatpush.msra.mxu2 %v7704_v18  ;;  %v10195_v25 = vld [vmem:[#allocation38_spill] sm:$0xff]  ;;  %v10196_v18 = vld [vmem:[#allocation39_spill] sm:$0xff] }
 0x515   : > { %3376 = vmatpush.msra.mxu3 %v7707_v28  ;;  %3317 = vmatpush.msra.mxu0 %v7710_v19  ;;  %v10197_v28 = vld [vmem:[#allocation40_spill] sm:$0xff]  ;;  %v10198_v19 = vld [vmem:[#allocation41_spill] sm:$0xff] }
 0x516   : > { %3337 = vmatpush.msra.mxu1 %v7713_v20  ;;  %3357 = vmatpush.msra.mxu2 %v7716_v21  ;;  %v10199_v20 = vld [vmem:[#allocation42_spill] sm:$0xff]  ;;  %v10200_v21 = vld [vmem:[#allocation43_spill] sm:$0xff] }
 0x517   : > { %3377 = vmatpush.msra.mxu3 %v7719_v59  ;;  %3318 = vmatpush.msra.mxu0 %v10170_v55  ;;  %v10201_v59 = vld [vmem:[#allocation44_spill] sm:$0xff]  ;;  %v10216_v55 = vld [vmem:[#allocation61_spill] sm:$0xff] }
 0x518   : > { %3338 = vmatpush.msra.mxu1 %v10171_v43  ;;  %3358 = vmatpush.msra.mxu2 %v10172_v48  ;;  %v10217_v43 = vld [vmem:[#allocation62_spill] sm:$0xff]  ;;  %v10218_v48 = vld [vmem:[#allocation64_spill] sm:$0xff] }
 0x519   : > { %3378 = vmatpush.msra.mxu3 %v10173_v30  ;;  %3319 = vmatpush.msra.mxu0 %v10174_v7  ;;  %v10219_v30 = vld [vmem:[#allocation59_spill] sm:$0xff]  ;;  %v10220_v7 = vld [vmem:[#allocation65_spill] sm:$0xff] }
 0x51a   : > { %3339 = vmatpush.msra.mxu1 %v10175_v60  ;;  %3359 = vmatpush.msra.mxu2 %v10176_v17  ;;  %v10221_v60 = vld [vmem:[#allocation66_spill] sm:$0xff]  ;;  %v10222_v17 = vld [vmem:[#allocation63_spill] sm:$0xff] }
 0x51b   : > { %3379 = vmatpush.msra.mxu3 %v10177_v33  ;;  %3320 = vmatpush.msra.mxu0 %v10178_v23  ;;  %v10223_v33 = vld [vmem:[#allocation67_spill] sm:$0xff]  ;;  %v10228_v23 = vld [vmem:[#allocation76_spill] sm:$0xff] }
 0x51c   : > { %3340 = vmatpush.msra.mxu1 %v10179_v4  ;;  %3360 = vmatpush.msra.mxu2 %v10180_v54  ;;  %v10235_v4 = vld [vmem:[#allocation80_spill] sm:$0xff] }
 0x51d   : > { %3380 = vmatpush.msra.mxu3 %v10181_v13  ;;  %3321 = vmatpush.msra.mxu0 %v10182_v31  ;;  %v10236_v54 = vld [vmem:[#allocation84_spill] sm:$0xff]  ;;  %v10237_v13 = vld [vmem:[#allocation85_spill] sm:$0xff]  ;;  %v10238_v31 = vld [vmem:[#allocation82_spill] sm:$0xff] }
 0x51e   : > { %3341 = vmatpush.msra.mxu1 %v10183_v58  ;;  %3361 = vmatpush.msra.mxu2 %v10184_v44  ;;  %v10239_v58 = vld [vmem:[#allocation74_spill] sm:$0xff] }
 0x51f   : > { %3381 = vmatpush.msra.mxu3 %v10185_v39  ;;  %3322 = vmatpush.msra.mxu0 %v10186_v46  ;;  %v10240_v39 = vld [vmem:[#allocation77_spill] sm:$0xff] }
 0x520   : > { %3342 = vmatpush.msra.mxu1 %v10187_v36  ;;  %3362 = vmatpush.msra.mxu2 %v10188_v22 }
 0x521   : > { %3382 = vmatpush.msra.mxu3 %v10189_v11  ;;  %3323 = vmatpush.msra.mxu0 %v10190_v50  ;;  %v10241_v11 = vld [vmem:[#allocation90_spill] sm:$0xff] }
 0x522   : > { %3343 = vmatpush.msra.mxu1 %v10191_v52  ;;  %3363 = vmatpush.msra.mxu2 %v10192_v2 }
 0x523   : > { %3383 = vmatpush.msra.mxu3 %v10193_v3  ;;  %3324 = vmatpush.msra.mxu0 %v10194_v41 }
 0x524   : > { %3344 = vmatpush.msra.mxu1 %v10195_v25  ;;  %3364 = vmatpush.msra.mxu2 %v10196_v18  ;;  %v10242_v18 = vld [vmem:[#allocation99_spill] sm:$0xff] }
 0x525   : > { %3384 = vmatpush.msra.mxu3 %v10197_v28  ;;  %3325 = vmatpush.msra.mxu0 %v10198_v19 }
 0x526   : > { %3345 = vmatpush.msra.mxu1 %v10199_v20  ;;  %3365 = vmatpush.msra.mxu2 %v10200_v21 }
 0x527   : > { %3394 = vmatpush.msrb.mxu0 %v7829_v53  ;;  %3385 = vmatpush.msra.mxu3 %v10201_v59  ;;  %v10202_v53 = vld [vmem:[#allocation48_spill] sm:$0xff] }
 0x528   : > { %3414 = vmatpush.msrb.mxu1 %v7832_v24  ;;  %3434 = vmatpush.msrb.mxu2 %v7837_v56  ;;  %v10203_v24 = vld [vmem:[#allocation46_spill] sm:$0xff]  ;;  %v10204_v56 = vld [vmem:[#allocation49_spill] sm:$0xff] }
 0x529   : > { %3395 = vmatpush.msrb.mxu0 %v7845_v38  ;;  %3454 = vmatpush.msrb.mxu3 %v7840_v12  ;;  %v10205_v38 = vld [vmem:[#allocation50_spill] sm:$0xff]  ;;  %v10210_v12 = vld [vmem:[#allocation56_spill] sm:$0xff] }
 0x52a   : > { %3415 = vmatpush.msrb.mxu1 %v7848_v8  ;;  %3435 = vmatpush.msrb.mxu2 %v7852_v35  ;;  %v10207_v8 = vld [vmem:[#allocation47_spill] sm:$0xff]  ;;  %v10208_v35 = vld [vmem:[#allocation53_spill] sm:$0xff] }
 0x52b   : > { %3396 = vmatpush.msrb.mxu0 %v7859_v14  ;;  %3455 = vmatpush.msrb.mxu3 %v10203_v24  ;;  %v10209_v14 = vld [vmem:[#allocation54_spill] sm:$0xff] }
 0x52c   : > { %3416 = vmatpush.msrb.mxu1 %v7862_v5  ;;  %3436 = vmatpush.msrb.mxu2 %v7865_v9  ;;  %v10211_v5 = vld [vmem:[#allocation51_spill] sm:$0xff]  ;;  %v10212_v9 = vld [vmem:[#allocation57_spill] sm:$0xff] }
 0x52d   : > { %3397 = vmatpush.msrb.mxu0 %v10202_v53  ;;  %3456 = vmatpush.msrb.mxu3 %v10207_v8 }
 0x52e   : > { %3417 = vmatpush.msrb.mxu1 %v10204_v56  ;;  %3437 = vmatpush.msrb.mxu2 %v10205_v38 }
 0x52f   : > { %3398 = vmatpush.msrb.mxu0 %v10206_v49  ;;  %3457 = vmatpush.msrb.mxu3 %v10211_v5 }
 0x530   : > { %3418 = vmatpush.msrb.mxu1 %v10208_v35  ;;  %3438 = vmatpush.msrb.mxu2 %v10209_v14 }
 0x531   : > { %3399 = vmatpush.msrb.mxu0 %v10210_v12  ;;  %3458 = vmatpush.msrb.mxu3 %v10215_v6 }
 0x532   : > { %3419 = vmatpush.msrb.mxu1 %v10212_v9  ;;  %3439 = vmatpush.msrb.mxu2 %v10213_v42 }
 0x533   : > { %3400 = vmatpush.msrb.mxu0 %v10214_v29  ;;  %3459 = vmatpush.msrb.mxu3 %v10219_v30 }
 0x534   : > { %3420 = vmatpush.msrb.mxu1 %v10216_v55  ;;  %3440 = vmatpush.msrb.mxu2 %v10217_v43 }
 0x535   : > { %3401 = vmatpush.msrb.mxu0 %v10218_v48  ;;  %3460 = vmatpush.msrb.mxu3 %v10222_v17 }
 0x536   : > { %3421 = vmatpush.msrb.mxu1 %v10220_v7  ;;  %3441 = vmatpush.msrb.mxu2 %v10221_v60 }
 0x537   : > { %3402 = vmatpush.msrb.mxu0 %v7974_v16  ;;  %3461 = vmatpush.msrb.mxu3 %v10223_v33  ;;  %v10224_v16 = vld [vmem:[#allocation71_spill] sm:$0xff] }
 0x538   : > { %3422 = vmatpush.msrb.mxu1 %v7977_v0  ;;  %3442 = vmatpush.msrb.mxu2 %v7983_v47  ;;  %v10225_v0 = vld [vmem:[#allocation68_spill] sm:$0xff] }
 0x539   : > { %3403 = vmatpush.msrb.mxu0 %v7989_v27  ;;  %3462 = vmatpush.msrb.mxu3 %v7986_v57  ;;  %v10226_v47 = vld [vmem:[#allocation72_spill] sm:$0xff]  ;;  %v10227_v27 = vld [vmem:[#allocation73_spill] sm:$0xff] }
 0x53a   : > { %3423 = vmatpush.msrb.mxu1 %v7992_v26  ;;  %3443 = vmatpush.msrb.mxu2 %v7997_v40  ;;  %v10229_v26 = vld [vmem:[#allocation70_spill] sm:$0xff]  ;;  %v10232_v57 = vld [vmem:[#allocation81_spill] sm:$0xff] }
 0x53b   : > { %3404 = vmatpush.msrb.mxu0 %v8003_v61  ;;  %3463 = vmatpush.msrb.mxu3 %v10225_v0  ;;  %v10230_v40 = vld [vmem:[#allocation78_spill] sm:$0xff]  ;;  %v10231_v61 = vld [vmem:[#allocation79_spill] sm:$0xff] }
 0x53c   : > { %3424 = vmatpush.msrb.mxu1 %v8006_v62  ;;  %3444 = vmatpush.msrb.mxu2 %v8011_v51  ;;  %v10233_v62 = vld [vmem:[#allocation75_spill] sm:$0xff] }
 0x53d   : > { %3405 = vmatpush.msrb.mxu0 %v10224_v16  ;;  %3464 = vmatpush.msrb.mxu3 %v10229_v26  ;;  %v10234_v51 = vld [vmem:[#allocation83_spill] sm:$0xff]  ;;  %v10243_v16 = vld [vmem:[#allocation45_spill] sm:$0xff] }
 0x53e   : > { %3425 = vmatpush.msrb.mxu1 %v10226_v47  ;;  %3445 = vmatpush.msrb.mxu2 %v10227_v27 }
 0x53f   : > { %3406 = vmatpush.msrb.mxu0 %v10228_v23  ;;  %3465 = vmatpush.msrb.mxu3 %v10233_v62  ;;  %v10244_v23 = vld [vmem:[#allocation6_spill] sm:$0xff] }
 0x540   : > { %3426 = vmatpush.msrb.mxu1 %v10230_v40  ;;  %3446 = vmatpush.msrb.mxu2 %v10231_v61  ;;  %v10245_v40 = vld [vmem:[#allocation7_spill] sm:$0xff] }
 0x541   : > { %3407 = vmatpush.msrb.mxu0 %v10232_v57  ;;  %3466 = vmatpush.msrb.mxu3 %v10235_v4 }
 0x542   : > { %3427 = vmatpush.msrb.mxu1 %v8056_v37  ;;  %3447 = vmatpush.msrb.mxu2 %v8062_v1 }
 0x543   : > { %3408 = vmatpush.msrb.mxu0 %v10234_v51  ;;  %3467 = vmatpush.msrb.mxu3 %v10238_v31 }
 0x544   : > { %3428 = vmatpush.msrb.mxu1 %v10236_v54  ;;  %3448 = vmatpush.msrb.mxu2 %v10237_v13 }
 0x545   : > { %3409 = vmatpush.msrb.mxu0 %v8080_v10  ;;  %3468 = vmatpush.msrb.mxu3 %v8077_v32 }
 0x546   : > { %3429 = vmatpush.msrb.mxu1 %v8083_v63  ;;  %3449 = vmatpush.msrb.mxu2 %v8088_v15 }
 0x547   : > { %3469 = vmatpush.msrb.mxu3 %v8091_v34 }
 0x55c   : > { %v2948_v1 = vpop.f32.mrf.mxu0  ;;  %v2968_v37 = vpop.f32.mrf.mxu1 }
 0x55d   : > { %v3091_v44 = vadd.f32 %v2948_v1, %v10239_v58  ;;  %v3092_v46 = vadd.f32 %v2968_v37, %v10240_v39 }
 0x55f   : > { %v3960_v36 = vmul.f32 -1.442695, %v3091_v44  ;;  %v3961_v22 = vmul.f32 -1.442695, %v3092_v46 }
 0x561   : > { %4199 = vpow2.f32 %v3960_v36  ;;  %v10246_v36 = vld [vmem:[#allocation8_spill] sm:$0xff] }
 0x562   : > { %4201 = vpow2.f32 %v3961_v22 }
 0x563   : > { %v3008_v10 = vpop.f32.mrf.mxu3  ;;  %v2988_v34 = vpop.f32.mrf.mxu2 }
 0x564   : > { %v3094_v50 = vadd.f32 %v3008_v10, %v10241_v11  ;;  %v3093_v28 = vadd.f32 %v2988_v34, %v10242_v18  ;;  %v3613_v34 = vld [vmem:[%s8721_s3 + $0x1f8] sm:$0xff] }
 0x566   : > { %v3962_v63 = vmul.f32 -1.442695, %v3094_v50  ;;  %v3028_v29 = vpop.f32.mrf.mxu0  ;;  %v3048_v6 = vpop.f32.mrf.mxu1 }
 0x567   : > { %v4200_v52 = vpop.eup %4199  ;;  %v3095_v26 = vadd.f32 %v3028_v29, %v10244_v23  ;;  %v3096_v61 = vadd.f32 %v3048_v6, %v10245_v40  ;;  %v3609_v29 = vld [vmem:[%s8721_s3 + $0x1d8] sm:$0xff] }
 0x568   : > { %v4202_v15 = vpop.eup %4201  ;;  %v3250_v2 = vadd.f32 1.0, %v4200_v52  ;;  %4203 = vpow2.f32 %v3962_v63  ;;  %v3565_v52 = vld [vmem:[%s8721_s3 + $0x78] sm:$0xff] }
 0x569   : > { %v3269_v32 = vadd.f32 1.0, %v4202_v15  ;;  %v3581_v15 = vld [vmem:[%s8721_s3 + $0xf8] sm:$0xff] }
 0x56a   : > { %4205 = vrcp.f32 %v3250_v2  ;;  %v3262_v24 = vand.u32 2147483648, %v3250_v2  ;;  %v3260_v49 = vand.u32 2147483647, %v3250_v2  ;;  %vm3256_vm14 = vweird.f32 %v3250_v2 }
 0x56b   : > { %4207 = vrcp.f32 %v3269_v32  ;;  %v3281_v56 = vand.u32 2147483648, %v3269_v32  ;;  %v3279_v35 = vand.u32 2147483647, %v3269_v32  ;;  %vm3275_vm15 = vweird.f32 %v3269_v32 }
 0x56c   : > { %v3263_v5 = vor.u32 1.1754944e-38, %v3262_v24  ;;  %vm3261_vm2 = vcmp.eq.f32.partialorder %v3260_v49, 8.507059e+37  ;;  %v3562_v49 = vld [vmem:[%s8721_s3 + $0x60] sm:$0xff] }
 0x56d   : > { %v3282_v55 = vor.u32 1.1754944e-38, %v3281_v56  ;;  %vm3280_vm3 = vcmp.eq.f32.partialorder %v3279_v35, 8.507059e+37  ;;  %v3088_v57 = vpop.f32.mrf.mxu3  ;;  %v3595_v56 = vld [vmem:[%s8721_s3 + $0x168] sm:$0xff]  ;;  %v3594_v35 = vld [vmem:[%s8721_s3 + $0x160] sm:$0xff] }
 0x56e   : > { %v4204_v3 = vpop.eup %4203  ;;  %v3098_v22 = vadd.f32 %v3088_v57, %v10246_v36  ;;  %v3607_v57 = vld [vmem:[%s8721_s3 + $0x1c8] sm:$0xff] }
 0x56f   : > { %v3289_v41 = vadd.f32 1.0, %v4204_v3 }
 0x570   : > { %v4206_v25 = vpop.eup %4205 }
 0x571   : > { %v4208_v19 = vpop.eup %4207  ;;  %v3252_v20 = vmul.f32 %v4206_v25, %v3250_v2  ;;  %4209 = vrcp.f32 %v3289_v41  ;;  %vm3257_vm12 = vweird.f32 %v4206_v25  ;;  %v3301_v54 = vand.u32 2147483648, %v3289_v41  ;;  %v3068_v2 = vpop.f32.mrf.mxu2 }
 0x572   : > { %v3271_v21 = vmul.f32 %v4208_v19, %v3269_v32  ;;  %4211 = vtanh.f32 %v3093_v28  ;;  %vm3276_vm13 = vweird.f32 %v4208_v19  ;;  %vm3258_vm0 = vmor %vm3256_vm14, %vm3257_vm12  ;;  %vm3295_vm5 = vweird.f32 %v3289_v41  ;;  %v3597_v32 = vld [vmem:[%s8721_s3 + $0x178] sm:$0xff]  ;;  %v3596_v28 = vld [vmem:[%s8721_s3 + $0x170] sm:$0xff] }
 0x573   : > { %v3253_v59 = vsub.f32 1.0, %v3252_v20  ;;  %vm3277_vm1 = vmor %vm3275_vm15, %vm3276_vm13  ;;  %v3299_v1 = vand.u32 2147483647, %v3289_v41  ;;  %v3302_v39 = vor.u32 1.1754944e-38, %v3301_v54 }
 0x574   : > { %v3272_v53 = vsub.f32 1.0, %v3271_v21 }
 0x575   : > { %v3254_v38 = vmul.f32 %v4206_v25, %v3253_v59  ;;  %vm3300_vm7 = vcmp.eq.f32.partialorder %v3299_v1, 8.507059e+37  ;;  %v3563_v59 = vld [vmem:[%s8721_s3 + $0x68] sm:$0xff] }
 0x576   : > { %v3273_v8 = vmul.f32 %v4208_v19, %v3272_v53  ;;  %v3579_v53 = vld [vmem:[%s8721_s3 + $0xe8] sm:$0xff] }
 0x577   : > { %v4210_v14 = vpop.eup %4209  ;;  %v3255_v12 = vadd.f32 %v4206_v25, %v3254_v38  ;;  %v3611_v38 = vld [vmem:[%s8721_s3 + $0x1e8] sm:$0xff] }
 0x578   : > { %v3274_v9 = vadd.f32 %v4208_v19, %v3273_v8  ;;  %v3291_v42 = vmul.f32 %v4210_v14, %v3289_v41  ;;  %v4212_v48 = vpop.eup %4211  ;;  %vm3296_vm4 = vweird.f32 %v4210_v14  ;;  %v3564_v41 = vld [vmem:[%s8721_s3 + $0x70] sm:$0xff]  ;;  %v3578_v8 = vld [vmem:[%s8721_s3 + $0xe0] sm:$0xff] }
 0x579   : > { %v3259_v43 = vsel %vm3258_vm0, %v4206_v25, %v3255_v12  ;;  %vm3297_vm6 = vmor %vm3295_vm5, %vm3296_vm4  ;;  %v3580_v25 = vld [vmem:[%s8721_s3 + $0xf0] sm:$0xff]  ;;  %v3561_v12 = vld [vmem:[%s8721_s3 + $0x58] sm:$0xff] }
 0x57a   : > { %v3264_v30 = vsel %vm3261_vm2, %v3263_v5, %v3259_v43  ;;  %v3278_v7 = vsel %vm3277_vm1, %v4208_v19, %v3274_v9  ;;  %v3292_v60 = vsub.f32 1.0, %v3291_v42  ;;  %v3612_v19 = vld [vmem:[%s8721_s3 + $0x1f0] sm:$0xff]  ;;  %v3577_v5 = vld [vmem:[%s8721_s3 + $0xd8] sm:$0xff] }
 0x57b   : > { %v3283_v17 = vsel %vm3280_vm3, %v3282_v55, %v3278_v7  ;;  %v3306_v33 = vmul.f32 %v4212_v48, %v3264_v30  ;;  %v3593_v42 = vld [vmem:[%s8721_s3 + $0x158] sm:$0xff]  ;;  %v3560_v48 = vld [vmem:[%s8721_s3 + $0x50] sm:$0xff] }
 0x57c   : > { %v3305_v0 = vmul.f32 %v3283_v17, %v10243_v16  ;;  %v3293_v47 = vmul.f32 %v4210_v14, %v3292_v60  ;;  %v10247_v55 = vld [vmem:[#allocation9_spill] sm:$0xff]  ;;  %v3576_v30 = vld [vmem:[%s8721_s3 + $0xd0] sm:$0xff] }
 0x57d   : > { %v3097_v43 = vadd.f32 %v3068_v2, %v10247_v55  ;;  %v3592_v60 = vld [vmem:[%s8721_s3 + $0x150] sm:$0xff] }
 0x57e   : > { %v3307_v27 = vadd.f32 %v3306_v33, %v3305_v0  ;;  %v3294_v62 = vadd.f32 %v4210_v14, %v3293_v47  ;;  %v3608_v17 = vld [vmem:[%s8721_s3 + $0x1d0] sm:$0xff]  ;;  %v3559_v0 = vld [vmem:[%s8721_s3 + $0x48] sm:$0xff] }
 0x57f   : > { %v3575_v47 = vld [vmem:[%s8721_s3 + $0xc8] sm:$0xff] }
 0x580   : > { %4213 = vtanh.f32 %v3307_v27  ;;  %v3298_v44 = vsel %vm3297_vm6, %v4210_v14, %v3294_v62  ;;  %v3610_v14 = vld [vmem:[%s8721_s3 + $0x1e0] sm:$0xff] }
 0x581   : > { %v3303_v10 = vsel %vm3300_vm7, %v3302_v39, %v3298_v44  ;;  %v3573_v44 = vld [vmem:[%s8721_s3 + $0xb8] sm:$0xff] }
 0x583   : > { %v3116_v51 = vpop.f32.mrf.mxu0 }
 0x584   : > { %v3136_v4 = vpop.f32.mrf.mxu1  ;;  %v3179_v13 = vadd.f32 %v3116_v51, %v3095_v26  ;;  %v3558_v51 = vld [vmem:[%s8721_s3 + $0x40] sm:$0xff] }
 0x585   : > { %v3180_v31 = vadd.f32 %v3136_v4, %v3096_v61  ;;  %v3591_v61 = vld [vmem:[%s8721_s3 + $0x148] sm:$0xff]  ;;  %v3574_v4 = vld [vmem:[%s8721_s3 + $0xc0] sm:$0xff] }
 0x586   : > { %v3957_v37 = vmul.f32 -1.442695, %v3179_v13  ;;  %v4214_v46 = vpop.eup %4213  ;;  %v3590_v13 = vld [vmem:[%s8721_s3 + $0x140] sm:$0xff] }
 0x587   : > { %v3958_v58 = vmul.f32 -1.442695, %v3180_v31  ;;  %v3309_v50 = vmul.f32 %v4214_v46, %v3303_v10  ;;  %v3606_v31 = vld [vmem:[%s8721_s3 + $0x1c0] sm:$0xff]  ;;  %v3589_v10 = vld [vmem:[%s8721_s3 + $0x138] sm:$0xff] }
 0x588   : > { %4215 = vpow2.f32 %v3957_v37 }
 0x589   : > { %4217 = vpow2.f32 %v3958_v58  ;;  %3326 = vmatmul.f32.vlgmr.msra.gmra.mxu0 %v3309_v50  ;;  %3346 = vmatmul.f32.vlgmr.msra.gmra.mxu1 %v3309_v50  ;;  %v3557_v58 = vld [vmem:[%s8721_s3 + $0x38] sm:$0xff] }
 0x58a   : > { %3366 = vmatmul.f32.vlgmr.msra.gmra.mxu2 %v3309_v50  ;;  %3386 = vmatmul.f32.vlgmr.msra.gmra.mxu3 %v3309_v50  ;;  %v3156_v9 = vpop.f32.mrf.mxu2 }
 0x58b   : > { %v3176_v11 = vpop.f32.mrf.mxu3  ;;  %3682 = vmatpush.msra.mxu0 %v3565_v52  ;;  %3702 = vmatpush.msra.mxu1 %v3581_v15  ;;  %v3181_v16 = vadd.f32 %v3156_v9, %v3097_v43  ;;  %v3556_v52 = vld [vmem:[%s8721_s3 + $0x30] sm:$0xff] }
 0x58c   : > { %v3182_v63 = vadd.f32 %v3176_v11, %v3098_v22  ;;  %3722 = vmatpush.msra.mxu2 %v3597_v32  ;;  %3742 = vmatpush.msra.mxu3 %v3613_v34  ;;  %v3605_v11 = vld [vmem:[%s8721_s3 + $0x1b8] sm:$0xff]  ;;  %v3572_v15 = vld [vmem:[%s8721_s3 + $0xb0] sm:$0xff] }
 0x58d   : > { %3683 = vmatpush.msra.mxu0 %v3564_v41  ;;  %3703 = vmatpush.msra.mxu1 %v3580_v25  ;;  %v3588_v34 = vld [vmem:[%s8721_s3 + $0x130] sm:$0xff]  ;;  %v3626_v41 = vld [vmem:[%s8721_s3 + $0x260] sm:$0xff] }
 0x58e   : > { %v3959_v3 = vmul.f32 -1.442695, %v3182_v63  ;;  %v4216_v18 = vpop.eup %4215  ;;  %3723 = vmatpush.msra.mxu2 %v3596_v28  ;;  %3743 = vmatpush.msra.mxu3 %v3612_v19  ;;  %v3555_v19 = vld [vmem:[%s8721_s3 + $0x28] sm:$0xff] }
 0x58f   : > { %v4218_v20 = vpop.eup %4217  ;;  %v8258_v21 = vadd.f32 1.0, %v4216_v18  ;;  %3684 = vmatpush.msra.mxu0 %v3563_v59  ;;  %3704 = vmatpush.msra.mxu1 %v3579_v53 }
 0x590   : > { %4219 = vpow2.f32 %v3959_v3  ;;  %v8266_v24 = vadd.f32 1.0, %v4218_v20  ;;  %3724 = vmatpush.msra.mxu2 %v3595_v56  ;;  %3744 = vmatpush.msra.mxu3 %v3611_v38  ;;  %v3604_v3 = vld [vmem:[%s8721_s3 + $0x1b0] sm:$0xff]  ;;  %v3571_v20 = vld [vmem:[%s8721_s3 + $0xa8] sm:$0xff] }
 0x591   : > { %4221 = vrcp.f32 %v8258_v21  ;;  %3685 = vmatpush.msra.mxu0 %v3562_v49  ;;  %3705 = vmatpush.msra.mxu1 %v3578_v8  ;;  %v3198_v37 = vand.u32 2147483648, %v8258_v21  ;;  %v3196_v22 = vand.u32 2147483647, %v8258_v21  ;;  %vm3192_vm10 = vweird.f32 %v8258_v21  ;;  %v3603_v56 = vld [vmem:[%s8721_s3 + $0x1a8] sm:$0xff] }
 0x592   : > { %4223 = vrcp.f32 %v8266_v24  ;;  %3725 = vmatpush.msra.mxu2 %v3594_v35  ;;  %3745 = vmatpush.msra.mxu3 %v3610_v14  ;;  %v3217_v39 = vand.u32 2147483648, %v8266_v24  ;;  %v3215_v63 = vand.u32 2147483647, %v8266_v24  ;;  %vm3211_vm11 = vweird.f32 %v8266_v24  ;;  %v3554_v14 = vld [vmem:[%s8721_s3 + $0x20] sm:$0xff] }
 0x593   : > { %3686 = vmatpush.msra.mxu0 %v3561_v12  ;;  %3706 = vmatpush.msra.mxu1 %v3577_v5  ;;  %v3199_v25 = vor.u32 1.1754944e-38, %v3198_v37  ;;  %vm3197_vm14 = vcmp.eq.f32.partialorder %v3196_v22, 8.507059e+37  ;;  %v3570_v12 = vld [vmem:[%s8721_s3 + $0xa0] sm:$0xff] }
 0x594   : > { %3726 = vmatpush.msra.mxu2 %v3593_v42  ;;  %3746 = vmatpush.msra.mxu3 %v3609_v29  ;;  %v3218_v59 = vor.u32 1.1754944e-38, %v3217_v39  ;;  %vm3216_vm15 = vcmp.eq.f32.partialorder %v3215_v63, 8.507059e+37  ;;  %v3586_v42 = vld [vmem:[%s8721_s3 + $0x120] sm:$0xff]  ;;  %v3661_v63 = vld [vmem:[%s8721_s3 + $0x378] sm:$0xff] }
 0x595   : > { %3687 = vmatpush.msra.mxu0 %v3560_v48  ;;  %3707 = vmatpush.msra.mxu1 %v3576_v30  ;;  %v3602_v29 = vld [vmem:[%s8721_s3 + $0x1a0] sm:$0xff]  ;;  %v3553_v30 = vld [vmem:[%s8721_s3 + $0x18] sm:$0xff] }
 0x596   : > { %v4220_v6 = vpop.eup %4219  ;;  %3727 = vmatpush.msra.mxu2 %v3592_v60  ;;  %3747 = vmatpush.msra.mxu3 %v3608_v17  ;;  %v3569_v60 = vld [vmem:[%s8721_s3 + $0x98] sm:$0xff]  ;;  %v3566_v37 = vld [vmem:[%s8721_s3 + $0x80] sm:$0xff] }
 0x597   : > { %v8307_v7 = vadd.f32 1.0, %v4220_v6  ;;  %v8315_v33 = vpop.eup %4221  ;;  %3688 = vmatpush.msra.mxu0 %v3559_v0  ;;  %3708 = vmatpush.msra.mxu1 %v3575_v47  ;;  %v10252_v6 = vld [vmem:[#allocation69_spill] sm:$0xff]  ;;  %v3552_v0 = vld [vmem:[%s8721_s3 + $0x10] sm:$0xff] }
 0x598   : > { %v8323_v27 = vpop.eup %4223  ;;  %v3188_v26 = vmul.f32 %v8315_v33, %v8258_v21  ;;  %3728 = vmatpush.msra.mxu2 %v3591_v61  ;;  %3748 = vmatpush.msra.mxu3 %v3607_v57  ;;  %vm3193_vm8 = vweird.f32 %v8315_v33  ;;  %v3585_v17 = vld [vmem:[%s8721_s3 + $0x118] sm:$0xff]  ;;  %v3568_v47 = vld [vmem:[%s8721_s3 + $0x90] sm:$0xff] }
 0x599   : > { %4225 = vrcp.f32 %v8307_v7  ;;  %v3207_v62 = vmul.f32 %v8323_v27, %v8266_v24  ;;  %3689 = vmatpush.msra.mxu0 %v3558_v51  ;;  %3709 = vmatpush.msra.mxu1 %v3574_v4  ;;  %vm3212_vm9 = vweird.f32 %v8323_v27  ;;  %vm8387_vm12 = vmor %vm3192_vm10, %vm3193_vm8  ;;  %v3587_v24 = vld [vmem:[%s8721_s3 + $0x128] sm:$0xff]  ;;  %v3600_v61 = vld [vmem:[%s8721_s3 + $0x190] sm:$0xff]  ;;  %v3237_v57 = vand.u32 2147483648, %v8307_v7 }
 0x59a   : > { %v3189_v54 = vsub.f32 1.0, %v3188_v26  ;;  %4227 = vtanh.f32 %v3181_v16  ;;  %3729 = vmatpush.msra.mxu2 %v3590_v13  ;;  %3749 = vmatpush.msra.mxu3 %v3606_v31  ;;  %vm8402_vm13 = vmor %vm3211_vm11, %vm3212_vm9  ;;  %v3567_v51 = vld [vmem:[%s8721_s3 + $0x88] sm:$0xff]  ;;  %vm3231_vm1 = vweird.f32 %v8307_v7  ;;  %v3657_v21 = vld [vmem:[%s8721_s3 + $0x358] sm:$0xff] }
 0x59b   : > { %v3208_v1 = vsub.f32 1.0, %v3207_v62  ;;  %3690 = vmatpush.msra.mxu0 %v3557_v58  ;;  %3710 = vmatpush.msra.mxu1 %v3573_v44  ;;  %v3551_v62 = vld [vmem:[%s8721_s3 + $0x8] sm:$0xff]  ;;  %v3598_v44 = vld [vmem:[%s8721_s3 + $0x180] sm:$0xff]  ;;  %v3238_v39 = vor.u32 1.1754944e-38, %v3237_v57  ;;  %v3649_v57 = vld [vmem:[%s8721_s3 + $0x318] sm:$0xff] }
 0x59c   : > { %v3190_v46 = vmul.f32 %v8315_v33, %v3189_v54  ;;  %3730 = vmatpush.msra.mxu2 %v3589_v10  ;;  %3750 = vmatpush.msra.mxu3 %v3605_v11  ;;  %v3583_v4 = vld [vmem:[%s8721_s3 + $0x108] sm:$0xff]  ;;  %v3235_v54 = vand.u32 2147483647, %v8307_v7  ;;  %v3629_v11 = vld [vmem:[%s8721_s3 + $0x278] sm:$0xff] }
 0x59d   : > { %v3209_v50 = vmul.f32 %v8323_v27, %v3208_v1  ;;  %3691 = vmatpush.msra.mxu0 %v3556_v52  ;;  %3711 = vmatpush.msra.mxu1 %v3572_v15  ;;  %v3599_v13 = vld [vmem:[%s8721_s3 + $0x188] sm:$0xff]  ;;  %v3550_v1 = vld [vmem:[%s8721_s3] sm:$0xff]  ;;  %v3628_v52 = vld [vmem:[%s8721_s3 + $0x270] sm:$0xff] }
 0x59e   : > { %v3191_v32 = vadd.f32 %v8315_v33, %v3190_v46  ;;  %3731 = vmatpush.msra.mxu2 %v3588_v34  ;;  %3751 = vmatpush.msra.mxu3 %v3604_v3  ;;  %vm3236_vm3 = vcmp.eq.f32.partialorder %v3235_v54, 8.507059e+37  ;;  %v3644_v15 = vld [vmem:[%s8721_s3 + $0x2f0] sm:$0xff]  ;;  %v3643_v34 = vld [vmem:[%s8721_s3 + $0x2e8] sm:$0xff] }
 0x59f   : > { %v8374_v2 = vpop.eup %4225  ;;  %v3210_v18 = vadd.f32 %v8323_v27, %v3209_v50  ;;  %3692 = vmatpush.msra.mxu0 %v3555_v19  ;;  %3712 = vmatpush.msra.mxu1 %v3571_v20  ;;  %v3645_v50 = vld [vmem:[%s8721_s3 + $0x2f8] sm:$0xff]  ;;  %v3659_v3 = vld [vmem:[%s8721_s3 + $0x368] sm:$0xff]  ;;  %v10255_v19 = vld [vmem:[#allocation10_spill] sm:$0xff] }
 0x5a0   : > { %v3227_v28 = vmul.f32 %v8374_v2, %v8307_v7  ;;  %v3195_v53 = vsel %vm8387_vm12, %v8315_v33, %v3191_v32  ;;  %v4228_v38 = vpop.eup %4227  ;;  %3732 = vmatpush.msra.mxu2 %v3587_v24  ;;  %3752 = vmatpush.msra.mxu3 %v3603_v56  ;;  %v3601_v33 = vld [vmem:[%s8721_s3 + $0x198] sm:$0xff]  ;;  %vm3232_vm0 = vweird.f32 %v8374_v2  ;;  %v3582_v7 = vld [vmem:[%s8721_s3 + $0x100] sm:$0xff]  ;;  %v3627_v32 = vld [vmem:[%s8721_s3 + $0x268] sm:$0xff] }
 0x5a1   : > { %v3200_v49 = vsel %vm3197_vm14, %v3199_v25, %v3195_v53  ;;  %v3214_v8 = vsel %vm8402_vm13, %v8323_v27, %v3210_v18  ;;  %3693 = vmatpush.msra.mxu0 %v3554_v14  ;;  %3713 = vmatpush.msra.mxu1 %v3570_v12  ;;  %v3584_v27 = vld [vmem:[%s8721_s3 + $0x110] sm:$0xff]  ;;  %vm8478_vm2 = vmor %vm3231_vm1, %vm3232_vm0  ;;  %v3642_v25 = vld [vmem:[%s8721_s3 + $0x2e0] sm:$0xff]  ;;  %vm3842_vm0 = vcmask 64512  }
 0x5a2   : > { %v3228_v35 = vsub.f32 1.0, %v3227_v28  ;;  %v3219_v5 = vsel %vm3216_vm15, %v3218_v59, %v3214_v8  ;;  %v3242_v9 = vmul.f32 %v4228_v38, %v3200_v49  ;;  %3733 = vmatpush.msra.mxu2 %v3586_v42  ;;  %3753 = vmatpush.msra.mxu3 %v3602_v29  ;;  %v3658_v18 = vld [vmem:[%s8721_s3 + $0x360] sm:$0xff]  ;;  %v3625_v28 = vld [vmem:[%s8721_s3 + $0x258] sm:$0xff]  ;;  %v10257_v53 = vld [vmem:[#allocation11_spill] sm:$0xff] }
 0x5a3   : > { %v3241_v43 = vmul.f32 %v3219_v5, %v10252_v6  ;;  %3694 = vmatpush.msra.mxu0 %v3553_v30  ;;  %3714 = vmatpush.msra.mxu1 %v3569_v60  ;;  %v3641_v20 = vld [vmem:[%s8721_s3 + $0x2d8] sm:$0xff]  ;;  %v3624_v24 = vld [vmem:[%s8721_s3 + $0x250] sm:$0xff]  ;;  %v10258_v56 = vld [vmem:[#allocation155_spill] sm:$0xff] }
 0x5a4   : > { %v3229_v48 = vmul.f32 %v8374_v2, %v3228_v35  ;;  %3734 = vmatpush.msra.mxu2 %v3585_v17  ;;  %3754 = vmatpush.msra.mxu3 %v3601_v33  ;;  %v10256_v59 = vld [vmem:[#allocation153_spill] sm:$0xff]  ;;  %v3640_v38 = vld [vmem:[%s8721_s3 + $0x2d0] sm:$0xff]  ;;  %v3623_v8 = vld [vmem:[%s8721_s3 + $0x248] sm:$0xff] }
 0x5a5   : > { %v8444_v16 = vadd.f32 %v3242_v9, %v3241_v43  ;;  %3695 = vmatpush.msra.mxu0 %v3552_v0  ;;  %3715 = vmatpush.msra.mxu1 %v3568_v47  ;;  %v3656_v49 = vld [vmem:[%s8721_s3 + $0x350] sm:$0xff]  ;;  %v3639_v35 = vld [vmem:[%s8721_s3 + $0x2c8] sm:$0xff]  ;;  %v3622_v12 = vld [vmem:[%s8721_s3 + $0x240] sm:$0xff] }
 0x5a6   : > { %v3230_v26 = vadd.f32 %v8374_v2, %v3229_v48  ;;  %3735 = vmatpush.msra.mxu2 %v3584_v27  ;;  %3755 = vmatpush.msra.mxu3 %v3600_v61  ;;  %v3655_v14 = vld [vmem:[%s8721_s3 + $0x348] sm:$0xff]  ;;  %v3638_v5 = vld [vmem:[%s8721_s3 + $0x2c0] sm:$0xff]  ;;  %v3621_v42 = vld [vmem:[%s8721_s3 + $0x238] sm:$0xff] }
 0x5a7   : > { %4229 = vtanh.f32 %v8444_v16  ;;  %3696 = vmatpush.msra.mxu0 %v3551_v62  ;;  %3716 = vmatpush.msra.mxu1 %v3567_v51  ;;  %v3654_v9 = vld [vmem:[%s8721_s3 + $0x340] sm:$0xff]  ;;  %v3637_v29 = vld [vmem:[%s8721_s3 + $0x2b8] sm:$0xff]  ;;  %v3620_v43 = vld [vmem:[%s8721_s3 + $0x230] sm:$0xff] }
 0x5a8   : > { %v3234_v58 = vsel %vm8478_vm2, %v8374_v2, %v3230_v26  ;;  %3736 = vmatpush.msra.mxu2 %v3583_v4  ;;  %3756 = vmatpush.msra.mxu3 %v3599_v13  ;;  %v3660_v2 = vld [vmem:[%s8721_s3 + $0x370] sm:$0xff]  ;;  %v3653_v6 = vld [vmem:[%s8721_s3 + $0x338] sm:$0xff]  ;;  %v3619_v60 = vld [vmem:[%s8721_s3 + $0x228] sm:$0xff] }
 0x5a9   : > { %3697 = vmatpush.msra.mxu0 %v3550_v1  ;;  %3717 = vmatpush.msra.mxu1 %v3566_v37  ;;  %v3239_v22 = vsel %vm3236_vm3, %v3238_v39, %v3234_v58  ;;  %v3636_v48 = vld [vmem:[%s8721_s3 + $0x2b0] sm:$0xff]  ;;  %v3635_v17 = vld [vmem:[%s8721_s3 + $0x2a8] sm:$0xff]  ;;  %v3618_v0 = vld [vmem:[%s8721_s3 + $0x220] sm:$0xff] }
 0x5aa   : > { %3737 = vmatpush.msra.mxu2 %v3582_v7  ;;  %3757 = vmatpush.msra.mxu3 %v3598_v44  ;;  %v3652_v30 = vld [vmem:[%s8721_s3 + $0x330] sm:$0xff]  ;;  %v3651_v33 = vld [vmem:[%s8721_s3 + $0x328] sm:$0xff]  ;;  %v3634_v47 = vld [vmem:[%s8721_s3 + $0x2a0] sm:$0xff] }
 0x5ab   : > { %v3650_v27 = vld [vmem:[%s8721_s3 + $0x320] sm:$0xff]  ;;  %v3617_v26 = vld [vmem:[%s8721_s3 + $0x218] sm:$0xff]  ;;  %v3616_v62 = vld [vmem:[%s8721_s3 + $0x210] sm:$0xff] }
 0x5ac   : > { %v3633_v61 = vld [vmem:[%s8721_s3 + $0x298] sm:$0xff]  ;;  %v3632_v51 = vld [vmem:[%s8721_s3 + $0x290] sm:$0xff]  ;;  %v3615_v54 = vld [vmem:[%s8721_s3 + $0x208] sm:$0xff] }
 0x5ad   : > { %v4230_v46 = vpop.eup %4229  ;;  %v3648_v4 = vld [vmem:[%s8721_s3 + $0x310] sm:$0xff]  ;;  %v3631_v13 = vld [vmem:[%s8721_s3 + $0x288] sm:$0xff]  ;;  %v3614_v1 = vld [vmem:[%s8721_s3 + $0x200] sm:$0xff] }
 0x5ae   : > { %v8497_v10 = vmul.f32 %v4230_v46, %v3239_v22  ;;  %v3647_v31 = vld [vmem:[%s8721_s3 + $0x308] sm:$0xff]  ;;  %v3630_v37 = vld [vmem:[%s8721_s3 + $0x280] sm:$0xff]  ;;  %v10259_v58 = vld [vmem:[#allocation12_spill] sm:$0xff] }
 0x5af   : > { %v3646_v7 = vld [vmem:[%s8721_s3 + $0x300] sm:$0xff]  ;;  %v3677_v44 = vld [vmem:[%s8721_s3 + $0x3f8] sm:$0xff]  ;;  %v3676_v39 = vld [vmem:[%s8721_s3 + $0x3f0] sm:$0xff] }
 0x5b0   : > { %3410 = vmatmul.f32.vlgmr.msrb.gmra.mxu0 %v8497_v10  ;;  %3430 = vmatmul.f32.vlgmr.msrb.gmra.mxu1 %v8497_v10  ;;  %v3675_v46 = vld [vmem:[%s8721_s3 + $0x3e8] sm:$0xff] }
 0x5b1   : > { %3450 = vmatmul.f32.vlgmr.msrb.gmra.mxu2 %v8497_v10  ;;  %3470 = vmatmul.f32.vlgmr.msrb.gmra.mxu3 %v8497_v10 }
 0x5b2   : > { %3762 = vmatpush.msrb.mxu0 %v3629_v11  ;;  %3782 = vmatpush.msrb.mxu1 %v3645_v50  ;;  %v3673_v11 = vld [vmem:[%s8721_s3 + $0x3d8] sm:$0xff]  ;;  %v3672_v50 = vld [vmem:[%s8721_s3 + $0x3d0] sm:$0xff] }
 0x5b3   : > { %3802 = vmatpush.msrb.mxu2 %v3661_v63  ;;  %3822 = vmatpush.msrb.mxu3 %v3677_v44  ;;  %v3671_v63 = vld [vmem:[%s8721_s3 + $0x3c8] sm:$0xff] }
 0x5b4   : > { %3763 = vmatpush.msrb.mxu0 %v3628_v52  ;;  %3783 = vmatpush.msrb.mxu1 %v3644_v15 }
 0x5b5   : > { %3803 = vmatpush.msrb.mxu2 %v3660_v2  ;;  %3823 = vmatpush.msrb.mxu3 %v3676_v39 }
 0x5b6   : > { %3764 = vmatpush.msrb.mxu0 %v3627_v32  ;;  %3784 = vmatpush.msrb.mxu1 %v3643_v34  ;;  %v3670_v32 = vld [vmem:[%s8721_s3 + $0x3c0] sm:$0xff] }
 0x5b7   : > { %3804 = vmatpush.msrb.mxu2 %v3659_v3  ;;  %3824 = vmatpush.msrb.mxu3 %v3675_v46 }
 0x5b8   : > { %3765 = vmatpush.msrb.mxu0 %v3626_v41  ;;  %3785 = vmatpush.msrb.mxu1 %v3642_v25 }
 0x5b9   : > { %3805 = vmatpush.msrb.mxu2 %v3658_v18  ;;  %3698 = vmatmul.f32.vlgmr.msra.gmra.mxu0 %v10255_v19  ;;  %v3669_v18 = vld [vmem:[%s8721_s3 + $0x3b8] sm:$0xff] }
 0x5ba   : > { %3718 = vmatmul.f32.vlgmr.msra.gmra.mxu1 %v10256_v59  ;;  %3738 = vmatmul.f32.vlgmr.msra.gmra.mxu2 %v10257_v53 }
 0x5bb   : > { %3758 = vmatmul.f32.vlgmr.msra.gmra.mxu3 %v10258_v56  ;;  %3766 = vmatpush.msrb.mxu0 %v3625_v28  ;;  %v3665_v56 = vld [vmem:[%s8721_s3 + $0x398] sm:$0xff] }
 0x5bc   : > { %3786 = vmatpush.msrb.mxu1 %v3641_v20  ;;  %3806 = vmatpush.msrb.mxu2 %v3657_v21  ;;  %v3666_v21 = vld [vmem:[%s8721_s3 + $0x3a0] sm:$0xff] }
 0x5bd   : > { %3767 = vmatpush.msrb.mxu0 %v3624_v24 }
 0x5be   : > { %3787 = vmatpush.msrb.mxu1 %v3640_v38  ;;  %3807 = vmatpush.msrb.mxu2 %v3656_v49 }
 0x5bf   : > { %3768 = vmatpush.msrb.mxu0 %v3623_v8  ;;  %v3663_v8 = vld [vmem:[%s8721_s3 + $0x388] sm:$0xff] }
 0x5c0   : > { %3788 = vmatpush.msrb.mxu1 %v3639_v35  ;;  %3808 = vmatpush.msrb.mxu2 %v3655_v14 }
 0x5c1   : > { %3769 = vmatpush.msrb.mxu0 %v3622_v12 }
 0x5c2   : > { %3789 = vmatpush.msrb.mxu1 %v3638_v5  ;;  %3809 = vmatpush.msrb.mxu2 %v3654_v9  ;;  %v3662_v5 = vld [vmem:[%s8721_s3 + $0x380] sm:$0xff] }
 0x5c3   : > { %3770 = vmatpush.msrb.mxu0 %v3621_v42 }
 0x5c4   : > { %3790 = vmatpush.msrb.mxu1 %v3637_v29  ;;  %3810 = vmatpush.msrb.mxu2 %v3653_v6 }
 0x5c5   : > { %3771 = vmatpush.msrb.mxu0 %v3620_v43 }
 0x5c6   : > { %3791 = vmatpush.msrb.mxu1 %v3636_v48  ;;  %3811 = vmatpush.msrb.mxu2 %v3652_v30 }
 0x5c7   : > { %3772 = vmatpush.msrb.mxu0 %v3619_v60 }
 0x5c8   : > { %3792 = vmatpush.msrb.mxu1 %v3635_v17  ;;  %3812 = vmatpush.msrb.mxu2 %v3651_v33 }
 0x5c9   : > { %3773 = vmatpush.msrb.mxu0 %v3618_v0 }
 0x5ca   : > { %3793 = vmatpush.msrb.mxu1 %v3634_v47  ;;  %3813 = vmatpush.msrb.mxu2 %v3650_v27 }
 0x5cb   : > { %3774 = vmatpush.msrb.mxu0 %v3617_v26 }
 0x5cc   : > { %3794 = vmatpush.msrb.mxu1 %v3633_v61  ;;  %3814 = vmatpush.msrb.mxu2 %v3649_v57 }
 0x5cd   : > { %3775 = vmatpush.msrb.mxu0 %v3616_v62 }
 0x5ce   : > { %3795 = vmatpush.msrb.mxu1 %v3632_v51  ;;  %3815 = vmatpush.msrb.mxu2 %v3648_v4 }
 0x5cf   : > { %3776 = vmatpush.msrb.mxu0 %v3615_v54 }
 0x5d0   : > { %3796 = vmatpush.msrb.mxu1 %v3631_v13  ;;  %3816 = vmatpush.msrb.mxu2 %v3647_v31 }
 0x5d1   : > { %3777 = vmatpush.msrb.mxu0 %v3614_v1 }
 0x5d2   : > { %3797 = vmatpush.msrb.mxu1 %v3630_v37  ;;  %3817 = vmatpush.msrb.mxu2 %v3646_v7 }
 0x5d3   : > { %3778 = vmatmul.f32.vlgmr.msrb.gmra.mxu0 %v10259_v58  ;;  %3798 = vmatmul.f32.vlgmr.msrb.gmra.mxu1 %v8086_v45  ;;  %v3674_v45 = vld [vmem:[%s8721_s3 + $0x3e0] sm:$0xff] }
 0x5d4   : > { %3818 = vmatmul.f32.vlgmr.msrb.gmra.mxu2 %v8497_v10  ;;  %3825 = vmatpush.msrb.mxu3 %v3674_v45 }
 0x5d6   : > { %3826 = vmatpush.msrb.mxu3 %v3673_v11 }
 0x5d8   : > { %3827 = vmatpush.msrb.mxu3 %v3672_v50 }
 0x5da   : > { %3828 = vmatpush.msrb.mxu3 %v3671_v63 }
 0x5dc   : > { %3829 = vmatpush.msrb.mxu3 %v3670_v32 }
 0x5de   : > { %3830 = vmatpush.msrb.mxu3 %v3669_v18 }
 0x606   : > { %v3327_v22 = vpop.f32.mrf.mxu0  ;;  %v3347_v10 = vpop.f32.mrf.mxu1 }
 0x607   : > { %v3390_v52 = vadd.f32 %v3327_v22, %v10244_v23  ;;  %v3391_v15 = vadd.f32 %v3347_v10, %v10245_v40  ;;  %v3668_v23 = vld [vmem:[%s8721_s3 + $0x3b0] sm:$0xff]  ;;  %v3667_v40 = vld [vmem:[%s8721_s3 + $0x3a8] sm:$0xff] }
 0x608   : > { %3831 = vmatpush.msrb.mxu3 %v3668_v23 }
 0x60a   : > { %3832 = vmatpush.msrb.mxu3 %v3667_v40 }
 0x60c   : > { %3833 = vmatpush.msrb.mxu3 %v3666_v21 }
 0x60d   : > { %v3387_v2 = vpop.f32.mrf.mxu3  ;;  %v3367_v24 = vpop.f32.mrf.mxu2 }
 0x60e   : > { %v3393_v20 = vadd.f32 %v3387_v2, %v10246_v36  ;;  %3834 = vmatpush.msrb.mxu3 %v3665_v56  ;;  %v3664_v36 = vld [vmem:[%s8721_s3 + $0x390] sm:$0xff]  ;;  %v3392_v29 = vadd.f32 %v3367_v24, %v10247_v55 }
 0x610   : > { %3835 = vmatpush.msrb.mxu3 %v3664_v36 }
 0x612   : > { %3836 = vmatpush.msrb.mxu3 %v3663_v8 }
 0x614   : > { %3837 = vmatpush.msrb.mxu3 %v3662_v5 }
 0x62d   : > { %v3411_v34 = vpop.f32.mrf.mxu0  ;;  %v3431_v3 = vpop.f32.mrf.mxu1 }
 0x62e   : > { %v3474_v41 = vadd.f32 %v3411_v34, %v3390_v52  ;;  %v3475_v25 = vadd.f32 %v3431_v3, %v3391_v15 }
 0x630   : > { %v3963_v28 = vmul.f32 -1.442695, %v3474_v41  ;;  %v3964_v19 = vmul.f32 -1.442695, %v3475_v25 }
 0x632   : > { %4231 = vpow2.f32 %v3963_v28 }
 0x633   : > { %4233 = vpow2.f32 %v3964_v19 }
 0x634   : > { %v3471_v59 = vpop.f32.mrf.mxu3  ;;  %v3451_v9 = vpop.f32.mrf.mxu2 }
 0x635   : > { %v3477_v53 = vadd.f32 %v3471_v59, %v3393_v20  ;;  %v3476_v48 = vadd.f32 %v3451_v9, %v3392_v29 }
 0x636   : > { %v3699_v3 = vpop.f32.mrf.mxu0 }
 0x637   : > { %v3965_v38 = vmul.f32 -1.442695, %v3477_v53  ;;  %v3719_v25 = vpop.f32.mrf.mxu1 }
 0x638   : > { %v4232_v49 = vpop.eup %4231 }
 0x639   : > { %v4234_v35 = vpop.eup %4233  ;;  %v3481_v14 = vadd.f32 1.0, %v4232_v49  ;;  %4235 = vpow2.f32 %v3965_v38 }
 0x63a   : > { %v3500_v12 = vadd.f32 1.0, %v4234_v35 }
 0x63b   : > { %4237 = vrcp.f32 %v3481_v14  ;;  %v3493_v47 = vand.u32 2147483648, %v3481_v14  ;;  %v3491_v61 = vand.u32 2147483647, %v3481_v14  ;;  %vm3487_vm6 = vweird.f32 %v3481_v14 }
 0x63c   : > { %4239 = vrcp.f32 %v3500_v12  ;;  %v3512_v27 = vand.u32 2147483648, %v3500_v12  ;;  %v3510_v62 = vand.u32 2147483647, %v3500_v12  ;;  %vm3506_vm7 = vweird.f32 %v3500_v12 }
 0x63d   : > { %v3494_v4 = vor.u32 1.1754944e-38, %v3493_v47  ;;  %vm3492_vm10 = vcmp.eq.f32.partialorder %v3491_v61, 8.507059e+37  ;;  %v3739_v18 = vpop.f32.mrf.mxu2 }
 0x63e   : > { %v3513_v31 = vor.u32 1.1754944e-38, %v3512_v27  ;;  %vm3511_vm11 = vcmp.eq.f32.partialorder %v3510_v62, 8.507059e+37  ;;  %v3759_v23 = vpop.f32.mrf.mxu3 }
 0x63f   : > { %v4236_v42 = vpop.eup %4235 }
 0x640   : > { %v3520_v6 = vadd.f32 1.0, %v4236_v42 }
 0x641   : > { %v4238_v43 = vpop.eup %4237 }
 0x642   : > { %v4240_v30 = vpop.eup %4239  ;;  %v3483_v60 = vmul.f32 %v4238_v43, %v3481_v14  ;;  %4241 = vrcp.f32 %v3520_v6  ;;  %vm3488_vm4 = vweird.f32 %v4238_v43  ;;  %v3532_v50 = vand.u32 2147483648, %v3520_v6 }
 0x643   : > { %v3502_v17 = vmul.f32 %v4240_v30, %v3500_v12  ;;  %4243 = vtanh.f32 %v3476_v48  ;;  %vm3507_vm5 = vweird.f32 %v4240_v30  ;;  %vm3489_vm8 = vmor %vm3487_vm6, %vm3488_vm4  ;;  %vm3526_vm13 = vweird.f32 %v3520_v6 }
 0x644   : > { %v3484_v33 = vsub.f32 1.0, %v3483_v60  ;;  %vm3508_vm9 = vmor %vm3506_vm7, %vm3507_vm5  ;;  %v3530_v63 = vand.u32 2147483647, %v3520_v6  ;;  %v3533_v15 = vor.u32 1.1754944e-38, %v3532_v50 }
 0x645   : > { %v3503_v0 = vsub.f32 1.0, %v3502_v17 }
 0x646   : > { %v3485_v26 = vmul.f32 %v4238_v43, %v3484_v33  ;;  %vm3531_vm15 = vcmp.eq.f32.partialorder %v3530_v63, 8.507059e+37 }
 0x647   : > { %v3504_v57 = vmul.f32 %v4240_v30, %v3503_v0 }
 0x648   : > { %v4242_v51 = vpop.eup %4241  ;;  %v3486_v55 = vadd.f32 %v4238_v43, %v3485_v26 }
 0x649   : > { %v3505_v54 = vadd.f32 %v4240_v30, %v3504_v57  ;;  %v3522_v13 = vmul.f32 %v4242_v51, %v3520_v6  ;;  %v4244_v37 = vpop.eup %4243  ;;  %vm3527_vm12 = vweird.f32 %v4242_v51 }
 0x64a   : > { %v3490_v1 = vsel %vm3489_vm8, %v4238_v43, %v3486_v55  ;;  %vm3528_vm14 = vmor %vm3526_vm13, %vm3527_vm12 }
 0x64b   : > { %v3495_v7 = vsel %vm3492_vm10, %v3494_v4, %v3490_v1  ;;  %v3509_v58 = vsel %vm3508_vm9, %v4240_v30, %v3505_v54  ;;  %v3523_v44 = vsub.f32 1.0, %v3522_v13 }
 0x64c   : > { %v3514_v39 = vsel %vm3511_vm11, %v3513_v31, %v3509_v58  ;;  %v3537_v46 = vmul.f32 %v4244_v37, %v3495_v7 }
 0x64d   : > { %v3536_v45 = vmul.f32 %v3514_v39, %v8444_v16  ;;  %v3524_v22 = vmul.f32 %v4242_v51, %v3523_v44  ;;  %v3990_v16 = vld [vmem:[%s8722_s4] ss:$0 sm:$0xff] }
 0x64e   : > { %v3700_v41 = vadd.f32 %v3990_v16, %v3699_v3 }
 0x64f   : > { %v3538_v10 = vadd.f32 %v3537_v46, %v3536_v45  ;;  %v3525_v11 = vadd.f32 %v4242_v51, %v3524_v22 }
 0x650   : > { %v3720_v28 = vadd.f32 %v3719_v25, %v3700_v41  ;;  %v3779_v40 = vpop.f32.mrf.mxu0  ;;  %v3799_v59 = vpop.f32.mrf.mxu1 }
 0x651   : > { %4245 = vtanh.f32 %v3538_v10  ;;  %v3529_v52 = vsel %vm3528_vm14, %v4242_v51, %v3525_v11 }
 0x652   : > { %v3534_v32 = vsel %vm3531_vm15, %v3533_v15, %v3529_v52  ;;  %v3740_v19 = vadd.f32 %v3739_v18, %v3720_v28 }
 0x654   : > { %v3760_v20 = vadd.f32 %v3759_v23, %v3740_v19 }
 0x656   : > { %v3780_v21 = vadd.f32 %v3779_v40, %v3760_v20 }
 0x657   : > { %v4246_v2 = vpop.eup %4245  ;;  %v3819_v53 = vpop.f32.mrf.mxu2 }
 0x658   : > { %v3540_v34 = vmul.f32 %v4246_v2, %v3534_v32  ;;  %v3800_v24 = vadd.f32 %v3799_v59, %v3780_v21 }
 0x65a   : > { %3838 = vmatmul.f32.vlgmr.msrb.gmra.mxu3 %v3540_v34  ;;  %v3820_v56 = vadd.f32 %v3819_v53, %v3800_v24 }
 0x6dd   : > { %v3839_v38 = vpop.f32.mrf.mxu3 }
 0x6de   : > { %v3840_v49 = vadd.f32 %v3839_v38, %v3820_v56 }
 0x6e0   : > { %3843 = vst.msk [vmem:[%s236_s6] sm:$0xff] %vm3842_vm0, %v3840_v49 }
 0x6e1 PF: > { %s16_s18 = sadd.s32 1, %s4863_s18  }
 0x6e2   : > { %p13_p7 = scmp.ge.s32.totalorder %s16_s18, 4  }
 0x6e4   :  { %15 = sbr.rel (!%p13_p7) target bundleno = 1 (0x1), region = 75 }
 0x6e9   :  { %3863 = vsyncpa [#allocation4], 1 }
 0x6ea   :  { %3865 = vsyncpa [#allocation4 + $0x1], 1 }

</bundles_post_ra>
